<compile_context>
chip_gen: v5e
topology: v5e:2x2
jax: 0.10.0
libtpu: 0.0.40
codegen_flags: <defaults>
</compile_context>

<pallas_src>
import functools
import math

import jax
import jax.numpy as jnp
from jax.experimental import pallas as pl
from jax.experimental.pallas import tpu as pltpu


def _round_up(x, m):
    return ((x + m - 1) // m) * m


# ------------------------------ Pallas kernels ------------------------------

def _erf_f32(x):
    # Abramowitz & Stegun 7.1.26 rational approximation, |err| < 1.5e-7.
    a1, a2, a3, a4, a5 = (0.254829592, -0.284496736, 1.421413741,
                          -1.453152027, 1.061405429)
    p = 0.3275911
    sgn = jnp.where(x < 0.0, -1.0, 1.0)
    ax = jnp.abs(x)
    t = 1.0 / (1.0 + p * ax)
    poly = ((((a5 * t + a4) * t + a3) * t + a2) * t + a1) * t
    return sgn * (1.0 - poly * jnp.exp(-ax * ax))


def _gelu_exact(x):
    # exact (erf) GELU, matching nn.GELU()
    return 0.5 * x * (1.0 + _erf_f32(x * 0.7071067811865476))


def _matmul_bias_kernel(x_ref, w_ref, b_ref, o_ref):
    # (TM, K) @ (K, N) on the MXU; bf16 operands, f32 accumulate, bias fused.
    y = jnp.dot(x_ref[...].astype(jnp.bfloat16),
                w_ref[...].astype(jnp.bfloat16),
                preferred_element_type=jnp.float32)
    o_ref[...] = (y + b_ref[...]).astype(o_ref.dtype)


def matmul_bias(x, w, b, *, out_dtype=jnp.float32, block_rows=256):
    """out = x @ w + b, row-tiled over the token dimension (handles any M)."""
    M, K = x.shape
    N = w.shape[1]
    TM = min(block_rows, _round_up(M, 8))
    Mp = _round_up(M, TM)
    xp = jnp.pad(x, ((0, Mp - M), (0, 0))) if Mp != M else x
    out = pl.pallas_call(
        _matmul_bias_kernel,
        out_shape=jax.ShapeDtypeStruct((Mp, N), out_dtype),
        grid=(Mp // TM,),
        in_specs=[pl.BlockSpec((TM, K), lambda i: (i, 0)),
                  pl.BlockSpec((K, N), lambda i: (0, 0)),   # constant block -> DMA'd once
                  pl.BlockSpec((1, N), lambda i: (0, 0))],
        out_specs=pl.BlockSpec((TM, N), lambda i: (i, 0)),
        compiler_params=pltpu.CompilerParams(
            dimension_semantics=("parallel",)),
    )(xp, w, b.reshape(1, N))
    return out[:M] if Mp != M else out


def _dwconv_gelu_kernel(x_ref, w_ref, b_ref, o_ref, *, H, W):
    # x_ref: (1, H+2, W+2, C) zero-padded NHWC tile; w_ref: (9, C); b_ref: (1, C)
    x = x_ref[...]
    wd = w_ref[...]
    C = wd.shape[-1]
    acc = jnp.zeros((1, H, W, C), jnp.float32)
    for ky in range(3):
        for kx in range(3):
            acc = acc + (x[:, ky:ky + H, kx:kx + W, :].astype(jnp.float32)
                         * wd[ky * 3 + kx].reshape(1, 1, 1, C))
    y = acc + b_ref[...].reshape(1, 1, 1, C)
    o_ref[...] = _gelu_exact(y).astype(o_ref.dtype)   # GELU fused into the conv kernel


def dwconv3x3_gelu(x_nhwc, w9, b, *, out_dtype=None):
    """Depthwise 3x3 conv (stride 1, pad 1, groups=C) + bias + exact GELU, fused."""
    B, H, W, C = x_nhwc.shape
    out_dtype = out_dtype or x_nhwc.dtype
    xp = jnp.pad(x_nhwc, ((0, 0), (1, 1), (1, 1), (0, 0)))
    kern = functools.partial(_dwconv_gelu_kernel, H=H, W=W)
    return pl.pallas_call(
        kern,
        out_shape=jax.ShapeDtypeStruct((B, H, W, C), out_dtype),
        grid=(B,),
        in_specs=[pl.BlockSpec((1, H + 2, W + 2, C), lambda b: (b, 0, 0, 0)),
                  pl.BlockSpec((9, C), lambda b: (0, 0)),
                  pl.BlockSpec((1, C), lambda b: (0, 0))],
        out_specs=pl.BlockSpec((1, H, W, C), lambda b: (b, 0, 0, 0)),
        compiler_params=pltpu.CompilerParams(
            dimension_semantics=("parallel",)),
    )(xp, w9, b.reshape(1, C))


# ------------------------------- JAX glue ops --------------------------------

def spatial_shift(x_nhwc, axis, shift_size=5, pad=2):
    """torch: pad(2) -> chunk(C, shift_size) -> roll chunk_i by (i-pad) along `axis` -> crop.

    axis=1 rolls along H (dim 2 of NCHW), axis=2 rolls along W (dim 3 of NCHW).
    """
    B, H, W, C = x_nhwc.shape
    xp = jnp.pad(x_nhwc, ((0, 0), (pad, pad), (pad, pad), (0, 0)))
    cs = -(-C // shift_size)             # torch.chunk chunk size
    parts = []
    start = 0
    for sh in range(-pad, pad + 1):
        if start >= C:
            break
        end = min(start + cs, C)
        parts.append(jnp.roll(xp[..., start:end], sh, axis=axis))
        start = end
    xc = jnp.concatenate(parts, axis=-1)
    return xc[:, pad:pad + H, pad:pad + W, :]


# ----------------------------- shiftmlp forward ------------------------------

def shiftmlp_forward(params, x, H, W, shift_size=5):
    """x: (B, N, C) tokens (channels last), N = H * W.  drop=0.0 -> identity."""
    B, N, C = x.shape
    pad = shift_size // 2
    w1 = params['fc1_w'].T                                    # (C, hidden)
    w2 = params['fc2_w'].T                                    # (hidden, out)
    dh = w1.shape[1]
    w_dw = jnp.transpose(params['dw_w'][:, 0], (1, 2, 0)).reshape(9, dh)  # (C,1,3,3)->(9,C)

    x_nhwc = x.reshape(B, H, W, C)
    # shift along H, then fc1 (row-tiled bf16 matmul, bias fused, bf16 out)
    xs = spatial_shift(x_nhwc, axis=1, shift_size=shift_size, pad=pad)
    h = matmul_bias(xs.reshape(B * N, C), w1, params['fc1_b'],
                    out_dtype=jnp.bfloat16)
    # DWConv 3x3 + bias + GELU fused in one kernel (bf16 in/out, f32 accumulate)
    h = dwconv3x3_gelu(h.reshape(B, H, W, dh), w_dw, params['dw_b'],
                       out_dtype=jnp.bfloat16)
    # shift along W, then fc2 (final output in f32)
    hs = spatial_shift(h, axis=2, shift_size=shift_size, pad=pad)
    out = matmul_bias(hs.reshape(B * N, dh), w2, params['fc2_b'],
                      out_dtype=jnp.float32)
    return out.reshape(B, N, -1)


# ------------------------- pure-JAX f32 reference ----------------------------

def shiftmlp_reference(params, x, H, W, shift_size=5):
    B, N, C = x.shape
    pad = shift_size // 2
    x_nhwc = x.reshape(B, H, W, C)
    xs = spatial_shift(x_nhwc, axis=1, shift_size=shift_size, pad=pad)
    h = xs.reshape(B * N, C) @ params['fc1_w'].T + params['fc1_b']
    dh = h.shape[-1]
    h = h.reshape(B, H, W, dh)
    hp = jnp.pad(h, ((0, 0), (1, 1), (1, 1), (0, 0)))
    wd = jnp.transpose(params['dw_w'][:, 0], (1, 2, 0))       # (3, 3, C)
    acc = jnp.zeros_like(h)
    for ky in range(3):
        for kx in range(3):
            acc = acc + hp[:, ky:ky + H, kx:kx + W, :] * wd[ky, kx]
    y = acc + params['dw_b']
    y = 0.5 * y * (1.0 + jax.scipy.special.erf(y * 0.7071067811865476))
    hs = spatial_shift(y, axis=2, shift_size=shift_size, pad=pad)
    out = hs.reshape(B * N, dh) @ params['fc2_w'].T + params['fc2_b']
    return out.reshape(B, N, -1)


# ----------------------------------- main ------------------------------------

if __name__ == "__main__":
    key = jax.random.PRNGKey(0)
    kx, k1, k2, k3, k4, k5, k6 = jax.random.split(key, 7)

    B, H, W = 2, 16, 16
    dim = 128          # in = hidden = out features (UNeXt uses mlp_ratio=1); lane-aligned
    N = H * W

    params = {
        # PyTorch layouts: Linear (out, in); depthwise Conv2d (C, 1, 3, 3)
        'fc1_w': 0.02 * jax.random.normal(k1, (dim, dim), jnp.float32),
        'fc1_b': 0.01 * jax.random.normal(k2, (dim,), jnp.float32),
        'dw_w': math.sqrt(2.0 / 9.0) * jax.random.normal(k3, (dim, 1, 3, 3), jnp.float32),
        'dw_b': 0.01 * jax.random.normal(k4, (dim,), jnp.float32),
        'fc2_w': 0.02 * jax.random.normal(k5, (dim, dim), jnp.float32),
        'fc2_b': 0.01 * jax.random.normal(k6, (dim,), jnp.float32),
    }
    x = jax.random.normal(kx, (B, N, dim), jnp.float32)

    fwd = jax.jit(functools.partial(shiftmlp_forward, H=H, W=W))
    out = fwd(params, x)
    jax.block_until_ready(out)

    ref = shiftmlp_reference(params, x, H, W)
    err = float(jnp.max(jnp.abs(out - ref)))

    assert out.shape == (B, N, dim), out.shape
    assert bool(jnp.all(jnp.isfinite(out)))
    assert err < 3e-2, f"max abs error vs f32 reference: {err}"
    print("KERNEL_OK")
</pallas_src>

<mosaic_0001>
module attributes {stable_mosaic.version = 11 : i64} {
  func.func @_matmul_bias_kernel(%arg0: i32, %arg1: memref<256x128xf32, #tpu.memory_space<vmem>>, %arg2: memref<128x128xf32, #tpu.memory_space<vmem>>, %arg3: memref<1x128xf32, #tpu.memory_space<vmem>>, %arg4: memref<256x128xbf16, #tpu.memory_space<vmem>>) attributes {dimension_semantics = [#tpu.dimension_semantics<parallel>], iteration_bounds = array<i64: 2>, scalar_prefetch = 0 : i64, scratch_operands = 0 : i64, tpu.core_type = #tpu.core_type<tc>, window_params = [{transform_indices = @transform_0, window_bounds = array<i64: 256, 128>}, {pipeline_mode = #tpu.pipeline_mode<synchronous>, transform_indices = @transform_1, window_bounds = array<i64: 128, 128>}, {pipeline_mode = #tpu.pipeline_mode<synchronous>, transform_indices = @transform_2, window_bounds = array<i64: 1, 128>}, {transform_indices = @transform_3, window_bounds = array<i64: 256, 128>}]} {
    %c0 = arith.constant 0 : index
    %c0_0 = arith.constant 0 : index
    %0 = vector.load %arg1[%c0, %c0_0] : memref<256x128xf32, #tpu.memory_space<vmem>>, vector<256x128xf32>
    %1 = arith.truncf %0 : vector<256x128xf32> to vector<256x128xbf16>
    %c0_1 = arith.constant 0 : index
    %c0_2 = arith.constant 0 : index
    %2 = vector.load %arg2[%c0_1, %c0_2] : memref<128x128xf32, #tpu.memory_space<vmem>>, vector<128x128xf32>
    %3 = arith.truncf %2 : vector<128x128xf32> to vector<128x128xbf16>
    %cst = arith.constant dense<0.000000e+00> : vector<256x128xf32>
    %4 = tpu.matmul %1, %3, %cst {dimension_numbers = #tpu.dot_dimension_numbers<[1], [0], [0], [1], [0, 0, 1, 1], [], []>} : vector<256x128xbf16>, vector<128x128xbf16>, vector<256x128xf32> -> vector<256x128xf32>
    %c0_3 = arith.constant 0 : index
    %c0_4 = arith.constant 0 : index
    %5 = vector.load %arg3[%c0_3, %c0_4] : memref<1x128xf32, #tpu.memory_space<vmem>>, vector<1x128xf32>
    %6 = vector.broadcast %5 : vector<1x128xf32> to vector<256x128xf32>
    %7 = arith.addf %4, %6 : vector<256x128xf32>
    %8 = arith.truncf %7 : vector<256x128xf32> to vector<256x128xbf16>
    %c0_5 = arith.constant 0 : index
    %c0_6 = arith.constant 0 : index
    %9 = vector.load %arg4[%c0_5, %c0_6] : memref<256x128xbf16, #tpu.memory_space<vmem>>, vector<256x128xbf16>
    tpu.vector_store %arg4[%c0_5, %c0_6], %8 {strides = array<i32>} : memref<256x128xbf16, #tpu.memory_space<vmem>>, vector<256x128xbf16>,
    return
  }
  func.func @transform_0(%arg0: i32) -> (i32, i32) {
    %c0_i32 = arith.constant 0 : i32
    %c0_i32_0 = arith.constant 0 : i32
    return %arg0, %c0_i32 : i32, i32
  }
  func.func @transform_1(%arg0: i32) -> (i32, i32) {
    %c0_i32 = arith.constant 0 : i32
    %c0_i32_0 = arith.constant 0 : i32
    %c0_i32_1 = arith.constant 0 : i32
    return %c0_i32, %c0_i32_0 : i32, i32
  }
  func.func @transform_2(%arg0: i32) -> (i32, i32) {
    %c0_i32 = arith.constant 0 : i32
    %c0_i32_0 = arith.constant 0 : i32
    %c0_i32_1 = arith.constant 0 : i32
    return %c0_i32, %c0_i32_0 : i32, i32
  }
  func.func @transform_3(%arg0: i32) -> (i32, i32) {
    %c0_i32 = arith.constant 0 : i32
    %c0_i32_0 = arith.constant 0 : i32
    return %arg0, %c0_i32 : i32, i32
  }
}

module attributes {stable_mosaic.version = 11 : i64} {
  func.func @_dwconv_gelu_kernel(%arg0: i32, %arg1: memref<1x18x18x128xbf16, #tpu.memory_space<vmem>>, %arg2: memref<9x128xf32, #tpu.memory_space<vmem>>, %arg3: memref<1x128xf32, #tpu.memory_space<vmem>>, %arg4: memref<1x16x16x128xbf16, #tpu.memory_space<vmem>>) attributes {dimension_semantics = [#tpu.dimension_semantics<parallel>], iteration_bounds = array<i64: 2>, scalar_prefetch = 0 : i64, scratch_operands = 0 : i64, tpu.core_type = #tpu.core_type<tc>, window_params = [{transform_indices = @transform_0, window_bounds = array<i64: 1, 18, 18, 128>}, {pipeline_mode = #tpu.pipeline_mode<synchronous>, transform_indices = @transform_1, window_bounds = array<i64: 9, 128>}, {pipeline_mode = #tpu.pipeline_mode<synchronous>, transform_indices = @transform_2, window_bounds = array<i64: 1, 128>}, {transform_indices = @transform_3, window_bounds = array<i64: 1, 16, 16, 128>}]} {
    %c0 = arith.constant 0 : index
    %c0_0 = arith.constant 0 : index
    %c0_1 = arith.constant 0 : index
    %c0_2 = arith.constant 0 : index
    %0 = vector.load %arg1[%c0, %c0_0, %c0_1, %c0_2] : memref<1x18x18x128xbf16, #tpu.memory_space<vmem>>, vector<1x18x18x128xbf16>
    %c0_3 = arith.constant 0 : index
    %c0_4 = arith.constant 0 : index
    %1 = vector.load %arg2[%c0_3, %c0_4] : memref<9x128xf32, #tpu.memory_space<vmem>>, vector<9x128xf32>
    %cst = arith.constant 0.000000e+00 : f32
    %2 = vector.broadcast %cst : f32 to vector<1x16x16x128xf32>
    %3 = vector.extract_strided_slice %0 {offsets = [0, 0, 0, 0], sizes = [1, 16, 16, 128], strides = [1, 1, 1, 1]} : vector<1x18x18x128xbf16> to vector<1x16x16x128xbf16>
    %4 = arith.extf %3 : vector<1x16x16x128xbf16> to vector<1x16x16x128xf32>
    %5 = vector.extract_strided_slice %1 {offsets = [0, 0], sizes = [1, 128], strides = [1, 1]} : vector<9x128xf32> to vector<1x128xf32>
    %6 = vector.shape_cast %5 : vector<1x128xf32> to vector<128xf32>
    %7 = vector.shape_cast %6 : vector<128xf32> to vector<1x1x1x128xf32>
    %8 = vector.broadcast %7 : vector<1x1x1x128xf32> to vector<1x16x16x128xf32>
    %9 = arith.mulf %4, %8 : vector<1x16x16x128xf32>
    %10 = arith.addf %2, %9 : vector<1x16x16x128xf32>
    %11 = vector.extract_strided_slice %0 {offsets = [0, 0, 1, 0], sizes = [1, 16, 16, 128], strides = [1, 1, 1, 1]} : vector<1x18x18x128xbf16> to vector<1x16x16x128xbf16>
    %12 = arith.extf %11 : vector<1x16x16x128xbf16> to vector<1x16x16x128xf32>
    %13 = vector.extract_strided_slice %1 {offsets = [1, 0], sizes = [1, 128], strides = [1, 1]} : vector<9x128xf32> to vector<1x128xf32>
    %14 = vector.shape_cast %13 : vector<1x128xf32> to vector<128xf32>
    %15 = vector.shape_cast %14 : vector<128xf32> to vector<1x1x1x128xf32>
    %16 = vector.broadcast %15 : vector<1x1x1x128xf32> to vector<1x16x16x128xf32>
    %17 = arith.mulf %12, %16 : vector<1x16x16x128xf32>
    %18 = arith.addf %10, %17 : vector<1x16x16x128xf32>
    %19 = vector.extract_strided_slice %0 {offsets = [0, 0, 2, 0], sizes = [1, 16, 16, 128], strides = [1, 1, 1, 1]} : vector<1x18x18x128xbf16> to vector<1x16x16x128xbf16>
    %20 = arith.extf %19 : vector<1x16x16x128xbf16> to vector<1x16x16x128xf32>
    %21 = vector.extract_strided_slice %1 {offsets = [2, 0], sizes = [1, 128], strides = [1, 1]} : vector<9x128xf32> to vector<1x128xf32>
    %22 = vector.shape_cast %21 : vector<1x128xf32> to vector<128xf32>
    %23 = vector.shape_cast %22 : vector<128xf32> to vector<1x1x1x128xf32>
    %24 = vector.broadcast %23 : vector<1x1x1x128xf32> to vector<1x16x16x128xf32>
    %25 = arith.mulf %20, %24 : vector<1x16x16x128xf32>
    %26 = arith.addf %18, %25 : vector<1x16x16x128xf32>
    %27 = vector.extract_strided_slice %0 {offsets = [0, 1, 0, 0], sizes = [1, 16, 16, 128], strides = [1, 1, 1, 1]} : vector<1x18x18x128xbf16> to vector<1x16x16x128xbf16>
    %28 = arith.extf %27 : vector<1x16x16x128xbf16> to vector<1x16x16x128xf32>
    %29 = vector.extract_strided_slice %1 {offsets = [3, 0], sizes = [1, 128], strides = [1, 1]} : vector<9x128xf32> to vector<1x128xf32>
    %30 = vector.shape_cast %29 : vector<1x128xf32> to vector<128xf32>
    %31 = vector.shape_cast %30 : vector<128xf32> to vector<1x1x1x128xf32>
    %32 = vector.broadcast %31 : vector<1x1x1x128xf32> to vector<1x16x16x128xf32>
    %33 = arith.mulf %28, %32 : vector<1x16x16x128xf32>
    %34 = arith.addf %26, %33 : vector<1x16x16x128xf32>
    %35 = vector.extract_strided_slice %0 {offsets = [0, 1, 1, 0], sizes = [1, 16, 16, 128], strides = [1, 1, 1, 1]} : vector<1x18x18x128xbf16> to vector<1x16x16x128xbf16>
    %36 = arith.extf %35 : vector<1x16x16x128xbf16> to vector<1x16x16x128xf32>
    %37 = vector.extract_strided_slice %1 {offsets = [4, 0], sizes = [1, 128], strides = [1, 1]} : vector<9x128xf32> to vector<1x128xf32>
    %38 = vector.shape_cast %37 : vector<1x128xf32> to vector<128xf32>
    %39 = vector.shape_cast %38 : vector<128xf32> to vector<1x1x1x128xf32>
    %40 = vector.broadcast %39 : vector<1x1x1x128xf32> to vector<1x16x16x128xf32>
    %41 = arith.mulf %36, %40 : vector<1x16x16x128xf32>
    %42 = arith.addf %34, %41 : vector<1x16x16x128xf32>
    %43 = vector.extract_strided_slice %0 {offsets = [0, 1, 2, 0], sizes = [1, 16, 16, 128], strides = [1, 1, 1, 1]} : vector<1x18x18x128xbf16> to vector<1x16x16x128xbf16>
    %44 = arith.extf %43 : vector<1x16x16x128xbf16> to vector<1x16x16x128xf32>
    %45 = vector.extract_strided_slice %1 {offsets = [5, 0], sizes = [1, 128], strides = [1, 1]} : vector<9x128xf32> to vector<1x128xf32>
    %46 = vector.shape_cast %45 : vector<1x128xf32> to vector<128xf32>
    %47 = vector.shape_cast %46 : vector<128xf32> to vector<1x1x1x128xf32>
    %48 = vector.broadcast %47 : vector<1x1x1x128xf32> to vector<1x16x16x128xf32>
    %49 = arith.mulf %44, %48 : vector<1x16x16x128xf32>
    %50 = arith.addf %42, %49 : vector<1x16x16x128xf32>
    %51 = vector.extract_strided_slice %0 {offsets = [0, 2, 0, 0], sizes = [1, 16, 16, 128], strides = [1, 1, 1, 1]} : vector<1x18x18x128xbf16> to vector<1x16x16x128xbf16>
    %52 = arith.extf %51 : vector<1x16x16x128xbf16> to vector<1x16x16x128xf32>
    %53 = vector.extract_strided_slice %1 {offsets = [6, 0], sizes = [1, 128], strides = [1, 1]} : vector<9x128xf32> to vector<1x128xf32>
    %54 = vector.shape_cast %53 : vector<1x128xf32> to vector<128xf32>
    %55 = vector.shape_cast %54 : vector<128xf32> to vector<1x1x1x128xf32>
    %56 = vector.broadcast %55 : vector<1x1x1x128xf32> to vector<1x16x16x128xf32>
    %57 = arith.mulf %52, %56 : vector<1x16x16x128xf32>
    %58 = arith.addf %50, %57 : vector<1x16x16x128xf32>
    %59 = vector.extract_strided_slice %0 {offsets = [0, 2, 1, 0], sizes = [1, 16, 16, 128], strides = [1, 1, 1, 1]} : vector<1x18x18x128xbf16> to vector<1x16x16x128xbf16>
    %60 = arith.extf %59 : vector<1x16x16x128xbf16> to vector<1x16x16x128xf32>
    %61 = vector.extract_strided_slice %1 {offsets = [7, 0], sizes = [1, 128], strides = [1, 1]} : vector<9x128xf32> to vector<1x128xf32>
    %62 = vector.shape_cast %61 : vector<1x128xf32> to vector<128xf32>
    %63 = vector.shape_cast %62 : vector<128xf32> to vector<1x1x1x128xf32>
    %64 = vector.broadcast %63 : vector<1x1x1x128xf32> to vector<1x16x16x128xf32>
    %65 = arith.mulf %60, %64 : vector<1x16x16x128xf32>
    %66 = arith.addf %58, %65 : vector<1x16x16x128xf32>
    %67 = vector.extract_strided_slice %0 {offsets = [0, 2, 2, 0], sizes = [1, 16, 16, 128], strides = [1, 1, 1, 1]} : vector<1x18x18x128xbf16> to vector<1x16x16x128xbf16>
    %68 = arith.extf %67 : vector<1x16x16x128xbf16> to vector<1x16x16x128xf32>
    %69 = vector.extract_strided_slice %1 {offsets = [8, 0], sizes = [1, 128], strides = [1, 1]} : vector<9x128xf32> to vector<1x128xf32>
    %70 = vector.shape_cast %69 : vector<1x128xf32> to vector<128xf32>
    %71 = vector.shape_cast %70 : vector<128xf32> to vector<1x1x1x128xf32>
    %72 = vector.broadcast %71 : vector<1x1x1x128xf32> to vector<1x16x16x128xf32>
    %73 = arith.mulf %68, %72 : vector<1x16x16x128xf32>
    %74 = arith.addf %66, %73 : vector<1x16x16x128xf32>
    %c0_5 = arith.constant 0 : index
    %c0_6 = arith.constant 0 : index
    %75 = vector.load %arg3[%c0_5, %c0_6] : memref<1x128xf32, #tpu.memory_space<vmem>>, vector<1x128xf32>
    %76 = vector.shape_cast %75 : vector<1x128xf32> to vector<1x1x1x128xf32>
    %77 = vector.broadcast %76 : vector<1x1x1x128xf32> to vector<1x16x16x128xf32>
    %78 = arith.addf %74, %77 : vector<1x16x16x128xf32>
    %cst_7 = arith.constant 5.000000e-01 : f32
    %79 = vector.broadcast %cst_7 : f32 to vector<1x16x16x128xf32>
    %80 = arith.mulf %79, %78 : vector<1x16x16x128xf32>
    %cst_8 = arith.constant 0.707106769 : f32
    %81 = vector.broadcast %cst_8 : f32 to vector<1x16x16x128xf32>
    %82 = arith.mulf %78, %81 : vector<1x16x16x128xf32>
    %cst_9 = arith.constant 0.000000e+00 : f32
    %83 = vector.broadcast %cst_9 : f32 to vector<1x16x16x128xf32>
    %84 = arith.cmpf olt, %82, %83 : vector<1x16x16x128xf32>
    %cst_10 = arith.constant -1.000000e+00 : f32
    %cst_11 = arith.constant 1.000000e+00 : f32
    %85 = vector.broadcast %cst_10 : f32 to vector<1x16x16x128xf32>
    %86 = vector.broadcast %cst_11 : f32 to vector<1x16x16x128xf32>
    %87 = arith.select %84, %85, %86 : vector<1x16x16x128xi1>, vector<1x16x16x128xf32>
    %88 = math.absf %82 : vector<1x16x16x128xf32>
    %cst_12 = arith.constant 0.327591091 : f32
    %89 = vector.broadcast %cst_12 : f32 to vector<1x16x16x128xf32>
    %90 = arith.mulf %89, %88 : vector<1x16x16x128xf32>
    %cst_13 = arith.constant 1.000000e+00 : f32
    %91 = vector.broadcast %cst_13 : f32 to vector<1x16x16x128xf32>
    %92 = arith.addf %91, %90 : vector<1x16x16x128xf32>
    %cst_14 = arith.constant 1.000000e+00 : f32
    %93 = vector.broadcast %cst_14 : f32 to vector<1x16x16x128xf32>
    %94 = arith.divf %93, %92 : vector<1x16x16x128xf32>
    %cst_15 = arith.constant 1.06140542 : f32
    %95 = vector.broadcast %cst_15 : f32 to vector<1x16x16x128xf32>
    %96 = arith.mulf %95, %94 : vector<1x16x16x128xf32>
    %cst_16 = arith.constant -1.45315206 : f32
    %97 = vector.broadcast %cst_16 : f32 to vector<1x16x16x128xf32>
    %98 = arith.addf %96, %97 : vector<1x16x16x128xf32>
    %99 = arith.mulf %98, %94 : vector<1x16x16x128xf32>
    %cst_17 = arith.constant 1.42141378 : f32
    %100 = vector.broadcast %cst_17 : f32 to vector<1x16x16x128xf32>
    %101 = arith.addf %99, %100 : vector<1x16x16x128xf32>
    %102 = arith.mulf %101, %94 : vector<1x16x16x128xf32>
    %cst_18 = arith.constant -0.284496725 : f32
    %103 = vector.broadcast %cst_18 : f32 to vector<1x16x16x128xf32>
    %104 = arith.addf %102, %103 : vector<1x16x16x128xf32>
    %105 = arith.mulf %104, %94 : vector<1x16x16x128xf32>
    %cst_19 = arith.constant 0.254829586 : f32
    %106 = vector.broadcast %cst_19 : f32 to vector<1x16x16x128xf32>
    %107 = arith.addf %105, %106 : vector<1x16x16x128xf32>
    %108 = arith.mulf %107, %94 : vector<1x16x16x128xf32>
    %cst_20 = arith.constant 0.000000e+00 : f32
    %109 = vector.broadcast %cst_20 : f32 to vector<1x16x16x128xf32>
    %110 = arith.subf %109, %88 : vector<1x16x16x128xf32>
    %111 = arith.mulf %110, %88 : vector<1x16x16x128xf32>
    %112 = math.exp %111 : vector<1x16x16x128xf32>
    %113 = arith.mulf %108, %112 : vector<1x16x16x128xf32>
    %cst_21 = arith.constant 1.000000e+00 : f32
    %114 = vector.broadcast %cst_21 : f32 to vector<1x16x16x128xf32>
    %115 = arith.subf %114, %113 : vector<1x16x16x128xf32>
    %116 = arith.mulf %87, %115 : vector<1x16x16x128xf32>
    %cst_22 = arith.constant 1.000000e+00 : f32
    %117 = vector.broadcast %cst_22 : f32 to vector<1x16x16x128xf32>
    %118 = arith.addf %117, %116 : vector<1x16x16x128xf32>
    %119 = arith.mulf %80, %118 : vector<1x16x16x128xf32>
    %120 = arith.truncf %119 : vector<1x16x16x128xf32> to vector<1x16x16x128xbf16>
    %c0_23 = arith.constant 0 : index
    %c0_24 = arith.constant 0 : index
    %c0_25 = arith.constant 0 : index
    %c0_26 = arith.constant 0 : index
    %121 = vector.load %arg4[%c0_23, %c0_24, %c0_25, %c0_26] : memref<1x16x16x128xbf16, #tpu.memory_space<vmem>>, vector<1x16x16x128xbf16>
    tpu.vector_store %arg4[%c0_23, %c0_24, %c0_25, %c0_26], %120 {strides = array<i32>} : memref<1x16x16x128xbf16, #tpu.memory_space<vmem>>, vector<1x16x16x128xbf16>,
    return
  }
  func.func @transform_0(%arg0: i32) -> (i32, i32, i32, i32) {
    %c0_i32 = arith.constant 0 : i32
    %c0_i32_0 = arith.constant 0 : i32
    %c0_i32_1 = arith.constant 0 : i32
    %c0_i32_2 = arith.constant 0 : i32
    return %arg0, %c0_i32, %c0_i32_0, %c0_i32_1 : i32, i32, i32, i32
  }
  func.func @transform_1(%arg0: i32) -> (i32, i32) {
    %c0_i32 = arith.constant 0 : i32
    %c0_i32_0 = arith.constant 0 : i32
    %c0_i32_1 = arith.constant 0 : i32
    return %c0_i32, %c0_i32_0 : i32, i32
  }
  func.func @transform_2(%arg0: i32) -> (i32, i32) {
    %c0_i32 = arith.constant 0 : i32
    %c0_i32_0 = arith.constant 0 : i32
    %c0_i32_1 = arith.constant 0 : i32
    return %c0_i32, %c0_i32_0 : i32, i32
  }
  func.func @transform_3(%arg0: i32) -> (i32, i32, i32, i32) {
    %c0_i32 = arith.constant 0 : i32
    %c0_i32_0 = arith.constant 0 : i32
    %c0_i32_1 = arith.constant 0 : i32
    %c0_i32_2 = arith.constant 0 : i32
    return %arg0, %c0_i32, %c0_i32_0, %c0_i32_1 : i32, i32, i32, i32
  }
}

module attributes {stable_mosaic.version = 11 : i64} {
  func.func @_matmul_bias_kernel(%arg0: i32, %arg1: memref<256x128xbf16, #tpu.memory_space<vmem>>, %arg2: memref<128x128xf32, #tpu.memory_space<vmem>>, %arg3: memref<1x128xf32, #tpu.memory_space<vmem>>, %arg4: memref<256x128xf32, #tpu.memory_space<vmem>>) attributes {dimension_semantics = [#tpu.dimension_semantics<parallel>], iteration_bounds = array<i64: 2>, scalar_prefetch = 0 : i64, scratch_operands = 0 : i64, tpu.core_type = #tpu.core_type<tc>, window_params = [{transform_indices = @transform_0, window_bounds = array<i64: 256, 128>}, {pipeline_mode = #tpu.pipeline_mode<synchronous>, transform_indices = @transform_1, window_bounds = array<i64: 128, 128>}, {pipeline_mode = #tpu.pipeline_mode<synchronous>, transform_indices = @transform_2, window_bounds = array<i64: 1, 128>}, {transform_indices = @transform_3, window_bounds = array<i64: 256, 128>}]} {
    %c0 = arith.constant 0 : index
    %c0_0 = arith.constant 0 : index
    %0 = vector.load %arg1[%c0, %c0_0] : memref<256x128xbf16, #tpu.memory_space<vmem>>, vector<256x128xbf16>
    %c0_1 = arith.constant 0 : index
    %c0_2 = arith.constant 0 : index
    %1 = vector.load %arg2[%c0_1, %c0_2] : memref<128x128xf32, #tpu.memory_space<vmem>>, vector<128x128xf32>
    %2 = arith.truncf %1 : vector<128x128xf32> to vector<128x128xbf16>
    %cst = arith.constant dense<0.000000e+00> : vector<256x128xf32>
    %3 = tpu.matmul %0, %2, %cst {dimension_numbers = #tpu.dot_dimension_numbers<[1], [0], [0], [1], [0, 0, 1, 1], [], []>} : vector<256x128xbf16>, vector<128x128xbf16>, vector<256x128xf32> -> vector<256x128xf32>
    %c0_3 = arith.constant 0 : index
    %c0_4 = arith.constant 0 : index
    %4 = vector.load %arg3[%c0_3, %c0_4] : memref<1x128xf32, #tpu.memory_space<vmem>>, vector<1x128xf32>
    %5 = vector.broadcast %4 : vector<1x128xf32> to vector<256x128xf32>
    %6 = arith.addf %3, %5 : vector<256x128xf32>
    %c0_5 = arith.constant 0 : index
    %c0_6 = arith.constant 0 : index
    %7 = vector.load %arg4[%c0_5, %c0_6] : memref<256x128xf32, #tpu.memory_space<vmem>>, vector<256x128xf32>
    tpu.vector_store %arg4[%c0_5, %c0_6], %6 {strides = array<i32>} : memref<256x128xf32, #tpu.memory_space<vmem>>, vector<256x128xf32>,
    return
  }
  func.func @transform_0(%arg0: i32) -> (i32, i32) {
    %c0_i32 = arith.constant 0 : i32
    %c0_i32_0 = arith.constant 0 : i32
    return %arg0, %c0_i32 : i32, i32
  }
  func.func @transform_1(%arg0: i32) -> (i32, i32) {
    %c0_i32 = arith.constant 0 : i32
    %c0_i32_0 = arith.constant 0 : i32
    %c0_i32_1 = arith.constant 0 : i32
    return %c0_i32, %c0_i32_0 : i32, i32
  }
  func.func @transform_2(%arg0: i32) -> (i32, i32) {
    %c0_i32 = arith.constant 0 : i32
    %c0_i32_0 = arith.constant 0 : i32
    %c0_i32_1 = arith.constant 0 : i32
    return %c0_i32, %c0_i32_0 : i32, i32
  }
  func.func @transform_3(%arg0: i32) -> (i32, i32) {
    %c0_i32 = arith.constant 0 : i32
    %c0_i32_0 = arith.constant 0 : i32
    return %arg0, %c0_i32 : i32, i32
  }
}

</mosaic_0001>

<bundles_post_ra>
// kernel: shiftmlp_forward.3
= control target key start
LH: loop header
LB: loop body
LE: loop exit
PB: predicated region body
PF: predicated region fallthrough
CT: control target
= control target key end

     0   :  { %s626_s12 = smov 0   ;;  %s784_s0 = inlined_call_operand.vmem [shape: f32[512,128], index: 0, kind: input, shape index: {}]   ;;  %s785_s1 = inlined_call_operand.vmem [shape: f32[128,128], index: 1, kind: input, shape index: {}]   ;;  %s786_s2 = inlined_call_operand.vmem [shape: f32[1,128], index: 2, kind: input, shape index: {}]   ;;  %s787_s3 = inlined_call_operand.vmem [shape: bf16[512,128], index: 3, kind: output, shape index: {}]  }
   0x1 LB: > { %s459_s13 = sadd.s32 4294967295, %s604_s12   ;;  %p463_p0 = scmp.ge.s32.totalorder %s604_s12, 1  ;;  %s604_s12 = sphi %s626_s12, %s13_s12  }
   0x2   : > { %p138_p1 = scmp.lt.s32.totalorder %s604_s12, 3 }
   0x4   : > { %p139_p2 = pnand %p463_p0, %p138_p1 }
   0x5   : > { %s464_s30 = sshll.u32 (!%p139_p2), %s459_s13, 5 }
   0x6   : > { %142 = sbr.rel (%p139_p2) target bundleno = 240 (0xf0), region = 32  ;;  %p163_p3 = scmp.lt.s32.totalorder (!%p139_p2), %s464_s30, 63 }
   0xb   : > { %v236_v0 = vld [vmem:[%s785_s1 + $0x70] sm:$0xff]  ;;  %v237_v1 = vld [vmem:[%s785_s1 + $0x78] sm:$0xff]  ;;  %v234_v2 = vld [vmem:[%s785_s1 + $0x60] sm:$0xff]  ;;  %s789_s30 = smov (!%p163_p3, %s464_s30), 63 }
   0xc   : > { %v245_v3 = vpack.c.bf16 %v237_v1, %v236_v0  ;;  %v235_v4 = vld [vmem:[%s785_s1 + $0x68] sm:$0xff]  ;;  %v232_v6 = vld [vmem:[%s785_s1 + $0x50] sm:$0xff]  ;;  %v233_v7 = vld [vmem:[%s785_s1 + $0x58] sm:$0xff]  ;;  %s465_s17 = sshll.u32 %s789_s30, 3  ;;  %s467_s27 = sshll.u32 %s789_s30, 2 }
   0xd   : > { %v244_v5 = vpack.c.bf16 %v235_v4, %v234_v2  ;;  %v243_v8 = vpack.c.bf16 %v233_v7, %v232_v6  ;;  %v230_v9 = vld [vmem:[%s785_s1 + $0x40] sm:$0xff]  ;;  %v231_v10 = vld [vmem:[%s785_s1 + $0x48] sm:$0xff]  ;;  %v228_v12 = vld [vmem:[%s785_s1 + $0x30] sm:$0xff]  ;;  %s682_s20 = scalar_lea.vmem %s784_s0, %s465_s17  ;;  %s735_s4 = scalar_lea.vmem %s787_s3, %s467_s27 }
   0xe   : > { %250 = vmatpush.bf16.msra.mxu0 %v245_v3  ;;  %565 = vmatpush.bf16.msra.mxu1 %v245_v3  ;;  %v242_v11 = vpack.c.bf16 %v231_v10, %v230_v9  ;;  %v229_v13 = vld [vmem:[%s785_s1 + $0x38] sm:$0xff]  ;;  %v226_v15 = vld [vmem:[%s785_s1 + $0x20] sm:$0xff]  ;;  %v227_v16 = vld [vmem:[%s785_s1 + $0x28] sm:$0xff] }
   0xf   : > { %566 = vmatpush.bf16.msra.mxu2 %v245_v3  ;;  %567 = vmatpush.bf16.msra.mxu3 %v245_v3  ;;  %v241_v14 = vpack.c.bf16 %v229_v13, %v228_v12  ;;  %v240_v17 = vpack.c.bf16 %v227_v16, %v226_v15  ;;  %v224_v18 = vld [vmem:[%s785_s1 + $0x10] sm:$0xff]  ;;  %v225_v19 = vld [vmem:[%s785_s1 + $0x18] sm:$0xff]  ;;  %v222_v21 = vld [vmem:[%s785_s1] sm:$0xff] }
  0x10   : > { %v239_v20 = vpack.c.bf16 %v225_v19, %v224_v18  ;;  %v223_v22 = vld [vmem:[%s785_s1 + $0x8] sm:$0xff]  ;;  %v174_v23 = vld [vmem:[%s682_s20] sm:$0xff]  ;;  %v176_v36 = vld [vmem:[%s682_s20 + $0x10] sm:$0xff] }
  0x11   : > { %v175_v24 = vld [vmem:[%s682_s20 + $0x8] sm:$0xff]  ;;  %v238_v25 = vpack.c.bf16 %v223_v22, %v222_v21  ;;  %v182_v26 = vld [vmem:[%s682_s20 + $0x40] sm:$0xff]  ;;  %v177_v37 = vld [vmem:[%s682_s20 + $0x18] sm:$0xff] }
  0x12   : > { %251 = vmatpush.bf16.msra.mxu0 %v244_v5  ;;  %568 = vmatpush.bf16.msra.mxu1 %v244_v5  ;;  %v183_v27 = vld [vmem:[%s682_s20 + $0x48] sm:$0xff]  ;;  %v190_v28 = vld [vmem:[%s682_s20 + $0x80] sm:$0xff]  ;;  %v206_v32 = vpack.c.bf16 %v175_v24, %v174_v23  ;;  %v184_v38 = vld [vmem:[%s682_s20 + $0x50] sm:$0xff]  ;;  %v207_v44 = vpack.c.bf16 %v177_v37, %v176_v36 }
  0x13   : > { %569 = vmatpush.bf16.msra.mxu2 %v244_v5  ;;  %570 = vmatpush.bf16.msra.mxu3 %v244_v5  ;;  %v191_v29 = vld [vmem:[%s682_s20 + $0x88] sm:$0xff]  ;;  %v198_v30 = vld [vmem:[%s682_s20 + $0xc0] sm:$0xff]  ;;  %v210_v33 = vpack.c.bf16 %v183_v27, %v182_v26  ;;  %v185_v39 = vld [vmem:[%s682_s20 + $0x58] sm:$0xff] }
  0x14   : > { %v199_v31 = vld [vmem:[%s682_s20 + $0xc8] sm:$0xff]  ;;  %v214_v34 = vpack.c.bf16 %v191_v29, %v190_v28  ;;  %v192_v40 = vld [vmem:[%s682_s20 + $0x90] sm:$0xff]  ;;  %v193_v41 = vld [vmem:[%s682_s20 + $0x98] sm:$0xff]  ;;  %v211_v45 = vpack.c.bf16 %v185_v39, %v184_v38 }
  0x15   : > { %v218_v35 = vpack.c.bf16 %v199_v31, %v198_v30  ;;  %v200_v42 = vld [vmem:[%s682_s20 + $0xd0] sm:$0xff]  ;;  %v201_v43 = vld [vmem:[%s682_s20 + $0xd8] sm:$0xff]  ;;  %v215_v46 = vpack.c.bf16 %v193_v41, %v192_v40  ;;  %v178_v48 = vld [vmem:[%s682_s20 + $0x20] sm:$0xff] }
  0x16   : > { %252 = vmatpush.bf16.msra.mxu0 %v243_v8  ;;  %571 = vmatpush.bf16.msra.mxu1 %v243_v8  ;;  %v219_v47 = vpack.c.bf16 %v201_v43, %v200_v42  ;;  %v179_v49 = vld [vmem:[%s682_s20 + $0x28] sm:$0xff]  ;;  %v186_v50 = vld [vmem:[%s682_s20 + $0x60] sm:$0xff]  ;;  %v180_v60 = vld [vmem:[%s682_s20 + $0x30] sm:$0xff] }
  0x17   : > { %572 = vmatpush.bf16.msra.mxu2 %v243_v8  ;;  %573 = vmatpush.bf16.msra.mxu3 %v243_v8  ;;  %v187_v51 = vld [vmem:[%s682_s20 + $0x68] sm:$0xff]  ;;  %v194_v52 = vld [vmem:[%s682_s20 + $0xa0] sm:$0xff]  ;;  %v208_v56 = vpack.c.bf16 %v179_v49, %v178_v48  ;;  %v181_v61 = vld [vmem:[%s682_s20 + $0x38] sm:$0xff] }
  0x18   : > { %v195_v53 = vld [vmem:[%s682_s20 + $0xa8] sm:$0xff]  ;;  %v202_v54 = vld [vmem:[%s682_s20 + $0xe0] sm:$0xff]  ;;  %v212_v57 = vpack.c.bf16 %v187_v51, %v186_v50  ;;  %v188_v62 = vld [vmem:[%s682_s20 + $0x70] sm:$0xff]  ;;  %v209_v4 = vpack.c.bf16 %v181_v61, %v180_v60 }
  0x19   : > { %v203_v55 = vld [vmem:[%s682_s20 + $0xe8] sm:$0xff]  ;;  %v216_v58 = vpack.c.bf16 %v195_v53, %v194_v52  ;;  %v189_v63 = vld [vmem:[%s682_s20 + $0x78] sm:$0xff]  ;;  %v196_v0 = vld [vmem:[%s682_s20 + $0xb0] sm:$0xff] }
  0x1a   : > { %253 = vmatpush.bf16.msra.mxu0 %v242_v11  ;;  %574 = vmatpush.bf16.msra.mxu1 %v242_v11  ;;  %v220_v59 = vpack.c.bf16 %v203_v55, %v202_v54  ;;  %v197_v1 = vld [vmem:[%s682_s20 + $0xb8] sm:$0xff]  ;;  %v204_v2 = vld [vmem:[%s682_s20 + $0xf0] sm:$0xff]  ;;  %v213_v5 = vpack.c.bf16 %v189_v63, %v188_v62  ;;  %v725_v10 = vld [vmem:[%s786_s2] ss:$0 sm:$0xff] }
  0x1b   : > { %575 = vmatpush.bf16.msra.mxu2 %v242_v11  ;;  %576 = vmatpush.bf16.msra.mxu3 %v242_v11  ;;  %v205_v3 = vld [vmem:[%s682_s20 + $0xf8] sm:$0xff]  ;;  %v217_v6 = vpack.c.bf16 %v197_v1, %v196_v0 }
  0x1c   : > { %v221_v7 = vpack.c.bf16 %v205_v3, %v204_v2 }
  0x1e   : > { %254 = vmatpush.bf16.msra.mxu0 %v241_v14  ;;  %577 = vmatpush.bf16.msra.mxu1 %v241_v14 }
  0x1f   : > { %578 = vmatpush.bf16.msra.mxu2 %v241_v14  ;;  %579 = vmatpush.bf16.msra.mxu3 %v241_v14 }
  0x22   : > { %255 = vmatpush.bf16.msra.mxu0 %v240_v17  ;;  %580 = vmatpush.bf16.msra.mxu1 %v240_v17 }
  0x23   : > { %581 = vmatpush.bf16.msra.mxu2 %v240_v17  ;;  %582 = vmatpush.bf16.msra.mxu3 %v240_v17 }
  0x26   : > { %256 = vmatpush.bf16.msra.mxu0 %v239_v20  ;;  %583 = vmatpush.bf16.msra.mxu1 %v239_v20 }
  0x27   : > { %584 = vmatpush.bf16.msra.mxu2 %v239_v20  ;;  %585 = vmatpush.bf16.msra.mxu3 %v239_v20 }
  0x2a   : > { %257 = vmatpush.bf16.msra.mxu0 %v238_v25  ;;  %586 = vmatpush.bf16.msra.mxu1 %v238_v25 }
  0x2b   : > { %587 = vmatpush.bf16.msra.mxu2 %v238_v25  ;;  %588 = vmatpush.bf16.msra.mxu3 %v238_v25 }
  0x2d   : > { %258 = vmatmul.bf16.vlgmr.msra.gmra.mxu0 %v206_v32  ;;  %278 = vmatmul.bf16.vlgmr.msra.gmra.mxu1 %v210_v33 }
  0x2e   : > { %298 = vmatmul.bf16.vlgmr.msra.gmra.mxu2 %v214_v34  ;;  %318 = vmatmul.bf16.vlgmr.msra.gmra.mxu3 %v218_v35 }
  0x3d   : > { %263 = vmatmul.bf16.gmra.mxu0 %v207_v44  ;;  %283 = vmatmul.bf16.gmra.mxu1 %v211_v45 }
  0x3e   : > { %303 = vmatmul.bf16.gmra.mxu2 %v215_v46  ;;  %323 = vmatmul.bf16.gmra.mxu3 %v219_v47 }
  0x4d   : > { %268 = vmatmul.bf16.gmra.mxu0 %v208_v56  ;;  %288 = vmatmul.bf16.gmra.mxu1 %v212_v57 }
  0x4e   : > { %308 = vmatmul.bf16.gmra.mxu2 %v216_v58  ;;  %328 = vmatmul.bf16.gmra.mxu3 %v220_v59 }
  0x5d   : > { %273 = vmatmul.bf16.gmra.mxu0 %v209_v4  ;;  %293 = vmatmul.bf16.gmra.mxu1 %v213_v5 }
  0x5e   : > { %313 = vmatmul.bf16.gmra.mxu2 %v217_v6  ;;  %333 = vmatmul.bf16.gmra.mxu3 %v221_v7 }
  0xaa   : > { %v259_v8 = vpop.f32.mrf.mxu0  ;;  %v279_v9 = vpop.f32.mrf.mxu1 }
  0xab   : > { %v260_v15 = vadd.f32 %v725_v10, %v259_v8  ;;  %v280_v16 = vadd.f32 %v725_v10, %v279_v9 }
  0xb1   : > { %v299_v11 = vpop.f32.mrf.mxu2  ;;  %v319_v12 = vpop.f32.mrf.mxu3 }
  0xb2   : > { %v261_v13 = vpop.f32.mrf.mxu0  ;;  %v281_v14 = vpop.f32.mrf.mxu1  ;;  %v300_v23 = vadd.f32 %v725_v10, %v299_v11  ;;  %v320_v24 = vadd.f32 %v725_v10, %v319_v12 }
  0xb3   : > { %v262_v17 = vadd.f32 %v725_v10, %v261_v13  ;;  %v282_v18 = vadd.f32 %v725_v10, %v281_v14 }
  0xb5   : > { %v473_v19 = vpack.c.bf16 %v262_v17, %v260_v15  ;;  %v493_v20 = vpack.c.bf16 %v282_v18, %v280_v16 }
  0xb7   : > { %474 = vst [vmem:[%s735_s4] sm:$0xff] %v473_v19  }
  0xb8   : > { %553 = vst [vmem:[%s735_s4 + $0x20] sm:$0xff] %v493_v20  }
  0xb9   : > { %v301_v21 = vpop.f32.mrf.mxu2  ;;  %v321_v22 = vpop.f32.mrf.mxu3 }
  0xba   : > { %v302_v25 = vadd.f32 %v725_v10, %v301_v21  ;;  %v322_v26 = vadd.f32 %v725_v10, %v321_v22  ;;  %v264_v27 = vpop.f32.mrf.mxu0  ;;  %v284_v28 = vpop.f32.mrf.mxu1 }
  0xbb   : > { %v265_v35 = vadd.f32 %v725_v10, %v264_v27  ;;  %v285_v36 = vadd.f32 %v725_v10, %v284_v28 }
  0xbc   : > { %v513_v29 = vpack.c.bf16 %v302_v25, %v300_v23  ;;  %v533_v30 = vpack.c.bf16 %v322_v26, %v320_v24 }
  0xbe   : > { %557 = vst [vmem:[%s735_s4 + $0x40] sm:$0xff] %v513_v29  }
  0xbf   : > { %561 = vst [vmem:[%s735_s4 + $0x60] sm:$0xff] %v533_v30  }
  0xc1   : > { %v304_v31 = vpop.f32.mrf.mxu2  ;;  %v324_v32 = vpop.f32.mrf.mxu3 }
  0xc2   : > { %v266_v33 = vpop.f32.mrf.mxu0  ;;  %v286_v34 = vpop.f32.mrf.mxu1  ;;  %v305_v43 = vadd.f32 %v725_v10, %v304_v31  ;;  %v325_v44 = vadd.f32 %v725_v10, %v324_v32 }
  0xc3   : > { %v267_v37 = vadd.f32 %v725_v10, %v266_v33  ;;  %v287_v38 = vadd.f32 %v725_v10, %v286_v34 }
  0xc5   : > { %v478_v39 = vpack.c.bf16 %v267_v37, %v265_v35  ;;  %v498_v40 = vpack.c.bf16 %v287_v38, %v285_v36 }
  0xc7   : > { %550 = vst [vmem:[%s735_s4 + $0x8] sm:$0xff] %v478_v39  }
  0xc8   : > { %554 = vst [vmem:[%s735_s4 + $0x28] sm:$0xff] %v498_v40  }
  0xc9   : > { %v306_v41 = vpop.f32.mrf.mxu2  ;;  %v326_v42 = vpop.f32.mrf.mxu3 }
  0xca   : > { %v307_v45 = vadd.f32 %v725_v10, %v306_v41  ;;  %v327_v46 = vadd.f32 %v725_v10, %v326_v42  ;;  %v269_v47 = vpop.f32.mrf.mxu0  ;;  %v289_v48 = vpop.f32.mrf.mxu1 }
  0xcb   : > { %v270_v55 = vadd.f32 %v725_v10, %v269_v47  ;;  %v290_v56 = vadd.f32 %v725_v10, %v289_v48 }
  0xcc   : > { %v518_v49 = vpack.c.bf16 %v307_v45, %v305_v43  ;;  %v538_v50 = vpack.c.bf16 %v327_v46, %v325_v44 }
  0xce   : > { %558 = vst [vmem:[%s735_s4 + $0x48] sm:$0xff] %v518_v49  }
  0xcf   : > { %562 = vst [vmem:[%s735_s4 + $0x68] sm:$0xff] %v538_v50  }
  0xd1   : > { %v309_v51 = vpop.f32.mrf.mxu2  ;;  %v329_v52 = vpop.f32.mrf.mxu3 }
  0xd2   : > { %v271_v53 = vpop.f32.mrf.mxu0  ;;  %v291_v54 = vpop.f32.mrf.mxu1  ;;  %v310_v63 = vadd.f32 %v725_v10, %v309_v51  ;;  %v330_v0 = vadd.f32 %v725_v10, %v329_v52 }
  0xd3   : > { %v272_v57 = vadd.f32 %v725_v10, %v271_v53  ;;  %v292_v58 = vadd.f32 %v725_v10, %v291_v54 }
  0xd5   : > { %v483_v59 = vpack.c.bf16 %v272_v57, %v270_v55  ;;  %v503_v60 = vpack.c.bf16 %v292_v58, %v290_v56 }
  0xd7   : > { %551 = vst [vmem:[%s735_s4 + $0x10] sm:$0xff] %v483_v59  }
  0xd8   : > { %555 = vst [vmem:[%s735_s4 + $0x30] sm:$0xff] %v503_v60  }
  0xd9   : > { %v311_v61 = vpop.f32.mrf.mxu2  ;;  %v331_v62 = vpop.f32.mrf.mxu3 }
  0xda   : > { %v312_v1 = vadd.f32 %v725_v10, %v311_v61  ;;  %v332_v2 = vadd.f32 %v725_v10, %v331_v62  ;;  %v274_v3 = vpop.f32.mrf.mxu0  ;;  %v294_v4 = vpop.f32.mrf.mxu1 }
  0xdb   : > { %v275_v12 = vadd.f32 %v725_v10, %v274_v3  ;;  %v295_v13 = vadd.f32 %v725_v10, %v294_v4 }
  0xdc   : > { %v523_v5 = vpack.c.bf16 %v312_v1, %v310_v63  ;;  %v543_v6 = vpack.c.bf16 %v332_v2, %v330_v0 }
  0xde   : > { %559 = vst [vmem:[%s735_s4 + $0x50] sm:$0xff] %v523_v5  }
  0xdf   : > { %563 = vst [vmem:[%s735_s4 + $0x70] sm:$0xff] %v543_v6  }
  0xe1   : > { %v314_v7 = vpop.f32.mrf.mxu2  ;;  %v334_v8 = vpop.f32.mrf.mxu3 }
  0xe2   : > { %v276_v9 = vpop.f32.mrf.mxu0  ;;  %v296_v11 = vpop.f32.mrf.mxu1  ;;  %v315_v20 = vadd.f32 %v725_v10, %v314_v7  ;;  %v335_v21 = vadd.f32 %v725_v10, %v334_v8 }
  0xe3   : > { %v277_v14 = vadd.f32 %v725_v10, %v276_v9  ;;  %v297_v15 = vadd.f32 %v725_v10, %v296_v11 }
  0xe5   : > { %v488_v16 = vpack.c.bf16 %v277_v14, %v275_v12  ;;  %v508_v17 = vpack.c.bf16 %v297_v15, %v295_v13 }
  0xe7   : > { %552 = vst [vmem:[%s735_s4 + $0x18] sm:$0xff] %v488_v16  }
  0xe8   : > { %556 = vst [vmem:[%s735_s4 + $0x38] sm:$0xff] %v508_v17  }
  0xe9   : > { %v316_v18 = vpop.f32.mrf.mxu2  ;;  %v336_v19 = vpop.f32.mrf.mxu3 }
  0xea   : > { %v317_v22 = vadd.f32 %v725_v10, %v316_v18  ;;  %v337_v23 = vadd.f32 %v725_v10, %v336_v19 }
  0xec   : > { %v528_v24 = vpack.c.bf16 %v317_v22, %v315_v20  ;;  %v548_v25 = vpack.c.bf16 %v337_v23, %v335_v21 }
  0xee   : > { %560 = vst [vmem:[%s735_s4 + $0x58] sm:$0xff] %v528_v24  }
  0xef   : > { %564 = vst [vmem:[%s735_s4 + $0x78] sm:$0xff] %v548_v25  }
  0xf0 PF: > { %s13_s12 = sadd.s32 1, %s604_s12  }
  0xf1   : > { %p10_p4 = scmp.ge.s32.totalorder %s13_s12, 4  }
  0xf3   :  { %12 = sbr.rel (!%p10_p4) target bundleno = 1 (0x1), region = 62 }

// kernel: shiftmlp_forward.4
= control target key start
LH: loop header
LB: loop body
LE: loop exit
PB: predicated region body
PF: predicated region fallthrough
CT: control target
= control target key end

     0   :  { %s3679_s12 = smov 0   ;;  %s8416_s0 = inlined_call_operand.vmem [shape: bf16[2,18,18,128], index: 0, kind: input, shape index: {}]   ;;  %s8417_s1 = inlined_call_operand.vmem [shape: f32[9,128], index: 1, kind: input, shape index: {}]   ;;  %s8418_s2 = inlined_call_operand.vmem [shape: f32[1,128], index: 2, kind: input, shape index: {}]   ;;  %s8419_s3 = inlined_call_operand.vmem [shape: bf16[2,16,16,128], index: 3, kind: output, shape index: {}]  }
   0x1 LB: > { %s3359_s13 = sadd.s32 4294967295, %s3656_s12   ;;  %p3363_p0 = scmp.ge.s32.totalorder %s3656_s12, 1  ;;  %s3656_s12 = sphi %s3679_s12, %s13_s12  }
   0x2   : > { %p137_p1 = scmp.lt.s32.totalorder %s3656_s12, 3 }
   0x4   : > { %p138_p2 = pnand %p3363_p0, %p137_p1 }
   0x6   : > { %141 = sbr.rel (%p138_p2) target bundleno = 769 (0x301), region = 32 }
   0xb   : > { %p161_p3 = scmp.lt.s32.totalorder %s3359_s13, 1  ;;  %v3699_v1 = vld [vmem:[%s8417_s1] sm:$0xff]  ;;  %vm437_vm0 = vcmask 1046528   ;;  %vm679_vm1 = vcmask 1045504  }
   0xc   : > { %8659 = vst [vmem:[#allocation2_spill] sm:$0xff] %v3699_v1  ;;  %v3713_v10 = vperm.slane %v3699_v1, 0  ;;  %v3716_v11 = vperm.slane %v3699_v1, 1 }
   0xd   : > { %s9874_s13 = smov (!%p161_p3, %s3359_s13), 1 }
   0xe   : > { %s3509_s14 = smul.u32 216, %s9874_s13  ;;  %s3369_s26 = sshll.u32 %s9874_s13, 7 }
   0xf   : > { %s8373_s29 = scalar_lea.vmem %s8419_s3, %s3369_s26 }
  0x10   : > { %s3693_s17 = scalar_lea.vmem %s8416_s0, %s3509_s14 }
  0x11   : > { %v3371_v0 = vld [vmem:[%s3693_s17] sm:$0xff]   ;;  %v174_v2 = vld [vmem:[%s3693_s17 + $0xc] sm:$0xff]   ;;  %v3486_v3 = vld [vmem:[%s3693_s17 + $0x18] sm:$0xff]  }
  0x12   : > { %v3704_v4 = vld [vmem:[%s3693_s17 + $0x8] sm:$0x1]  ;;  %v176_v5 = vld [vmem:[%s3693_s17 + $0x14] sm:$0x1]  ;;  %v3708_v7 = vunpack.c.l.bf16 %v3371_v0  ;;  %v186_v9 = vld [vmem:[%s3693_s17 + $0x3c] sm:$0xff]   ;;  %v3718_v12 = vunpack.c.h.bf16 %v3371_v0  ;;  %v3720_v13 = vunpack.c.l.bf16 %v3486_v3  ;;  %v3723_v15 = vunpack.c.l.bf16 %v174_v2 }
  0x13   : > { %8660 = vst [vmem:[#allocation3_spill] sm:$0xff] %v3704_v4  ;;  %v3487_v6 = vld [vmem:[%s3693_s17 + $0x30] sm:$0xff]   ;;  %v180_v8 = vld [vmem:[%s3693_s17 + $0x24] sm:$0xff]   ;;  %v3725_v16 = vunpack.c.h.bf16 %v174_v2  ;;  %v3727_v17 = vunpack.c.h.bf16 %v3486_v3  ;;  %v3734_v22 = vunpack.c.l.bf16 %v176_v5  ;;  %v3490_v24 = vld [vmem:[%s3693_s17 + $0x78] sm:$0xff]   ;;  %v3743_v27 = vunpack.c.l.bf16 %v186_v9 }
  0x14   : > { %8661 = vst [vmem:[#allocation4_spill] sm:$0xff] %v3718_v12  ;;  %v3488_v14 = vld [vmem:[%s3693_s17 + $0x48] sm:$0xff]   ;;  %v3729_v18 = vunpack.c.l.bf16 %v3487_v6  ;;  %v192_v19 = vld [vmem:[%s3693_s17 + $0x54] sm:$0xff]   ;;  %v3489_v20 = vld [vmem:[%s3693_s17 + $0x60] sm:$0xff]   ;;  %v3736_v23 = vunpack.c.h.bf16 %v3487_v6  ;;  %v3739_v25 = vunpack.c.l.bf16 %v180_v8  ;;  %v3741_v26 = vunpack.c.h.bf16 %v180_v8 }
  0x15   : > { %8662 = vst [vmem:[#allocation5_spill] sm:$0xff] %v3720_v13  ;;  %v3745_v28 = vunpack.c.l.bf16 %v3488_v14  ;;  %v198_v29 = vld [vmem:[%s3693_s17 + $0x6c] sm:$0xff]   ;;  %v204_v30 = vld [vmem:[%s3693_s17 + $0x84] sm:$0xff]   ;;  %v3749_v31 = vunpack.c.h.bf16 %v186_v9  ;;  %v3753_v32 = vmul.f32 %v3708_v7, %v3713_v10  ;;  %v3757_v33 = vmul.f32 %v3718_v12, %v3713_v10  ;;  %v210_v41 = vld [vmem:[%s3693_s17 + $0x9c] sm:$0xff]  }
  0x16   : > { %8663 = vst [vmem:[#allocation6_spill] sm:$0xff] %v3723_v15  ;;  %v3759_v34 = vunpack.c.h.bf16 %v3488_v14  ;;  %v3761_v35 = vunpack.c.l.bf16 %v3489_v20  ;;  %v3491_v36 = vld [vmem:[%s3693_s17 + $0x90] sm:$0xff]   ;;  %v3764_v37 = vunpack.c.l.bf16 %v192_v19  ;;  %v3766_v38 = vunpack.c.h.bf16 %v192_v19  ;;  %v3492_v42 = vld [vmem:[%s3693_s17 + $0xa8] sm:$0xff]   ;;  %v3493_v46 = vld [vmem:[%s3693_s17 + $0xc0] sm:$0xff]  }
  0x17   : > { %8664 = vst [vmem:[#allocation7_spill] sm:$0xff] %v3725_v16  ;;  %v3768_v39 = vunpack.c.h.bf16 %v3489_v20  ;;  %v3770_v40 = vunpack.c.l.bf16 %v3490_v24  ;;  %v3776_v43 = vmul.f32 %v3713_v10, %v3723_v15  ;;  %v3780_v44 = vmul.f32 %v3713_v10, %v3725_v16  ;;  %v216_v51 = vld [vmem:[%s3693_s17 + $0xb4] sm:$0xff]   ;;  %v179_v14 = vld [vmem:[%s3693_s17 + $0x20] sm:$0x1]  ;;  %v197_v1 = vld [vmem:[%s3693_s17 + $0x68] sm:$0x1] }
  0x18   : > { %8665 = vst [vmem:[#allocation8_spill] sm:$0xff] %v3727_v17  ;;  %v3782_v45 = vunpack.c.h.bf16 %v3490_v24  ;;  %v3785_v47 = vunpack.c.l.bf16 %v198_v29  ;;  %v3787_v48 = vunpack.c.h.bf16 %v198_v29  ;;  %v3789_v49 = vunpack.c.l.bf16 %v204_v30 }
  0x19   : > { %8666 = vst [vmem:[#allocation9_spill] sm:$0xff] %v3729_v18  ;;  %v3791_v50 = vunpack.c.l.bf16 %v3491_v36  ;;  %v3794_v52 = vunpack.c.h.bf16 %v204_v30  ;;  %v3798_v53 = vmul.f32 %v3720_v13, %v3713_v10  ;;  %v3802_v54 = vmul.f32 %v3727_v17, %v3713_v10  ;;  %v182_v30 = vld [vmem:[%s3693_s17 + $0x2c] sm:$0x1] }
  0x1a   : > { %8667 = vst [vmem:[#allocation10_spill] sm:$0xff] %v3734_v22  ;;  %v3804_v55 = vunpack.c.h.bf16 %v3491_v36  ;;  %v3806_v56 = vunpack.c.l.bf16 %v3492_v42  ;;  %v3808_v57 = vunpack.c.l.bf16 %v210_v41  ;;  %v3810_v58 = vunpack.c.h.bf16 %v210_v41  ;;  %v185_v36 = vld [vmem:[%s3693_s17 + $0x38] sm:$0x1]  ;;  %v188_v41 = vld [vmem:[%s3693_s17 + $0x44] sm:$0x1] }
  0x1b   : > { %8668 = vst [vmem:[#allocation11_spill] sm:$0xff] %v3736_v23  ;;  %v3812_v59 = vunpack.c.h.bf16 %v3492_v42  ;;  %v3814_v60 = vunpack.c.l.bf16 %v3493_v46  ;;  %v3818_v61 = vmul.f32 %v3713_v10, %v3739_v25  ;;  %v3822_v62 = vmul.f32 %v3713_v10, %v3741_v26 }
  0x1c   : > { %8669 = vst [vmem:[#allocation12_spill] sm:$0xff] %v3739_v25  ;;  %v3824_v63 = vunpack.c.h.bf16 %v3493_v46  ;;  %v3826_v0 = vunpack.c.l.bf16 %v216_v51  ;;  %v3828_v2 = vunpack.c.h.bf16 %v216_v51  ;;  %v3832_v3 = vmul.f32 %v3729_v18, %v3713_v10 }
  0x1d   : > { %8670 = vst [vmem:[#allocation13_spill] sm:$0xff] %v3741_v26  ;;  %v3836_v5 = vmul.f32 %v3736_v23, %v3713_v10  ;;  %v3840_v6 = vmul.f32 %v3713_v10, %v3743_v27  ;;  %v3844_v8 = vmul.f32 %v3713_v10, %v3749_v31  ;;  %v3848_v9 = vmul.f32 %v3745_v28, %v3713_v10 }
  0x1e   : > { %8671 = vst [vmem:[#allocation14_spill] sm:$0xff] %v3743_v27  ;;  %v3853_v19 = vmul.f32 %v3759_v34, %v3713_v10  ;;  %v3857_v20 = vmul.f32 %v3713_v10, %v3764_v37  ;;  %v3861_v24 = vmul.f32 %v3713_v10, %v3766_v38  ;;  %v3865_v29 = vmul.f32 %v3761_v35, %v3713_v10 }
  0x1f   : > { %8672 = vst [vmem:[#allocation15_spill] sm:$0xff] %v3745_v28  ;;  %v3872_v42 = vmul.f32 %v3768_v39, %v3713_v10  ;;  %v3876_v46 = vmul.f32 %v3713_v10, %v3785_v47  ;;  %v3880_v51 = vmul.f32 %v3713_v10, %v3787_v48  ;;  %v3884_v21 = vmul.f32 %v3770_v40, %v3713_v10 }
  0x20   : > { %8673 = vst [vmem:[#allocation16_spill] sm:$0xff] %v3749_v31 }
  0x21   : > { %8674 = vst [vmem:[#allocation17_spill] sm:$0xff] %v3759_v34 }
  0x22   : > { %8675 = vst [vmem:[#allocation18_spill] sm:$0xff] %v3761_v35 }
  0x23   : > { %8676 = vst [vmem:[#allocation19_spill] sm:$0xff] %v3764_v37 }
  0x24   : > { %8677 = vst [vmem:[#allocation20_spill] sm:$0xff] %v3766_v38 }
  0x25   : > { %8678 = vst [vmem:[#allocation21_spill] sm:$0xff] %v3768_v39 }
  0x26   : > { %8679 = vst [vmem:[#allocation22_spill] sm:$0xff] %v3770_v40 }
  0x27   : > { %8680 = vst [vmem:[#allocation23_spill] sm:$0xff] %v3782_v45 }
  0x28   : > { %8681 = vst [vmem:[#allocation24_spill] sm:$0xff] %v3785_v47 }
  0x29   : > { %8682 = vst [vmem:[#allocation25_spill] sm:$0xff] %v3787_v48 }
  0x2a   : > { %8683 = vst [vmem:[#allocation26_spill] sm:$0xff] %v3789_v49 }
  0x2b   : > { %8684 = vst [vmem:[#allocation27_spill] sm:$0xff] %v3791_v50 }
  0x2c   : > { %8685 = vst [vmem:[#allocation28_spill] sm:$0xff] %v3794_v52 }
  0x2d   : > { %8686 = vst [vmem:[#allocation29_spill] sm:$0xff] %v3798_v53 }
  0x2e   : > { %8687 = vst [vmem:[#allocation30_spill] sm:$0xff] %v3802_v54  ;;  %v3952_v54 = vunpack.c.l.bf16 %v197_v1  ;;  %v342_v1 = vmul.f32 %v3718_v12, %v3716_v11 }
  0x2f   : > { %8688 = vst [vmem:[#allocation31_spill] sm:$0xff] %v3804_v55 }
  0x30   : > { %8689 = vst [vmem:[#allocation32_spill] sm:$0xff] %v3806_v56 }
  0x31   : > { %8690 = vst [vmem:[#allocation33_spill] sm:$0xff] %v3808_v57 }
  0x32   : > { %8691 = vst [vmem:[#allocation34_spill] sm:$0xff] %v3810_v58 }
  0x33   : > { %8692 = vst [vmem:[#allocation35_spill] sm:$0xff] %v3812_v59 }
  0x34   : > { %8693 = vst [vmem:[#allocation36_spill] sm:$0xff] %v3814_v60  ;;  %v194_v60 = vld [vmem:[%s3693_s17 + $0x5c] sm:$0x1] }
  0x35   : > { %8694 = vst [vmem:[#allocation37_spill] sm:$0xff] %v3818_v61 }
  0x36   : > { %8695 = vst [vmem:[#allocation38_spill] sm:$0xff] %v3822_v62  ;;  %v3946_v62 = vunpack.c.l.bf16 %v188_v41 }
  0x37   : > { %8696 = vst [vmem:[#allocation39_spill] sm:$0xff] %v3824_v63  ;;  %v191_v63 = vld [vmem:[%s3693_s17 + $0x50] sm:$0x1] }
  0x38   : > { %8697 = vst [vmem:[#allocation40_spill] sm:$0xff] %v3826_v0  ;;  %v3948_v61 = vunpack.c.l.bf16 %v191_v63  ;;  %v8736_v63 = vunpack.c.l.bf16 %v3704_v4 }
  0x39   : > { %8698 = vst [vmem:[#allocation41_spill] sm:$0xff] %v3828_v2 }
  0x3a   : > { %8699 = vst [vmem:[#allocation42_spill] sm:$0xff] %v3832_v3  ;;  %v3942_v3 = vunpack.c.l.bf16 %v182_v30 }
  0x3b   : > { %8700 = vst [vmem:[#allocation43_spill] sm:$0xff] %v3836_v5  ;;  %v218_v5 = vld [vmem:[%s3693_s17 + $0xbc] sm:$0x1] }
  0x3c   : > { %8701 = vst [vmem:[#allocation44_spill] sm:$0xff] %v3840_v6  ;;  %v3929_v6 = vmul.f32 %v3812_v59, %v3713_v10  ;;  %v3966_v41 = vunpack.c.l.bf16 %v218_v5  ;;  %v3983_v5 = vmul.f32 %v3716_v11, %v3734_v22  ;;  %v4003_v22 = vmul.f32 %v3716_v11, %v3741_v26 }
  0x3d   : > { %8702 = vst [vmem:[#allocation45_spill] sm:$0xff] %v3844_v8  ;;  %v215_v8 = vld [vmem:[%s3693_s17 + $0xb0] sm:$0x1]  ;;  %v4023_v26 = vmul.f32 %v3716_v11, %v3743_v27  ;;  %v4043_v27 = vmul.f32 %v3716_v11, %v3948_v61 }
  0x3e   : > { %8703 = vst [vmem:[#allocation46_spill] sm:$0xff] %v3848_v9  ;;  %v212_v9 = vld [vmem:[%s3693_s17 + $0xa4] sm:$0x1] }
  0x3f   : > { %8704 = vst [vmem:[#allocation47_spill] sm:$0xff] %v3853_v19  ;;  %v3910_v19 = vmul.f32 %v3804_v55, %v3713_v10  ;;  %v3962_v30 = vunpack.c.l.bf16 %v212_v9  ;;  %v3979_v9 = vmul.f32 %v3716_v11, %v3725_v16 }
  0x40   : > { %8705 = vst [vmem:[#allocation48_spill] sm:$0xff] %v3857_v20  ;;  %v206_v20 = vld [vmem:[%s3693_s17 + $0x8c] sm:$0x1] }
  0x41   : > { %8706 = vst [vmem:[#allocation49_spill] sm:$0xff] %v3861_v24  ;;  %v203_v24 = vld [vmem:[%s3693_s17 + $0x80] sm:$0x1]  ;;  %v4128_v12 = vmul.f32 %v3716_v11, %v3962_v30 }
  0x42   : > { %8707 = vst [vmem:[#allocation50_spill] sm:$0xff] %v3865_v29  ;;  %v200_v29 = vld [vmem:[%s3693_s17 + $0x74] sm:$0x1]  ;;  %v3956_v53 = vunpack.c.l.bf16 %v203_v24  ;;  %v343_v24 = vmul.f32 %v3716_v11, %v8736_v63  ;;  %v3999_v63 = vmul.f32 %v3716_v11, %v3739_v25 }
  0x43   : > { %8708 = vst [vmem:[#allocation51_spill] sm:$0xff] %v3872_v42  ;;  %v3891_v42 = vmul.f32 %v3782_v45, %v3713_v10 }
  0x44   : > { %8709 = vst [vmem:[#allocation52_spill] sm:$0xff] %v3876_v46  ;;  %v3895_v46 = vmul.f32 %v3713_v10, %v3789_v49 }
  0x45   : > { %8710 = vst [vmem:[#allocation53_spill] sm:$0xff] %v3880_v51  ;;  %v3899_v51 = vmul.f32 %v3713_v10, %v3794_v52 }
  0x46   : > { %8711 = vst [vmem:[#allocation54_spill] sm:$0xff] %v3884_v21  ;;  %v3903_v21 = vmul.f32 %v3791_v50, %v3713_v10 }
  0x47   : > { %8712 = vst [vmem:[#allocation55_spill] sm:$0xff] %v3891_v42  ;;  %v3914_v42 = vmul.f32 %v3713_v10, %v3808_v57 }
  0x48   : > { %8713 = vst [vmem:[#allocation56_spill] sm:$0xff] %v3895_v46  ;;  %v3918_v46 = vmul.f32 %v3713_v10, %v3810_v58 }
  0x49   : > { %8714 = vst [vmem:[#allocation57_spill] sm:$0xff] %v3899_v51  ;;  %v3922_v51 = vmul.f32 %v3806_v56, %v3713_v10 }
  0x4a   : > { %8715 = vst [vmem:[#allocation58_spill] sm:$0xff] %v3903_v21  ;;  %v209_v21 = vld [vmem:[%s3693_s17 + $0x98] sm:$0x1] }
  0x4b   : > { %8716 = vst [vmem:[#allocation59_spill] sm:$0xff] %v3910_v19  ;;  %v3933_v19 = vmul.f32 %v3713_v10, %v3826_v0 }
  0x4c   : > { %8717 = vst [vmem:[#allocation60_spill] sm:$0xff] %v3914_v42  ;;  %v3937_v42 = vmul.f32 %v3713_v10, %v3828_v2  ;;  %v3958_v10 = vunpack.c.l.bf16 %v206_v20  ;;  %v3991_v20 = vmul.f32 %v3727_v17, %v3716_v11  ;;  %v4011_v17 = vmul.f32 %v3729_v18, %v3716_v11 }
  0x4d   : > { %8718 = vst [vmem:[#allocation61_spill] sm:$0xff] %v3918_v46  ;;  %v3939_v46 = vunpack.c.l.bf16 %v179_v14  ;;  %v3960_v14 = vunpack.c.l.bf16 %v209_v21  ;;  %v344_v21 = vmul.f32 %v3716_v11, %v3723_v15  ;;  %v4031_v18 = vmul.f32 %v3716_v11, %v3946_v62 }
  0x4e   : > { %8719 = vst [vmem:[#allocation62_spill] sm:$0xff] %v3922_v51  ;;  %v3944_v51 = vunpack.c.l.bf16 %v185_v36  ;;  %v3964_v36 = vunpack.c.l.bf16 %v215_v8  ;;  %v3987_v8 = vmul.f32 %v3720_v13, %v3716_v11  ;;  %v4007_v13 = vmul.f32 %v3716_v11, %v3942_v3 }
  0x4f   : > { %8720 = vst [vmem:[#allocation63_spill] sm:$0xff] %v3929_v6  ;;  %v3950_v6 = vunpack.c.l.bf16 %v194_v60  ;;  %v341_v60 = vmul.f32 %v3708_v7, %v3716_v11  ;;  %v439_v15 = vrot.slane %v342_v1, 1  ;;  %v443_v4 = vrot.slane %v344_v21, 1 }
  0x50   : > { %8721 = vst [vmem:[#allocation64_spill] sm:$0xff] %v3933_v19  ;;  %v3954_v19 = vunpack.c.l.bf16 %v200_v29  ;;  %v3995_v29 = vmul.f32 %v3716_v11, %v3939_v46  ;;  %v4019_v25 = vmul.f32 %v3716_v11, %v3944_v51  ;;  %v4144_v1 = vmul.f32 %v3716_v11, %v3826_v0 }
  0x51   : > { %8722 = vst [vmem:[#allocation65_spill] sm:$0xff] %v3939_v46  ;;  %v4015_v46 = vmul.f32 %v3736_v23, %v3716_v11  ;;  %v4035_v23 = vmul.f32 %v3745_v28, %v3716_v11  ;;  %v4055_v28 = vmul.f32 %v3716_v11, %v3950_v6  ;;  %v438_v16 = vrot.slane %v341_v60, 1 }
  0x52   : > { %8723 = vst [vmem:[#allocation66_spill] sm:$0xff] %v3942_v3  ;;  %v4027_v3 = vmul.f32 %v3716_v11, %v3749_v31  ;;  %v4047_v31 = vmul.f32 %v3716_v11, %v3764_v37  ;;  %v4067_v37 = vmul.f32 %v3716_v11, %v3952_v54  ;;  %v4140_v60 = vmul.f32 %v3716_v11, %v3964_v36 }
  0x53   : > { %8724 = vst [vmem:[#allocation67_spill] sm:$0xff] %v3944_v51  ;;  %v4039_v51 = vmul.f32 %v3759_v34, %v3716_v11  ;;  %v4059_v34 = vmul.f32 %v3761_v35, %v3716_v11  ;;  %v4079_v35 = vmul.f32 %v3716_v11, %v3954_v19  ;;  %v4152_v21 = vmul.f32 %v3716_v11, %v3966_v41 }
  0x54   : > { %8725 = vst [vmem:[#allocation68_spill] sm:$0xff] %v3946_v62  ;;  %v4051_v62 = vmul.f32 %v3716_v11, %v3766_v38  ;;  %v4071_v38 = vmul.f32 %v3716_v11, %v3785_v47  ;;  %v4091_v47 = vmul.f32 %v3716_v11, %v3956_v53  ;;  %v451_v0 = vrot.slane %v3995_v29, 1 }
  0x55   : > { %8726 = vst [vmem:[#allocation69_spill] sm:$0xff] %v3948_v61  ;;  %v4063_v61 = vmul.f32 %v3768_v39, %v3716_v11  ;;  %v4083_v39 = vmul.f32 %v3770_v40, %v3716_v11  ;;  %v4103_v40 = vmul.f32 %v3716_v11, %v3958_v10  ;;  %v463_v29 = vrot.slane %v4023_v26, 1 }
  0x56   : > { %8727 = vst [vmem:[#allocation70_spill] sm:$0xff] %v3950_v6  ;;  %v4075_v6 = vmul.f32 %v3716_v11, %v3787_v48  ;;  %v4095_v48 = vmul.f32 %v3716_v11, %v3789_v49  ;;  %v4115_v49 = vmul.f32 %v3716_v11, %v3960_v14  ;;  %v478_v26 = vrot.slane %v4059_v34, 1 }
  0x57   : > { %8728 = vst [vmem:[#allocation71_spill] sm:$0xff] %v3952_v54  ;;  %v4087_v54 = vmul.f32 %v3782_v45, %v3716_v11  ;;  %v4107_v45 = vmul.f32 %v3791_v50, %v3716_v11  ;;  %v441_v50 = vrot.slane %v343_v24, 1  ;;  %v4148_v24 = vmul.f32 %v3716_v11, %v3828_v2 }
  0x58   : > { %8729 = vst [vmem:[#allocation72_spill] sm:$0xff] %v3954_v19  ;;  %v4099_v19 = vmul.f32 %v3716_v11, %v3794_v52  ;;  %v4119_v52 = vmul.f32 %v3716_v11, %v3808_v57  ;;  %v4136_v57 = vmul.f32 %v3812_v59, %v3716_v11  ;;  %v4156_v59 = vsel %vm437_vm0, %v438_v16, %v439_v15 }
  0x59   : > { %8730 = vst [vmem:[#allocation73_spill] sm:$0xff] %v3956_v53  ;;  %v4111_v53 = vmul.f32 %v3804_v55, %v3716_v11  ;;  %v444_v55 = vrot.slane %v3979_v9, 1  ;;  %v446_v9 = vrot.slane %v3983_v5, 1  ;;  %v456_v5 = vrot.slane %v4007_v13, 1 }
  0x5a   : > { %8731 = vst [vmem:[#allocation74_spill] sm:$0xff] %v3958_v10  ;;  %v4123_v10 = vmul.f32 %v3716_v11, %v3810_v58  ;;  %v458_v16 = vrot.slane %v4011_v17, 1  ;;  %v473_v13 = vrot.slane %v4047_v31, 1  ;;  %v474_v17 = vrot.slane %v4051_v62, 1 }
  0x5b   : > { %8732 = vst [vmem:[#allocation75_spill] sm:$0xff] %v3960_v14  ;;  %v4132_v14 = vmul.f32 %v3806_v56, %v3716_v11  ;;  %v449_v56 = vrot.slane %v3991_v20, 1  ;;  %v4165_v2 = vsel %vm437_vm0, %v443_v4, %v444_v55  ;;  %v453_v11 = vrot.slane %v3999_v63, 1 }
  0x5c   : > { %8733 = vst [vmem:[#allocation76_spill] sm:$0xff] %v3962_v30  ;;  %v4162_v30 = vsel %vm437_vm0, %v439_v15, %v441_v50  ;;  %v461_v20 = vrot.slane %v4019_v25, 1  ;;  %v464_v15 = vrot.slane %v4027_v3, 1  ;;  %v466_v50 = vrot.slane %v4031_v18, 1 }
  0x5d   : > { %8734 = vst [vmem:[#allocation77_spill] sm:$0xff] %v3964_v36  ;;  %v448_v36 = vrot.slane %v3987_v8, 1  ;;  %v459_v8 = vrot.slane %v4015_v46, 1  ;;  %v468_v4 = vrot.slane %v4035_v23, 1  ;;  %v469_v63 = vrot.slane %v4039_v51, 1 }
  0x5e   : > { %8735 = vst [vmem:[#allocation78_spill] sm:$0xff] %v3966_v41  ;;  %v454_v41 = vrot.slane %v4003_v22, 1  ;;  %v471_v22 = vrot.slane %v4043_v27, 1  ;;  %v447_v46 = vsel %vm437_vm0, %v444_v55, %v446_v9  ;;  %v476_v25 = vrot.slane %v4055_v28, 1 }
  0x5f   : > { %v479_v3 = vrot.slane %v4063_v61, 1  ;;  %v450_v18 = vsel %vm437_vm0, %v448_v36, %v449_v56  ;;  %v452_v23 = vsel %vm437_vm0, %v449_v56, %v451_v0  ;;  %v481_v27 = vrot.slane %v4067_v37, 1 }
  0x60   : > { %v455_v51 = vsel %vm437_vm0, %v453_v11, %v454_v41  ;;  %v457_v31 = vsel %vm437_vm0, %v454_v41, %v456_v5  ;;  %v460_v62 = vsel %vm437_vm0, %v458_v16, %v459_v8  ;;  %v462_v55 = vsel %vm437_vm0, %v459_v8, %v461_v20 }
  0x61   : > { %v465_v28 = vsel %vm437_vm0, %v463_v29, %v464_v15  ;;  %v467_v34 = vsel %vm437_vm0, %v464_v15, %v466_v50  ;;  %v470_v61 = vsel %vm437_vm0, %v468_v4, %v469_v63  ;;  %v472_v36 = vsel %vm437_vm0, %v469_v63, %v471_v22 }
  0x62   : > { %v475_v56 = vsel %vm437_vm0, %v473_v13, %v474_v17  ;;  %v477_v0 = vsel %vm437_vm0, %v474_v17, %v476_v25  ;;  %v480_v37 = vsel %vm437_vm0, %v478_v26, %v479_v3  ;;  %v483_v41 = vrot.slane %v4071_v38, 1 }
  0x63   : > { %v484_v9 = vrot.slane %v4075_v6, 1  ;;  %v482_v11 = vsel %vm437_vm0, %v479_v3, %v481_v27  ;;  %v486_v5 = vrot.slane %v4079_v35, 1  ;;  %v488_v16 = vrot.slane %v4083_v39, 1 }
  0x64   : > { %v489_v8 = vrot.slane %v4087_v54, 1  ;;  %v491_v20 = vrot.slane %v4091_v47, 1  ;;  %v493_v29 = vrot.slane %v4095_v48, 1  ;;  %v494_v15 = vrot.slane %v4099_v19, 1 }
  0x65   : > { %v496_v50 = vrot.slane %v4103_v40, 1  ;;  %v498_v38 = vrot.slane %v4107_v45, 1  ;;  %v499_v6 = vrot.slane %v4111_v53, 1  ;;  %v501_v4 = vrot.slane %v4115_v49, 1 }
  0x66   : > { %v503_v35 = vrot.slane %v4119_v52, 1  ;;  %v504_v39 = vrot.slane %v4123_v10, 1  ;;  %v506_v54 = vrot.slane %v4128_v12, 1  ;;  %v508_v47 = vrot.slane %v4132_v14, 1 }
  0x67   : > { %v509_v48 = vrot.slane %v4136_v57, 1  ;;  %v485_v19 = vsel %vm437_vm0, %v483_v41, %v484_v9  ;;  %v511_v40 = vrot.slane %v4140_v60, 1  ;;  %v513_v45 = vrot.slane %v4144_v1, 1  ;;  %v8737_v41 = vld [vmem:[#allocation29_spill] sm:$0xff] }
  0x68   : > { %v514_v53 = vrot.slane %v4148_v24, 1  ;;  %v487_v49 = vsel %vm437_vm0, %v484_v9, %v486_v5  ;;  %v490_v52 = vsel %vm437_vm0, %v488_v16, %v489_v8  ;;  %v492_v10 = vsel %vm437_vm0, %v489_v8, %v491_v20  ;;  %v8739_v5 = vld [vmem:[#allocation37_spill] sm:$0xff]  ;;  %v8743_v8 = vld [vmem:[#allocation42_spill] sm:$0xff] }
  0x69   : > { %v516_v12 = vrot.slane %v4152_v21, 1  ;;  %v495_v14 = vsel %vm437_vm0, %v493_v29, %v494_v15  ;;  %v497_v57 = vsel %vm437_vm0, %v494_v15, %v496_v50  ;;  %v500_v63 = vsel %vm437_vm0, %v498_v38, %v499_v6 }
  0x6a   : > { %v502_v60 = vsel %vm437_vm0, %v499_v6, %v501_v4  ;;  %v505_v1 = vsel %vm437_vm0, %v503_v35, %v504_v39  ;;  %v507_v24 = vsel %vm437_vm0, %v504_v39, %v506_v54  ;;  %v510_v22 = vsel %vm437_vm0, %v508_v47, %v509_v48 }
  0x6b   : > { %v4234_v13 = vadd.f32 %v4156_v59, %v3753_v32  ;;  %v512_v21 = vsel %vm437_vm0, %v509_v48, %v511_v40  ;;  %v515_v17 = vsel %vm437_vm0, %v513_v45, %v514_v53  ;;  %v4240_v25 = vadd.f32 %v4162_v30, %v3757_v33  ;;  %v8738_v59 = vld [vmem:[#allocation30_spill] sm:$0xff] }
  0x6c   : > { %v4244_v26 = vadd.f32 %v4165_v2, %v3776_v43  ;;  %v517_v3 = vsel %vm437_vm0, %v514_v53, %v516_v12  ;;  %v4248_v27 = vadd.f32 %v447_v46, %v3780_v44  ;;  %v4251_v32 = vadd.f32 %v450_v18, %v8737_v41  ;;  %v8741_v33 = vld [vmem:[#allocation38_spill] sm:$0xff]  ;;  %v8745_v2 = vld [vmem:[#allocation43_spill] sm:$0xff]  ;;  %v8747_v44 = vld [vmem:[#allocation44_spill] sm:$0xff] }
  0x6d   : > { %v4254_v9 = vadd.f32 %v452_v23, %v8738_v59  ;;  %v4257_v16 = vadd.f32 %v455_v51, %v8739_v5  ;;  %v4260_v30 = vadd.f32 %v457_v31, %v8741_v33  ;;  %v4263_v43 = vadd.f32 %v460_v62, %v8743_v8  ;;  %v8749_v18 = vld [vmem:[#allocation45_spill] sm:$0xff]  ;;  %v8751_v23 = vld [vmem:[#allocation46_spill] sm:$0xff]  ;;  %v8753_v51 = vld [vmem:[#allocation47_spill] sm:$0xff] }
  0x6e   : > { %v4266_v20 = vadd.f32 %v462_v55, %v8745_v2  ;;  %v4269_v46 = vadd.f32 %v465_v28, %v8747_v44  ;;  %v4272_v29 = vadd.f32 %v467_v34, %v8749_v18  ;;  %v4275_v15 = vadd.f32 %v470_v61, %v8751_v23  ;;  %v8755_v31 = vld [vmem:[#allocation48_spill] sm:$0xff]  ;;  %v8757_v62 = vld [vmem:[#allocation49_spill] sm:$0xff]  ;;  %v8759_v55 = vld [vmem:[#allocation50_spill] sm:$0xff] }
  0x6f   : > { %8740 = vst [vmem:[#allocation29_spill] sm:$0xff] %v4257_v16  ;;  %v4278_v50 = vadd.f32 %v472_v36, %v8753_v51  ;;  %v4281_v38 = vadd.f32 %v475_v56, %v8755_v31  ;;  %v4284_v6 = vadd.f32 %v477_v0, %v8757_v62  ;;  %v4287_v4 = vadd.f32 %v480_v37, %v8759_v55  ;;  %v8761_v28 = vld [vmem:[#allocation2_spill] sm:$0xff]  ;;  %v8762_v34 = vld [vmem:[#allocation51_spill] sm:$0xff]  ;;  %v8764_v61 = vld [vmem:[#allocation52_spill] sm:$0xff] }
  0x70   : > { %8742 = vst [vmem:[#allocation30_spill] sm:$0xff] %v4260_v30  ;;  %v4290_v35 = vperm.slane %v8761_v28, 2  ;;  %v4293_v39 = vadd.f32 %v482_v11, %v8762_v34  ;;  %v4296_v54 = vadd.f32 %v485_v19, %v8764_v61  ;;  %v8766_v36 = vld [vmem:[#allocation53_spill] sm:$0xff]  ;;  %v8768_v56 = vld [vmem:[#allocation54_spill] sm:$0xff]  ;;  %v8770_v0 = vld [vmem:[#allocation55_spill] sm:$0xff] }
  0x71   : > { %8744 = vst [vmem:[#allocation37_spill] sm:$0xff] %v4263_v43  ;;  %v4299_v47 = vadd.f32 %v487_v49, %v8766_v36  ;;  %v4302_v48 = vadd.f32 %v490_v52, %v8768_v56  ;;  %v4305_v40 = vadd.f32 %v492_v10, %v8770_v0  ;;  %v8772_v37 = vld [vmem:[#allocation56_spill] sm:$0xff]  ;;  %v8774_v53 = vld [vmem:[#allocation57_spill] sm:$0xff]  ;;  %v8776_v11 = vld [vmem:[#allocation58_spill] sm:$0xff] }
  0x72   : > { %8746 = vst [vmem:[#allocation38_spill] sm:$0xff] %v4266_v20  ;;  %v4308_v45 = vadd.f32 %v495_v14, %v8772_v37  ;;  %v4311_v12 = vadd.f32 %v497_v57, %v8774_v53  ;;  %v4314_v41 = vadd.f32 %v500_v63, %v8776_v11  ;;  %v8778_v19 = vld [vmem:[#allocation59_spill] sm:$0xff]  ;;  %v8780_v49 = vld [vmem:[#allocation60_spill] sm:$0xff]  ;;  %v8782_v52 = vld [vmem:[#allocation61_spill] sm:$0xff]  ;;  %v4335_v63 = vadd.f32 %v517_v3, %v3937_v42 }
  0x73   : > { %8748 = vst [vmem:[#allocation42_spill] sm:$0xff] %v4269_v46  ;;  %v4317_v59 = vadd.f32 %v502_v60, %v8778_v19  ;;  %v4320_v5 = vadd.f32 %v505_v1, %v8780_v49  ;;  %v4323_v33 = vadd.f32 %v507_v24, %v8782_v52  ;;  %v8784_v10 = vld [vmem:[#allocation62_spill] sm:$0xff]  ;;  %v8786_v14 = vld [vmem:[#allocation63_spill] sm:$0xff]  ;;  %v8788_v57 = vld [vmem:[#allocation64_spill] sm:$0xff]  ;;  %v583_v60 = vmul.f32 %v3708_v7, %v4290_v35 }
  0x74   : > { %8750 = vst [vmem:[#allocation43_spill] sm:$0xff] %v4272_v29  ;;  %v4326_v8 = vadd.f32 %v510_v22, %v8784_v10  ;;  %v4329_v2 = vadd.f32 %v512_v21, %v8786_v14  ;;  %v4332_v44 = vadd.f32 %v515_v17, %v8788_v57  ;;  %v8791_v1 = vld [vmem:[#allocation4_spill] sm:$0xff]  ;;  %v8792_v24 = vld [vmem:[#allocation3_spill] sm:$0xff]  ;;  %v8794_v51 = vld [vmem:[#allocation6_spill] sm:$0xff] }
  0x75   : > { %8752 = vst [vmem:[#allocation44_spill] sm:$0xff] %v4275_v15  ;;  %v584_v18 = vmul.f32 %v8791_v1, %v4290_v35  ;;  %v8793_v23 = vunpack.c.l.bf16 %v8792_v24  ;;  %v4346_v21 = vmul.f32 %v4290_v35, %v8794_v51  ;;  %v8795_v31 = vld [vmem:[#allocation7_spill] sm:$0xff]  ;;  %v8796_v42 = vld [vmem:[#allocation10_spill] sm:$0xff]  ;;  %v8797_v7 = vld [vmem:[#allocation5_spill] sm:$0xff] }
  0x76   : > { %8754 = vst [vmem:[#allocation45_spill] sm:$0xff] %v4278_v50  ;;  %v4350_v17 = vmul.f32 %v4290_v35, %v8795_v31  ;;  %v4354_v3 = vmul.f32 %v4290_v35, %v8796_v42  ;;  %v4358_v62 = vmul.f32 %v8797_v7, %v4290_v35  ;;  %v8798_v55 = vld [vmem:[#allocation8_spill] sm:$0xff]  ;;  %v8799_v61 = vld [vmem:[#allocation65_spill] sm:$0xff]  ;;  %v8802_v11 = vld [vmem:[#allocation66_spill] sm:$0xff] }
  0x77   : > { %8756 = vst [vmem:[#allocation46_spill] sm:$0xff] %v4281_v38  ;;  %v585_v22 = vmul.f32 %v4290_v35, %v8793_v23  ;;  %v4362_v34 = vmul.f32 %v8798_v55, %v4290_v35  ;;  %v4366_v36 = vmul.f32 %v4290_v35, %v8799_v61  ;;  %v8800_v56 = vld [vmem:[#allocation12_spill] sm:$0xff]  ;;  %v8801_v37 = vld [vmem:[#allocation13_spill] sm:$0xff]  ;;  %v4378_v19 = vmul.f32 %v4290_v35, %v8802_v11  ;;  %v8804_v10 = vld [vmem:[#allocation11_spill] sm:$0xff] }
  0x78   : > { %8758 = vst [vmem:[#allocation47_spill] sm:$0xff] %v4284_v6  ;;  %v4370_v0 = vmul.f32 %v4290_v35, %v8800_v56  ;;  %v4374_v53 = vmul.f32 %v4290_v35, %v8801_v37  ;;  %v8803_v49 = vld [vmem:[#allocation9_spill] sm:$0xff]  ;;  %v4386_v14 = vmul.f32 %v8804_v10, %v4290_v35  ;;  %v8805_v57 = vld [vmem:[#allocation67_spill] sm:$0xff]  ;;  %v8806_v24 = vld [vmem:[#allocation14_spill] sm:$0xff]  ;;  %v685_v20 = vrot.slane %v4346_v21, 2 }
  0x79   : > { %8760 = vst [vmem:[#allocation48_spill] sm:$0xff] %v4287_v4  ;;  %v4382_v52 = vmul.f32 %v8803_v49, %v4290_v35  ;;  %v4390_v1 = vmul.f32 %v4290_v35, %v8805_v57  ;;  %v4394_v23 = vmul.f32 %v4290_v35, %v8806_v24  ;;  %v8807_v61 = vld [vmem:[#allocation16_spill] sm:$0xff]  ;;  %v8809_v37 = vld [vmem:[#allocation15_spill] sm:$0xff]  ;;  %v8810_v56 = vld [vmem:[#allocation17_spill] sm:$0xff]  ;;  %v681_v4 = vrot.slane %v584_v18, 2 }
  0x7a   : > { %8763 = vst [vmem:[#allocation49_spill] sm:$0xff] %v4293_v39  ;;  %v4398_v11 = vmul.f32 %v4290_v35, %v8807_v61  ;;  %v8808_v42 = vld [vmem:[#allocation68_spill] sm:$0xff]  ;;  %v4406_v10 = vmul.f32 %v8809_v37, %v4290_v35  ;;  %v4410_v57 = vmul.f32 %v8810_v56, %v4290_v35  ;;  %v8811_v55 = vld [vmem:[#allocation69_spill] sm:$0xff]  ;;  %v8812_v7 = vld [vmem:[#allocation19_spill] sm:$0xff]  ;;  %v680_v39 = vrot.slane %v583_v60, 2 }
  0x7b   : > { %8765 = vst [vmem:[#allocation50_spill] sm:$0xff] %v4296_v54  ;;  %v4402_v49 = vmul.f32 %v4290_v35, %v8808_v42  ;;  %v4414_v24 = vmul.f32 %v4290_v35, %v8811_v55  ;;  %v4418_v61 = vmul.f32 %v4290_v35, %v8812_v7  ;;  %v8813_v31 = vld [vmem:[#allocation20_spill] sm:$0xff]  ;;  %v8814_v51 = vld [vmem:[#allocation70_spill] sm:$0xff]  ;;  %v8827_v28 = vld [vmem:[#allocation27_spill] sm:$0xff]  ;;  %v691_v30 = vrot.slane %v4362_v34, 2 }
  0x7c   : > { %8767 = vst [vmem:[#allocation51_spill] sm:$0xff] %v4299_v47  ;;  %v4422_v42 = vmul.f32 %v4290_v35, %v8813_v31  ;;  %v4426_v37 = vmul.f32 %v4290_v35, %v8814_v51  ;;  %v8828_v47 = vld [vmem:[#allocation31_spill] sm:$0xff]  ;;  %v8832_v50 = vld [vmem:[#allocation32_spill] sm:$0xff]  ;;  %v8836_v46 = vld [vmem:[#allocation41_spill] sm:$0xff]  ;;  %v4527_v43 = vsel %vm679_vm1, %v680_v39, %v681_v4  ;;  %v693_v16 = vrot.slane %v4366_v36, 2 }
  0x7d   : > { %8769 = vst [vmem:[#allocation52_spill] sm:$0xff] %v4302_v48  ;;  %v8826_v48 = vld [vmem:[#allocation74_spill] sm:$0xff]  ;;  %v8829_v54 = vld [vmem:[#allocation75_spill] sm:$0xff]  ;;  %v4502_v15 = vmul.f32 %v8832_v50, %v4290_v35  ;;  %v8835_v29 = vld [vmem:[#allocation40_spill] sm:$0xff]  ;;  %v696_v21 = vrot.slane %v4374_v53, 2  ;;  %v700_v39 = vrot.slane %v4382_v52, 2 }
  0x7e   : > { %8771 = vst [vmem:[#allocation53_spill] sm:$0xff] %v4305_v40  ;;  %v8825_v40 = vld [vmem:[#allocation28_spill] sm:$0xff]  ;;  %v8833_v60 = vld [vmem:[#allocation35_spill] sm:$0xff]  ;;  %v706_v34 = vrot.slane %v4398_v11, 2  ;;  %v711_v36 = vrot.slane %v4410_v57, 2  ;;  %v715_v53 = vrot.slane %v4418_v61, 2  ;;  %v694_v57 = vsel %vm679_vm1, %v691_v30, %v693_v16 }
  0x7f   : > { %8773 = vst [vmem:[#allocation54_spill] sm:$0xff] %v4308_v45  ;;  %v8824_v45 = vld [vmem:[#allocation26_spill] sm:$0xff]  ;;  %v4506_v18 = vmul.f32 %v8833_v60, %v4290_v35  ;;  %v686_v60 = vrot.slane %v4350_v17, 2  ;;  %v698_v17 = vrot.slane %v4378_v19, 2  ;;  %v716_v19 = vrot.slane %v4422_v42, 2 }
  0x80   : > { %8775 = vst [vmem:[#allocation55_spill] sm:$0xff] %v4311_v12  ;;  %v8823_v12 = vld [vmem:[#allocation73_spill] sm:$0xff] }
  0x81   : > { %8777 = vst [vmem:[#allocation56_spill] sm:$0xff] %v4314_v41  ;;  %v8822_v41 = vld [vmem:[#allocation23_spill] sm:$0xff]  ;;  %v687_v52 = vsel %vm679_vm1, %v685_v20, %v686_v60  ;;  %v699_v61 = vsel %vm679_vm1, %v696_v21, %v698_v17 }
  0x82   : > { %8779 = vst [vmem:[#allocation57_spill] sm:$0xff] %v4317_v59  ;;  %v8821_v59 = vld [vmem:[#allocation22_spill] sm:$0xff] }
  0x83   : > { %8781 = vst [vmem:[#allocation58_spill] sm:$0xff] %v4320_v5  ;;  %v8820_v5 = vld [vmem:[#allocation72_spill] sm:$0xff] }
  0x84   : > { %8783 = vst [vmem:[#allocation59_spill] sm:$0xff] %v4323_v33  ;;  %v8819_v33 = vld [vmem:[#allocation25_spill] sm:$0xff] }
  0x85   : > { %8785 = vst [vmem:[#allocation60_spill] sm:$0xff] %v4326_v8  ;;  %v8818_v8 = vld [vmem:[#allocation24_spill] sm:$0xff]  ;;  %v4446_v51 = vmul.f32 %v4290_v35, %v8819_v33  ;;  %v4466_v33 = vmul.f32 %v4290_v35, %v8824_v45  ;;  %v4486_v45 = vmul.f32 %v4290_v35, %v8829_v54  ;;  %v8834_v54 = vld [vmem:[#allocation77_spill] sm:$0xff] }
  0x86   : > { %8787 = vst [vmem:[#allocation61_spill] sm:$0xff] %v4329_v2  ;;  %v8817_v2 = vld [vmem:[#allocation71_spill] sm:$0xff]  ;;  %v4442_v31 = vmul.f32 %v4290_v35, %v8818_v8  ;;  %v4462_v8 = vmul.f32 %v4290_v35, %v8823_v12  ;;  %v4482_v12 = vmul.f32 %v8828_v47, %v4290_v35  ;;  %v683_v47 = vrot.slane %v585_v22, 2  ;;  %v8837_v22 = vld [vmem:[#allocation78_spill] sm:$0xff] }
  0x87   : > { %8789 = vst [vmem:[#allocation62_spill] sm:$0xff] %v4332_v44  ;;  %v8816_v44 = vld [vmem:[#allocation21_spill] sm:$0xff]  ;;  %v4438_v7 = vmul.f32 %v4290_v35, %v8817_v2  ;;  %v4458_v2 = vmul.f32 %v8822_v41, %v4290_v35  ;;  %v4478_v41 = vmul.f32 %v8827_v28, %v4290_v35  ;;  %v8831_v28 = vld [vmem:[#allocation76_spill] sm:$0xff]  ;;  %v4522_v50 = vmul.f32 %v4290_v35, %v8837_v22 }
  0x88   : > { %8790 = vst [vmem:[#allocation63_spill] sm:$0xff] %v4335_v63  ;;  %v8815_v63 = vld [vmem:[#allocation18_spill] sm:$0xff]  ;;  %v4434_v55 = vmul.f32 %v8816_v44, %v4290_v35  ;;  %v4454_v44 = vmul.f32 %v8821_v59, %v4290_v35  ;;  %v4474_v59 = vmul.f32 %v4290_v35, %v8826_v48  ;;  %v4494_v48 = vmul.f32 %v4290_v35, %v3810_v58 }
  0x89   : > { %v4430_v56 = vmul.f32 %v8815_v63, %v4290_v35  ;;  %v4450_v63 = vmul.f32 %v4290_v35, %v8820_v5  ;;  %v4470_v5 = vmul.f32 %v4290_v35, %v8825_v40  ;;  %v8830_v40 = vld [vmem:[#allocation33_spill] sm:$0xff]  ;;  %v4498_v38 = vmul.f32 %v4290_v35, %v8831_v28 }
  0x8a   : > { %v4490_v6 = vmul.f32 %v4290_v35, %v8830_v40  ;;  %v4510_v40 = vmul.f32 %v4290_v35, %v8834_v54  ;;  %v4514_v58 = vmul.f32 %v4290_v35, %v8835_v29  ;;  %v4518_v28 = vmul.f32 %v4290_v35, %v8836_v46 }
  0x8b   : > { %v688_v54 = vrot.slane %v4354_v3, 2  ;;  %v690_v29 = vrot.slane %v4358_v62, 2  ;;  %v4533_v46 = vsel %vm679_vm1, %v681_v4, %v683_v47  ;;  %v695_v35 = vrot.slane %v4370_v0, 2 }
  0x8c   : > { %v701_v22 = vrot.slane %v4386_v14, 2  ;;  %v703_v3 = vrot.slane %v4390_v1, 2  ;;  %v705_v62 = vrot.slane %v4394_v23, 2  ;;  %v708_v4 = vrot.slane %v4402_v49, 2 }
  0x8d   : > { %v710_v47 = vrot.slane %v4406_v10, 2  ;;  %v713_v0 = vrot.slane %v4414_v24, 2  ;;  %v718_v14 = vrot.slane %v4426_v37, 2  ;;  %v720_v1 = vrot.slane %v4430_v56, 2 }
  0x8e   : > { %v721_v11 = vrot.slane %v4434_v55, 2  ;;  %v689_v49 = vsel %vm679_vm1, %v686_v60, %v688_v54  ;;  %v692_v10 = vsel %vm679_vm1, %v690_v29, %v691_v30  ;;  %v697_v24 = vsel %vm679_vm1, %v695_v35, %v696_v21 }
  0x8f   : > { %v702_v42 = vsel %vm679_vm1, %v700_v39, %v701_v22  ;;  %v704_v20 = vsel %vm679_vm1, %v701_v22, %v703_v3  ;;  %v707_v37 = vsel %vm679_vm1, %v705_v62, %v706_v34  ;;  %v709_v56 = vsel %vm679_vm1, %v706_v34, %v708_v4 }
  0x90   : > { %v712_v55 = vsel %vm679_vm1, %v710_v47, %v711_v36  ;;  %v714_v54 = vsel %vm679_vm1, %v711_v36, %v713_v0  ;;  %v717_v29 = vsel %vm679_vm1, %v715_v53, %v716_v19  ;;  %v719_v16 = vsel %vm679_vm1, %v716_v19, %v718_v14 }
  0x91   : > { %v722_v30 = vsel %vm679_vm1, %v720_v1, %v721_v11  ;;  %v723_v23 = vrot.slane %v4438_v7, 2  ;;  %v725_v60 = vrot.slane %v4442_v31, 2  ;;  %v726_v22 = vrot.slane %v4446_v51, 2 }
  0x92   : > { %v728_v35 = vrot.slane %v4450_v63, 2  ;;  %v730_v21 = vrot.slane %v4454_v44, 2  ;;  %v731_v17 = vrot.slane %v4458_v2, 2  ;;  %v733_v39 = vrot.slane %v4462_v8, 2 }
  0x93   : > { %v735_v3 = vrot.slane %v4466_v33, 2  ;;  %v736_v62 = vrot.slane %v4470_v5, 2  ;;  %v738_v34 = vrot.slane %v4474_v59, 2  ;;  %v740_v7 = vrot.slane %v4478_v41, 2 }
  0x94   : > { %v741_v31 = vrot.slane %v4482_v12, 2  ;;  %v743_v51 = vrot.slane %v4486_v45, 2  ;;  %v745_v63 = vrot.slane %v4490_v6, 2  ;;  %v746_v44 = vrot.slane %v4494_v48, 2 }
  0x95   : > { %v748_v2 = vrot.slane %v4498_v38, 2  ;;  %v750_v8 = vrot.slane %v4502_v15, 2  ;;  %v751_v33 = vrot.slane %v4506_v18, 2  ;;  %v724_v5 = vsel %vm679_vm1, %v721_v11, %v723_v23 }
  0x96   : > { %v753_v59 = vrot.slane %v4510_v40, 2  ;;  %v755_v41 = vrot.slane %v4514_v58, 2  ;;  %v756_v12 = vrot.slane %v4518_v28, 2  ;;  %v727_v45 = vsel %vm679_vm1, %v725_v60, %v726_v22 }
  0x97   : > { %v729_v6 = vsel %vm679_vm1, %v726_v22, %v728_v35  ;;  %v732_v48 = vsel %vm679_vm1, %v730_v21, %v731_v17  ;;  %v758_v38 = vrot.slane %v4522_v50, 2  ;;  %v734_v15 = vsel %vm679_vm1, %v731_v17, %v733_v39  ;;  %v8840_v22 = vld [vmem:[#allocation37_spill] sm:$0xff] }
  0x98   : > { %v737_v18 = vsel %vm679_vm1, %v735_v3, %v736_v62  ;;  %v739_v4 = vsel %vm679_vm1, %v736_v62, %v738_v34  ;;  %v742_v40 = vsel %vm679_vm1, %v740_v7, %v741_v31  ;;  %v744_v58 = vsel %vm679_vm1, %v741_v31, %v743_v51  ;;  %v221_v51 = vld [vmem:[%s3693_s17 + $0xc8] sm:$0x1] }
  0x99   : > { %v747_v28 = vsel %vm679_vm1, %v745_v63, %v746_v44  ;;  %v749_v47 = vsel %vm679_vm1, %v746_v44, %v748_v2  ;;  %v752_v36 = vsel %vm679_vm1, %v750_v8, %v751_v33  ;;  %v754_v0 = vsel %vm679_vm1, %v751_v33, %v753_v59  ;;  %v8858_v8 = vld [vmem:[#allocation55_spill] sm:$0xff] }
  0x9a   : > { %v757_v50 = vsel %vm679_vm1, %v755_v41, %v756_v12  ;;  %v4606_v53 = vadd.f32 %v4527_v43, %v4234_v13  ;;  %v4610_v19 = vadd.f32 %v4533_v46, %v4240_v25  ;;  %v759_v14 = vsel %vm679_vm1, %v756_v12, %v758_v38  ;;  %v8838_v13 = vld [vmem:[#allocation29_spill] sm:$0xff]  ;;  %v8839_v25 = vld [vmem:[#allocation30_spill] sm:$0xff] }
  0x9b   : > { %v4614_v1 = vadd.f32 %v687_v52, %v4244_v26  ;;  %v4617_v11 = vadd.f32 %v689_v49, %v4248_v27  ;;  %v4620_v23 = vadd.f32 %v692_v10, %v4251_v32  ;;  %v4623_v60 = vadd.f32 %v694_v57, %v4254_v9  ;;  %v8841_v26 = vld [vmem:[#allocation38_spill] sm:$0xff]  ;;  %v8843_v32 = vld [vmem:[#allocation43_spill] sm:$0xff]  ;;  %v8844_v9 = vld [vmem:[#allocation44_spill] sm:$0xff] }
  0x9c   : > { %v4626_v43 = vadd.f32 %v697_v24, %v8838_v13  ;;  %v4629_v46 = vadd.f32 %v699_v61, %v8839_v25  ;;  %v4632_v35 = vadd.f32 %v702_v42, %v8840_v22  ;;  %v4635_v52 = vadd.f32 %v704_v20, %v8841_v26  ;;  %v8842_v27 = vld [vmem:[#allocation42_spill] sm:$0xff]  ;;  %v8845_v24 = vld [vmem:[#allocation45_spill] sm:$0xff]  ;;  %v8847_v42 = vld [vmem:[#allocation47_spill] sm:$0xff] }
  0x9d   : > { %v4638_v49 = vadd.f32 %v707_v37, %v8842_v27  ;;  %v4641_v10 = vadd.f32 %v709_v56, %v8843_v32  ;;  %v4644_v57 = vadd.f32 %v712_v55, %v8844_v9  ;;  %v4647_v21 = vadd.f32 %v714_v54, %v8845_v24  ;;  %v8846_v61 = vld [vmem:[#allocation46_spill] sm:$0xff]  ;;  %v8848_v20 = vld [vmem:[#allocation48_spill] sm:$0xff]  ;;  %v8849_v37 = vld [vmem:[#allocation49_spill] sm:$0xff] }
  0x9e   : > { %v4650_v17 = vadd.f32 %v717_v29, %v8846_v61  ;;  %v4653_v39 = vadd.f32 %v719_v16, %v8847_v42  ;;  %v4656_v3 = vadd.f32 %v722_v30, %v8848_v20  ;;  %v4659_v62 = vadd.f32 %v724_v5, %v8849_v37  ;;  %v8850_v56 = vld [vmem:[#allocation50_spill] sm:$0xff]  ;;  %v8851_v55 = vld [vmem:[#allocation51_spill] sm:$0xff]  ;;  %v8853_v29 = vld [vmem:[#allocation52_spill] sm:$0xff] }
  0x9f   : > { %v4662_v34 = vadd.f32 %v727_v45, %v8850_v56  ;;  %v4665_v7 = vadd.f32 %v729_v6, %v8851_v55  ;;  %v8852_v54 = vld [vmem:[#allocation2_spill] sm:$0xff]  ;;  %v4670_v63 = vadd.f32 %v732_v48, %v8853_v29  ;;  %v8854_v16 = vld [vmem:[#allocation53_spill] sm:$0xff]  ;;  %v4679_v33 = vadd.f32 %v739_v4, %v8858_v8  ;;  %v8860_v5 = vld [vmem:[#allocation56_spill] sm:$0xff] }
  0xa0   : > { %v826_v31 = vperm.slane %v8852_v54, 3  ;;  %v4673_v44 = vadd.f32 %v734_v15, %v8854_v16  ;;  %v8856_v30 = vld [vmem:[#allocation54_spill] sm:$0xff]  ;;  %v4682_v59 = vadd.f32 %v742_v40, %v8860_v5  ;;  %v8862_v41 = vld [vmem:[#allocation57_spill] sm:$0xff]  ;;  %v8866_v48 = vld [vmem:[#allocation59_spill] sm:$0xff]  ;;  %v4707_v9 = vunpack.c.l.bf16 %v221_v51 }
  0xa1   : > { %v4676_v2 = vadd.f32 %v737_v18, %v8856_v30  ;;  %8859 = vst [vmem:[#allocation3_spill] sm:$0xff] %v4679_v33  ;;  %v4685_v12 = vadd.f32 %v744_v58, %v8862_v41  ;;  %v8864_v45 = vld [vmem:[#allocation58_spill] sm:$0xff]  ;;  %v4691_v38 = vadd.f32 %v749_v47, %v8866_v48  ;;  %v8868_v15 = vld [vmem:[#allocation60_spill] sm:$0xff]  ;;  %v8870_v18 = vld [vmem:[#allocation61_spill] sm:$0xff]  ;;  %v4710_v47 = vperm.slane %v8852_v54, 4 }
  0xa2   : > { %8855 = vst [vmem:[#allocation64_spill] sm:$0xff] %v4673_v44  ;;  %v4688_v6 = vadd.f32 %v747_v28, %v8864_v45  ;;  %v4694_v13 = vadd.f32 %v752_v36, %v8868_v15  ;;  %v4697_v25 = vadd.f32 %v754_v0, %v8870_v18  ;;  %v8872_v4 = vld [vmem:[#allocation62_spill] sm:$0xff]  ;;  %v8874_v40 = vld [vmem:[#allocation63_spill] sm:$0xff]  ;;  %v8880_v36 = vld [vmem:[#allocation5_spill] sm:$0xff] }
  0xa3   : > { %8857 = vst [vmem:[#allocation4_spill] sm:$0xff] %v4676_v2  ;;  %v4700_v22 = vadd.f32 %v757_v50, %v8872_v4  ;;  %v4703_v26 = vadd.f32 %v759_v14, %v8874_v40  ;;  %v8876_v58 = vld [vmem:[#allocation6_spill] sm:$0xff]  ;;  %v8877_v32 = vld [vmem:[#allocation7_spill] sm:$0xff]  ;;  %v829_v24 = vmul.f32 %v8880_v36, %v826_v31  ;;  %v8881_v61 = vld [vmem:[#allocation8_spill] sm:$0xff] }
  0xa4   : > { %8861 = vst [vmem:[#allocation29_spill] sm:$0xff] %v4682_v59  ;;  %v827_v27 = vmul.f32 %v826_v31, %v8876_v58  ;;  %v828_v28 = vmul.f32 %v826_v31, %v8877_v32  ;;  %v830_v0 = vmul.f32 %v8881_v61, %v826_v31  ;;  %v8882_v42 = vld [vmem:[#allocation12_spill] sm:$0xff]  ;;  %v8883_v50 = vld [vmem:[#allocation13_spill] sm:$0xff]  ;;  %v8885_v55 = vld [vmem:[#allocation11_spill] sm:$0xff] }
  0xa5   : > { %8863 = vst [vmem:[#allocation30_spill] sm:$0xff] %v4685_v12  ;;  %v831_v20 = vmul.f32 %v826_v31, %v8882_v42  ;;  %v832_v37 = vmul.f32 %v826_v31, %v8883_v50  ;;  %v8884_v56 = vld [vmem:[#allocation9_spill] sm:$0xff]  ;;  %v834_v29 = vmul.f32 %v8885_v55, %v826_v31  ;;  %v8886_v16 = vld [vmem:[#allocation14_spill] sm:$0xff]  ;;  %v8887_v8 = vld [vmem:[#allocation16_spill] sm:$0xff] }
  0xa6   : > { %8865 = vst [vmem:[#allocation37_spill] sm:$0xff] %v4688_v6  ;;  %v833_v14 = vmul.f32 %v8884_v56, %v826_v31  ;;  %v835_v30 = vmul.f32 %v826_v31, %v8886_v16  ;;  %v836_v51 = vmul.f32 %v826_v31, %v8887_v8  ;;  %v8888_v5 = vld [vmem:[#allocation15_spill] sm:$0xff]  ;;  %v8889_v54 = vld [vmem:[#allocation17_spill] sm:$0xff]  ;;  %v8891_v18 = vld [vmem:[#allocation20_spill] sm:$0xff] }
  0xa7   : > { %8867 = vst [vmem:[#allocation38_spill] sm:$0xff] %v4691_v38  ;;  %v837_v41 = vmul.f32 %v8888_v5, %v826_v31  ;;  %v838_v45 = vmul.f32 %v8889_v54, %v826_v31  ;;  %v8890_v48 = vld [vmem:[#allocation19_spill] sm:$0xff]  ;;  %v840_v4 = vmul.f32 %v826_v31, %v8891_v18  ;;  %v8892_v40 = vld [vmem:[#allocation18_spill] sm:$0xff]  ;;  %v8893_v42 = vld [vmem:[#allocation21_spill] sm:$0xff] }
  0xa8   : > { %8869 = vst [vmem:[#allocation42_spill] sm:$0xff] %v4694_v13  ;;  %v839_v15 = vmul.f32 %v826_v31, %v8890_v48  ;;  %v842_v50 = vmul.f32 %v8893_v42, %v826_v31  ;;  %v8894_v61 = vld [vmem:[#allocation24_spill] sm:$0xff]  ;;  %v8895_v36 = vld [vmem:[#allocation25_spill] sm:$0xff]  ;;  %v8896_v32 = vld [vmem:[#allocation22_spill] sm:$0xff] }
  0xa9   : > { %8871 = vst [vmem:[#allocation43_spill] sm:$0xff] %v4697_v25  ;;  %v843_v56 = vmul.f32 %v826_v31, %v8894_v61  ;;  %v844_v55 = vmul.f32 %v826_v31, %v8895_v36  ;;  %v845_v16 = vmul.f32 %v8896_v32, %v826_v31  ;;  %v8898_v58 = vld [vmem:[#allocation26_spill] sm:$0xff]  ;;  %v8901_v25 = vld [vmem:[#allocation31_spill] sm:$0xff]  ;;  %v8902_v13 = vld [vmem:[#allocation33_spill] sm:$0xff] }
  0xaa   : > { %8873 = vst [vmem:[#allocation44_spill] sm:$0xff] %v4700_v22  ;;  %v847_v5 = vmul.f32 %v826_v31, %v8898_v58  ;;  %v8900_v22 = vld [vmem:[#allocation27_spill] sm:$0xff]  ;;  %v850_v18 = vmul.f32 %v8901_v25, %v826_v31  ;;  %v8903_v38 = vld [vmem:[#allocation34_spill] sm:$0xff]  ;;  %v8904_v6 = vld [vmem:[#allocation32_spill] sm:$0xff]  ;;  %v4746_v25 = vadd.f32 %v828_v28, %v4610_v19  ;;  %v4767_v19 = vadd.f32 %v835_v30, %v4632_v35 }
  0xab   : > { %8875 = vst [vmem:[#allocation45_spill] sm:$0xff] %v4703_v26  ;;  %v8899_v26 = vld [vmem:[#allocation28_spill] sm:$0xff]  ;;  %v849_v48 = vmul.f32 %v8900_v22, %v826_v31  ;;  %v852_v42 = vmul.f32 %v826_v31, %v8903_v38  ;;  %v853_v61 = vmul.f32 %v8904_v6, %v826_v31  ;;  %v8905_v12 = vld [vmem:[#allocation35_spill] sm:$0xff]  ;;  %v8907_v33 = vld [vmem:[#allocation41_spill] sm:$0xff]  ;;  %v4743_v22 = vadd.f32 %v827_v27, %v4606_v53 }
  0xac   : > { %8878 = vst [vmem:[#allocation46_spill] sm:$0xff] %v4707_v9  ;;  %v841_v9 = vmul.f32 %v8892_v40, %v826_v31  ;;  %v848_v54 = vmul.f32 %v826_v31, %v8899_v26  ;;  %v851_v40 = vmul.f32 %v826_v31, %v8902_v13  ;;  %v854_v36 = vmul.f32 %v8905_v12, %v826_v31  ;;  %v8906_v59 = vld [vmem:[#allocation40_spill] sm:$0xff]  ;;  %v8909_v44 = vld [vmem:[#allocation39_spill] sm:$0xff] }
  0xad   : > { %8879 = vst [vmem:[#allocation47_spill] sm:$0xff] %v4710_v47  ;;  %v8897_v47 = vld [vmem:[#allocation23_spill] sm:$0xff]  ;;  %v855_v32 = vmul.f32 %v826_v31, %v8906_v59  ;;  %v8908_v2 = vld [vmem:[#allocation36_spill] sm:$0xff]  ;;  %v858_v26 = vmul.f32 %v8909_v44, %v826_v31  ;;  %v4749_v38 = vadd.f32 %v829_v24, %v4614_v1  ;;  %v4752_v6 = vadd.f32 %v830_v0, %v4617_v11 }
  0xae   : > { %v846_v8 = vmul.f32 %v8897_v47, %v826_v31  ;;  %v856_v47 = vmul.f32 %v826_v31, %v8907_v33  ;;  %v857_v58 = vmul.f32 %v8908_v2, %v826_v31  ;;  %v4755_v59 = vadd.f32 %v831_v20, %v4620_v23  ;;  %8912 = vst [vmem:[#allocation50_spill] sm:$0xff] %v4767_v19 }
  0xaf   : > { %v4758_v33 = vadd.f32 %v832_v37, %v4623_v60  ;;  %v4761_v31 = vadd.f32 %v833_v14, %v4626_v43  ;;  %v4764_v53 = vadd.f32 %v834_v29, %v4629_v46  ;;  %v4770_v1 = vadd.f32 %v836_v51, %v4635_v52  ;;  %v8939_v37 = vld [vmem:[#allocation42_spill] sm:$0xff] }
  0xb0   : > { %v4773_v11 = vadd.f32 %v837_v41, %v4638_v49  ;;  %v4776_v23 = vadd.f32 %v838_v45, %v4641_v10  ;;  %v4779_v60 = vadd.f32 %v839_v15, %v4644_v57  ;;  %v4782_v43 = vadd.f32 %v840_v4, %v4647_v21  ;;  %v8941_v14 = vld [vmem:[#allocation43_spill] sm:$0xff]  ;;  %v8954_v15 = vld [vmem:[#allocation12_spill] sm:$0xff]  ;;  %v8955_v4 = vld [vmem:[#allocation13_spill] sm:$0xff] }
  0xb1   : > { %8910 = vst [vmem:[#allocation48_spill] sm:$0xff] %v4761_v31  ;;  %v4785_v46 = vadd.f32 %v841_v9, %v4650_v17  ;;  %v4788_v35 = vadd.f32 %v842_v50, %v4653_v39  ;;  %v4791_v52 = vadd.f32 %v843_v56, %v4656_v3  ;;  %v4794_v49 = vadd.f32 %v844_v55, %v4659_v62  ;;  %v8925_v17 = vld [vmem:[#allocation64_spill] sm:$0xff]  ;;  %v8929_v3 = vld [vmem:[#allocation3_spill] sm:$0xff]  ;;  %v8931_v62 = vld [vmem:[#allocation29_spill] sm:$0xff] }
  0xb2   : > { %8911 = vst [vmem:[#allocation49_spill] sm:$0xff] %v4764_v53  ;;  %v4797_v10 = vadd.f32 %v845_v16, %v4662_v34  ;;  %v4800_v57 = vadd.f32 %v846_v8, %v4665_v7  ;;  %v4803_v21 = vadd.f32 %v847_v5, %v4670_v63  ;;  %v4806_v27 = vadd.f32 %v848_v54, %v8925_v17  ;;  %v8927_v39 = vld [vmem:[#allocation4_spill] sm:$0xff]  ;;  %v8933_v34 = vld [vmem:[#allocation30_spill] sm:$0xff]  ;;  %v8935_v7 = vld [vmem:[#allocation37_spill] sm:$0xff] }
  0xb3   : > { %8913 = vst [vmem:[#allocation51_spill] sm:$0xff] %v4770_v1  ;;  %v4809_v28 = vadd.f32 %v849_v48, %v8927_v39  ;;  %v4812_v9 = vadd.f32 %v850_v18, %v8929_v3  ;;  %v4815_v24 = vadd.f32 %v851_v40, %v8931_v62  ;;  %v4818_v0 = vadd.f32 %v852_v42, %v8933_v34  ;;  %v8937_v63 = vld [vmem:[#allocation38_spill] sm:$0xff]  ;;  %v8943_v29 = vld [vmem:[#allocation44_spill] sm:$0xff]  ;;  %v8945_v30 = vld [vmem:[#allocation45_spill] sm:$0xff] }
  0xb4   : > { %8914 = vst [vmem:[#allocation2_spill] sm:$0xff] %v4773_v11  ;;  %v4821_v20 = vadd.f32 %v853_v61, %v8935_v7  ;;  %v4824_v50 = vadd.f32 %v854_v36, %v8937_v63  ;;  %v4827_v56 = vadd.f32 %v855_v32, %v8939_v37  ;;  %v4830_v55 = vadd.f32 %v856_v47, %v8941_v14  ;;  %v8947_v42 = vld [vmem:[#allocation6_spill] sm:$0xff]  ;;  %v8948_v51 = vld [vmem:[#allocation47_spill] sm:$0xff]  ;;  %v8951_v32 = vld [vmem:[#allocation5_spill] sm:$0xff] }
  0xb5   : > { %8915 = vst [vmem:[#allocation52_spill] sm:$0xff] %v4776_v23  ;;  %v4833_v16 = vadd.f32 %v857_v58, %v8943_v29  ;;  %v4836_v8 = vadd.f32 %v858_v26, %v8945_v30  ;;  %v893_v5 = vmul.f32 %v8948_v51, %v8947_v42  ;;  %v8949_v61 = vld [vmem:[#allocation7_spill] sm:$0xff]  ;;  %v8950_v36 = vld [vmem:[#allocation10_spill] sm:$0xff]  ;;  %v4846_v45 = vmul.f32 %v8951_v32, %v8948_v51  ;;  %v8952_v47 = vld [vmem:[#allocation8_spill] sm:$0xff] }
  0xb6   : > { %8916 = vst [vmem:[#allocation53_spill] sm:$0xff] %v4779_v60  ;;  %v894_v41 = vmul.f32 %v8948_v51, %v8949_v61  ;;  %v895_v54 = vmul.f32 %v8948_v51, %v8950_v36  ;;  %v4850_v58 = vmul.f32 %v8952_v47, %v8948_v51  ;;  %v8953_v48 = vld [vmem:[#allocation65_spill] sm:$0xff]  ;;  %v4858_v18 = vmul.f32 %v8948_v51, %v8954_v15  ;;  %v8956_v17 = vld [vmem:[#allocation66_spill] sm:$0xff]  ;;  %v8958_v34 = vld [vmem:[#allocation11_spill] sm:$0xff] }
  0xb7   : > { %8917 = vst [vmem:[#allocation54_spill] sm:$0xff] %v4782_v43  ;;  %v4854_v26 = vmul.f32 %v8948_v51, %v8953_v48  ;;  %v4862_v40 = vmul.f32 %v8948_v51, %v8955_v4  ;;  %v4866_v39 = vmul.f32 %v8948_v51, %v8956_v17  ;;  %v8957_v3 = vld [vmem:[#allocation9_spill] sm:$0xff]  ;;  %v4874_v7 = vmul.f32 %v8958_v34, %v8948_v51  ;;  %v8959_v63 = vld [vmem:[#allocation67_spill] sm:$0xff]  ;;  %v8960_v14 = vld [vmem:[#allocation14_spill] sm:$0xff] }
  0xb8   : > { %8918 = vst [vmem:[#allocation55_spill] sm:$0xff] %v4785_v46  ;;  %v4870_v62 = vmul.f32 %v8957_v3, %v8948_v51  ;;  %v4878_v37 = vmul.f32 %v8948_v51, %v8959_v63  ;;  %v4882_v29 = vmul.f32 %v8948_v51, %v8960_v14  ;;  %v8961_v30 = vld [vmem:[#allocation16_spill] sm:$0xff]  ;;  %v8963_v15 = vld [vmem:[#allocation15_spill] sm:$0xff]  ;;  %v8964_v48 = vld [vmem:[#allocation17_spill] sm:$0xff]  ;;  %v990_v46 = vrot.slane %v894_v41, 1 }
  0xb9   : > { %8919 = vst [vmem:[#allocation56_spill] sm:$0xff] %v4788_v35  ;;  %v4886_v17 = vmul.f32 %v8948_v51, %v8961_v30  ;;  %v8962_v4 = vld [vmem:[#allocation68_spill] sm:$0xff]  ;;  %v4894_v34 = vmul.f32 %v8963_v15, %v8948_v51  ;;  %v4898_v63 = vmul.f32 %v8964_v48, %v8948_v51  ;;  %v8965_v47 = vld [vmem:[#allocation69_spill] sm:$0xff]  ;;  %v8966_v32 = vld [vmem:[#allocation19_spill] sm:$0xff]  ;;  %v989_v35 = vrot.slane %v893_v5, 1 }
  0xba   : > { %8920 = vst [vmem:[#allocation57_spill] sm:$0xff] %v4791_v52  ;;  %v4890_v3 = vmul.f32 %v8948_v51, %v8962_v4  ;;  %v4902_v14 = vmul.f32 %v8948_v51, %v8965_v47  ;;  %v4906_v30 = vmul.f32 %v8948_v51, %v8966_v32  ;;  %v8967_v36 = vld [vmem:[#allocation20_spill] sm:$0xff]  ;;  %v8968_v61 = vld [vmem:[#allocation70_spill] sm:$0xff]  ;;  %v994_v1 = vrot.slane %v4846_v45, 1 }
  0xbb   : > { %8921 = vst [vmem:[#allocation58_spill] sm:$0xff] %v4794_v49  ;;  %v4910_v4 = vmul.f32 %v8948_v51, %v8967_v36  ;;  %v4914_v15 = vmul.f32 %v8948_v51, %v8968_v61  ;;  %v8969_v42 = vld [vmem:[#allocation18_spill] sm:$0xff]  ;;  %v8985_v52 = vld [vmem:[#allocation76_spill] sm:$0xff]  ;;  %v997_v19 = vrot.slane %v4854_v26, 1  ;;  %v999_v53 = vrot.slane %v4858_v18, 1 }
  0xbc   : > { %8922 = vst [vmem:[#allocation59_spill] sm:$0xff] %v4797_v10  ;;  %v4918_v48 = vmul.f32 %v8969_v42, %v8948_v51  ;;  %v8983_v10 = vld [vmem:[#allocation75_spill] sm:$0xff]  ;;  %v8984_v49 = vld [vmem:[#allocation34_spill] sm:$0xff]  ;;  %v8986_v43 = vld [vmem:[#allocation32_spill] sm:$0xff]  ;;  %v1002_v31 = vrot.slane %v4866_v39, 1  ;;  %v1005_v45 = vrot.slane %v4874_v7, 1 }
  0xbd   : > { %8923 = vst [vmem:[#allocation60_spill] sm:$0xff] %v4800_v57  ;;  %v8982_v57 = vld [vmem:[#allocation31_spill] sm:$0xff]  ;;  %v4990_v60 = vmul.f32 %v8986_v43, %v8948_v51  ;;  %v8990_v41 = vld [vmem:[#allocation78_spill] sm:$0xff]  ;;  %v1009_v26 = vrot.slane %v4882_v29, 1  ;;  %v1017_v18 = vrot.slane %v4902_v14, 1  ;;  %v1020_v39 = vrot.slane %v4910_v4, 1 }
  0xbe   : > { %8924 = vst [vmem:[#allocation61_spill] sm:$0xff] %v4803_v21  ;;  %v8981_v21 = vld [vmem:[#allocation27_spill] sm:$0xff]  ;;  %v8991_v43 = vld [vmem:[#allocation46_spill] sm:$0xff]  ;;  %v1024_v7 = vrot.slane %v4918_v48, 1 }
  0xbf   : > { %8926 = vst [vmem:[#allocation62_spill] sm:$0xff] %v4806_v27  ;;  %v8980_v27 = vld [vmem:[#allocation74_spill] sm:$0xff] }
  0xc0   : > { %8928 = vst [vmem:[#allocation63_spill] sm:$0xff] %v4809_v28  ;;  %v8979_v28 = vld [vmem:[#allocation28_spill] sm:$0xff] }
  0xc1   : > { %8930 = vst [vmem:[#allocation64_spill] sm:$0xff] %v4812_v9  ;;  %v8978_v9 = vld [vmem:[#allocation26_spill] sm:$0xff] }
  0xc2   : > { %8932 = vst [vmem:[#allocation4_spill] sm:$0xff] %v4815_v24  ;;  %v8977_v24 = vld [vmem:[#allocation73_spill] sm:$0xff] }
  0xc3   : > { %8934 = vst [vmem:[#allocation3_spill] sm:$0xff] %v4818_v0  ;;  %v8976_v0 = vld [vmem:[#allocation23_spill] sm:$0xff] }
  0xc4   : > { %8936 = vst [vmem:[#allocation29_spill] sm:$0xff] %v4821_v20  ;;  %v8975_v20 = vld [vmem:[#allocation22_spill] sm:$0xff] }
  0xc5   : > { %8938 = vst [vmem:[#allocation30_spill] sm:$0xff] %v4824_v50  ;;  %v8974_v50 = vld [vmem:[#allocation72_spill] sm:$0xff] }
  0xc6   : > { %8940 = vst [vmem:[#allocation37_spill] sm:$0xff] %v4827_v56  ;;  %v8973_v56 = vld [vmem:[#allocation25_spill] sm:$0xff]  ;;  %v4938_v42 = vmul.f32 %v8948_v51, %v8974_v50  ;;  %v4958_v50 = vmul.f32 %v8948_v51, %v8979_v28  ;;  %v4978_v28 = vmul.f32 %v8948_v51, %v8902_v13 }
  0xc7   : > { %8942 = vst [vmem:[#allocation38_spill] sm:$0xff] %v4830_v55  ;;  %v8972_v55 = vld [vmem:[#allocation24_spill] sm:$0xff]  ;;  %v4934_v61 = vmul.f32 %v8948_v51, %v8973_v56  ;;  %v4954_v56 = vmul.f32 %v8948_v51, %v8978_v9  ;;  %v4974_v9 = vmul.f32 %v8948_v51, %v8983_v10  ;;  %v4994_v10 = vmul.f32 %v8905_v12, %v8948_v51  ;;  %v8987_v13 = vld [vmem:[#allocation77_spill] sm:$0xff] }
  0xc8   : > { %8944 = vst [vmem:[#allocation42_spill] sm:$0xff] %v4833_v16  ;;  %v8971_v16 = vld [vmem:[#allocation71_spill] sm:$0xff]  ;;  %v4930_v36 = vmul.f32 %v8948_v51, %v8972_v55  ;;  %v4950_v55 = vmul.f32 %v8948_v51, %v8977_v24  ;;  %v4970_v24 = vmul.f32 %v8982_v57, %v8948_v51  ;;  %v992_v57 = vrot.slane %v895_v54, 1 }
  0xc9   : > { %8946 = vst [vmem:[#allocation43_spill] sm:$0xff] %v4836_v8  ;;  %v8970_v8 = vld [vmem:[#allocation21_spill] sm:$0xff]  ;;  %v4926_v32 = vmul.f32 %v8948_v51, %v8971_v16  ;;  %v4946_v16 = vmul.f32 %v8976_v0, %v8948_v51  ;;  %v4966_v0 = vmul.f32 %v8981_v21, %v8948_v51  ;;  %v4986_v21 = vmul.f32 %v8948_v51, %v8985_v52 }
  0xca   : > { %v4922_v47 = vmul.f32 %v8970_v8, %v8948_v51  ;;  %v4942_v8 = vmul.f32 %v8975_v20, %v8948_v51  ;;  %v4962_v20 = vmul.f32 %v8948_v51, %v8980_v27  ;;  %v4982_v27 = vmul.f32 %v8948_v51, %v8984_v49  ;;  %v8988_v49 = vld [vmem:[#allocation40_spill] sm:$0xff]  ;;  %v8989_v52 = vld [vmem:[#allocation41_spill] sm:$0xff] }
  0xcb   : > { %v4998_v23 = vmul.f32 %v8948_v51, %v8987_v13  ;;  %v5002_v11 = vmul.f32 %v8948_v51, %v8988_v49  ;;  %v5006_v5 = vmul.f32 %v8948_v51, %v8989_v52  ;;  %v5010_v54 = vmul.f32 %v8948_v51, %v8990_v41 }
  0xcc   : > { %v5014_v12 = vmul.f32 %v8908_v2, %v8948_v51  ;;  %v5018_v13 = vmul.f32 %v8909_v44, %v8948_v51  ;;  %v5022_v49 = vmul.f32 %v8948_v51, %v8991_v43  ;;  %v995_v52 = vrot.slane %v4850_v58, 1 }
  0xcd   : > { %v5028_v41 = vsel %vm437_vm0, %v989_v35, %v990_v46  ;;  %v5031_v2 = vsel %vm437_vm0, %v990_v46, %v992_v57  ;;  %v1000_v44 = vrot.slane %v4862_v40, 1  ;;  %v1004_v51 = vrot.slane %v4870_v62, 1 }
  0xce   : > { %v1007_v58 = vrot.slane %v4878_v37, 1  ;;  %v1010_v35 = vrot.slane %v4886_v17, 1  ;;  %v1012_v43 = vrot.slane %v4890_v3, 1  ;;  %v1014_v46 = vrot.slane %v4894_v34, 1 }
  0xcf   : > { %v1015_v57 = vrot.slane %v4898_v63, 1  ;;  %v1019_v40 = vrot.slane %v4906_v30, 1  ;;  %v1022_v62 = vrot.slane %v4914_v15, 1  ;;  %v1025_v37 = vrot.slane %v4922_v47, 1 }
  0xd0   : > { %v1027_v17 = vrot.slane %v4926_v32, 1  ;;  %v996_v3 = vsel %vm437_vm0, %v994_v1, %v995_v52  ;;  %v998_v34 = vsel %vm437_vm0, %v995_v52, %v997_v19  ;;  %v1029_v63 = vrot.slane %v4930_v36, 1 }
  0xd1   : > { %v1030_v14 = vrot.slane %v4934_v61, 1  ;;  %v1001_v29 = vsel %vm437_vm0, %v999_v53, %v1000_v44  ;;  %v1003_v4 = vsel %vm437_vm0, %v1000_v44, %v1002_v31  ;;  %v1006_v15 = vsel %vm437_vm0, %v1004_v51, %v1005_v45 }
  0xd2   : > { %v1008_v48 = vsel %vm437_vm0, %v1005_v45, %v1007_v58  ;;  %v1011_v47 = vsel %vm437_vm0, %v1009_v26, %v1010_v35  ;;  %v1013_v32 = vsel %vm437_vm0, %v1010_v35, %v1012_v43  ;;  %v1016_v1 = vsel %vm437_vm0, %v1014_v46, %v1015_v57 }
  0xd3   : > { %v1018_v19 = vsel %vm437_vm0, %v1015_v57, %v1017_v18  ;;  %v1021_v52 = vsel %vm437_vm0, %v1019_v40, %v1020_v39  ;;  %v1023_v61 = vsel %vm437_vm0, %v1020_v39, %v1022_v62  ;;  %v1026_v53 = vsel %vm437_vm0, %v1024_v7, %v1025_v37 }
  0xd4   : > { %v1028_v44 = vsel %vm437_vm0, %v1025_v37, %v1027_v17  ;;  %v1031_v31 = vsel %vm437_vm0, %v1029_v63, %v1030_v14  ;;  %v1032_v36 = vrot.slane %v4938_v42, 1  ;;  %v1034_v30 = vrot.slane %v4942_v8, 1 }
  0xd5   : > { %v1035_v43 = vrot.slane %v4946_v16, 1  ;;  %v1037_v51 = vrot.slane %v4950_v55, 1  ;;  %v1039_v45 = vrot.slane %v4954_v56, 1  ;;  %v1040_v58 = vrot.slane %v4958_v50, 1 }
  0xd6   : > { %v1042_v26 = vrot.slane %v4962_v20, 1  ;;  %v1044_v35 = vrot.slane %v4966_v0, 1  ;;  %v1045_v46 = vrot.slane %v4970_v24, 1  ;;  %v1047_v57 = vrot.slane %v4974_v9, 1 }
  0xd7   : > { %v1049_v42 = vrot.slane %v4978_v28, 1  ;;  %v1050_v8 = vrot.slane %v4982_v27, 1  ;;  %v1052_v16 = vrot.slane %v4986_v21, 1  ;;  %v1054_v55 = vrot.slane %v4990_v60, 1 }
  0xd8   : > { %v1055_v56 = vrot.slane %v4994_v10, 1  ;;  %v1057_v50 = vrot.slane %v4998_v23, 1  ;;  %v1059_v20 = vrot.slane %v5002_v11, 1  ;;  %v1060_v0 = vrot.slane %v5006_v5, 1 }
  0xd9   : > { %v1062_v24 = vrot.slane %v5010_v54, 1  ;;  %v1033_v9 = vsel %vm437_vm0, %v1030_v14, %v1032_v36  ;;  %v1064_v28 = vrot.slane %v5014_v12, 1  ;;  %v1065_v27 = vrot.slane %v5018_v13, 1 }
  0xda   : > { %v1067_v21 = vrot.slane %v5022_v49, 1  ;;  %v1036_v60 = vsel %vm437_vm0, %v1034_v30, %v1035_v43  ;;  %v1038_v10 = vsel %vm437_vm0, %v1035_v43, %v1037_v51  ;;  %v1041_v23 = vsel %vm437_vm0, %v1039_v45, %v1040_v58  ;;  %v8992_v43 = vld [vmem:[#allocation48_spill] sm:$0xff] }
  0xdb   : > { %v1043_v11 = vsel %vm437_vm0, %v1040_v58, %v1042_v26  ;;  %v1046_v5 = vsel %vm437_vm0, %v1044_v35, %v1045_v46  ;;  %v1048_v54 = vsel %vm437_vm0, %v1045_v46, %v1047_v57  ;;  %v1051_v18 = vsel %vm437_vm0, %v1049_v42, %v1050_v8  ;;  %v9017_v46 = vld [vmem:[#allocation59_spill] sm:$0xff]  ;;  %v9019_v57 = vld [vmem:[#allocation60_spill] sm:$0xff]  ;;  %v9021_v42 = vld [vmem:[#allocation61_spill] sm:$0xff] }
  0xdc   : > { %v1053_v12 = vsel %vm437_vm0, %v1050_v8, %v1052_v16  ;;  %v1056_v13 = vsel %vm437_vm0, %v1054_v55, %v1055_v56  ;;  %v1058_v49 = vsel %vm437_vm0, %v1055_v56, %v1057_v50  ;;  %v1061_v40 = vsel %vm437_vm0, %v1059_v20, %v1060_v0  ;;  %v9023_v8 = vld [vmem:[#allocation62_spill] sm:$0xff]  ;;  %v9025_v55 = vld [vmem:[#allocation63_spill] sm:$0xff]  ;;  %v9027_v50 = vld [vmem:[#allocation64_spill] sm:$0xff] }
  0xdd   : > { %v1063_v39 = vsel %vm437_vm0, %v1060_v0, %v1062_v24  ;;  %v1066_v62 = vsel %vm437_vm0, %v1064_v28, %v1065_v27  ;;  %v1068_v7 = vsel %vm437_vm0, %v1065_v27, %v1067_v21  ;;  %v5107_v37 = vadd.f32 %v5028_v41, %v4743_v22  ;;  %v8994_v22 = vld [vmem:[#allocation49_spill] sm:$0xff]  ;;  %v9029_v0 = vld [vmem:[#allocation4_spill] sm:$0xff] }
  0xde   : > { %v5111_v17 = vadd.f32 %v5031_v2, %v4746_v25  ;;  %v5114_v63 = vadd.f32 %v996_v3, %v4749_v38  ;;  %v5117_v14 = vadd.f32 %v998_v34, %v4752_v6  ;;  %v5120_v36 = vadd.f32 %v1001_v29, %v4755_v59  ;;  %v8996_v2 = vld [vmem:[#allocation50_spill] sm:$0xff]  ;;  %v8998_v38 = vld [vmem:[#allocation51_spill] sm:$0xff]  ;;  %v9002_v59 = vld [vmem:[#allocation52_spill] sm:$0xff] }
  0xdf   : > { %v5123_v30 = vadd.f32 %v1003_v4, %v4758_v33  ;;  %v5126_v51 = vadd.f32 %v1006_v15, %v8992_v43  ;;  %v5129_v41 = vadd.f32 %v1008_v48, %v8994_v22  ;;  %v5132_v25 = vadd.f32 %v1011_v47, %v8996_v2  ;;  %v9000_v6 = vld [vmem:[#allocation2_spill] sm:$0xff]  ;;  %v9004_v33 = vld [vmem:[#allocation53_spill] sm:$0xff]  ;;  %v9008_v48 = vld [vmem:[#allocation55_spill] sm:$0xff] }
  0xe0   : > { %v5135_v3 = vadd.f32 %v1013_v32, %v8998_v38  ;;  %v5138_v34 = vadd.f32 %v1016_v1, %v9000_v6  ;;  %v5141_v29 = vadd.f32 %v1018_v19, %v9002_v59  ;;  %v5144_v4 = vadd.f32 %v1021_v52, %v9004_v33  ;;  %v9006_v15 = vld [vmem:[#allocation54_spill] sm:$0xff]  ;;  %v9010_v47 = vld [vmem:[#allocation56_spill] sm:$0xff]  ;;  %v9012_v32 = vld [vmem:[#allocation57_spill] sm:$0xff] }
  0xe1   : > { %8993 = vst [vmem:[#allocation44_spill] sm:$0xff] %v5126_v51  ;;  %v5147_v45 = vadd.f32 %v1023_v61, %v9006_v15  ;;  %v5150_v58 = vadd.f32 %v1026_v53, %v9008_v48  ;;  %v5153_v26 = vadd.f32 %v1028_v44, %v9010_v47  ;;  %v5156_v35 = vadd.f32 %v1031_v31, %v9012_v32  ;;  %v5161_v1 = vld [vmem:[%s8417_s1] sm:$0xff]  ;;  %v9033_v27 = vld [vmem:[#allocation29_spill] sm:$0xff]  ;;  %v9051_v48 = vld [vmem:[#allocation12_spill] sm:$0xff] }
  0xe2   : > { %8995 = vst [vmem:[#allocation45_spill] sm:$0xff] %v5129_v41  ;;  %v5164_v19 = vperm.slane %v5161_v1, 5  ;;  %v9015_v52 = vld [vmem:[#allocation58_spill] sm:$0xff]  ;;  %v5170_v53 = vadd.f32 %v1036_v60, %v9017_v46  ;;  %v5173_v44 = vadd.f32 %v1038_v10, %v9019_v57  ;;  %v5176_v31 = vadd.f32 %v1041_v23, %v9021_v42  ;;  %v9037_v23 = vld [vmem:[#allocation37_spill] sm:$0xff] }
  0xe3   : > { %8997 = vst [vmem:[#allocation47_spill] sm:$0xff] %v5132_v25  ;;  %v5167_v61 = vadd.f32 %v1033_v9, %v9015_v52  ;;  %v5179_v16 = vadd.f32 %v1043_v11, %v9023_v8  ;;  %v5182_v56 = vadd.f32 %v1046_v5, %v9025_v55  ;;  %v5185_v20 = vadd.f32 %v1048_v54, %v9027_v50  ;;  %v9031_v9 = vld [vmem:[#allocation3_spill] sm:$0xff]  ;;  %v9035_v60 = vld [vmem:[#allocation30_spill] sm:$0xff]  ;;  %v9050_v15 = vld [vmem:[#allocation65_spill] sm:$0xff] }
  0xe4   : > { %8999 = vst [vmem:[#allocation48_spill] sm:$0xff] %v5135_v3  ;;  %v5188_v24 = vadd.f32 %v1051_v18, %v9029_v0  ;;  %v5191_v28 = vadd.f32 %v1053_v12, %v9031_v9  ;;  %v5194_v21 = vadd.f32 %v1056_v13, %v9033_v27  ;;  %v5197_v10 = vadd.f32 %v1058_v49, %v9035_v60  ;;  %v9039_v5 = vld [vmem:[#allocation38_spill] sm:$0xff]  ;;  %v9043_v18 = vld [vmem:[#allocation43_spill] sm:$0xff]  ;;  %v9052_v32 = vld [vmem:[#allocation13_spill] sm:$0xff] }
  0xe5   : > { %9001 = vst [vmem:[#allocation49_spill] sm:$0xff] %v5138_v34  ;;  %v5200_v11 = vadd.f32 %v1061_v40, %v9037_v23  ;;  %v5203_v43 = vadd.f32 %v1063_v39, %v9039_v5  ;;  %v9041_v54 = vld [vmem:[#allocation42_spill] sm:$0xff]  ;;  %v5209_v2 = vadd.f32 %v1068_v7, %v9043_v18  ;;  %v9046_v13 = vld [vmem:[#allocation7_spill] sm:$0xff]  ;;  %v9048_v40 = vld [vmem:[#allocation5_spill] sm:$0xff]  ;;  %v5227_v7 = vmul.f32 %v5164_v19, %v9050_v15 }
  0xe6   : > { %9003 = vst [vmem:[#allocation50_spill] sm:$0xff] %v5141_v29  ;;  %v5206_v22 = vadd.f32 %v1066_v62, %v9041_v54  ;;  %v9045_v12 = vld [vmem:[#allocation6_spill] sm:$0xff]  ;;  %v1135_v6 = vmul.f32 %v5164_v19, %v9046_v13  ;;  %v5219_v33 = vmul.f32 %v9048_v40, %v5164_v19  ;;  %v9049_v39 = vld [vmem:[#allocation8_spill] sm:$0xff]  ;;  %v5231_v47 = vmul.f32 %v5164_v19, %v9051_v48  ;;  %v9054_v42 = vld [vmem:[#allocation9_spill] sm:$0xff] }
  0xe7   : > { %9005 = vst [vmem:[#allocation51_spill] sm:$0xff] %v5144_v4  ;;  %v1134_v38 = vmul.f32 %v5164_v19, %v9045_v12  ;;  %v9047_v49 = vld [vmem:[#allocation10_spill] sm:$0xff]  ;;  %v5223_v62 = vmul.f32 %v9049_v39, %v5164_v19  ;;  %v5235_v52 = vmul.f32 %v5164_v19, %v9052_v32  ;;  %v5243_v8 = vmul.f32 %v9054_v42, %v5164_v19  ;;  %v9055_v55 = vld [vmem:[#allocation11_spill] sm:$0xff]  ;;  %v9058_v23 = vld [vmem:[#allocation16_spill] sm:$0xff] }
  0xe8   : > { %9007 = vst [vmem:[#allocation2_spill] sm:$0xff] %v5147_v45  ;;  %v1136_v59 = vmul.f32 %v5164_v19, %v9047_v49  ;;  %v9053_v46 = vld [vmem:[#allocation66_spill] sm:$0xff]  ;;  %v5247_v50 = vmul.f32 %v9055_v55, %v5164_v19  ;;  %v9056_v0 = vld [vmem:[#allocation67_spill] sm:$0xff]  ;;  %v5259_v5 = vmul.f32 %v5164_v19, %v9058_v23  ;;  %v9059_v54 = vld [vmem:[#allocation68_spill] sm:$0xff]  ;;  %v1235_v3 = vrot.slane %v5219_v33, 2 }
  0xe9   : > { %9009 = vst [vmem:[#allocation52_spill] sm:$0xff] %v5150_v58  ;;  %v5239_v57 = vmul.f32 %v5164_v19, %v9053_v46  ;;  %v5251_v9 = vmul.f32 %v5164_v19, %v9056_v0  ;;  %v9057_v27 = vld [vmem:[#allocation14_spill] sm:$0xff]  ;;  %v5263_v18 = vmul.f32 %v5164_v19, %v9059_v54  ;;  %v9060_v12 = vld [vmem:[#allocation15_spill] sm:$0xff]  ;;  %v9061_v49 = vld [vmem:[#allocation17_spill] sm:$0xff]  ;;  %v1241_v41 = vrot.slane %v5235_v52, 2 }
  0xea   : > { %9011 = vst [vmem:[#allocation53_spill] sm:$0xff] %v5153_v26  ;;  %v5255_v60 = vmul.f32 %v5164_v19, %v9057_v27  ;;  %v5267_v13 = vmul.f32 %v9060_v12, %v5164_v19  ;;  %v5271_v0 = vmul.f32 %v9061_v49, %v5164_v19  ;;  %v9062_v46 = vld [vmem:[#allocation69_spill] sm:$0xff]  ;;  %v9063_v27 = vld [vmem:[#allocation19_spill] sm:$0xff]  ;;  %v9064_v55 = vld [vmem:[#allocation20_spill] sm:$0xff]  ;;  %v1246_v33 = vrot.slane %v5247_v50, 2 }
  0xeb   : > { %9013 = vst [vmem:[#allocation54_spill] sm:$0xff] %v5156_v35  ;;  %v5275_v15 = vmul.f32 %v5164_v19, %v9062_v46  ;;  %v5279_v23 = vmul.f32 %v5164_v19, %v9063_v27  ;;  %v5283_v54 = vmul.f32 %v5164_v19, %v9064_v55  ;;  %v9065_v42 = vld [vmem:[#allocation70_spill] sm:$0xff]  ;;  %v9067_v48 = vld [vmem:[#allocation21_spill] sm:$0xff]  ;;  %v9068_v39 = vld [vmem:[#allocation71_spill] sm:$0xff]  ;;  %v1243_v51 = vrot.slane %v5239_v57, 2 }
  0xec   : > { %9014 = vst [vmem:[#allocation55_spill] sm:$0xff] %v5161_v1  ;;  %v5287_v12 = vmul.f32 %v5164_v19, %v9065_v42  ;;  %v9066_v32 = vld [vmem:[#allocation18_spill] sm:$0xff]  ;;  %v5295_v46 = vmul.f32 %v9067_v48, %v5164_v19  ;;  %v5299_v27 = vmul.f32 %v5164_v19, %v9068_v39  ;;  %v9069_v40 = vld [vmem:[#allocation24_spill] sm:$0xff]  ;;  %v9078_v1 = vld [vmem:[#allocation27_spill] sm:$0xff]  ;;  %v1256_v52 = vrot.slane %v5271_v0, 2 }
  0xed   : > { %9016 = vst [vmem:[#allocation56_spill] sm:$0xff] %v5167_v61  ;;  %v5291_v49 = vmul.f32 %v9066_v32, %v5164_v19  ;;  %v5303_v55 = vmul.f32 %v5164_v19, %v9069_v40  ;;  %v1231_v61 = vrot.slane %v1135_v6, 2  ;;  %v9087_v45 = vld [vmem:[#allocation40_spill] sm:$0xff]  ;;  %v9089_v6 = vld [vmem:[#allocation78_spill] sm:$0xff]  ;;  %v1261_v57 = vrot.slane %v5283_v54, 2 }
  0xee   : > { %9018 = vst [vmem:[#allocation57_spill] sm:$0xff] %v5170_v53  ;;  %v1230_v53 = vrot.slane %v1134_v38, 2  ;;  %v5375_v4 = vmul.f32 %v5164_v19, %v9087_v45  ;;  %v1244_v54 = vsel %vm679_vm1, %v1241_v41, %v1243_v51 }
  0xef   : > { %9020 = vst [vmem:[#allocation58_spill] sm:$0xff] %v5173_v44  ;;  %v9083_v44 = vld [vmem:[#allocation76_spill] sm:$0xff]  ;;  %v1265_v50 = vrot.slane %v5291_v49, 2 }
  0xf0   : > { %9022 = vst [vmem:[#allocation59_spill] sm:$0xff] %v5176_v31  ;;  %v9082_v31 = vld [vmem:[#allocation34_spill] sm:$0xff]  ;;  %v5400_v25 = vsel %vm679_vm1, %v1230_v53, %v1231_v61  ;;  %v1250_v53 = vrot.slane %v5255_v60, 2 }
  0xf1   : > { %9024 = vst [vmem:[#allocation60_spill] sm:$0xff] %v5179_v16  ;;  %v9081_v16 = vld [vmem:[#allocation33_spill] sm:$0xff] }
  0xf2   : > { %9026 = vst [vmem:[#allocation61_spill] sm:$0xff] %v5182_v56  ;;  %v9080_v56 = vld [vmem:[#allocation75_spill] sm:$0xff] }
  0xf3   : > { %9028 = vst [vmem:[#allocation62_spill] sm:$0xff] %v5185_v20  ;;  %v9079_v20 = vld [vmem:[#allocation31_spill] sm:$0xff] }
  0xf4   : > { %9030 = vst [vmem:[#allocation63_spill] sm:$0xff] %v5188_v24  ;;  %v9077_v24 = vld [vmem:[#allocation74_spill] sm:$0xff] }
  0xf5   : > { %9032 = vst [vmem:[#allocation64_spill] sm:$0xff] %v5191_v28  ;;  %v9076_v28 = vld [vmem:[#allocation28_spill] sm:$0xff] }
  0xf6   : > { %9034 = vst [vmem:[#allocation4_spill] sm:$0xff] %v5194_v21  ;;  %v9075_v21 = vld [vmem:[#allocation26_spill] sm:$0xff] }
  0xf7   : > { %9036 = vst [vmem:[#allocation3_spill] sm:$0xff] %v5197_v10  ;;  %v9074_v10 = vld [vmem:[#allocation73_spill] sm:$0xff] }
  0xf8   : > { %9038 = vst [vmem:[#allocation29_spill] sm:$0xff] %v5200_v11  ;;  %v9073_v11 = vld [vmem:[#allocation23_spill] sm:$0xff]  ;;  %v5323_v40 = vmul.f32 %v5164_v19, %v9074_v10  ;;  %v5343_v10 = vmul.f32 %v9079_v20, %v5164_v19  ;;  %v9084_v20 = vld [vmem:[#allocation32_spill] sm:$0xff] }
  0xf9   : > { %9040 = vst [vmem:[#allocation30_spill] sm:$0xff] %v5203_v43  ;;  %v9072_v43 = vld [vmem:[#allocation22_spill] sm:$0xff]  ;;  %v5319_v39 = vmul.f32 %v9073_v11, %v5164_v19  ;;  %v5339_v11 = vmul.f32 %v9078_v1, %v5164_v19  ;;  %v5359_v1 = vmul.f32 %v5164_v19, %v9083_v44  ;;  %v5363_v35 = vmul.f32 %v9084_v20, %v5164_v19  ;;  %v9088_v44 = vld [vmem:[#allocation41_spill] sm:$0xff] }
  0xfa   : > { %9042 = vst [vmem:[#allocation37_spill] sm:$0xff] %v5206_v22  ;;  %v9071_v22 = vld [vmem:[#allocation72_spill] sm:$0xff]  ;;  %v5315_v48 = vmul.f32 %v9072_v43, %v5164_v19  ;;  %v5335_v43 = vmul.f32 %v5164_v19, %v9077_v24  ;;  %v5355_v24 = vmul.f32 %v5164_v19, %v9082_v31  ;;  %v1233_v31 = vrot.slane %v1136_v59, 2  ;;  %v9092_v59 = vld [vmem:[#allocation46_spill] sm:$0xff] }
  0xfb   : > { %9044 = vst [vmem:[#allocation38_spill] sm:$0xff] %v5209_v2  ;;  %v9070_v2 = vld [vmem:[#allocation25_spill] sm:$0xff]  ;;  %v5311_v32 = vmul.f32 %v5164_v19, %v9071_v22  ;;  %v5331_v22 = vmul.f32 %v5164_v19, %v9076_v28  ;;  %v5351_v28 = vmul.f32 %v5164_v19, %v9081_v16  ;;  %v5379_v38 = vmul.f32 %v5164_v19, %v9088_v44 }
  0xfc   : > { %v5307_v42 = vmul.f32 %v5164_v19, %v9070_v2  ;;  %v5327_v2 = vmul.f32 %v5164_v19, %v9075_v21  ;;  %v5347_v21 = vmul.f32 %v5164_v19, %v9080_v56  ;;  %v9085_v56 = vld [vmem:[#allocation35_spill] sm:$0xff]  ;;  %v9086_v16 = vld [vmem:[#allocation77_spill] sm:$0xff]  ;;  %v5383_v20 = vmul.f32 %v5164_v19, %v9089_v6 }
  0xfd   : > { %v5367_v26 = vmul.f32 %v9085_v56, %v5164_v19  ;;  %v5371_v58 = vmul.f32 %v5164_v19, %v9086_v16  ;;  %v9090_v56 = vld [vmem:[#allocation36_spill] sm:$0xff]  ;;  %v9091_v16 = vld [vmem:[#allocation39_spill] sm:$0xff]  ;;  %v5395_v45 = vmul.f32 %v5164_v19, %v9092_v59  ;;  %v1236_v44 = vrot.slane %v5223_v62, 2 }
  0xfe   : > { %v5387_v29 = vmul.f32 %v9090_v56, %v5164_v19  ;;  %v5391_v34 = vmul.f32 %v9091_v16, %v5164_v19  ;;  %v1238_v6 = vrot.slane %v5227_v7, 2  ;;  %v1240_v56 = vrot.slane %v5231_v47, 2 }
  0xff   : > { %v5406_v16 = vsel %vm679_vm1, %v1231_v61, %v1233_v31  ;;  %v1245_v19 = vrot.slane %v5243_v8, 2  ;;  %v1248_v62 = vrot.slane %v5251_v9, 2  ;;  %v1251_v59 = vrot.slane %v5259_v5, 2 }
 0x100   : > { %v1253_v7 = vrot.slane %v5263_v18, 2  ;;  %v1255_v47 = vrot.slane %v5267_v13, 2  ;;  %v1258_v61 = vrot.slane %v5275_v15, 2  ;;  %v1260_v31 = vrot.slane %v5279_v23, 2 }
 0x101   : > { %v1263_v8 = vrot.slane %v5287_v12, 2  ;;  %v1266_v9 = vrot.slane %v5295_v46, 2  ;;  %v1237_v60 = vsel %vm679_vm1, %v1235_v3, %v1236_v44  ;;  %v1268_v5 = vrot.slane %v5299_v27, 2 }
 0x102   : > { %v1270_v18 = vrot.slane %v5303_v55, 2  ;;  %v1271_v0 = vrot.slane %v5307_v42, 2  ;;  %v1239_v15 = vsel %vm679_vm1, %v1236_v44, %v1238_v6  ;;  %v1242_v23 = vsel %vm679_vm1, %v1240_v56, %v1241_v41 }
 0x103   : > { %v1247_v12 = vsel %vm679_vm1, %v1245_v19, %v1246_v33  ;;  %v1249_v13 = vsel %vm679_vm1, %v1246_v33, %v1248_v62  ;;  %v1252_v46 = vsel %vm679_vm1, %v1250_v53, %v1251_v59  ;;  %v1254_v3 = vsel %vm679_vm1, %v1251_v59, %v1253_v7 }
 0x104   : > { %v1257_v27 = vsel %vm679_vm1, %v1255_v47, %v1256_v52  ;;  %v1259_v55 = vsel %vm679_vm1, %v1256_v52, %v1258_v61  ;;  %v1262_v42 = vsel %vm679_vm1, %v1260_v31, %v1261_v57  ;;  %v1264_v44 = vsel %vm679_vm1, %v1261_v57, %v1263_v8 }
 0x105   : > { %v1267_v56 = vsel %vm679_vm1, %v1265_v50, %v1266_v9  ;;  %v1269_v51 = vsel %vm679_vm1, %v1266_v9, %v1268_v5  ;;  %v1272_v41 = vsel %vm679_vm1, %v1270_v18, %v1271_v0  ;;  %v1273_v49 = vrot.slane %v5311_v32, 2 }
 0x106   : > { %v1275_v6 = vrot.slane %v5315_v48, 2  ;;  %v1276_v59 = vrot.slane %v5319_v39, 2  ;;  %v1278_v19 = vrot.slane %v5323_v40, 2  ;;  %v1280_v33 = vrot.slane %v5327_v2, 2 }
 0x107   : > { %v1281_v62 = vrot.slane %v5331_v22, 2  ;;  %v1283_v53 = vrot.slane %v5335_v43, 2  ;;  %v1285_v7 = vrot.slane %v5339_v11, 2  ;;  %v1286_v47 = vrot.slane %v5343_v10, 2 }
 0x108   : > { %v1288_v52 = vrot.slane %v5347_v21, 2  ;;  %v1290_v32 = vrot.slane %v5351_v28, 2  ;;  %v1291_v48 = vrot.slane %v5355_v24, 2  ;;  %v1293_v39 = vrot.slane %v5359_v1, 2 }
 0x109   : > { %v1295_v40 = vrot.slane %v5363_v35, 2  ;;  %v1296_v2 = vrot.slane %v5367_v26, 2  ;;  %v1298_v22 = vrot.slane %v5371_v58, 2  ;;  %v1300_v43 = vrot.slane %v5375_v4, 2 }
 0x10a   : > { %v1301_v11 = vrot.slane %v5379_v38, 2  ;;  %v1274_v10 = vsel %vm679_vm1, %v1271_v0, %v1273_v49  ;;  %v1303_v21 = vrot.slane %v5383_v20, 2  ;;  %v1305_v28 = vrot.slane %v5387_v29, 2 }
 0x10b   : > { %v1306_v24 = vrot.slane %v5391_v34, 2  ;;  %v1277_v1 = vsel %vm679_vm1, %v1275_v6, %v1276_v59  ;;  %v1279_v35 = vsel %vm679_vm1, %v1276_v59, %v1278_v19  ;;  %v1282_v26 = vsel %vm679_vm1, %v1280_v33, %v1281_v62  ;;  %v9095_v59 = vld [vmem:[#allocation47_spill] sm:$0xff] }
 0x10c   : > { %v1308_v58 = vrot.slane %v5395_v45, 2  ;;  %v1284_v4 = vsel %vm679_vm1, %v1281_v62, %v1283_v53  ;;  %v1287_v38 = vsel %vm679_vm1, %v1285_v7, %v1286_v47  ;;  %v1289_v61 = vsel %vm679_vm1, %v1286_v47, %v1288_v52 }
 0x10d   : > { %v1292_v20 = vsel %vm679_vm1, %v1290_v32, %v1291_v48  ;;  %v1294_v29 = vsel %vm679_vm1, %v1291_v48, %v1293_v39  ;;  %v1297_v34 = vsel %vm679_vm1, %v1295_v40, %v1296_v2  ;;  %v1299_v31 = vsel %vm679_vm1, %v1296_v2, %v1298_v22  ;;  %v5545_v39 = vld [vmem:[%s3693_s17 + $0xd4] sm:$0x1]  ;;  %v9113_v22 = vld [vmem:[#allocation62_spill] sm:$0xff] }
 0x10e   : > { %v1302_v57 = vsel %vm679_vm1, %v1300_v43, %v1301_v11  ;;  %v1304_v8 = vsel %vm679_vm1, %v1301_v11, %v1303_v21  ;;  %v1307_v45 = vsel %vm679_vm1, %v1305_v28, %v1306_v24  ;;  %v5479_v50 = vadd.f32 %v5400_v25, %v5107_v37  ;;  %v9093_v37 = vld [vmem:[#allocation44_spill] sm:$0xff]  ;;  %9108 = vst [vmem:[#allocation42_spill] sm:$0xff] %v5545_v39  ;;  %v9115_v11 = vld [vmem:[#allocation55_spill] sm:$0xff] }
 0x10f   : > { %v5483_v9 = vadd.f32 %v5406_v16, %v5111_v17  ;;  %v1309_v5 = vsel %vm679_vm1, %v1306_v24, %v1308_v58  ;;  %v5487_v18 = vadd.f32 %v1237_v60, %v5114_v63  ;;  %v5490_v0 = vadd.f32 %v1239_v15, %v5117_v14  ;;  %v9094_v17 = vld [vmem:[#allocation45_spill] sm:$0xff]  ;;  %v9096_v60 = vld [vmem:[#allocation48_spill] sm:$0xff]  ;;  %v9116_v21 = vld [vmem:[#allocation63_spill] sm:$0xff] }
 0x110   : > { %v5493_v49 = vadd.f32 %v1242_v23, %v5120_v36  ;;  %v5496_v6 = vadd.f32 %v1244_v54, %v5123_v30  ;;  %v5499_v25 = vadd.f32 %v1247_v12, %v9093_v37  ;;  %v5502_v16 = vadd.f32 %v1249_v13, %v9094_v17  ;;  %v9097_v15 = vld [vmem:[#allocation49_spill] sm:$0xff]  ;;  %v9098_v23 = vld [vmem:[#allocation50_spill] sm:$0xff]  ;;  %v9099_v54 = vld [vmem:[#allocation51_spill] sm:$0xff] }
 0x111   : > { %v5505_v63 = vadd.f32 %v1252_v46, %v9095_v59  ;;  %v5508_v14 = vadd.f32 %v1254_v3, %v9096_v60  ;;  %v5511_v36 = vadd.f32 %v1257_v27, %v9097_v15  ;;  %v5514_v30 = vadd.f32 %v1259_v55, %v9098_v23  ;;  %v9100_v12 = vld [vmem:[#allocation2_spill] sm:$0xff]  ;;  %v9101_v13 = vld [vmem:[#allocation52_spill] sm:$0xff]  ;;  %v9102_v46 = vld [vmem:[#allocation53_spill] sm:$0xff] }
 0x112   : > { %v5517_v19 = vadd.f32 %v1262_v42, %v9099_v54  ;;  %v5520_v33 = vadd.f32 %v1264_v44, %v9100_v12  ;;  %v5523_v62 = vadd.f32 %v1267_v56, %v9101_v13  ;;  %v5526_v53 = vadd.f32 %v1269_v51, %v9102_v46  ;;  %v9103_v3 = vld [vmem:[#allocation54_spill] sm:$0xff]  ;;  %v9104_v27 = vld [vmem:[#allocation56_spill] sm:$0xff]  ;;  %v9105_v55 = vld [vmem:[#allocation57_spill] sm:$0xff] }
 0x113   : > { %v5529_v7 = vadd.f32 %v1272_v41, %v9103_v3  ;;  %v5532_v47 = vadd.f32 %v1274_v10, %v9104_v27  ;;  %v5535_v52 = vadd.f32 %v1277_v1, %v9105_v55  ;;  %v9106_v42 = vld [vmem:[#allocation58_spill] sm:$0xff]  ;;  %v9107_v44 = vld [vmem:[#allocation59_spill] sm:$0xff]  ;;  %v9109_v51 = vld [vmem:[#allocation60_spill] sm:$0xff]  ;;  %v5554_v43 = vadd.f32 %v1289_v61, %v9113_v22 }
 0x114   : > { %v5538_v32 = vadd.f32 %v1279_v35, %v9106_v42  ;;  %v5541_v48 = vadd.f32 %v1282_v26, %v9107_v44  ;;  %v222_v56 = vld [vmem:[%s3693_s17 + $0xcc] sm:$0xff]   ;;  %v5548_v40 = vadd.f32 %v1284_v4, %v9109_v51  ;;  %v9111_v41 = vld [vmem:[#allocation61_spill] sm:$0xff]  ;;  %v1376_v10 = vperm.slane %v9115_v11, 6  ;;  %v9126_v17 = vld [vmem:[#allocation30_spill] sm:$0xff] }
 0x115   : > { %v5551_v2 = vadd.f32 %v1287_v38, %v9111_v41  ;;  %9114 = vst [vmem:[#allocation7_spill] sm:$0xff] %v5554_v43  ;;  %v5558_v28 = vadd.f32 %v1292_v20, %v9116_v21  ;;  %v9118_v24 = vld [vmem:[#allocation64_spill] sm:$0xff]  ;;  %v9122_v58 = vld [vmem:[#allocation3_spill] sm:$0xff]  ;;  %v9124_v37 = vld [vmem:[#allocation29_spill] sm:$0xff]  ;;  %v5573_v61 = vadd.f32 %v1304_v8, %v9126_v17  ;;  %v5583_v23 = vunpack.c.h.bf16 %v222_v56 }
 0x116   : > { %9110 = vst [vmem:[#allocation43_spill] sm:$0xff] %v5548_v40  ;;  %v5561_v1 = vadd.f32 %v1294_v29, %v9118_v24  ;;  %v9120_v35 = vld [vmem:[#allocation4_spill] sm:$0xff]  ;;  %v5567_v4 = vadd.f32 %v1299_v31, %v9122_v58  ;;  %v5570_v38 = vadd.f32 %v1302_v57, %v9124_v37  ;;  %v9128_v59 = vld [vmem:[#allocation37_spill] sm:$0xff]  ;;  %v9130_v20 = vld [vmem:[#allocation38_spill] sm:$0xff]  ;;  %v5581_v29 = vunpack.c.l.bf16 %v222_v56 }
 0x117   : > { %9112 = vst [vmem:[#allocation6_spill] sm:$0xff] %v5551_v2  ;;  %v5564_v26 = vadd.f32 %v1297_v34, %v9120_v35  ;;  %v5576_v60 = vadd.f32 %v1307_v45, %v9128_v59  ;;  %v5579_v15 = vadd.f32 %v1309_v5, %v9130_v20  ;;  %v5587_v31 = vperm.slane %v9115_v11, 7  ;;  %v9135_v57 = vld [vmem:[#allocation5_spill] sm:$0xff]  ;;  %v9136_v12 = vld [vmem:[#allocation8_spill] sm:$0xff]  ;;  %v9140_v55 = vld [vmem:[#allocation11_spill] sm:$0xff] }
 0x118   : > { %9117 = vst [vmem:[#allocation10_spill] sm:$0xff] %v5558_v28  ;;  %v1377_v54 = vmul.f32 %v9135_v57, %v1376_v10  ;;  %v1378_v8 = vmul.f32 %v9136_v12, %v1376_v10  ;;  %v9137_v13 = vld [vmem:[#allocation12_spill] sm:$0xff]  ;;  %v9138_v45 = vld [vmem:[#allocation13_spill] sm:$0xff]  ;;  %v1382_v42 = vmul.f32 %v9140_v55, %v1376_v10  ;;  %v9141_v44 = vld [vmem:[#allocation14_spill] sm:$0xff] }
 0x119   : > { %9119 = vst [vmem:[#allocation44_spill] sm:$0xff] %v5561_v1  ;;  %v1379_v46 = vmul.f32 %v1376_v10, %v9137_v13  ;;  %v1380_v3 = vmul.f32 %v1376_v10, %v9138_v45  ;;  %v9139_v27 = vld [vmem:[#allocation9_spill] sm:$0xff]  ;;  %v1383_v56 = vmul.f32 %v1376_v10, %v9141_v44  ;;  %v9142_v51 = vld [vmem:[#allocation16_spill] sm:$0xff]  ;;  %v9143_v22 = vld [vmem:[#allocation15_spill] sm:$0xff] }
 0x11a   : > { %9121 = vst [vmem:[#allocation45_spill] sm:$0xff] %v5564_v26  ;;  %v1381_v5 = vmul.f32 %v9139_v27, %v1376_v10  ;;  %v1384_v41 = vmul.f32 %v1376_v10, %v9142_v51  ;;  %v1385_v21 = vmul.f32 %v9143_v22, %v1376_v10  ;;  %v9144_v11 = vld [vmem:[#allocation17_spill] sm:$0xff]  ;;  %v9145_v35 = vld [vmem:[#allocation19_spill] sm:$0xff]  ;;  %v9146_v37 = vld [vmem:[#allocation20_spill] sm:$0xff] }
 0x11b   : > { %9123 = vst [vmem:[#allocation47_spill] sm:$0xff] %v5567_v4  ;;  %v1386_v24 = vmul.f32 %v9144_v11, %v1376_v10  ;;  %v1387_v58 = vmul.f32 %v1376_v10, %v9145_v35  ;;  %v1388_v17 = vmul.f32 %v1376_v10, %v9146_v37  ;;  %v9147_v59 = vld [vmem:[#allocation18_spill] sm:$0xff]  ;;  %v9148_v34 = vld [vmem:[#allocation21_spill] sm:$0xff]  ;;  %v9149_v45 = vld [vmem:[#allocation24_spill] sm:$0xff] }
 0x11c   : > { %9125 = vst [vmem:[#allocation48_spill] sm:$0xff] %v5570_v38  ;;  %v1389_v20 = vmul.f32 %v9147_v59, %v1376_v10  ;;  %v1390_v39 = vmul.f32 %v9148_v34, %v1376_v10  ;;  %v1391_v27 = vmul.f32 %v1376_v10, %v9149_v45  ;;  %v9150_v13 = vld [vmem:[#allocation25_spill] sm:$0xff]  ;;  %v9151_v12 = vld [vmem:[#allocation22_spill] sm:$0xff]  ;;  %v9152_v57 = vld [vmem:[#allocation23_spill] sm:$0xff] }
 0x11d   : > { %9127 = vst [vmem:[#allocation49_spill] sm:$0xff] %v5573_v61  ;;  %v1392_v55 = vmul.f32 %v1376_v10, %v9150_v13  ;;  %v1393_v44 = vmul.f32 %v9151_v12, %v1376_v10  ;;  %v1394_v51 = vmul.f32 %v9152_v57, %v1376_v10  ;;  %v9156_v61 = vld [vmem:[#allocation31_spill] sm:$0xff]  ;;  %v9157_v38 = vld [vmem:[#allocation33_spill] sm:$0xff]  ;;  %v9158_v4 = vld [vmem:[#allocation34_spill] sm:$0xff] }
 0x11e   : > { %9129 = vst [vmem:[#allocation50_spill] sm:$0xff] %v5576_v60  ;;  %v9155_v60 = vld [vmem:[#allocation27_spill] sm:$0xff]  ;;  %v1398_v37 = vmul.f32 %v9156_v61, %v1376_v10  ;;  %v1399_v59 = vmul.f32 %v1376_v10, %v9157_v38  ;;  %v1400_v34 = vmul.f32 %v1376_v10, %v9158_v4  ;;  %v9159_v26 = vld [vmem:[#allocation32_spill] sm:$0xff]  ;;  %v9162_v43 = vld [vmem:[#allocation41_spill] sm:$0xff]  ;;  %v1408_v61 = vmul.f32 %v1376_v10, %v5583_v23 }
 0x11f   : > { %9131 = vst [vmem:[#allocation51_spill] sm:$0xff] %v5579_v15  ;;  %v9154_v15 = vld [vmem:[#allocation28_spill] sm:$0xff]  ;;  %v1397_v35 = vmul.f32 %v9155_v60, %v1376_v10  ;;  %v1401_v45 = vmul.f32 %v9159_v26, %v1376_v10  ;;  %v9160_v1 = vld [vmem:[#allocation35_spill] sm:$0xff]  ;;  %v1404_v57 = vmul.f32 %v1376_v10, %v9162_v43  ;;  %v1407_v60 = vmul.f32 %v1376_v10, %v5581_v29 }
 0x120   : > { %9132 = vst [vmem:[#allocation2_spill] sm:$0xff] %v5581_v29  ;;  %v1396_v11 = vmul.f32 %v1376_v10, %v9154_v15  ;;  %v1402_v13 = vmul.f32 %v9160_v1, %v1376_v10  ;;  %v9161_v28 = vld [vmem:[#allocation40_spill] sm:$0xff]  ;;  %v9164_v40 = vld [vmem:[#allocation39_spill] sm:$0xff]  ;;  %v5622_v38 = vadd.f32 %v1377_v54, %v5479_v50  ;;  %v5625_v4 = vadd.f32 %v1378_v8, %v5483_v9 }
 0x121   : > { %9133 = vst [vmem:[#allocation52_spill] sm:$0xff] %v5583_v23  ;;  %v1403_v12 = vmul.f32 %v1376_v10, %v9161_v28  ;;  %v9163_v2 = vld [vmem:[#allocation36_spill] sm:$0xff]  ;;  %v1406_v15 = vmul.f32 %v9164_v40, %v1376_v10  ;;  %v5628_v1 = vadd.f32 %v1379_v46, %v5487_v18  ;;  %v5631_v28 = vadd.f32 %v1380_v3, %v5490_v0 }
 0x122   : > { %9134 = vst [vmem:[#allocation53_spill] sm:$0xff] %v5587_v31  ;;  %v9153_v31 = vld [vmem:[#allocation26_spill] sm:$0xff]  ;;  %v5637_v40 = vadd.f32 %v1382_v42, %v5496_v6  ;;  %v5643_v50 = vadd.f32 %v1384_v41, %v5502_v16  ;;  %v5646_v9 = vadd.f32 %v1385_v21, %v5505_v63  ;;  %v5649_v18 = vadd.f32 %v1386_v24, %v5508_v14 }
 0x123   : > { %v1395_v22 = vmul.f32 %v1376_v10, %v9153_v31  ;;  %v1405_v31 = vmul.f32 %v9163_v2, %v1376_v10  ;;  %v5634_v2 = vadd.f32 %v1381_v5, %v5493_v49  ;;  %v5640_v10 = vadd.f32 %v1383_v56, %v5499_v25 }
 0x124   : > { %9166 = vst [vmem:[#allocation56_spill] sm:$0xff] %v5643_v50  ;;  %v5652_v0 = vadd.f32 %v1387_v58, %v5511_v36  ;;  %v5655_v49 = vadd.f32 %v1388_v17, %v5514_v30  ;;  %v5658_v6 = vadd.f32 %v1389_v20, %v5517_v19  ;;  %v5661_v25 = vadd.f32 %v1390_v39, %v5520_v33 }
 0x125   : > { %9165 = vst [vmem:[#allocation54_spill] sm:$0xff] %v5640_v10  ;;  %v5664_v16 = vadd.f32 %v1391_v27, %v5523_v62  ;;  %v5667_v63 = vadd.f32 %v1392_v55, %v5526_v53  ;;  %v5670_v14 = vadd.f32 %v1393_v44, %v5529_v7  ;;  %v5673_v36 = vadd.f32 %v1394_v51, %v5532_v47  ;;  %v9180_v62 = vld [vmem:[#allocation43_spill] sm:$0xff]  ;;  %v9182_v53 = vld [vmem:[#allocation6_spill] sm:$0xff]  ;;  %v9194_v55 = vld [vmem:[#allocation48_spill] sm:$0xff] }
 0x126   : > { %9167 = vst [vmem:[#allocation57_spill] sm:$0xff] %v5646_v9  ;;  %v5676_v30 = vadd.f32 %v1395_v22, %v5535_v52  ;;  %v5679_v19 = vadd.f32 %v1396_v11, %v5538_v32  ;;  %v5682_v33 = vadd.f32 %v1397_v35, %v5541_v48  ;;  %v5685_v39 = vadd.f32 %v1398_v37, %v9180_v62  ;;  %v9184_v7 = vld [vmem:[#allocation7_spill] sm:$0xff]  ;;  %v9186_v47 = vld [vmem:[#allocation10_spill] sm:$0xff]  ;;  %v9188_v52 = vld [vmem:[#allocation44_spill] sm:$0xff] }
 0x127   : > { %9168 = vst [vmem:[#allocation58_spill] sm:$0xff] %v5649_v18  ;;  %v5688_v54 = vadd.f32 %v1399_v59, %v9182_v53  ;;  %v5691_v8 = vadd.f32 %v1400_v34, %v9184_v7  ;;  %v5694_v46 = vadd.f32 %v1401_v45, %v9186_v47  ;;  %v5697_v3 = vadd.f32 %v1402_v13, %v9188_v52  ;;  %v9190_v32 = vld [vmem:[#allocation45_spill] sm:$0xff]  ;;  %v9192_v48 = vld [vmem:[#allocation47_spill] sm:$0xff]  ;;  %v9198_v34 = vld [vmem:[#allocation50_spill] sm:$0xff] }
 0x128   : > { %9169 = vst [vmem:[#allocation59_spill] sm:$0xff] %v5652_v0  ;;  %v5700_v27 = vadd.f32 %v1403_v12, %v9190_v32  ;;  %v5703_v5 = vadd.f32 %v1404_v57, %v9192_v48  ;;  %v5706_v42 = vadd.f32 %v1405_v31, %v9194_v55  ;;  %v9196_v44 = vld [vmem:[#allocation49_spill] sm:$0xff]  ;;  %v5712_v51 = vadd.f32 %v1407_v60, %v9198_v34  ;;  %v9200_v45 = vld [vmem:[#allocation51_spill] sm:$0xff]  ;;  %v9204_v12 = vld [vmem:[#allocation8_spill] sm:$0xff] }
 0x129   : > { %9170 = vst [vmem:[#allocation60_spill] sm:$0xff] %v5655_v49  ;;  %v5709_v56 = vadd.f32 %v1406_v15, %v9196_v44  ;;  %v5715_v41 = vadd.f32 %v1408_v61, %v9200_v45  ;;  %v9202_v13 = vld [vmem:[#allocation53_spill] sm:$0xff]  ;;  %v9206_v31 = vld [vmem:[#allocation12_spill] sm:$0xff]  ;;  %v9208_v60 = vld [vmem:[#allocation66_spill] sm:$0xff] }
 0x12a   : > { %9171 = vst [vmem:[#allocation61_spill] sm:$0xff] %v5658_v6  ;;  %v9203_v22 = vld [vmem:[#allocation5_spill] sm:$0xff]  ;;  %v1444_v11 = vmul.f32 %v9204_v12, %v9202_v13  ;;  %v1446_v35 = vmul.f32 %v9202_v13, %v9206_v31  ;;  %v1448_v37 = vmul.f32 %v9202_v13, %v9208_v60  ;;  %v9210_v59 = vld [vmem:[#allocation11_spill] sm:$0xff]  ;;  %v9212_v7 = vld [vmem:[#allocation14_spill] sm:$0xff] }
 0x12b   : > { %9172 = vst [vmem:[#allocation62_spill] sm:$0xff] %v5661_v25  ;;  %v1443_v21 = vmul.f32 %v9203_v22, %v9202_v13  ;;  %v9205_v57 = vld [vmem:[#allocation65_spill] sm:$0xff]  ;;  %v5735_v20 = vmul.f32 %v9210_v59, %v9202_v13  ;;  %v9211_v62 = vld [vmem:[#allocation67_spill] sm:$0xff]  ;;  %v5743_v47 = vmul.f32 %v9202_v13, %v9212_v7  ;;  %v9213_v52 = vld [vmem:[#allocation16_spill] sm:$0xff] }
 0x12c   : > { %9173 = vst [vmem:[#allocation55_spill] sm:$0xff] %v5664_v16  ;;  %v1445_v24 = vmul.f32 %v9202_v13, %v9205_v57  ;;  %v9207_v15 = vld [vmem:[#allocation13_spill] sm:$0xff]  ;;  %v5739_v53 = vmul.f32 %v9202_v13, %v9211_v62  ;;  %v5747_v32 = vmul.f32 %v9202_v13, %v9213_v52  ;;  %v9214_v48 = vld [vmem:[#allocation68_spill] sm:$0xff]  ;;  %v9215_v44 = vld [vmem:[#allocation15_spill] sm:$0xff]  ;;  %v1540_v25 = vrot.slane %v1444_v11, 1 }
 0x12d   : > { %9174 = vst [vmem:[#allocation63_spill] sm:$0xff] %v5667_v63  ;;  %v1447_v58 = vmul.f32 %v9202_v13, %v9207_v15  ;;  %v9209_v61 = vld [vmem:[#allocation9_spill] sm:$0xff]  ;;  %v5751_v55 = vmul.f32 %v9202_v13, %v9214_v48  ;;  %v5755_v34 = vmul.f32 %v9215_v44, %v9202_v13  ;;  %v9219_v60 = vld [vmem:[#allocation20_spill] sm:$0xff]  ;;  %v9220_v15 = vld [vmem:[#allocation70_spill] sm:$0xff]  ;;  %v1539_v16 = vrot.slane %v1443_v21, 1 }
 0x12e   : > { %9175 = vst [vmem:[#allocation64_spill] sm:$0xff] %v5670_v14  ;;  %v5731_v17 = vmul.f32 %v9209_v61, %v9202_v13  ;;  %v9216_v45 = vld [vmem:[#allocation17_spill] sm:$0xff]  ;;  %v9218_v61 = vld [vmem:[#allocation19_spill] sm:$0xff]  ;;  %v5771_v48 = vmul.f32 %v9202_v13, %v9219_v60  ;;  %v5775_v44 = vmul.f32 %v9202_v13, %v9220_v15  ;;  %v9221_v31 = vld [vmem:[#allocation18_spill] sm:$0xff]  ;;  %v1547_v18 = vrot.slane %v1448_v37, 1 }
 0x12f   : > { %9176 = vst [vmem:[#allocation4_spill] sm:$0xff] %v5673_v36  ;;  %v5759_v62 = vmul.f32 %v9216_v45, %v9202_v13  ;;  %v9217_v59 = vld [vmem:[#allocation69_spill] sm:$0xff]  ;;  %v5767_v52 = vmul.f32 %v9202_v13, %v9218_v61  ;;  %v5779_v45 = vmul.f32 %v9221_v31, %v9202_v13  ;;  %v9223_v12 = vld [vmem:[#allocation71_spill] sm:$0xff]  ;;  %v9224_v22 = vld [vmem:[#allocation24_spill] sm:$0xff]  ;;  %v1545_v0 = vrot.slane %v1447_v58, 1 }
 0x130   : > { %9177 = vst [vmem:[#allocation3_spill] sm:$0xff] %v5676_v30  ;;  %v5763_v7 = vmul.f32 %v9202_v13, %v9217_v59  ;;  %v9222_v57 = vld [vmem:[#allocation21_spill] sm:$0xff]  ;;  %v5787_v61 = vmul.f32 %v9202_v13, %v9223_v12  ;;  %v5791_v60 = vmul.f32 %v9202_v13, %v9224_v22  ;;  %v9238_v30 = vld [vmem:[#allocation76_spill] sm:$0xff]  ;;  %v9239_v36 = vld [vmem:[#allocation35_spill] sm:$0xff]  ;;  %v5887_v11 = vmul.f32 %v9202_v13, %v5581_v29 }
 0x131   : > { %9178 = vst [vmem:[#allocation29_spill] sm:$0xff] %v5679_v19  ;;  %v5783_v59 = vmul.f32 %v9222_v57, %v9202_v13  ;;  %v9237_v19 = vld [vmem:[#allocation34_spill] sm:$0xff]  ;;  %v9240_v14 = vld [vmem:[#allocation77_spill] sm:$0xff]  ;;  %v9241_v63 = vld [vmem:[#allocation40_spill] sm:$0xff]  ;;  %v1552_v29 = vrot.slane %v5739_v53, 1  ;;  %v1565_v53 = vrot.slane %v5771_v48, 1 }
 0x132   : > { %9179 = vst [vmem:[#allocation30_spill] sm:$0xff] %v5682_v33  ;;  %v9236_v33 = vld [vmem:[#allocation33_spill] sm:$0xff]  ;;  %v9242_v6 = vld [vmem:[#allocation78_spill] sm:$0xff] }
 0x133   : > { %9181 = vst [vmem:[#allocation37_spill] sm:$0xff] %v5685_v39  ;;  %v9235_v39 = vld [vmem:[#allocation75_spill] sm:$0xff]  ;;  %v5871_v49 = vmul.f32 %v9202_v13, %v9242_v6 }
 0x134   : > { %9183 = vst [vmem:[#allocation38_spill] sm:$0xff] %v5688_v54  ;;  %v9234_v54 = vld [vmem:[#allocation31_spill] sm:$0xff] }
 0x135   : > { %9185 = vst [vmem:[#allocation43_spill] sm:$0xff] %v5691_v8  ;;  %v9233_v8 = vld [vmem:[#allocation27_spill] sm:$0xff] }
 0x136   : > { %9187 = vst [vmem:[#allocation6_spill] sm:$0xff] %v5694_v46  ;;  %v9232_v46 = vld [vmem:[#allocation74_spill] sm:$0xff] }
 0x137   : > { %9189 = vst [vmem:[#allocation7_spill] sm:$0xff] %v5697_v3  ;;  %v9231_v3 = vld [vmem:[#allocation28_spill] sm:$0xff] }
 0x138   : > { %9191 = vst [vmem:[#allocation10_spill] sm:$0xff] %v5700_v27  ;;  %v9230_v27 = vld [vmem:[#allocation26_spill] sm:$0xff] }
 0x139   : > { %9193 = vst [vmem:[#allocation44_spill] sm:$0xff] %v5703_v5  ;;  %v9229_v5 = vld [vmem:[#allocation73_spill] sm:$0xff] }
 0x13a   : > { %9195 = vst [vmem:[#allocation45_spill] sm:$0xff] %v5706_v42  ;;  %v9228_v42 = vld [vmem:[#allocation23_spill] sm:$0xff]  ;;  %v5811_v22 = vmul.f32 %v9202_v13, %v9229_v5  ;;  %v5831_v5 = vmul.f32 %v9234_v54, %v9202_v13  ;;  %v5851_v54 = vmul.f32 %v9159_v26, %v9202_v13  ;;  %v1542_v26 = vrot.slane %v1445_v24, 1 }
 0x13b   : > { %9197 = vst [vmem:[#allocation47_spill] sm:$0xff] %v5709_v56  ;;  %v9227_v56 = vld [vmem:[#allocation22_spill] sm:$0xff]  ;;  %v5807_v12 = vmul.f32 %v9228_v42, %v9202_v13  ;;  %v5827_v42 = vmul.f32 %v9233_v8, %v9202_v13  ;;  %v5847_v8 = vmul.f32 %v9202_v13, %v9238_v30  ;;  %v5867_v30 = vmul.f32 %v9202_v13, %v9162_v43 }
 0x13c   : > { %9199 = vst [vmem:[#allocation48_spill] sm:$0xff] %v5712_v51  ;;  %v9226_v51 = vld [vmem:[#allocation72_spill] sm:$0xff]  ;;  %v5803_v57 = vmul.f32 %v9227_v56, %v9202_v13  ;;  %v5823_v56 = vmul.f32 %v9202_v13, %v9232_v46  ;;  %v5843_v46 = vmul.f32 %v9202_v13, %v9237_v19  ;;  %v5863_v19 = vmul.f32 %v9202_v13, %v9241_v63  ;;  %v9244_v63 = vld [vmem:[#allocation39_spill] sm:$0xff]  ;;  %v9245_v43 = vld [vmem:[#allocation46_spill] sm:$0xff] }
 0x13d   : > { %9201 = vst [vmem:[#allocation49_spill] sm:$0xff] %v5715_v41  ;;  %v9225_v41 = vld [vmem:[#allocation25_spill] sm:$0xff]  ;;  %v5799_v31 = vmul.f32 %v9202_v13, %v9226_v51  ;;  %v5819_v51 = vmul.f32 %v9202_v13, %v9231_v3  ;;  %v5839_v3 = vmul.f32 %v9202_v13, %v9236_v33  ;;  %v5859_v33 = vmul.f32 %v9202_v13, %v9240_v14  ;;  %v9243_v14 = vld [vmem:[#allocation36_spill] sm:$0xff] }
 0x13e   : > { %v5795_v15 = vmul.f32 %v9202_v13, %v9225_v41  ;;  %v5815_v41 = vmul.f32 %v9202_v13, %v9230_v27  ;;  %v5835_v27 = vmul.f32 %v9202_v13, %v9235_v39  ;;  %v5855_v39 = vmul.f32 %v9239_v36, %v9202_v13 }
 0x13f   : > { %v1544_v36 = vrot.slane %v1446_v35, 1  ;;  %v5875_v9 = vmul.f32 %v9243_v14, %v9202_v13  ;;  %v5879_v50 = vmul.f32 %v9244_v63, %v9202_v13  ;;  %v5883_v21 = vmul.f32 %v9202_v13, %v9245_v43  ;;  %v9246_v35 = vld [vmem:[#allocation42_spill] sm:$0xff] }
 0x140   : > { %v5891_v24 = vmul.f32 %v9202_v13, %v5583_v23  ;;  %v9247_v58 = vunpack.c.l.bf16 %v9246_v35  ;;  %v1549_v63 = vrot.slane %v5731_v17, 1  ;;  %v1550_v14 = vrot.slane %v5735_v20, 1 }
 0x141   : > { %v5901_v43 = vsel %vm437_vm0, %v1539_v16, %v1540_v25  ;;  %v5904_v6 = vsel %vm437_vm0, %v1540_v25, %v1542_v26  ;;  %v1554_v23 = vrot.slane %v5743_v47, 1  ;;  %v5909_v10 = vsel %vm437_vm0, %v1544_v36, %v1545_v0 }
 0x142   : > { %v5896_v37 = vmul.f32 %v9202_v13, %v9247_v58  ;;  %v5912_v13 = vsel %vm437_vm0, %v1545_v0, %v1547_v18  ;;  %v1555_v17 = vrot.slane %v5747_v32, 1  ;;  %v1557_v20 = vrot.slane %v5751_v55, 1 }
 0x143   : > { %v1559_v16 = vrot.slane %v5755_v34, 1  ;;  %v1560_v58 = vrot.slane %v5759_v62, 1  ;;  %v1562_v26 = vrot.slane %v5763_v7, 1  ;;  %v1564_v25 = vrot.slane %v5767_v52, 1 }
 0x144   : > { %v1567_v36 = vrot.slane %v5775_v44, 1  ;;  %v1569_v47 = vrot.slane %v5779_v45, 1  ;;  %v1570_v18 = vrot.slane %v5783_v59, 1  ;;  %v1572_v0 = vrot.slane %v5787_v61, 1 }
 0x145   : > { %v1574_v32 = vrot.slane %v5791_v60, 1  ;;  %v1575_v55 = vrot.slane %v5795_v15, 1  ;;  %v1577_v62 = vrot.slane %v5799_v31, 1  ;;  %v1551_v7 = vsel %vm437_vm0, %v1549_v63, %v1550_v14 }
 0x146   : > { %v1553_v52 = vsel %vm437_vm0, %v1550_v14, %v1552_v29  ;;  %v1579_v48 = vrot.slane %v5803_v57, 1  ;;  %v1580_v44 = vrot.slane %v5807_v12, 1  ;;  %v1556_v34 = vsel %vm437_vm0, %v1554_v23, %v1555_v17 }
 0x147   : > { %v1558_v59 = vsel %vm437_vm0, %v1555_v17, %v1557_v20  ;;  %v1561_v61 = vsel %vm437_vm0, %v1559_v16, %v1560_v58  ;;  %v1582_v60 = vrot.slane %v5811_v22, 1  ;;  %v1563_v15 = vsel %vm437_vm0, %v1560_v58, %v1562_v26 }
 0x148   : > { %v1566_v31 = vsel %vm437_vm0, %v1564_v25, %v1565_v53  ;;  %v1568_v63 = vsel %vm437_vm0, %v1565_v53, %v1567_v36  ;;  %v1571_v29 = vsel %vm437_vm0, %v1569_v47, %v1570_v18  ;;  %v1573_v14 = vsel %vm437_vm0, %v1570_v18, %v1572_v0 }
 0x149   : > { %v1576_v12 = vsel %vm437_vm0, %v1574_v32, %v1575_v55  ;;  %v1578_v23 = vsel %vm437_vm0, %v1575_v55, %v1577_v62  ;;  %v1584_v57 = vrot.slane %v5815_v41, 1  ;;  %v1581_v45 = vsel %vm437_vm0, %v1579_v48, %v1580_v44 }
 0x14a   : > { %v1585_v22 = vrot.slane %v5819_v51, 1  ;;  %v1587_v17 = vrot.slane %v5823_v56, 1  ;;  %v1589_v20 = vrot.slane %v5827_v42, 1  ;;  %v1583_v16 = vsel %vm437_vm0, %v1580_v44, %v1582_v60 }
 0x14b   : > { %v1590_v58 = vrot.slane %v5831_v5, 1  ;;  %v1592_v26 = vrot.slane %v5835_v27, 1  ;;  %v1594_v25 = vrot.slane %v5839_v3, 1  ;;  %v1595_v53 = vrot.slane %v5843_v46, 1 }
 0x14c   : > { %v1597_v41 = vrot.slane %v5847_v8, 1  ;;  %v1599_v36 = vrot.slane %v5851_v54, 1  ;;  %v1600_v51 = vrot.slane %v5855_v39, 1  ;;  %v1602_v56 = vrot.slane %v5859_v33, 1 }
 0x14d   : > { %v1604_v42 = vrot.slane %v5863_v19, 1  ;;  %v1605_v47 = vrot.slane %v5867_v30, 1  ;;  %v1607_v5 = vrot.slane %v5871_v49, 1  ;;  %v1586_v27 = vsel %vm437_vm0, %v1584_v57, %v1585_v22 }
 0x14e   : > { %v1609_v3 = vrot.slane %v5875_v9, 1  ;;  %v1610_v46 = vrot.slane %v5879_v50, 1  ;;  %v1612_v8 = vrot.slane %v5883_v21, 1  ;;  %v1588_v54 = vsel %vm437_vm0, %v1585_v22, %v1587_v17  ;;  %v9252_v17 = vld [vmem:[#allocation57_spill] sm:$0xff] }
 0x14f   : > { %v1614_v39 = vrot.slane %v5887_v11, 1  ;;  %v1615_v33 = vrot.slane %v5891_v24, 1  ;;  %v1617_v19 = vrot.slane %v5896_v37, 1  ;;  %v1591_v30 = vsel %vm437_vm0, %v1589_v20, %v1590_v58 }
 0x150   : > { %v1593_v49 = vsel %vm437_vm0, %v1590_v58, %v1592_v26  ;;  %v1596_v18 = vsel %vm437_vm0, %v1594_v25, %v1595_v53  ;;  %v1598_v9 = vsel %vm437_vm0, %v1595_v53, %v1597_v41  ;;  %v1601_v50 = vsel %vm437_vm0, %v1599_v36, %v1600_v51 }
 0x151   : > { %v1603_v21 = vsel %vm437_vm0, %v1600_v51, %v1602_v56  ;;  %v1606_v0 = vsel %vm437_vm0, %v1604_v42, %v1605_v47  ;;  %v1608_v11 = vsel %vm437_vm0, %v1605_v47, %v1607_v5  ;;  %v1611_v24 = vsel %vm437_vm0, %v1609_v3, %v1610_v46  ;;  %v9278_v56 = vld [vmem:[#allocation37_spill] sm:$0xff]  ;;  %v9280_v42 = vld [vmem:[#allocation38_spill] sm:$0xff]  ;;  %v9282_v47 = vld [vmem:[#allocation43_spill] sm:$0xff] }
 0x152   : > { %v1613_v37 = vsel %vm437_vm0, %v1610_v46, %v1612_v8  ;;  %v5980_v32 = vadd.f32 %v5901_v43, %v5622_v38  ;;  %v5984_v55 = vadd.f32 %v5904_v6, %v5625_v4  ;;  %v1616_v62 = vsel %vm437_vm0, %v1614_v39, %v1615_v33  ;;  %v9248_v4 = vld [vmem:[#allocation54_spill] sm:$0xff]  ;;  %v9250_v6 = vld [vmem:[#allocation56_spill] sm:$0xff]  ;;  %v9286_v46 = vld [vmem:[#allocation7_spill] sm:$0xff] }
 0x153   : > { %v1618_v48 = vsel %vm437_vm0, %v1615_v33, %v1617_v19  ;;  %v5990_v44 = vadd.f32 %v5909_v10, %v5628_v1  ;;  %v5994_v60 = vadd.f32 %v5912_v13, %v5631_v28  ;;  %v5997_v57 = vadd.f32 %v1551_v7, %v5634_v2  ;;  %v9254_v1 = vld [vmem:[#allocation58_spill] sm:$0xff]  ;;  %v9256_v28 = vld [vmem:[#allocation59_spill] sm:$0xff]  ;;  %v9258_v2 = vld [vmem:[#allocation60_spill] sm:$0xff] }
 0x154   : > { %v6000_v43 = vadd.f32 %v1553_v52, %v5637_v40  ;;  %v6003_v38 = vadd.f32 %v1556_v34, %v9248_v4  ;;  %v6006_v22 = vadd.f32 %v1558_v59, %v9250_v6  ;;  %v6009_v20 = vadd.f32 %v1561_v61, %v9252_v17  ;;  %v9260_v40 = vld [vmem:[#allocation61_spill] sm:$0xff]  ;;  %v9262_v34 = vld [vmem:[#allocation62_spill] sm:$0xff]  ;;  %v9264_v59 = vld [vmem:[#allocation55_spill] sm:$0xff] }
 0x155   : > { %v6012_v10 = vadd.f32 %v1563_v15, %v9254_v1  ;;  %v6015_v13 = vadd.f32 %v1566_v31, %v9256_v28  ;;  %v6018_v7 = vadd.f32 %v1568_v63, %v9258_v2  ;;  %v6021_v52 = vadd.f32 %v1571_v29, %v9260_v40  ;;  %v9266_v61 = vld [vmem:[#allocation63_spill] sm:$0xff]  ;;  %v9268_v15 = vld [vmem:[#allocation64_spill] sm:$0xff]  ;;  %v9274_v29 = vld [vmem:[#allocation29_spill] sm:$0xff] }
 0x156   : > { %9249 = vst [vmem:[#allocation50_spill] sm:$0xff] %v6003_v38  ;;  %v6024_v58 = vadd.f32 %v1573_v14, %v9262_v34  ;;  %v6027_v26 = vadd.f32 %v1576_v12, %v9264_v59  ;;  %v6030_v25 = vadd.f32 %v1578_v23, %v9266_v61  ;;  %v6033_v53 = vadd.f32 %v1581_v45, %v9268_v15  ;;  %v9270_v31 = vld [vmem:[#allocation4_spill] sm:$0xff]  ;;  %v9272_v63 = vld [vmem:[#allocation3_spill] sm:$0xff]  ;;  %v9276_v12 = vld [vmem:[#allocation30_spill] sm:$0xff] }
 0x157   : > { %9251 = vst [vmem:[#allocation51_spill] sm:$0xff] %v6006_v22  ;;  %v6036_v41 = vadd.f32 %v1583_v16, %v9270_v31  ;;  %v6039_v36 = vadd.f32 %v1586_v27, %v9272_v63  ;;  %v6042_v51 = vadd.f32 %v1588_v54, %v9274_v29  ;;  %v6047_v14 = vld [vmem:[%s8417_s1 + $0x8] ss:$0 sm:$0xff]  ;;  %v6050_v23 = vadd.f32 %v1591_v30, %v9276_v12  ;;  %v9284_v27 = vld [vmem:[#allocation6_spill] sm:$0xff]  ;;  %v9290_v33 = vld [vmem:[#allocation44_spill] sm:$0xff] }
 0x158   : > { %9253 = vst [vmem:[#allocation53_spill] sm:$0xff] %v6009_v20  ;;  %v6053_v45 = vadd.f32 %v1593_v49, %v9278_v56  ;;  %v6056_v16 = vadd.f32 %v1596_v18, %v9280_v42  ;;  %v6059_v5 = vadd.f32 %v1598_v9, %v9282_v47  ;;  %v6062_v3 = vadd.f32 %v1601_v50, %v9284_v27  ;;  %v9288_v54 = vld [vmem:[#allocation10_spill] sm:$0xff]  ;;  %v9292_v30 = vld [vmem:[#allocation45_spill] sm:$0xff]  ;;  %v9294_v18 = vld [vmem:[#allocation47_spill] sm:$0xff] }
 0x159   : > { %9255 = vst [vmem:[#allocation42_spill] sm:$0xff] %v6012_v10  ;;  %v6065_v8 = vadd.f32 %v1603_v21, %v9286_v46  ;;  %v6068_v39 = vadd.f32 %v1606_v0, %v9288_v54  ;;  %v6071_v19 = vadd.f32 %v1608_v11, %v9290_v33  ;;  %v6074_v49 = vadd.f32 %v1611_v24, %v9292_v30  ;;  %v9296_v9 = vld [vmem:[#allocation48_spill] sm:$0xff]  ;;  %v9298_v50 = vld [vmem:[#allocation49_spill] sm:$0xff]  ;;  %v9307_v15 = vld [vmem:[#allocation11_spill] sm:$0xff] }
 0x15a   : > { %9257 = vst [vmem:[#allocation54_spill] sm:$0xff] %v6015_v13  ;;  %v6077_v4 = vadd.f32 %v1613_v37, %v9294_v18  ;;  %v6080_v6 = vadd.f32 %v1616_v62, %v9296_v9  ;;  %v6083_v17 = vadd.f32 %v1618_v48, %v9298_v50  ;;  %v9300_v21 = vld [vmem:[#allocation5_spill] sm:$0xff]  ;;  %v9301_v0 = vld [vmem:[#allocation8_spill] sm:$0xff]  ;;  %v9305_v62 = vld [vmem:[#allocation66_spill] sm:$0xff]  ;;  %v6103_v31 = vmul.f32 %v6047_v14, %v9307_v15 }
 0x15b   : > { %9259 = vst [vmem:[#allocation56_spill] sm:$0xff] %v6018_v7  ;;  %v1684_v1 = vmul.f32 %v6047_v14, %v9300_v21  ;;  %v1685_v28 = vmul.f32 %v6047_v14, %v9301_v0  ;;  %v9302_v11 = vld [vmem:[#allocation65_spill] sm:$0xff]  ;;  %v9303_v24 = vld [vmem:[#allocation12_spill] sm:$0xff]  ;;  %v1689_v59 = vmul.f32 %v6047_v14, %v9305_v62  ;;  %v9308_v63 = vld [vmem:[#allocation67_spill] sm:$0xff] }
 0x15c   : > { %9261 = vst [vmem:[#allocation57_spill] sm:$0xff] %v6021_v52  ;;  %v1686_v2 = vmul.f32 %v6047_v14, %v9302_v11  ;;  %v1687_v40 = vmul.f32 %v6047_v14, %v9303_v24  ;;  %v9304_v37 = vld [vmem:[#allocation13_spill] sm:$0xff]  ;;  %v6107_v29 = vmul.f32 %v6047_v14, %v9308_v63  ;;  %v9309_v12 = vld [vmem:[#allocation14_spill] sm:$0xff]  ;;  %v9310_v42 = vld [vmem:[#allocation16_spill] sm:$0xff] }
 0x15d   : > { %9263 = vst [vmem:[#allocation58_spill] sm:$0xff] %v6024_v58  ;;  %v1688_v34 = vmul.f32 %v6047_v14, %v9304_v37  ;;  %v9306_v48 = vld [vmem:[#allocation9_spill] sm:$0xff]  ;;  %v6111_v56 = vmul.f32 %v6047_v14, %v9309_v12  ;;  %v6115_v47 = vmul.f32 %v6047_v14, %v9310_v42  ;;  %v9311_v27 = vld [vmem:[#allocation68_spill] sm:$0xff]  ;;  %v9312_v54 = vld [vmem:[#allocation15_spill] sm:$0xff]  ;;  %v1788_v13 = vrot.slane %v1689_v59, 2 }
 0x15e   : > { %9265 = vst [vmem:[#allocation59_spill] sm:$0xff] %v6027_v26  ;;  %v6099_v61 = vmul.f32 %v6047_v14, %v9306_v48  ;;  %v6119_v46 = vmul.f32 %v6047_v14, %v9311_v27  ;;  %v6123_v33 = vmul.f32 %v6047_v14, %v9312_v54  ;;  %v9313_v30 = vld [vmem:[#allocation17_spill] sm:$0xff]  ;;  %v9315_v21 = vld [vmem:[#allocation19_spill] sm:$0xff]  ;;  %v9316_v11 = vld [vmem:[#allocation20_spill] sm:$0xff]  ;;  %v1781_v26 = vrot.slane %v1685_v28, 2 }
 0x15f   : > { %9267 = vst [vmem:[#allocation60_spill] sm:$0xff] %v6030_v25  ;;  %v6127_v18 = vmul.f32 %v6047_v14, %v9313_v30  ;;  %v9314_v9 = vld [vmem:[#allocation69_spill] sm:$0xff]  ;;  %v6135_v0 = vmul.f32 %v6047_v14, %v9315_v21  ;;  %v6139_v24 = vmul.f32 %v6047_v14, %v9316_v11  ;;  %v9317_v37 = vld [vmem:[#allocation70_spill] sm:$0xff]  ;;  %v9320_v42 = vld [vmem:[#allocation71_spill] sm:$0xff]  ;;  %v1780_v25 = vrot.slane %v1684_v1, 2 }
 0x160   : > { %9269 = vst [vmem:[#allocation61_spill] sm:$0xff] %v6033_v53  ;;  %v6131_v50 = vmul.f32 %v6047_v14, %v9314_v9  ;;  %v6143_v62 = vmul.f32 %v6047_v14, %v9317_v37  ;;  %v9318_v48 = vld [vmem:[#allocation18_spill] sm:$0xff]  ;;  %v9319_v63 = vld [vmem:[#allocation21_spill] sm:$0xff]  ;;  %v6155_v27 = vmul.f32 %v6047_v14, %v9320_v42  ;;  %v9321_v54 = vld [vmem:[#allocation24_spill] sm:$0xff]  ;;  %v1786_v7 = vrot.slane %v1688_v34, 2 }
 0x161   : > { %9271 = vst [vmem:[#allocation62_spill] sm:$0xff] %v6036_v41  ;;  %v6147_v15 = vmul.f32 %v6047_v14, %v9318_v48  ;;  %v6151_v12 = vmul.f32 %v6047_v14, %v9319_v63  ;;  %v6159_v30 = vmul.f32 %v6047_v14, %v9321_v54  ;;  %v9322_v9 = vld [vmem:[#allocation25_spill] sm:$0xff]  ;;  %v9323_v11 = vld [vmem:[#allocation72_spill] sm:$0xff]  ;;  %v9324_v48 = vld [vmem:[#allocation22_spill] sm:$0xff]  ;;  %v9347_v34 = vunpack.c.l.bf16 %v9246_v35 }
 0x162   : > { %9273 = vst [vmem:[#allocation55_spill] sm:$0xff] %v6039_v36  ;;  %v6163_v21 = vmul.f32 %v6047_v14, %v9322_v9  ;;  %v6167_v37 = vmul.f32 %v6047_v14, %v9323_v11  ;;  %v6171_v63 = vmul.f32 %v6047_v14, %v9324_v48  ;;  %v9338_v36 = vld [vmem:[#allocation77_spill] sm:$0xff]  ;;  %v9339_v41 = vld [vmem:[#allocation40_spill] sm:$0xff]  ;;  %v9341_v58 = vld [vmem:[#allocation78_spill] sm:$0xff]  ;;  %v6280_v35 = vsel %vm679_vm1, %v1786_v7, %v1788_v13 }
 0x163   : > { %9275 = vst [vmem:[#allocation63_spill] sm:$0xff] %v6042_v51  ;;  %v9337_v51 = vld [vmem:[#allocation35_spill] sm:$0xff]  ;;  %v9340_v53 = vld [vmem:[#allocation41_spill] sm:$0xff]  ;;  %v6239_v52 = vmul.f32 %v6047_v14, %v9341_v58  ;;  %v9345_v28 = vld [vmem:[#allocation2_spill] sm:$0xff]  ;;  %v6264_v59 = vmul.f32 %v6047_v14, %v9347_v34  ;;  %v1811_v13 = vrot.slane %v6151_v12, 2 }
 0x164   : > { %9277 = vst [vmem:[#allocation64_spill] sm:$0xff] %v6050_v23  ;;  %v9336_v23 = vld [vmem:[#allocation32_spill] sm:$0xff] }
 0x165   : > { %9279 = vst [vmem:[#allocation4_spill] sm:$0xff] %v6053_v45  ;;  %v9335_v45 = vld [vmem:[#allocation76_spill] sm:$0xff] }
 0x166   : > { %9281 = vst [vmem:[#allocation3_spill] sm:$0xff] %v6056_v16  ;;  %v9334_v16 = vld [vmem:[#allocation34_spill] sm:$0xff]  ;;  %v9346_v58 = vld [vmem:[#allocation52_spill] sm:$0xff] }
 0x167   : > { %9283 = vst [vmem:[#allocation29_spill] sm:$0xff] %v6059_v5  ;;  %v9333_v5 = vld [vmem:[#allocation33_spill] sm:$0xff] }
 0x168   : > { %9285 = vst [vmem:[#allocation30_spill] sm:$0xff] %v6062_v3  ;;  %v9332_v3 = vld [vmem:[#allocation75_spill] sm:$0xff] }
 0x169   : > { %9287 = vst [vmem:[#allocation37_spill] sm:$0xff] %v6065_v8  ;;  %v9331_v8 = vld [vmem:[#allocation31_spill] sm:$0xff] }
 0x16a   : > { %9289 = vst [vmem:[#allocation38_spill] sm:$0xff] %v6068_v39  ;;  %v9330_v39 = vld [vmem:[#allocation27_spill] sm:$0xff] }
 0x16b   : > { %9291 = vst [vmem:[#allocation43_spill] sm:$0xff] %v6071_v19  ;;  %v9329_v19 = vld [vmem:[#allocation74_spill] sm:$0xff] }
 0x16c   : > { %9293 = vst [vmem:[#allocation6_spill] sm:$0xff] %v6074_v49  ;;  %v9328_v49 = vld [vmem:[#allocation28_spill] sm:$0xff]  ;;  %v6191_v48 = vmul.f32 %v6047_v14, %v9329_v19  ;;  %v6211_v19 = vmul.f32 %v6047_v14, %v9334_v16  ;;  %v6231_v16 = vmul.f32 %v6047_v14, %v9339_v41  ;;  %v9343_v41 = vld [vmem:[#allocation39_spill] sm:$0xff] }
 0x16d   : > { %9295 = vst [vmem:[#allocation7_spill] sm:$0xff] %v6077_v4  ;;  %v9327_v4 = vld [vmem:[#allocation26_spill] sm:$0xff]  ;;  %v6187_v11 = vmul.f32 %v6047_v14, %v9328_v49  ;;  %v6207_v49 = vmul.f32 %v6047_v14, %v9333_v5  ;;  %v6227_v5 = vmul.f32 %v6047_v14, %v9338_v36  ;;  %v9342_v36 = vld [vmem:[#allocation36_spill] sm:$0xff]  ;;  %v6247_v20 = vmul.f32 %v6047_v14, %v9343_v41 }
 0x16e   : > { %9297 = vst [vmem:[#allocation10_spill] sm:$0xff] %v6080_v6  ;;  %v9326_v6 = vld [vmem:[#allocation73_spill] sm:$0xff]  ;;  %v6183_v9 = vmul.f32 %v6047_v14, %v9327_v4  ;;  %v6203_v4 = vmul.f32 %v6047_v14, %v9332_v3  ;;  %v6223_v3 = vmul.f32 %v6047_v14, %v9337_v51  ;;  %v1785_v51 = vrot.slane %v1687_v40, 2 }
 0x16f   : > { %9299 = vst [vmem:[#allocation44_spill] sm:$0xff] %v6083_v17  ;;  %v9325_v17 = vld [vmem:[#allocation23_spill] sm:$0xff]  ;;  %v6179_v54 = vmul.f32 %v6047_v14, %v9326_v6  ;;  %v6199_v6 = vmul.f32 %v6047_v14, %v9331_v8  ;;  %v6219_v8 = vmul.f32 %v6047_v14, %v9336_v23  ;;  %v1783_v23 = vrot.slane %v1686_v2, 2 }
 0x170   : > { %v6175_v42 = vmul.f32 %v6047_v14, %v9325_v17  ;;  %v6195_v17 = vmul.f32 %v6047_v14, %v9330_v39  ;;  %v6215_v39 = vmul.f32 %v6047_v14, %v9335_v45  ;;  %v6235_v45 = vmul.f32 %v6047_v14, %v9340_v53  ;;  %v9344_v53 = vld [vmem:[#allocation46_spill] sm:$0xff] }
 0x171   : > { %v6243_v10 = vmul.f32 %v6047_v14, %v9342_v36  ;;  %v6251_v1 = vmul.f32 %v6047_v14, %v9344_v53  ;;  %v6255_v2 = vmul.f32 %v6047_v14, %v9345_v28  ;;  %v6259_v40 = vmul.f32 %v6047_v14, %v9346_v58 }
 0x172   : > { %v1790_v36 = vrot.slane %v6099_v61, 2  ;;  %v1791_v41 = vrot.slane %v6103_v31, 2  ;;  %v6269_v53 = vsel %vm679_vm1, %v1780_v25, %v1781_v26  ;;  %v6272_v22 = vsel %vm679_vm1, %v1781_v26, %v1783_v23 }
 0x173   : > { %v1793_v28 = vrot.slane %v6107_v29, 2  ;;  %v1795_v58 = vrot.slane %v6111_v56, 2  ;;  %v6277_v38 = vsel %vm679_vm1, %v1785_v51, %v1786_v7  ;;  %v1796_v14 = vrot.slane %v6115_v47, 2 }
 0x174   : > { %v1798_v61 = vrot.slane %v6119_v46, 2  ;;  %v1800_v25 = vrot.slane %v6123_v33, 2  ;;  %v1801_v31 = vrot.slane %v6127_v18, 2  ;;  %v1803_v26 = vrot.slane %v6131_v50, 2 }
 0x175   : > { %v1805_v29 = vrot.slane %v6135_v0, 2  ;;  %v1806_v56 = vrot.slane %v6139_v24, 2  ;;  %v1808_v23 = vrot.slane %v6143_v62, 2  ;;  %v1810_v51 = vrot.slane %v6147_v15, 2 }
 0x176   : > { %v1813_v7 = vrot.slane %v6155_v27, 2  ;;  %v1815_v47 = vrot.slane %v6159_v30, 2  ;;  %v1816_v46 = vrot.slane %v6163_v21, 2  ;;  %v1818_v33 = vrot.slane %v6167_v37, 2 }
 0x177   : > { %v1792_v18 = vsel %vm679_vm1, %v1790_v36, %v1791_v41  ;;  %v1794_v50 = vsel %vm679_vm1, %v1791_v41, %v1793_v28  ;;  %v1820_v0 = vrot.slane %v6171_v63, 2  ;;  %v1821_v24 = vrot.slane %v6175_v42, 2 }
 0x178   : > { %v1797_v62 = vsel %vm679_vm1, %v1795_v58, %v1796_v14  ;;  %v1799_v15 = vsel %vm679_vm1, %v1796_v14, %v1798_v61  ;;  %v1802_v12 = vsel %vm679_vm1, %v1800_v25, %v1801_v31  ;;  %v1823_v27 = vrot.slane %v6179_v54, 2 }
 0x179   : > { %v1804_v30 = vsel %vm679_vm1, %v1801_v31, %v1803_v26  ;;  %v1807_v21 = vsel %vm679_vm1, %v1805_v29, %v1806_v56  ;;  %v1809_v37 = vsel %vm679_vm1, %v1806_v56, %v1808_v23  ;;  %v1812_v34 = vsel %vm679_vm1, %v1810_v51, %v1811_v13 }
 0x17a   : > { %v1814_v63 = vsel %vm679_vm1, %v1811_v13, %v1813_v7  ;;  %v1817_v42 = vsel %vm679_vm1, %v1815_v47, %v1816_v46  ;;  %v1819_v36 = vsel %vm679_vm1, %v1816_v46, %v1818_v33  ;;  %v1825_v41 = vrot.slane %v6183_v9, 2 }
 0x17b   : > { %v1822_v28 = vsel %vm679_vm1, %v1820_v0, %v1821_v24  ;;  %v1826_v54 = vrot.slane %v6187_v11, 2  ;;  %v1828_v58 = vrot.slane %v6191_v48, 2  ;;  %v1830_v14 = vrot.slane %v6195_v17, 2 }
 0x17c   : > { %v1824_v61 = vsel %vm679_vm1, %v1821_v24, %v1823_v27  ;;  %v1831_v25 = vrot.slane %v6199_v6, 2  ;;  %v1833_v31 = vrot.slane %v6203_v4, 2  ;;  %v1835_v26 = vrot.slane %v6207_v49, 2 }
 0x17d   : > { %v1836_v29 = vrot.slane %v6211_v19, 2  ;;  %v1838_v9 = vrot.slane %v6215_v39, 2  ;;  %v1840_v56 = vrot.slane %v6219_v8, 2  ;;  %v1841_v11 = vrot.slane %v6223_v3, 2 }
 0x17e   : > { %v1843_v48 = vrot.slane %v6227_v5, 2  ;;  %v1845_v17 = vrot.slane %v6231_v16, 2  ;;  %v1846_v23 = vrot.slane %v6235_v45, 2  ;;  %v1848_v6 = vrot.slane %v6239_v52, 2 }
 0x17f   : > { %v1827_v4 = vsel %vm679_vm1, %v1825_v41, %v1826_v54  ;;  %v1850_v49 = vrot.slane %v6243_v10, 2  ;;  %v1851_v19 = vrot.slane %v6247_v20, 2  ;;  %v1853_v39 = vrot.slane %v6251_v1, 2 }
 0x180   : > { %v1829_v8 = vsel %vm679_vm1, %v1826_v54, %v1828_v58  ;;  %v1855_v3 = vrot.slane %v6255_v2, 2  ;;  %v1856_v5 = vrot.slane %v6259_v40, 2  ;;  %v1858_v16 = vrot.slane %v6264_v59, 2  ;;  %v9348_v54 = vld [vmem:[#allocation50_spill] sm:$0xff] }
 0x181   : > { %v1832_v45 = vsel %vm679_vm1, %v1830_v14, %v1831_v25  ;;  %v1834_v52 = vsel %vm679_vm1, %v1831_v25, %v1833_v31  ;;  %v1837_v51 = vsel %vm679_vm1, %v1835_v26, %v1836_v29  ;;  %v1839_v10 = vsel %vm679_vm1, %v1836_v29, %v1838_v9  ;;  %v9350_v14 = vld [vmem:[#allocation53_spill] sm:$0xff]  ;;  %v9352_v31 = vld [vmem:[#allocation54_spill] sm:$0xff]  ;;  %v9353_v29 = vld [vmem:[#allocation56_spill] sm:$0xff] }
 0x182   : > { %v1842_v20 = vsel %vm679_vm1, %v1840_v56, %v1841_v11  ;;  %v1844_v1 = vsel %vm679_vm1, %v1841_v11, %v1843_v48  ;;  %v1847_v13 = vsel %vm679_vm1, %v1845_v17, %v1846_v23  ;;  %v1849_v2 = vsel %vm679_vm1, %v1846_v23, %v1848_v6  ;;  %v9355_v56 = vld [vmem:[#allocation58_spill] sm:$0xff]  ;;  %v9360_v48 = vld [vmem:[#allocation55_spill] sm:$0xff]  ;;  %v9363_v23 = vld [vmem:[#allocation4_spill] sm:$0xff] }
 0x183   : > { %v1852_v40 = vsel %vm679_vm1, %v1850_v49, %v1851_v19  ;;  %v1854_v59 = vsel %vm679_vm1, %v1851_v19, %v1853_v39  ;;  %v1892_v7 = vadd.f32 %v6269_v53, %v5980_v32  ;;  %v1893_v47 = vadd.f32 %v6272_v22, %v5984_v55  ;;  %v9349_v32 = vld [vmem:[#allocation51_spill] sm:$0xff]  ;;  %v9351_v22 = vld [vmem:[#allocation42_spill] sm:$0xff]  ;;  %v9365_v49 = vld [vmem:[#allocation29_spill] sm:$0xff] }
 0x184   : > { %v1857_v46 = vsel %vm679_vm1, %v1855_v3, %v1856_v5  ;;  %v1859_v33 = vsel %vm679_vm1, %v1856_v5, %v1858_v16  ;;  %v1894_v0 = vadd.f32 %v6277_v38, %v5990_v44  ;;  %v1895_v24 = vadd.f32 %v6280_v35, %v5994_v60  ;;  %v9354_v44 = vld [vmem:[#allocation57_spill] sm:$0xff]  ;;  %v9356_v35 = vld [vmem:[#allocation59_spill] sm:$0xff]  ;;  %v9359_v11 = vld [vmem:[#allocation62_spill] sm:$0xff] }
 0x185   : > { %v1896_v27 = vadd.f32 %v1792_v18, %v5997_v57  ;;  %v1897_v41 = vadd.f32 %v1794_v50, %v6000_v43  ;;  %v1898_v58 = vadd.f32 %v1797_v62, %v9348_v54  ;;  %v1899_v53 = vadd.f32 %v1799_v15, %v9349_v32  ;;  %v9357_v18 = vld [vmem:[#allocation60_spill] sm:$0xff]  ;;  %v9358_v50 = vld [vmem:[#allocation61_spill] sm:$0xff]  ;;  %v9361_v17 = vld [vmem:[#allocation63_spill] sm:$0xff] }
 0x186   : > { %v1900_v55 = vadd.f32 %v1802_v12, %v9350_v14  ;;  %v1901_v25 = vadd.f32 %v1804_v30, %v9351_v22  ;;  %v1902_v26 = vadd.f32 %v1807_v21, %v9352_v31  ;;  %v1903_v9 = vadd.f32 %v1809_v37, %v9353_v29  ;;  %v3520_v21 = vld [vmem:[%s8418_s2] ss:$0 sm:$0xff]  ;;  %v9362_v37 = vld [vmem:[#allocation64_spill] sm:$0xff]  ;;  %v9364_v6 = vld [vmem:[#allocation3_spill] sm:$0xff] }
 0x187   : > { %v1904_v38 = vadd.f32 %v1812_v34, %v9354_v44  ;;  %v1905_v60 = vadd.f32 %v1814_v63, %v9355_v56  ;;  %v1906_v57 = vadd.f32 %v1817_v42, %v9356_v35  ;;  %v1907_v43 = vadd.f32 %v1819_v36, %v9357_v18  ;;  %v9366_v19 = vld [vmem:[#allocation30_spill] sm:$0xff]  ;;  %v9367_v39 = vld [vmem:[#allocation37_spill] sm:$0xff]  ;;  %v9369_v5 = vld [vmem:[#allocation43_spill] sm:$0xff] }
 0x188   : > { %v1908_v62 = vadd.f32 %v1822_v28, %v9358_v50  ;;  %v1909_v15 = vadd.f32 %v1824_v61, %v9359_v11  ;;  %v1910_v12 = vadd.f32 %v1827_v4, %v9360_v48  ;;  %v1911_v30 = vadd.f32 %v1829_v8, %v9361_v17  ;;  %v9368_v3 = vld [vmem:[#allocation38_spill] sm:$0xff]  ;;  %v9371_v32 = vld [vmem:[#allocation7_spill] sm:$0xff]  ;;  %v9373_v31 = vld [vmem:[#allocation44_spill] sm:$0xff] }
 0x189   : > { %v1912_v34 = vadd.f32 %v1832_v45, %v9362_v37  ;;  %v1913_v63 = vadd.f32 %v1834_v52, %v9363_v23  ;;  %v1914_v42 = vadd.f32 %v1837_v51, %v9364_v6  ;;  %v1915_v36 = vadd.f32 %v1839_v10, %v9365_v49  ;;  %v9370_v16 = vld [vmem:[#allocation6_spill] sm:$0xff] }
 0x18a   : > { %v1916_v28 = vadd.f32 %v1842_v20, %v9366_v19  ;;  %v1917_v61 = vadd.f32 %v1844_v1, %v9367_v39  ;;  %v1918_v4 = vadd.f32 %v1847_v13, %v9368_v3  ;;  %v1919_v8 = vadd.f32 %v1849_v2, %v9369_v5  ;;  %v9372_v22 = vld [vmem:[#allocation10_spill] sm:$0xff] }
 0x18b   : > { %v1920_v54 = vadd.f32 %v1852_v40, %v9370_v16  ;;  %v1921_v14 = vadd.f32 %v1854_v59, %v9371_v32  ;;  %v1922_v45 = vadd.f32 %v1857_v46, %v9372_v22  ;;  %v1923_v52 = vadd.f32 %v1859_v33, %v9373_v31 }
 0x18c   : > { %v6387_v29 = vadd.f32 %v3520_v21, %v1892_v7  ;;  %v6389_v51 = vadd.f32 %v3520_v21, %v1893_v47  ;;  %v6391_v10 = vadd.f32 %v3520_v21, %v1894_v0  ;;  %v6393_v20 = vadd.f32 %v3520_v21, %v1895_v24 }
 0x18d   : > { %v6395_v1 = vadd.f32 %v3520_v21, %v1896_v27  ;;  %v6397_v13 = vadd.f32 %v3520_v21, %v1897_v41  ;;  %v6399_v2 = vadd.f32 %v3520_v21, %v1898_v58  ;;  %v6401_v40 = vadd.f32 %v3520_v21, %v1899_v53 }
 0x18e   : > { %v6403_v59 = vadd.f32 %v3520_v21, %v1900_v55  ;;  %v6405_v46 = vadd.f32 %v3520_v21, %v1901_v25  ;;  %v6407_v7 = vadd.f32 %v3520_v21, %v1902_v26  ;;  %v6409_v47 = vadd.f32 %v3520_v21, %v1903_v9 }
 0x18f   : > { %v6411_v33 = vadd.f32 %v3520_v21, %v1904_v38  ;;  %v6413_v0 = vadd.f32 %v3520_v21, %v1905_v60  ;;  %v6415_v24 = vadd.f32 %v3520_v21, %v1906_v57  ;;  %v6417_v27 = vadd.f32 %v3520_v21, %v1907_v43 }
 0x190   : > { %v6419_v41 = vadd.f32 %v3520_v21, %v1908_v62  ;;  %v6421_v58 = vadd.f32 %v3520_v21, %v1909_v15  ;;  %v6423_v53 = vadd.f32 %v3520_v21, %v1910_v12  ;;  %v6425_v55 = vadd.f32 %v3520_v21, %v1911_v30 }
 0x191   : > { %v6427_v25 = vadd.f32 %v3520_v21, %v1912_v34  ;;  %v6429_v26 = vadd.f32 %v3520_v21, %v1913_v63  ;;  %v6431_v9 = vadd.f32 %v3520_v21, %v1914_v42  ;;  %v6433_v44 = vadd.f32 %v3520_v21, %v1915_v36 }
 0x192   : > { %v6435_v38 = vadd.f32 %v3520_v21, %v1916_v28  ;;  %v6437_v56 = vadd.f32 %v3520_v21, %v1917_v61  ;;  %v6439_v60 = vadd.f32 %v3520_v21, %v1918_v4  ;;  %v6441_v35 = vadd.f32 %v3520_v21, %v1919_v8 }
 0x193   : > { %v6443_v57 = vadd.f32 %v3520_v21, %v1920_v54  ;;  %v6445_v18 = vadd.f32 %v3520_v21, %v1921_v14  ;;  %v6447_v43 = vadd.f32 %v3520_v21, %v1922_v45  ;;  %v6449_v50 = vadd.f32 %v3520_v21, %v1923_v52 }
 0x194   : > { %v6452_v62 = vmul.f32 0.5, %v6387_v29  ;;  %v6455_v11 = vmul.f32 0.5, %v6389_v51  ;;  %v6458_v15 = vmul.f32 0.5, %v6391_v10  ;;  %v6461_v48 = vmul.f32 0.5, %v6393_v20 }
 0x195   : > { %v6464_v12 = vmul.f32 0.5, %v6395_v1  ;;  %v6467_v17 = vmul.f32 0.5, %v6397_v13  ;;  %v6470_v30 = vmul.f32 0.5, %v6399_v2  ;;  %v6473_v21 = vmul.f32 0.5, %v6401_v40 }
 0x196   : > { %9374 = vst [vmem:[#allocation45_spill] sm:$0xff] %v6452_v62  ;;  %v6476_v37 = vmul.f32 0.5, %v6403_v59  ;;  %v6479_v34 = vmul.f32 0.5, %v6405_v46  ;;  %v6482_v23 = vmul.f32 0.5, %v6407_v7  ;;  %v6485_v63 = vmul.f32 0.5, %v6409_v47 }
 0x197   : > { %9375 = vst [vmem:[#allocation47_spill] sm:$0xff] %v6455_v11  ;;  %v6488_v6 = vmul.f32 0.5, %v6411_v33  ;;  %v6491_v42 = vmul.f32 0.5, %v6413_v0  ;;  %v6494_v49 = vmul.f32 0.5, %v6415_v24  ;;  %v6497_v36 = vmul.f32 0.5, %v6417_v27 }
 0x198   : > { %9376 = vst [vmem:[#allocation48_spill] sm:$0xff] %v6458_v15  ;;  %v6500_v19 = vmul.f32 0.5, %v6419_v41  ;;  %v6503_v28 = vmul.f32 0.5, %v6421_v58  ;;  %v6506_v39 = vmul.f32 0.5, %v6423_v53  ;;  %v6509_v61 = vmul.f32 0.5, %v6425_v55 }
 0x199   : > { %9377 = vst [vmem:[#allocation49_spill] sm:$0xff] %v6461_v48  ;;  %v6512_v3 = vmul.f32 0.5, %v6427_v25  ;;  %v6515_v4 = vmul.f32 0.5, %v6429_v26  ;;  %v6518_v5 = vmul.f32 0.5, %v6431_v9  ;;  %v6521_v8 = vmul.f32 0.5, %v6433_v44 }
 0x19a   : > { %9378 = vst [vmem:[#allocation5_spill] sm:$0xff] %v6464_v12  ;;  %v6524_v16 = vmul.f32 0.5, %v6435_v38  ;;  %v6527_v54 = vmul.f32 0.5, %v6437_v56  ;;  %v6530_v32 = vmul.f32 0.5, %v6439_v60  ;;  %v6533_v14 = vmul.f32 0.5, %v6441_v35 }
 0x19b   : > { %9379 = vst [vmem:[#allocation8_spill] sm:$0xff] %v6467_v17  ;;  %v6536_v22 = vmul.f32 0.5, %v6443_v57  ;;  %v6539_v45 = vmul.f32 0.5, %v6445_v18  ;;  %v6542_v31 = vmul.f32 0.5, %v6447_v43  ;;  %v6545_v52 = vmul.f32 0.5, %v6449_v50 }
 0x19c   : > { %9380 = vst [vmem:[#allocation65_spill] sm:$0xff] %v6470_v30 }
 0x19d   : > { %9381 = vst [vmem:[#allocation12_spill] sm:$0xff] %v6473_v21 }
 0x19e   : > { %9382 = vst [vmem:[#allocation13_spill] sm:$0xff] %v6476_v37 }
 0x19f   : > { %9383 = vst [vmem:[#allocation66_spill] sm:$0xff] %v6479_v34 }
 0x1a0   : > { %9384 = vst [vmem:[#allocation9_spill] sm:$0xff] %v6482_v23 }
 0x1a1   : > { %9385 = vst [vmem:[#allocation11_spill] sm:$0xff] %v6485_v63 }
 0x1a2   : > { %9386 = vst [vmem:[#allocation67_spill] sm:$0xff] %v6488_v6 }
 0x1a3   : > { %9387 = vst [vmem:[#allocation14_spill] sm:$0xff] %v6491_v42 }
 0x1a4   : > { %9388 = vst [vmem:[#allocation16_spill] sm:$0xff] %v6494_v49 }
 0x1a5   : > { %9389 = vst [vmem:[#allocation68_spill] sm:$0xff] %v6497_v36 }
 0x1a6   : > { %9390 = vst [vmem:[#allocation15_spill] sm:$0xff] %v6500_v19 }
 0x1a7   : > { %9391 = vst [vmem:[#allocation17_spill] sm:$0xff] %v6503_v28 }
 0x1a8   : > { %9392 = vst [vmem:[#allocation69_spill] sm:$0xff] %v6506_v39 }
 0x1a9   : > { %9393 = vst [vmem:[#allocation19_spill] sm:$0xff] %v6509_v61 }
 0x1aa   : > { %9394 = vst [vmem:[#allocation20_spill] sm:$0xff] %v6512_v3 }
 0x1ab   : > { %9395 = vst [vmem:[#allocation70_spill] sm:$0xff] %v6515_v4 }
 0x1ac   : > { %9396 = vst [vmem:[#allocation18_spill] sm:$0xff] %v6518_v5 }
 0x1ad   : > { %9397 = vst [vmem:[#allocation21_spill] sm:$0xff] %v6521_v8 }
 0x1ae   : > { %9398 = vst [vmem:[#allocation71_spill] sm:$0xff] %v6524_v16 }
 0x1af   : > { %9399 = vst [vmem:[#allocation24_spill] sm:$0xff] %v6527_v54  ;;  %v6548_v54 = vmul.f32 0.70710677, %v6387_v29  ;;  %v6569_v29 = vmul.f32 0.70710677, %v6401_v40 }
 0x1b0   : > { %9400 = vst [vmem:[#allocation25_spill] sm:$0xff] %v6530_v32  ;;  %v6551_v32 = vmul.f32 0.70710677, %v6389_v51  ;;  %v6572_v51 = vmul.f32 0.70710677, %v6403_v59 }
 0x1b1   : > { %9401 = vst [vmem:[#allocation72_spill] sm:$0xff] %v6533_v14  ;;  %v6554_v14 = vmul.f32 0.70710677, %v6391_v10  ;;  %v6575_v10 = vmul.f32 0.70710677, %v6405_v46  ;;  %vm2024_vm2 = vcmp.lt.f32.partialorder %v6548_v54, 0.0 }
 0x1b2   : > { %9402 = vst [vmem:[#allocation22_spill] sm:$0xff] %v6536_v22  ;;  %v6557_v22 = vmul.f32 0.70710677, %v6393_v20  ;;  %v6578_v20 = vmul.f32 0.70710677, %v6407_v7  ;;  %vm2025_vm3 = vcmp.lt.f32.partialorder %v6551_v32, 0.0 }
 0x1b3   : > { %9403 = vst [vmem:[#allocation23_spill] sm:$0xff] %v6539_v45  ;;  %v6560_v45 = vmul.f32 0.70710677, %v6395_v1  ;;  %v6581_v1 = vmul.f32 0.70710677, %v6409_v47  ;;  %vm2026_vm4 = vcmp.lt.f32.partialorder %v6554_v14, 0.0 }
 0x1b4   : > { %9404 = vst [vmem:[#allocation73_spill] sm:$0xff] %v6542_v31  ;;  %v6563_v31 = vmul.f32 0.70710677, %v6397_v13  ;;  %v6584_v13 = vmul.f32 0.70710677, %v6411_v33  ;;  %vm2027_vm5 = vcmp.lt.f32.partialorder %v6557_v22, 0.0 }
 0x1b5   : > { %9405 = vst [vmem:[#allocation26_spill] sm:$0xff] %v6545_v52  ;;  %v6566_v52 = vmul.f32 0.70710677, %v6399_v2  ;;  %v6587_v2 = vmul.f32 0.70710677, %v6413_v0  ;;  %vm2028_vm6 = vcmp.lt.f32.partialorder %v6560_v45, 0.0 }
 0x1b6   : > { %v6590_v40 = vmul.f32 0.70710677, %v6415_v24  ;;  %v6593_v59 = vmul.f32 0.70710677, %v6417_v27  ;;  %v6596_v46 = vmul.f32 0.70710677, %v6419_v41 }
 0x1b7   : > { %v6599_v7 = vmul.f32 0.70710677, %v6421_v58  ;;  %v6602_v47 = vmul.f32 0.70710677, %v6423_v53  ;;  %v6605_v33 = vmul.f32 0.70710677, %v6425_v55 }
 0x1b8   : > { %v6608_v0 = vmul.f32 0.70710677, %v6427_v25  ;;  %v6611_v24 = vmul.f32 0.70710677, %v6429_v26  ;;  %v6614_v27 = vmul.f32 0.70710677, %v6431_v9 }
 0x1b9   : > { %v6617_v41 = vmul.f32 0.70710677, %v6433_v44  ;;  %v6620_v58 = vmul.f32 0.70710677, %v6435_v38  ;;  %v6623_v53 = vmul.f32 0.70710677, %v6437_v56 }
 0x1ba   : > { %v6626_v55 = vmul.f32 0.70710677, %v6439_v60  ;;  %v6629_v25 = vmul.f32 0.70710677, %v6441_v35  ;;  %v6632_v26 = vmul.f32 0.70710677, %v6443_v57 }
 0x1bb   : > { %v6635_v9 = vmul.f32 0.70710677, %v6445_v18  ;;  %v6638_v44 = vmul.f32 0.70710677, %v6447_v43  ;;  %v6641_v38 = vmul.f32 0.70710677, %v6449_v50 }
 0x1bc   : > { %vm2029_vm7 = vcmp.lt.f32.partialorder %v6563_v31, 0.0  ;;  %vm2042_vm10 = vcmp.lt.f32.partialorder %v6602_v47, 0.0  ;;  %vm2043_vm11 = vcmp.lt.f32.partialorder %v6605_v33, 0.0  ;;  %vm2044_vm12 = vcmp.lt.f32.partialorder %v6608_v0, 0.0 }
 0x1bd   : > { %vm2045_vm13 = vcmp.lt.f32.partialorder %v6611_v24, 0.0  ;;  %vm2046_vm14 = vcmp.lt.f32.partialorder %v6614_v27, 0.0  ;;  %vm2047_vm15 = vcmp.lt.f32.partialorder %v6617_v41, 0.0  ;;  %vm2048_vm0 = vcmp.lt.f32.partialorder %v6620_v58, 0.0 }
 0x1be   : > { %vm2049_vm1 = vcmp.lt.f32.partialorder %v6623_v53, 0.0  ;;  %vm2050_vm8 = vcmp.lt.f32.partialorder %v6626_v55, 0.0  ;;  %vm2051_vm9 = vcmp.lt.f32.partialorder %v6629_v25, 0.0  ;;  %v6672_v56 = vand.u32 2147483647, %v6548_v54 }
 0x1bf   : > { %v8531_v60 = vmov 1.0   ;;  %v6815_v15 = vand.u32 2147483647, %v6551_v32  ;;  %v6818_v11 = vand.u32 2147483647, %v6554_v14 }
 0x1c0   : > { %9406 = vst [vmem:[#allocation28_spill] sm:$0xff] %v6672_v56  ;;  %v6677_v35 = vsel %vm2024_vm2, -1.0, %v8531_v60  ;;  %v6682_v57 = vsel %vm2025_vm3, -1.0, %v8531_v60  ;;  %v6687_v18 = vsel %vm2026_vm4, -1.0, %v8531_v60  ;;  %v6692_v43 = vsel %vm2027_vm5, -1.0, %v8531_v60 }
 0x1c1   : > { %9407 = vst [vmem:[#allocation74_spill] sm:$0xff] %v6677_v35  ;;  %v6697_v50 = vsel %vm2028_vm6, -1.0, %v8531_v60  ;;  %v6702_v54 = vsel %vm2029_vm7, -1.0, %v8531_v60  ;;  %vm9413_vm2 = vcmp.lt.f32.partialorder %v6566_v52, 0.0  ;;  %vm9415_vm3 = vcmp.lt.f32.partialorder %v6569_v29, 0.0 }
 0x1c2   : > { %9408 = vst [vmem:[#allocation27_spill] sm:$0xff] %v6682_v57  ;;  %v6707_v16 = vsel %vm9413_vm2, -1.0, %v8531_v60  ;;  %v6712_v8 = vsel %vm9415_vm3, -1.0, %v8531_v60  ;;  %vm9417_vm4 = vcmp.lt.f32.partialorder %v6572_v51, 0.0  ;;  %vm9419_vm5 = vcmp.lt.f32.partialorder %v6575_v10, 0.0 }
 0x1c3   : > { %9409 = vst [vmem:[#allocation31_spill] sm:$0xff] %v6687_v18  ;;  %v6717_v5 = vsel %vm9417_vm4, -1.0, %v8531_v60  ;;  %v6722_v4 = vsel %vm9419_vm5, -1.0, %v8531_v60  ;;  %vm9421_vm6 = vcmp.lt.f32.partialorder %v6578_v20, 0.0  ;;  %vm9423_vm7 = vcmp.lt.f32.partialorder %v6581_v1, 0.0 }
 0x1c4   : > { %9410 = vst [vmem:[#allocation75_spill] sm:$0xff] %v6692_v43  ;;  %v6727_v3 = vsel %vm9421_vm6, -1.0, %v8531_v60  ;;  %v6732_v61 = vsel %vm9423_vm7, -1.0, %v8531_v60  ;;  %vm9425_vm2 = vcmp.lt.f32.partialorder %v6584_v13, 0.0  ;;  %vm9427_vm3 = vcmp.lt.f32.partialorder %v6587_v2, 0.0 }
 0x1c5   : > { %9411 = vst [vmem:[#allocation33_spill] sm:$0xff] %v6697_v50  ;;  %v6737_v39 = vsel %vm9425_vm2, -1.0, %v8531_v60  ;;  %v6742_v28 = vsel %vm9427_vm3, -1.0, %v8531_v60  ;;  %vm9429_vm4 = vcmp.lt.f32.partialorder %v6590_v40, 0.0  ;;  %vm9431_vm5 = vcmp.lt.f32.partialorder %v6593_v59, 0.0 }
 0x1c6   : > { %9412 = vst [vmem:[#allocation34_spill] sm:$0xff] %v6702_v54  ;;  %v6747_v19 = vsel %vm9429_vm4, -1.0, %v8531_v60  ;;  %v6752_v36 = vsel %vm9431_vm5, -1.0, %v8531_v60  ;;  %vm9433_vm6 = vcmp.lt.f32.partialorder %v6596_v46, 0.0  ;;  %vm9435_vm7 = vcmp.lt.f32.partialorder %v6599_v7, 0.0 }
 0x1c7   : > { %9414 = vst [vmem:[#allocation76_spill] sm:$0xff] %v6707_v16  ;;  %v6757_v49 = vsel %vm9433_vm6, -1.0, %v8531_v60  ;;  %v6762_v42 = vsel %vm9435_vm7, -1.0, %v8531_v60  ;;  %v6767_v6 = vsel %vm2042_vm10, -1.0, %v8531_v60  ;;  %v6772_v63 = vsel %vm2043_vm11, -1.0, %v8531_v60 }
 0x1c8   : > { %9416 = vst [vmem:[#allocation32_spill] sm:$0xff] %v6712_v8  ;;  %v6777_v23 = vsel %vm2044_vm12, -1.0, %v8531_v60  ;;  %v6782_v34 = vsel %vm2045_vm13, -1.0, %v8531_v60  ;;  %v6787_v37 = vsel %vm2046_vm14, -1.0, %v8531_v60  ;;  %v6792_v21 = vsel %vm2047_vm15, -1.0, %v8531_v60 }
 0x1c9   : > { %9418 = vst [vmem:[#allocation35_spill] sm:$0xff] %v6717_v5  ;;  %v6797_v30 = vsel %vm2048_vm0, -1.0, %v8531_v60  ;;  %v6802_v17 = vsel %vm2049_vm1, -1.0, %v8531_v60  ;;  %v6807_v12 = vsel %vm2050_vm8, -1.0, %v8531_v60  ;;  %v6812_v48 = vsel %vm2051_vm9, -1.0, %v8531_v60 }
 0x1ca   : > { %9420 = vst [vmem:[#allocation77_spill] sm:$0xff] %v6722_v4  ;;  %v6821_v62 = vand.u32 2147483647, %v6557_v22  ;;  %v6833_v60 = vand.u32 2147483647, %v6569_v29  ;;  %vm2052_vm8 = vcmp.lt.f32.partialorder %v6632_v26, 0.0 }
 0x1cb   : > { %9422 = vst [vmem:[#allocation40_spill] sm:$0xff] %v6727_v3  ;;  %v6836_v32 = vand.u32 2147483647, %v6572_v51  ;;  %v6839_v14 = vand.u32 2147483647, %v6575_v10  ;;  %vm2053_vm9 = vcmp.lt.f32.partialorder %v6635_v9, 0.0 }
 0x1cc   : > { %9424 = vst [vmem:[#allocation41_spill] sm:$0xff] %v6732_v61  ;;  %v6842_v22 = vand.u32 2147483647, %v6578_v20  ;;  %v6855_v29 = vand.u32 2147483647, %v6590_v40  ;;  %vm2054_vm10 = vcmp.lt.f32.partialorder %v6638_v44, 0.0 }
 0x1cd   : > { %9426 = vst [vmem:[#allocation78_spill] sm:$0xff] %v6737_v39  ;;  %v6858_v51 = vand.u32 2147483647, %v6593_v59  ;;  %v6862_v10 = vand.u32 2147483647, %v6596_v46  ;;  %vm2055_vm11 = vcmp.lt.f32.partialorder %v6641_v38, 0.0 }
 0x1ce   : > { %9428 = vst [vmem:[#allocation36_spill] sm:$0xff] %v6742_v28  ;;  %v6865_v20 = vand.u32 2147483647, %v6599_v7  ;;  %v6878_v40 = vand.u32 2147483647, %v6611_v24  ;;  %v9478_v28 = vmov 1.0  }
 0x1cf   : > { %9430 = vst [vmem:[#allocation39_spill] sm:$0xff] %v6747_v19  ;;  %v6882_v59 = vand.u32 2147483647, %v6614_v27  ;;  %v6885_v46 = vand.u32 2147483647, %v6617_v41  ;;  %v6928_v39 = vsel %vm2052_vm8, -1.0, %v9478_v28 }
 0x1d0   : > { %9432 = vst [vmem:[#allocation46_spill] sm:$0xff] %v6752_v36  ;;  %v6888_v7 = vand.u32 2147483647, %v6620_v58  ;;  %v6900_v24 = vand.u32 2147483647, %v6632_v26  ;;  %v6937_v5 = vsel %vm2053_vm9, -1.0, %v9478_v28 }
 0x1d1   : > { %9434 = vst [vmem:[#allocation2_spill] sm:$0xff] %v6757_v49  ;;  %v6903_v27 = vand.u32 2147483647, %v6635_v9  ;;  %v6906_v41 = vand.u32 2147483647, %v6638_v44  ;;  %v6946_v26 = vsel %vm2054_vm10, -1.0, %v9478_v28 }
 0x1d2   : > { %9436 = vst [vmem:[#allocation52_spill] sm:$0xff] %v6762_v42  ;;  %v6909_v58 = vand.u32 2147483647, %v6641_v38  ;;  %v2130_v42 = vmul.f32 0.3275911, %v6842_v22  ;;  %v6955_v9 = vsel %vm2055_vm11, -1.0, %v9478_v28 }
 0x1d3   : > { %9437 = vst [vmem:[#allocation50_spill] sm:$0xff] %v6767_v6  ;;  %v2129_v6 = vmul.f32 0.3275911, %v6839_v14  ;;  %v2134_v61 = vmul.f32 0.3275911, %v6855_v29 }
 0x1d4   : > { %9438 = vst [vmem:[#allocation51_spill] sm:$0xff] %v6772_v63  ;;  %v2128_v63 = vmul.f32 0.3275911, %v6836_v32  ;;  %v2135_v3 = vmul.f32 0.3275911, %v6858_v51 }
 0x1d5   : > { %9439 = vst [vmem:[#allocation53_spill] sm:$0xff] %v6777_v23  ;;  %v2127_v23 = vmul.f32 0.3275911, %v6833_v60  ;;  %v2136_v8 = vmul.f32 0.3275911, %v6862_v10 }
 0x1d6   : > { %9440 = vst [vmem:[#allocation42_spill] sm:$0xff] %v6782_v34  ;;  %v2137_v16 = vmul.f32 0.3275911, %v6865_v20  ;;  %v2142_v44 = vmul.f32 0.3275911, %v6882_v59 }
 0x1d7   : > { %9441 = vst [vmem:[#allocation54_spill] sm:$0xff] %v6787_v37  ;;  %v2150_v35 = vmul.f32 0.3275911, %v6906_v41 }
 0x1d8   : > { %9442 = vst [vmem:[#allocation56_spill] sm:$0xff] %v6792_v21 }
 0x1d9   : > { %9443 = vst [vmem:[#allocation57_spill] sm:$0xff] %v6797_v30  ;;  %v6827_v30 = vand.u32 2147483647, %v6563_v31  ;;  %v6848_v31 = vand.u32 2147483647, %v6584_v13 }
 0x1da   : > { %9444 = vst [vmem:[#allocation58_spill] sm:$0xff] %v6802_v17  ;;  %v6824_v17 = vand.u32 2147483647, %v6560_v45  ;;  %v6845_v45 = vand.u32 2147483647, %v6581_v1 }
 0x1db   : > { %9445 = vst [vmem:[#allocation59_spill] sm:$0xff] %v6807_v12  ;;  %v6830_v12 = vand.u32 2147483647, %v6566_v52  ;;  %v6852_v52 = vand.u32 2147483647, %v6587_v2 }
 0x1dc   : > { %9446 = vst [vmem:[#allocation60_spill] sm:$0xff] %v6812_v48  ;;  %v6868_v1 = vand.u32 2147483647, %v6602_v47  ;;  %v6872_v13 = vand.u32 2147483647, %v6605_v33 }
 0x1dd   : > { %9447 = vst [vmem:[#allocation61_spill] sm:$0xff] %v6815_v15  ;;  %v6875_v2 = vand.u32 2147483647, %v6608_v0  ;;  %v6891_v47 = vand.u32 2147483647, %v6623_v53 }
 0x1de   : > { %9448 = vst [vmem:[#allocation62_spill] sm:$0xff] %v6818_v11  ;;  %v6894_v33 = vand.u32 2147483647, %v6626_v55  ;;  %v6897_v0 = vand.u32 2147483647, %v6629_v25 }
 0x1df   : > { %9449 = vst [vmem:[#allocation55_spill] sm:$0xff] %v6821_v62  ;;  %v2120_v53 = vmul.f32 0.3275911, %v6672_v56  ;;  %v2121_v55 = vmul.f32 0.3275911, %v6815_v15 }
 0x1e0   : > { %9450 = vst [vmem:[#allocation63_spill] sm:$0xff] %v6824_v17  ;;  %v2122_v48 = vmul.f32 0.3275911, %v6818_v11  ;;  %v2123_v25 = vmul.f32 0.3275911, %v6821_v62 }
 0x1e1   : > { %9451 = vst [vmem:[#allocation64_spill] sm:$0xff] %v6827_v30  ;;  %v2124_v21 = vmul.f32 0.3275911, %v6824_v17  ;;  %v2125_v37 = vmul.f32 0.3275911, %v6827_v30  ;;  %v6932_v4 = vadd.f32 1.0, %v2120_v53 }
 0x1e2   : > { %9452 = vst [vmem:[#allocation4_spill] sm:$0xff] %v6830_v12  ;;  %v2126_v34 = vmul.f32 0.3275911, %v6830_v12  ;;  %v2131_v49 = vmul.f32 0.3275911, %v6845_v45  ;;  %v6941_v54 = vadd.f32 1.0, %v2121_v55 }
 0x1e3   : > { %9453 = vst [vmem:[#allocation3_spill] sm:$0xff] %v6833_v60  ;;  %v2132_v36 = vmul.f32 0.3275911, %v6848_v31  ;;  %v2133_v19 = vmul.f32 0.3275911, %v6852_v52  ;;  %v6950_v50 = vadd.f32 1.0, %v2122_v48  ;;  %3521 = vrcp.f32 %v6932_v4 }
 0x1e4   : > { %9454 = vst [vmem:[#allocation29_spill] sm:$0xff] %v6836_v32  ;;  %v2139_v53 = vmul.f32 0.3275911, %v6872_v13  ;;  %v2141_v55 = vmul.f32 0.3275911, %v6878_v40  ;;  %v6959_v43 = vadd.f32 1.0, %v2123_v25  ;;  %3523 = vrcp.f32 %v6941_v54 }
 0x1e5   : > { %9455 = vst [vmem:[#allocation30_spill] sm:$0xff] %v6839_v14  ;;  %v6963_v18 = vadd.f32 1.0, %v2124_v21  ;;  %v2144_v48 = vmul.f32 0.3275911, %v6888_v7  ;;  %v2145_v38 = vmul.f32 0.3275911, %v6891_v47  ;;  %3525 = vrcp.f32 %v6950_v50 }
 0x1e6   : > { %9456 = vst [vmem:[#allocation37_spill] sm:$0xff] %v6842_v22  ;;  %v2146_v28 = vmul.f32 0.3275911, %v6894_v33  ;;  %v2148_v25 = vmul.f32 0.3275911, %v6900_v24  ;;  %v6972_v57 = vadd.f32 1.0, %v2125_v37  ;;  %3527 = vrcp.f32 %v6959_v43 }
 0x1e7   : > { %9457 = vst [vmem:[#allocation38_spill] sm:$0xff] %v6845_v45  ;;  %v2149_v21 = vmul.f32 0.3275911, %v6903_v27  ;;  %3529 = vrcp.f32 %v6963_v18  ;;  %v6986_v37 = vadd.f32 1.0, %v2129_v6  ;;  %v7005_v6 = vadd.f32 1.0, %v2136_v8 }
 0x1e8   : > { %9458 = vst [vmem:[#allocation43_spill] sm:$0xff] %v6848_v31  ;;  %3531 = vrcp.f32 %v6972_v57  ;;  %v7025_v8 = vadd.f32 1.0, %v2144_v48  ;;  %v7043_v48 = vadd.f32 1.0, %v2150_v35  ;;  %vm2189_vm12 = vweird.f32 %v6932_v4 }
 0x1e9   : > { %9459 = vst [vmem:[#allocation6_spill] sm:$0xff] %v6852_v52  ;;  %v2193_v35 = vand.u32 2147483647, %v6932_v4  ;;  %vm2204_vm13 = vweird.f32 %v6941_v54  ;;  %v2240_v52 = vand.u32 2147483648, %v6959_v43  ;;  %v2223_v14 = vand.u32 2147483647, %v6950_v50 }
 0x1ea   : > { %9460 = vst [vmem:[#allocation7_spill] sm:$0xff] %v6855_v29  ;;  %vm2219_vm14 = vweird.f32 %v6950_v50  ;;  %vm2234_vm15 = vweird.f32 %v6959_v43  ;;  %vm2249_vm0 = vweird.f32 %v6963_v18  ;;  %v2253_v17 = vand.u32 2147483647, %v6963_v18 }
 0x1eb   : > { %9461 = vst [vmem:[#allocation10_spill] sm:$0xff] %v6858_v51  ;;  %vm7080_vm1 = vcmp.eq.f32.partialorder %v2193_v35, 8.507059e+37  ;;  %vm7096_vm4 = vcmp.eq.f32.partialorder %v2223_v14, 8.507059e+37 }
 0x1ec   : > { %9462 = vst [vmem:[#allocation44_spill] sm:$0xff] %v6862_v10 }
 0x1ed   : > { %9463 = vst [vmem:[#allocation79_spill] sm:$0xff] %v6865_v20  ;;  %v2225_v20 = vand.u32 2147483648, %v6950_v50 }
 0x1ee   : > { %9464 = vst [vmem:[#allocation80_spill] sm:$0xff] %v6868_v1 }
 0x1ef   : > { %9465 = vst [vmem:[#allocation81_spill] sm:$0xff] %v6872_v13  ;;  %v7041_v13 = vadd.f32 1.0, %v2149_v21  ;;  %v7075_v12 = vor.u32 1.1754944e-38, %v2225_v20 }
 0x1f0   : > { %9466 = vst [vmem:[#allocation82_spill] sm:$0xff] %v6875_v2 }
 0x1f1   : > { %9467 = vst [vmem:[#allocation83_spill] sm:$0xff] %v6878_v40 }
 0x1f2   : > { %9468 = vst [vmem:[#allocation84_spill] sm:$0xff] %v6882_v59 }
 0x1f3   : > { %9469 = vst [vmem:[#allocation85_spill] sm:$0xff] %v6885_v46 }
 0x1f4   : > { %9470 = vst [vmem:[#allocation86_spill] sm:$0xff] %v6888_v7  ;;  %v2151_v7 = vmul.f32 0.3275911, %v6909_v58 }
 0x1f5   : > { %9471 = vst [vmem:[#allocation87_spill] sm:$0xff] %v6891_v47  ;;  %v6979_v47 = vadd.f32 1.0, %v2126_v34  ;;  %v6998_v34 = vadd.f32 1.0, %v2134_v61  ;;  %v7017_v61 = vadd.f32 1.0, %v2141_v55  ;;  %v7036_v55 = vadd.f32 1.0, %v2148_v25 }
 0x1f6   : > { %9472 = vst [vmem:[#allocation88_spill] sm:$0xff] %v6894_v33  ;;  %v6981_v33 = vadd.f32 1.0, %v2127_v23  ;;  %v7000_v23 = vadd.f32 1.0, %v2135_v3  ;;  %v7019_v3 = vadd.f32 1.0, %v2142_v44  ;;  %v2195_v44 = vand.u32 2147483648, %v6932_v4 }
 0x1f7   : > { %9473 = vst [vmem:[#allocation89_spill] sm:$0xff] %v6897_v0  ;;  %3533 = vrcp.f32 %v6979_v47  ;;  %v2210_v25 = vand.u32 2147483648, %v6941_v54 }
 0x1f8   : > { %9474 = vst [vmem:[#allocation90_spill] sm:$0xff] %v6900_v24  ;;  %v6988_v24 = vadd.f32 1.0, %v2130_v42  ;;  %v7007_v42 = vadd.f32 1.0, %v2137_v16  ;;  %v7027_v16 = vadd.f32 1.0, %v2145_v38  ;;  %v7062_v29 = vor.u32 1.1754944e-38, %v2195_v44 }
 0x1f9   : > { %9475 = vst [vmem:[#allocation91_spill] sm:$0xff] %v6903_v27  ;;  %v6992_v27 = vadd.f32 1.0, %v2132_v36  ;;  %v7011_v36 = vadd.f32 1.0, %v2139_v53  ;;  %v7071_v60 = vor.u32 1.1754944e-38, %v2210_v25  ;;  %v2238_v44 = vand.u32 2147483647, %v6959_v43 }
 0x1fa   : > { %9476 = vst [vmem:[#allocation92_spill] sm:$0xff] %v6906_v41  ;;  %v6994_v41 = vpop.eup %3521  ;;  %v7084_v25 = vor.u32 1.1754944e-38, %v2240_v52  ;;  %3535 = vrcp.f32 %v6981_v33  ;;  %v2298_v35 = vand.u32 2147483647, %v6981_v33 }
 0x1fb   : > { %9477 = vst [vmem:[#allocation93_spill] sm:$0xff] %v6909_v58  ;;  %v6996_v58 = vadd.f32 1.0, %v2133_v19  ;;  %vm2190_vm2 = vweird.f32 %v6994_v41  ;;  %vm7102_vm6 = vcmp.eq.f32.partialorder %v2238_v44, 8.507059e+37 }
 0x1fc   : > { %9479 = vst [vmem:[#allocation94_spill] sm:$0xff] %v6928_v39  ;;  %v2138_v39 = vmul.f32 0.3275911, %v6868_v1  ;;  %vm7117_vm9 = vmor %vm2189_vm12, %vm2190_vm2  ;;  %vm7142_vm2 = vcmp.eq.f32.partialorder %v2253_v17, 8.507059e+37 }
 0x1fd   : > { %9480 = vst [vmem:[#allocation95_spill] sm:$0xff] %v6937_v5  ;;  %v2140_v5 = vmul.f32 0.3275911, %v6875_v2 }
 0x1fe   : > { %9481 = vst [vmem:[#allocation96_spill] sm:$0xff] %v6946_v26  ;;  %v2143_v26 = vmul.f32 0.3275911, %v6885_v46  ;;  %v6983_v46 = vadd.f32 1.0, %v2128_v63  ;;  %v7003_v63 = vpop.eup %3523 }
 0x1ff   : > { %9482 = vst [vmem:[#allocation97_spill] sm:$0xff] %v6955_v9  ;;  %v2147_v9 = vmul.f32 0.3275911, %v6897_v0  ;;  %v6990_v0 = vadd.f32 1.0, %v2131_v49  ;;  %v7009_v49 = vadd.f32 1.0, %v2138_v39  ;;  %v7013_v59 = vpop.eup %3525  ;;  %v7015_v19 = vadd.f32 1.0, %v2140_v5 }
 0x200   : > { %v7021_v40 = vadd.f32 1.0, %v2143_v26  ;;  %v7023_v2 = vpop.eup %3527  ;;  %v7029_v39 = vadd.f32 1.0, %v2146_v28  ;;  %v2185_v26 = vmul.f32 %v6994_v41, %v6932_v4  ;;  %v2200_v38 = vmul.f32 %v7003_v63, %v6941_v54 }
 0x201   : > { %v7032_v53 = vpop.eup %3529  ;;  %v7034_v5 = vadd.f32 1.0, %v2147_v9  ;;  %v2215_v28 = vmul.f32 %v7013_v59, %v6950_v50  ;;  %v7051_v9 = vadd.f32 1.0, %v2151_v7  ;;  %v2230_v21 = vmul.f32 %v7023_v2, %v6959_v43 }
 0x202   : > { %v7049_v1 = vpop.eup %3531  ;;  %v2245_v10 = vmul.f32 %v7032_v53, %v6963_v18  ;;  %v2186_v51 = vsub.f32 1.0, %v2185_v26  ;;  %v2208_v7 = vand.u32 2147483647, %v6941_v54  ;;  %v2201_v45 = vsub.f32 1.0, %v2200_v38 }
 0x203   : > { %v7066_v31 = vpop.eup %3533  ;;  %v2216_v22 = vsub.f32 1.0, %v2215_v28  ;;  %v2260_v32 = vmul.f32 %v7049_v1, %v6972_v57  ;;  %v2231_v26 = vsub.f32 1.0, %v2230_v21  ;;  %vm2205_vm5 = vweird.f32 %v7003_v63 }
 0x204   : > { %v2246_v30 = vsub.f32 1.0, %v2245_v10  ;;  %v2187_v38 = vmul.f32 %v6994_v41, %v2186_v51  ;;  %v2275_v21 = vmul.f32 %v7066_v31, %v6979_v47  ;;  %v2202_v20 = vmul.f32 %v7003_v63, %v2201_v45  ;;  %vm7128_vm11 = vmor %vm2204_vm13, %vm2205_vm5  ;;  %v7159_v17 = vpop.eup %3535 }
 0x205   : > { %vm7091_vm3 = vcmp.eq.f32.partialorder %v2208_v7, 8.507059e+37  ;;  %v2217_v51 = vmul.f32 %v7013_v59, %v2216_v22  ;;  %v2261_v52 = vsub.f32 1.0, %v2260_v32  ;;  %v2232_v62 = vmul.f32 %v7023_v2, %v2231_v26 }
 0x206   : > { %v2255_v45 = vand.u32 2147483648, %v6963_v18  ;;  %vm2220_vm7 = vweird.f32 %v7013_v59  ;;  %vm2235_vm8 = vweird.f32 %v7023_v2  ;;  %v2247_v14 = vmul.f32 %v7032_v53, %v2246_v30 }
 0x207   : > { %v2268_v32 = vand.u32 2147483647, %v6972_v57  ;;  %v2188_v22 = vadd.f32 %v6994_v41, %v2187_v38  ;;  %vm2250_vm10 = vweird.f32 %v7032_v53  ;;  %v2276_v26 = vsub.f32 1.0, %v2275_v21  ;;  %vm7137_vm12 = vmor %vm2219_vm14, %vm2220_vm7 }
 0x208   : > { %3537 = vrcp.f32 %v6983_v46  ;;  %v2203_v44 = vadd.f32 %v7003_v63, %v2202_v20  ;;  %v2218_v4 = vadd.f32 %v7013_v59, %v2217_v51  ;;  %v2262_v38 = vmul.f32 %v7049_v1, %v2261_v52  ;;  %vm7152_vm5 = vmor %vm2234_vm15, %vm2235_vm8 }
 0x209   : > { %3539 = vrcp.f32 %v6986_v37  ;;  %v2233_v20 = vadd.f32 %v7023_v2, %v2232_v62  ;;  %vm2264_vm13 = vweird.f32 %v6972_v57  ;;  %v2248_v51 = vadd.f32 %v7032_v53, %v2247_v14  ;;  %vm7168_vm15 = vmor %vm2249_vm0, %vm2250_vm10 }
 0x20a   : > { %3541 = vrcp.f32 %v6988_v24  ;;  %v2256_v52 = vor.u32 1.1754944e-38, %v2255_v45  ;;  %vm2265_vm14 = vweird.f32 %v7049_v1  ;;  %v2270_v62 = vand.u32 2147483648, %v6972_v57 }
 0x20b   : > { %v2192_v15 = vsel %vm7117_vm9, %v6994_v41, %v2188_v22  ;;  %vm7172_vm7 = vcmp.eq.f32.partialorder %v2268_v32, 8.507059e+37  ;;  %v2277_v14 = vmul.f32 %v7066_v31, %v2276_v26  ;;  %vm2279_vm8 = vweird.f32 %v6979_v47  ;;  %vm7193_vm0 = vmor %vm2264_vm13, %vm2265_vm14 }
 0x20c   : > { %v2207_v41 = vsel %vm7128_vm11, %v7003_v63, %v2203_v44  ;;  %v2222_v18 = vsel %vm7137_vm12, %v7013_v59, %v2218_v4  ;;  %v2263_v22 = vadd.f32 %v7049_v1, %v2262_v38  ;;  %v2283_v7 = vand.u32 2147483647, %v6979_v47 }
 0x20d   : > { %v2237_v26 = vsel %vm7152_vm5, %v7023_v2, %v2233_v20  ;;  %vm2280_vm9 = vweird.f32 %v7066_v31  ;;  %v2285_v59 = vand.u32 2147483648, %v6979_v47  ;;  %3543 = vrcp.f32 %v6990_v0 }
 0x20e   : > { %v7186_v32 = vpop.eup %3537  ;;  %v7205_v44 = vsel %vm7080_vm1, %v7062_v29, %v2192_v15  ;;  %v2252_v57 = vsel %vm7168_vm15, %v7032_v53, %v2248_v51  ;;  %v2271_v2 = vor.u32 1.1754944e-38, %v2270_v62  ;;  %v2290_v30 = vmul.f32 %v7159_v17, %v6981_v33  ;;  %vm7238_vm1 = vmor %vm2279_vm8, %vm2280_vm9 }
 0x20f   : > { %v7200_v63 = vpop.eup %3539  ;;  %v7217_v38 = vsel %vm7091_vm3, %v7071_v60, %v2207_v41  ;;  %v7222_v15 = vsel %vm7096_vm4, %v7075_v12, %v2222_v18  ;;  %v2278_v29 = vadd.f32 %v7066_v31, %v2277_v14  ;;  %3545 = vrcp.f32 %v6992_v27 }
 0x210   : > { %v7212_v4 = vpop.eup %3541  ;;  %v7229_v53 = vsel %vm7102_vm6, %v7084_v25, %v2237_v26  ;;  %v2267_v28 = vsel %vm7193_vm0, %v7049_v1, %v2263_v22  ;;  %vm7242_vm3 = vcmp.eq.f32.partialorder %v2283_v7, 8.507059e+37  ;;  %v2305_v11 = vmul.f32 %v7186_v32, %v6983_v46 }
 0x211   : > { %9507 = vst [vmem:[#allocation98_spill] sm:$0xff] %v7229_v53  ;;  %v7250_v25 = vsel %vm7142_vm2, %v2256_v52, %v2252_v57  ;;  %v2286_v56 = vor.u32 1.1754944e-38, %v2285_v59  ;;  %v2300_v1 = vand.u32 2147483648, %v6981_v33  ;;  %v2320_v47 = vmul.f32 %v7200_v63, %v6986_v37 }
 0x212   : > { %9512 = vst [vmem:[#allocation99_spill] sm:$0xff] %v7250_v25  ;;  %v2291_v10 = vsub.f32 1.0, %v2290_v30  ;;  %vm2294_vm4 = vweird.f32 %v6981_v33  ;;  %v2335_v21 = vmul.f32 %v7212_v4, %v6988_v24  ;;  %v7263_v54 = vsel %vm7172_vm7, %v2271_v2, %v2267_v28 }
 0x213   : > { %v7259_v20 = vpop.eup %3543  ;;  %9513 = vst [vmem:[#allocation100_spill] sm:$0xff] %v7263_v54  ;;  %v2282_v50 = vsel %vm7238_vm1, %v7066_v31, %v2278_v29  ;;  %v2315_v51 = vand.u32 2147483648, %v6983_v46  ;;  %3547 = vrcp.f32 %v6996_v58  ;;  %v2306_v52 = vsub.f32 1.0, %v2305_v11 }
 0x214   : > { %vm2309_vm6 = vweird.f32 %v6983_v46  ;;  %v2313_v62 = vand.u32 2147483647, %v6983_v46  ;;  %v2330_v43 = vand.u32 2147483648, %v6986_v37  ;;  %v2301_v45 = vor.u32 1.1754944e-38, %v2300_v1 }
 0x215   : > { %v7273_v14 = vpop.eup %3545  ;;  %v2321_v41 = vsub.f32 1.0, %v2320_v47  ;;  %vm2324_vm10 = vweird.f32 %v6986_v37  ;;  %v2328_v18 = vand.u32 2147483647, %v6986_v37  ;;  %v7279_v31 = vsel %vm7242_vm3, %v2286_v56, %v2282_v50 }
 0x216   : > { %9514 = vst [vmem:[#allocation101_spill] sm:$0xff] %v7279_v31  ;;  %v2292_v22 = vmul.f32 %v7159_v17, %v2291_v10  ;;  %vm7282_vm11 = vcmp.eq.f32.partialorder %v2298_v35, 8.507059e+37  ;;  %v2336_v26 = vsub.f32 1.0, %v2335_v21  ;;  %v2350_v59 = vmul.f32 %v7259_v20, %v6990_v0 }
 0x217   : > { %vm2295_vm12 = vweird.f32 %v7159_v17  ;;  %v2316_v57 = vor.u32 1.1754944e-38, %v2315_v51  ;;  %vm2339_vm2 = vweird.f32 %v6988_v24  ;;  %v2343_v2 = vand.u32 2147483647, %v6988_v24 }
 0x218   : > { %v2307_v30 = vmul.f32 %v7186_v32, %v2306_v52  ;;  %vm7292_vm13 = vcmp.eq.f32.partialorder %v2313_v62, 8.507059e+37  ;;  %v2331_v28 = vor.u32 1.1754944e-38, %v2330_v43  ;;  %v2345_v12 = vand.u32 2147483648, %v6988_v24  ;;  %vm7316_vm7 = vmor %vm2294_vm4, %vm2295_vm12 }
 0x219   : > { %v2365_v60 = vmul.f32 %v7273_v14, %v6992_v27  ;;  %v7299_v11 = vpop.eup %3547  ;;  %vm2310_vm5 = vweird.f32 %v7186_v32  ;;  %v2322_v56 = vmul.f32 %v7200_v63, %v2321_v41  ;;  %vm7303_vm14 = vcmp.eq.f32.partialorder %v2328_v18, 8.507059e+37 }
 0x21a   : > { %vm2354_vm15 = vweird.f32 %v6990_v0  ;;  %v2358_v47 = vand.u32 2147483647, %v6990_v0  ;;  %v2293_v10 = vadd.f32 %v7159_v17, %v2292_v22  ;;  %v2337_v35 = vmul.f32 %v7212_v4, %v2336_v26  ;;  %vm7335_vm1 = vmor %vm2309_vm6, %vm2310_vm5 }
 0x21b   : > { %v2351_v21 = vsub.f32 1.0, %v2350_v59  ;;  %3549 = vrcp.f32 %v6998_v34  ;;  %vm2325_vm8 = vweird.f32 %v7200_v63  ;;  %vm2340_vm0 = vweird.f32 %v7212_v4 }
 0x21c   : > { %vm7322_vm9 = vcmp.eq.f32.partialorder %v2343_v2, 8.507059e+37  ;;  %v2360_v52 = vand.u32 2147483648, %v6990_v0  ;;  %v2308_v62 = vadd.f32 %v7186_v32, %v2307_v30  ;;  %v2366_v43 = vsub.f32 1.0, %v2365_v60  ;;  %vm7347_vm3 = vmor %vm2324_vm10, %vm2325_vm8 }
 0x21d   : > { %v2380_v33 = vmul.f32 %v7299_v11, %v6996_v58  ;;  %3551 = vrcp.f32 %v7000_v23  ;;  %v2323_v18 = vadd.f32 %v7200_v63, %v2322_v56  ;;  %v2346_v22 = vor.u32 1.1754944e-38, %v2345_v12  ;;  %vm7361_vm6 = vmor %vm2339_vm2, %vm2340_vm0 }
 0x21e   : > { %v2373_v26 = vand.u32 2147483647, %v6992_v27  ;;  %3553 = vrcp.f32 %v7005_v6  ;;  %v2297_v59 = vsel %vm7316_vm7, %v7159_v17, %v2293_v10  ;;  %v2338_v46 = vadd.f32 %v7212_v4, %v2337_v35 }
 0x21f   : > { %v2352_v30 = vmul.f32 %v7259_v20, %v2351_v21  ;;  %vm7353_vm4 = vcmp.eq.f32.partialorder %v2358_v47, 8.507059e+37  ;;  %vm2355_vm10 = vweird.f32 %v7259_v20  ;;  %v2361_v37 = vor.u32 1.1754944e-38, %v2360_v52 }
 0x220   : > { %vm2369_vm12 = vweird.f32 %v6992_v27  ;;  %v2375_v60 = vand.u32 2147483648, %v6992_v27  ;;  %v2312_v47 = vsel %vm7335_vm1, %v7186_v32, %v2308_v62  ;;  %v2367_v10 = vmul.f32 %v7273_v14, %v2366_v43  ;;  %vm7405_vm5 = vmor %vm2354_vm15, %vm2355_vm10 }
 0x221   : > { %v7368_v56 = vpop.eup %3549  ;;  %v2381_v24 = vsub.f32 1.0, %v2380_v33  ;;  %3555 = vrcp.f32 %v7007_v42  ;;  %v7377_v35 = vsel %vm7282_vm11, %v2301_v45, %v2297_v59  ;;  %v2327_v21 = vsel %vm7347_vm3, %v7200_v63, %v2323_v18 }
 0x222   : > { %9533 = vst [vmem:[#allocation102_spill] sm:$0xff] %v7377_v35  ;;  %vm7382_vm2 = vcmp.eq.f32.partialorder %v2373_v26, 8.507059e+37  ;;  %v2388_v52 = vand.u32 2147483647, %v6996_v58  ;;  %v2342_v62 = vsel %vm7361_vm6, %v7212_v4, %v2338_v46  ;;  %v2353_v7 = vadd.f32 %v7259_v20, %v2352_v30 }
 0x223   : > { %v7387_v32 = vpop.eup %3551  ;;  %vm2370_vm11 = vweird.f32 %v7273_v14  ;;  %3557 = vrcp.f32 %v7009_v49  ;;  %v7399_v63 = vsel %vm7292_vm13, %v2316_v57, %v2312_v47  ;;  %v2376_v4 = vor.u32 1.1754944e-38, %v2375_v60 }
 0x224   : > { %v7395_v45 = vpop.eup %3553  ;;  %9536 = vst [vmem:[#allocation103_spill] sm:$0xff] %v7399_v63  ;;  %v2390_v33 = vand.u32 2147483648, %v6996_v58  ;;  %v2395_v41 = vmul.f32 %v7368_v56, %v6998_v34  ;;  %v7414_v18 = vsel %vm7303_vm14, %v2331_v28, %v2327_v21  ;;  %v2368_v57 = vadd.f32 %v7273_v14, %v2367_v10  ;;  %vm7425_vm15 = vmor %vm2369_vm12, %vm2370_vm11 }
 0x225   : > { %9539 = vst [vmem:[#allocation104_spill] sm:$0xff] %v7414_v18  ;;  %v2382_v29 = vmul.f32 %v7299_v11, %v2381_v24  ;;  %vm2384_vm13 = vweird.f32 %v6996_v58  ;;  %v7421_v0 = vsel %vm7322_vm9, %v2346_v22, %v2342_v62  ;;  %vm2385_vm7 = vweird.f32 %v7299_v11 }
 0x226   : > { %9540 = vst [vmem:[#allocation105_spill] sm:$0xff] %v7421_v0  ;;  %vm7430_vm14 = vcmp.eq.f32.partialorder %v2388_v52, 8.507059e+37  ;;  %v2410_v1 = vmul.f32 %v7387_v32, %v7000_v23  ;;  %v2357_v51 = vsel %vm7405_vm5, %v7259_v20, %v2353_v7  ;;  %v2405_v27 = vand.u32 2147483648, %v6998_v34  ;;  %vm7463_vm9 = vmor %vm2384_vm13, %vm2385_vm7 }
 0x227   : > { %v7436_v59 = vpop.eup %3555  ;;  %v2425_v22 = vmul.f32 %v7395_v45, %v7005_v6  ;;  %3559 = vrcp.f32 %v7011_v36  ;;  %v2391_v2 = vor.u32 1.1754944e-38, %v2390_v33  ;;  %v2396_v46 = vsub.f32 1.0, %v2395_v41 }
 0x228   : > { %vm2399_vm8 = vweird.f32 %v6998_v34  ;;  %v2403_v30 = vand.u32 2147483647, %v6998_v34  ;;  %v2372_v60 = vsel %vm7425_vm15, %v7273_v14, %v2368_v57  ;;  %v2383_v20 = vadd.f32 %v7299_v11, %v2382_v29 }
 0x229   : > { %v7447_v17 = vpop.eup %3557  ;;  %vm2414_vm0 = vweird.f32 %v7000_v23  ;;  %v2420_v47 = vand.u32 2147483648, %v7000_v23  ;;  %v7457_v10 = vsel %vm7353_vm4, %v2361_v37, %v2357_v51  ;;  %v2411_v21 = vsub.f32 1.0, %v2410_v1 }
 0x22a   : > { %9545 = vst [vmem:[#allocation106_spill] sm:$0xff] %v7457_v10  ;;  %v2418_v14 = vand.u32 2147483647, %v7000_v23  ;;  %v2440_v52 = vmul.f32 %v7436_v59, %v7007_v42  ;;  %v2406_v62 = vor.u32 1.1754944e-38, %v2405_v27  ;;  %v2426_v7 = vsub.f32 1.0, %v2425_v22 }
 0x22b   : > { %vm2429_vm1 = vweird.f32 %v7005_v6  ;;  %v2433_v12 = vand.u32 2147483647, %v7005_v6  ;;  %v7474_v37 = vsel %vm7382_vm2, %v2376_v4, %v2372_v60  ;;  %v2397_v58 = vmul.f32 %v7368_v56, %v2396_v46 }
 0x22c   : > { %9548 = vst [vmem:[#allocation107_spill] sm:$0xff] %v7474_v37  ;;  %vm7477_vm3 = vcmp.eq.f32.partialorder %v2403_v30, 8.507059e+37  ;;  %v2455_v33 = vmul.f32 %v7447_v17, %v7009_v49  ;;  %3561 = vrcp.f32 %v7015_v19  ;;  %v2387_v57 = vsel %vm7463_vm9, %v7299_v11, %v2383_v20 }
 0x22d   : > { %v7484_v41 = vpop.eup %3559  ;;  %vm2400_vm4 = vweird.f32 %v7368_v56  ;;  %v2421_v50 = vor.u32 1.1754944e-38, %v2420_v47  ;;  %v2435_v4 = vand.u32 2147483648, %v7005_v6  ;;  %v2412_v29 = vmul.f32 %v7387_v32, %v2411_v21 }
 0x22e   : > { %vm2415_vm6 = vweird.f32 %v7387_v32  ;;  %vm7493_vm10 = vcmp.eq.f32.partialorder %v2418_v14, 8.507059e+37  ;;  %v2441_v1 = vsub.f32 1.0, %v2440_v52  ;;  %3563 = vrcp.f32 %v7017_v61  ;;  %vm7518_vm2 = vmor %vm2399_vm8, %vm2400_vm4 }
 0x22f   : > { %v2427_v51 = vmul.f32 %v7395_v45, %v2426_v7  ;;  %v2448_v11 = vand.u32 2147483647, %v7007_v42  ;;  %v2450_v27 = vand.u32 2147483648, %v7007_v42  ;;  %v2463_v22 = vand.u32 2147483647, %v7009_v49  ;;  %vm7534_vm15 = vmor %vm2414_vm0, %vm2415_vm6 }
 0x230   : > { %v2398_v46 = vadd.f32 %v7368_v56, %v2397_v58  ;;  %vm7503_vm12 = vcmp.eq.f32.partialorder %v2433_v12, 8.507059e+37  ;;  %v2456_v60 = vsub.f32 1.0, %v2455_v33  ;;  %v2470_v20 = vmul.f32 %v7484_v41, %v7011_v36 }
 0x231   : > { %3565 = vrcp.f32 %v7019_v3  ;;  %v7512_v47 = vsel %vm7430_vm14, %v2391_v2, %v2387_v57  ;;  %vm2430_vm11 = vweird.f32 %v7395_v45  ;;  %v2436_v21 = vor.u32 1.1754944e-38, %v2435_v4 }
 0x232   : > { %9555 = vst [vmem:[#allocation108_spill] sm:$0xff] %v7512_v47  ;;  %v2465_v14 = vand.u32 2147483648, %v7009_v49  ;;  %v7524_v52 = vpop.eup %3561  ;;  %v2413_v7 = vadd.f32 %v7387_v32, %v2412_v29  ;;  %v2442_v28 = vmul.f32 %v7436_v59, %v2441_v1  ;;  %vm2444_vm5 = vweird.f32 %v7007_v42  ;;  %vm7553_vm14 = vmor %vm2429_vm1, %vm2430_vm11 }
 0x233   : > { %vm2459_vm13 = vweird.f32 %v7009_v49  ;;  %v2428_v2 = vadd.f32 %v7395_v45, %v2427_v51  ;;  %vm7539_vm7 = vcmp.eq.f32.partialorder %v2448_v11, 8.507059e+37  ;;  %v2451_v58 = vor.u32 1.1754944e-38, %v2450_v27 }
 0x234   : > { %v2480_v33 = vand.u32 2147483648, %v7011_v36  ;;  %v7544_v57 = vpop.eup %3563  ;;  %v2402_v4 = vsel %vm7518_vm2, %v7368_v56, %v2398_v46  ;;  %vm2445_vm8 = vweird.f32 %v7436_v59  ;;  %v2457_v29 = vmul.f32 %v7447_v17, %v2456_v60 }
 0x235   : > { %vm7559_vm0 = vcmp.eq.f32.partialorder %v2463_v22, 8.507059e+37  ;;  %v2471_v51 = vsub.f32 1.0, %v2470_v20  ;;  %v2466_v11 = vor.u32 1.1754944e-38, %v2465_v14  ;;  %v2478_v56 = vand.u32 2147483647, %v7011_v36  ;;  %vm7586_vm4 = vmor %vm2444_vm5, %vm2445_vm8 }
 0x236   : > { %v2485_v27 = vmul.f32 %v7524_v52, %v7015_v19  ;;  %3567 = vrcp.f32 %v7021_v40  ;;  %v2417_v46 = vsel %vm7534_vm15, %v7387_v32, %v2413_v7  ;;  %v2443_v22 = vadd.f32 %v7436_v59, %v2442_v28 }
 0x237   : > { %v7567_v6 = vpop.eup %3565  ;;  %vm2460_vm9 = vweird.f32 %v7447_v17  ;;  %vm2474_vm1 = vweird.f32 %v7011_v36  ;;  %v7577_v60 = vsel %vm7477_vm3, %v2406_v62, %v2402_v4  ;;  %v2432_v20 = vsel %vm7553_vm14, %v7395_v45, %v2428_v2 }
 0x238   : > { %9566 = vst [vmem:[#allocation109_spill] sm:$0xff] %v7577_v60  ;;  %v2481_v24 = vor.u32 1.1754944e-38, %v2480_v33  ;;  %v2500_v14 = vmul.f32 %v7544_v57, %v7017_v61  ;;  %v2458_v43 = vadd.f32 %v7447_v17, %v2457_v29  ;;  %v2472_v62 = vmul.f32 %v7484_v41, %v2471_v51  ;;  %vm7602_vm3 = vmor %vm2459_vm13, %vm2460_vm9 }
 0x239   : > { %v2495_v7 = vand.u32 2147483648, %v7015_v19  ;;  %3569 = vrcp.f32 %v7025_v8  ;;  %v7598_v45 = vsel %vm7493_vm10, %v2421_v50, %v2417_v46  ;;  %vm7606_vm6 = vcmp.eq.f32.partialorder %v2478_v56, 8.507059e+37 }
 0x23a   : > { %9569 = vst [vmem:[#allocation110_spill] sm:$0xff] %v7598_v45  ;;  %v2486_v34 = vsub.f32 1.0, %v2485_v27  ;;  %v2493_v2 = vand.u32 2147483647, %v7015_v19  ;;  %v2515_v33 = vmul.f32 %v7567_v6, %v7019_v3  ;;  %v2447_v50 = vsel %vm7586_vm4, %v7436_v59, %v2443_v22 }
 0x23b   : > { %vm2475_vm10 = vweird.f32 %v7484_v41  ;;  %vm2489_vm2 = vweird.f32 %v7015_v19  ;;  %3571 = vrcp.f32 %v7027_v16  ;;  %v7623_v26 = vsel %vm7503_vm12, %v2436_v21, %v2432_v20 }
 0x23c   : > { %v7619_v49 = vpop.eup %3567  ;;  %9574 = vst [vmem:[#allocation111_spill] sm:$0xff] %v7623_v26  ;;  %v2501_v4 = vsub.f32 1.0, %v2500_v14  ;;  %v2508_v23 = vand.u32 2147483647, %v7017_v61  ;;  %v2510_v29 = vand.u32 2147483648, %v7017_v61  ;;  %v2462_v59 = vsel %vm7602_vm3, %v7447_v17, %v2458_v43  ;;  %vm7638_vm12 = vmor %vm2474_vm1, %vm2475_vm10 }
 0x23d   : > { %v2473_v51 = vadd.f32 %v7484_v41, %v2472_v62  ;;  %v2496_v56 = vor.u32 1.1754944e-38, %v2495_v7  ;;  %vm2504_vm11 = vweird.f32 %v7017_v61  ;;  %v7634_v27 = vsel %vm7539_vm7, %v2451_v58, %v2447_v50 }
 0x23e   : > { %9575 = vst [vmem:[#allocation112_spill] sm:$0xff] %v7634_v27  ;;  %v2487_v21 = vmul.f32 %v7524_v52, %v2486_v34  ;;  %vm7643_vm5 = vcmp.eq.f32.partialorder %v2493_v2, 8.507059e+37  ;;  %v2516_v17 = vsub.f32 1.0, %v2515_v33  ;;  %3573 = vrcp.f32 %v7029_v39 }
 0x23f   : > { %v7648_v22 = vpop.eup %3569  ;;  %vm2490_vm13 = vweird.f32 %v7524_v52  ;;  %vm2519_vm15 = vweird.f32 %v7019_v3  ;;  %v2523_v36 = vand.u32 2147483647, %v7019_v3  ;;  %v2530_v12 = vmul.f32 %v7619_v49, %v7021_v40 }
 0x240   : > { %v7657_v58 = vsel %vm7559_vm0, %v2466_v11, %v2462_v59  ;;  %v2502_v20 = vmul.f32 %v7544_v57, %v2501_v4  ;;  %vm7660_vm7 = vcmp.eq.f32.partialorder %v2508_v23, 8.507059e+37  ;;  %v2511_v14 = vor.u32 1.1754944e-38, %v2510_v29  ;;  %vm7682_vm0 = vmor %vm2489_vm2, %vm2490_vm13 }
 0x241   : > { %9580 = vst [vmem:[#allocation113_spill] sm:$0xff] %v7657_v58  ;;  %v2545_v43 = vmul.f32 %v7648_v22, %v7025_v8  ;;  %v7666_v62 = vpop.eup %3571  ;;  %v2477_v7 = vsel %vm7638_vm12, %v7484_v41, %v2473_v51  ;;  %v2525_v1 = vand.u32 2147483648, %v7019_v3  ;;  %vm2534_vm14 = vweird.f32 %v7021_v40 }
 0x242   : > { %3575 = vrcp.f32 %v7034_v5  ;;  %v2488_v11 = vadd.f32 %v7524_v52, %v2487_v21  ;;  %vm2505_vm8 = vweird.f32 %v7544_v57  ;;  %v2517_v42 = vmul.f32 %v7567_v6, %v2516_v17 }
 0x243   : > { %v2540_v34 = vand.u32 2147483648, %v7021_v40  ;;  %vm2520_vm9 = vweird.f32 %v7567_v6  ;;  %vm7687_vm1 = vcmp.eq.f32.partialorder %v2523_v36, 8.507059e+37  ;;  %v2531_v33 = vsub.f32 1.0, %v2530_v12  ;;  %vm7704_vm4 = vmor %vm2504_vm11, %vm2505_vm8 }
 0x244   : > { %v2538_v50 = vand.u32 2147483647, %v7021_v40  ;;  %v7692_v4 = vpop.eup %3573  ;;  %v2503_v23 = vadd.f32 %v7544_v57, %v2502_v20  ;;  %v2546_v29 = vsub.f32 1.0, %v2545_v43  ;;  %v2553_v19 = vand.u32 2147483647, %v7025_v8 }
 0x245   : > { %v2560_v59 = vmul.f32 %v7666_v62, %v7027_v16  ;;  %v7700_v51 = vsel %vm7606_vm6, %v2481_v24, %v2477_v7  ;;  %v2526_v21 = vor.u32 1.1754944e-38, %v2525_v1  ;;  %vm2549_vm3 = vweird.f32 %v7025_v8  ;;  %vm7721_vm6 = vmor %vm2519_vm15, %vm2520_vm9 }
 0x246   : > { %9587 = vst [vmem:[#allocation114_spill] sm:$0xff] %v7700_v51  ;;  %v2555_v17 = vand.u32 2147483648, %v7025_v8  ;;  %v2492_v36 = vsel %vm7682_vm0, %v7524_v52, %v2488_v11  ;;  %v2518_v12 = vadd.f32 %v7567_v6, %v2517_v42  ;;  %v2541_v28 = vor.u32 1.1754944e-38, %v2540_v34 }
 0x247   : > { %3577 = vrcp.f32 %v7036_v55  ;;  %v2532_v20 = vmul.f32 %v7619_v49, %v2531_v33  ;;  %vm7726_vm10 = vcmp.eq.f32.partialorder %v2538_v50, 8.507059e+37  ;;  %vm2564_vm2 = vweird.f32 %v7027_v16 }
 0x248   : > { %v7715_v24 = vpop.eup %3575  ;;  %v2568_v52 = vand.u32 2147483647, %v7027_v16  ;;  %v2575_v7 = vmul.f32 %v7692_v4, %v7029_v39  ;;  %v2507_v3 = vsel %vm7704_vm4, %v7544_v57, %v2503_v23  ;;  %v2547_v1 = vmul.f32 %v7648_v22, %v2546_v29 }
 0x249   : > { %vm7738_vm11 = vcmp.eq.f32.partialorder %v2553_v19, 8.507059e+37  ;;  %v2561_v42 = vsub.f32 1.0, %v2560_v59  ;;  %v2570_v34 = vand.u32 2147483648, %v7027_v16  ;;  %v7745_v41 = vsel %vm7643_vm5, %v2496_v56, %v2492_v36 }
 0x24a   : > { %9596 = vst [vmem:[#allocation115_spill] sm:$0xff] %v7745_v41  ;;  %vm2535_vm12 = vweird.f32 %v7619_v49  ;;  %v2556_v33 = vor.u32 1.1754944e-38, %v2555_v17  ;;  %v2590_v50 = vmul.f32 %v7715_v24, %v7034_v5  ;;  %v2522_v57 = vsel %vm7721_vm6, %v7567_v6, %v2518_v12 }
 0x24b   : > { %vm2550_vm13 = vweird.f32 %v7648_v22  ;;  %v2585_v23 = vand.u32 2147483648, %v7029_v39  ;;  %3579 = vrcp.f32 %v7041_v13  ;;  %v7758_v56 = vsel %vm7660_vm7, %v2511_v14, %v2507_v3  ;;  %vm7766_vm5 = vmor %vm2534_vm14, %vm2535_vm12 }
 0x24c   : > { %9597 = vst [vmem:[#allocation116_spill] sm:$0xff] %v7758_v56  ;;  %v2533_v46 = vadd.f32 %v7619_v49, %v2532_v20  ;;  %v2576_v29 = vsub.f32 1.0, %v2575_v7  ;;  %v2583_v19 = vand.u32 2147483647, %v7029_v39  ;;  %v2548_v30 = vadd.f32 %v7648_v22, %v2547_v1  ;;  %vm7785_vm7 = vmor %vm2549_vm3, %vm2550_vm13 }
 0x24d   : > { %v7762_v59 = vpop.eup %3577  ;;  %v2562_v17 = vmul.f32 %v7666_v62, %v2561_v42  ;;  %vm7772_vm15 = vcmp.eq.f32.partialorder %v2568_v52, 8.507059e+37  ;;  %v2571_v14 = vor.u32 1.1754944e-38, %v2570_v34  ;;  %3581 = vrcp.f32 %v7043_v48 }
 0x24e   : > { %v7779_v36 = vsel %vm7687_vm1, %v2526_v21, %v2522_v57  ;;  %vm2579_vm14 = vweird.f32 %v7029_v39  ;;  %v2591_v12 = vsub.f32 1.0, %v2590_v50  ;;  %v2605_v61 = vmul.f32 %v7762_v59, %v7036_v55 }
 0x24f   : > { %9602 = vst [vmem:[#allocation117_spill] sm:$0xff] %v7779_v36  ;;  %vm2565_vm8 = vweird.f32 %v7666_v62  ;;  %v2586_v20 = vor.u32 1.1754944e-38, %v2585_v23  ;;  %v2598_v2 = vand.u32 2147483647, %v7034_v5  ;;  %v2600_v21 = vand.u32 2147483648, %v7034_v5 }
 0x250   : > { %v2537_v8 = vsel %vm7766_vm5, %v7619_v49, %v2533_v46  ;;  %v2577_v52 = vmul.f32 %v7692_v4, %v2576_v29  ;;  %vm7799_vm0 = vcmp.eq.f32.partialorder %v2583_v19, 8.507059e+37  ;;  %vm2594_vm9 = vweird.f32 %v7034_v5  ;;  %vm7814_vm4 = vmor %vm2564_vm2, %vm2565_vm8 }
 0x251   : > { %3583 = vrcp.f32 %v7051_v9  ;;  %v7805_v3 = vpop.eup %3579  ;;  %v2552_v1 = vsel %vm7785_vm7, %v7648_v22, %v2548_v30  ;;  %v2563_v42 = vadd.f32 %v7666_v62, %v2562_v17  ;;  %vm2580_vm1 = vweird.f32 %v7692_v4 }
 0x252   : > { %v2606_v49 = vsub.f32 1.0, %v2605_v61  ;;  %v2592_v50 = vmul.f32 %v7715_v24, %v2591_v12  ;;  %v2613_v57 = vand.u32 2147483647, %v7036_v55  ;;  %v2615_v23 = vand.u32 2147483648, %v7036_v55 }
 0x253   : > { %v2620_v22 = vmul.f32 %v7805_v3, %v7041_v13  ;;  %v7823_v46 = vpop.eup %3581  ;;  %v7827_v29 = vsel %vm7726_vm10, %v2541_v28, %v2537_v8  ;;  %vm7829_vm3 = vcmp.eq.f32.partialorder %v2598_v2, 8.507059e+37  ;;  %v2601_v19 = vor.u32 1.1754944e-38, %v2600_v21  ;;  %vm7849_vm10 = vmor %vm2579_vm14, %vm2580_vm1 }
 0x254   : > { %9609 = vst [vmem:[#allocation118_spill] sm:$0xff] %v7827_v29  ;;  %vm2609_vm6 = vweird.f32 %v7036_v55  ;;  %v7836_v6 = vsel %vm7738_vm11, %v2556_v33, %v2552_v1  ;;  %v2578_v30 = vadd.f32 %v7692_v4, %v2577_v52  ;;  %vm2595_vm2 = vweird.f32 %v7715_v24 }
 0x255   : > { %9612 = vst [vmem:[#allocation119_spill] sm:$0xff] %v7836_v6  ;;  %v2635_v43 = vmul.f32 %v7823_v46, %v7043_v48  ;;  %v2567_v28 = vsel %vm7814_vm4, %v7666_v62, %v2563_v42  ;;  %v2607_v11 = vmul.f32 %v7762_v59, %v2606_v49  ;;  %v2621_v33 = vsub.f32 1.0, %v2620_v22  ;;  %vm7864_vm12 = vmor %vm2594_vm9, %vm2595_vm2 }
 0x256   : > { %v2628_v40 = vand.u32 2147483647, %v7041_v13  ;;  %v2593_v61 = vadd.f32 %v7715_v24, %v2592_v50  ;;  %vm7858_vm11 = vcmp.eq.f32.partialorder %v2613_v57, 8.507059e+37  ;;  %v2616_v62 = vor.u32 1.1754944e-38, %v2615_v23 }
 0x257   : > { %v7855_v12 = vpop.eup %3583  ;;  %v2636_v21 = vsub.f32 1.0, %v2635_v43  ;;  %vm2610_vm13 = vweird.f32 %v7762_v59  ;;  %vm2624_vm5 = vweird.f32 %v7041_v13  ;;  %v2630_v8 = vand.u32 2147483648, %v7041_v13 }
 0x258   : > { %v2650_v52 = vmul.f32 %v7855_v12, %v7051_v9  ;;  %v7875_v1 = vsel %vm7772_vm15, %v2571_v14, %v2567_v28  ;;  %v2582_v5 = vsel %vm7849_vm10, %v7692_v4, %v2578_v30  ;;  %vm2639_vm7 = vweird.f32 %v7043_v48  ;;  %vm7894_vm15 = vmor %vm2609_vm6, %vm2610_vm13 }
 0x259   : > { %9619 = vst [vmem:[#allocation120_spill] sm:$0xff] %v7875_v1  ;;  %v2643_v42 = vand.u32 2147483647, %v7043_v48  ;;  %v2608_v49 = vadd.f32 %v7762_v59, %v2607_v11  ;;  %v2622_v34 = vmul.f32 %v7805_v3, %v2621_v33  ;;  %vm7884_vm14 = vcmp.eq.f32.partialorder %v2628_v40, 8.507059e+37 }
 0x25a   : > { %v2645_v32 = vand.u32 2147483648, %v7043_v48  ;;  %v2651_v14 = vsub.f32 1.0, %v2650_v52  ;;  %v2597_v57 = vsel %vm7864_vm12, %v7715_v24, %v2593_v61  ;;  %v2637_v23 = vmul.f32 %v7823_v46, %v2636_v21 }
 0x25b   : > { %v2658_v22 = vand.u32 2147483647, %v7051_v9  ;;  %v2660_v30 = vand.u32 2147483648, %v7051_v9  ;;  %v7903_v43 = vsel %vm7799_vm0, %v2586_v20, %v2582_v5  ;;  %vm2625_vm8 = vweird.f32 %v7805_v3 }
 0x25c   : > { %9624 = vst [vmem:[#allocation121_spill] sm:$0xff] %v7903_v43  ;;  %v2631_v28 = vor.u32 1.1754944e-38, %v2630_v8  ;;  %v2652_v24 = vmul.f32 %v7855_v12, %v2651_v14  ;;  %vm2640_vm9 = vweird.f32 %v7823_v46  ;;  %vm7908_vm1 = vcmp.eq.f32.partialorder %v2643_v42, 8.507059e+37  ;;  %vm7925_vm6 = vmor %vm2624_vm5, %vm2625_vm8 }
 0x25d   : > { %vm2654_vm4 = vweird.f32 %v7051_v9  ;;  %v2664_v17 = vmul.f32 1.0614054, %v7205_v44  ;;  %v7916_v7 = vsel %vm7829_vm3, %v2601_v19, %v2597_v57  ;;  %v2612_v20 = vsel %vm7894_vm15, %v7762_v59, %v2608_v49  ;;  %vm7936_vm3 = vmor %vm2639_vm7, %vm2640_vm9 }
 0x25e   : > { %9627 = vst [vmem:[#allocation122_spill] sm:$0xff] %v7916_v7  ;;  %v2623_v11 = vadd.f32 %v7805_v3, %v2622_v34  ;;  %vm2655_vm0 = vweird.f32 %v7855_v12  ;;  %v2638_v40 = vadd.f32 %v7823_v46, %v2637_v23  ;;  %v2646_v61 = vor.u32 1.1754944e-38, %v2645_v32 }
 0x25f   : > { %vm7930_vm2 = vcmp.eq.f32.partialorder %v2658_v22, 8.507059e+37  ;;  %v2661_v19 = vor.u32 1.1754944e-38, %v2660_v30  ;;  %v2653_v13 = vadd.f32 %v7855_v12, %v2652_v24  ;;  %v2665_v21 = vmul.f32 1.0614054, %v7217_v38  ;;  %vm7950_vm10 = vmor %vm2654_vm4, %vm2655_vm0 }
 0x260   : > { %v2666_v39 = vmul.f32 1.0614054, %v7222_v15  ;;  %v2667_v8 = vmul.f32 1.0614054, %v7229_v53  ;;  %v7946_v52 = vsel %vm7858_vm11, %v2616_v62, %v2612_v20  ;;  %v2668_v5 = vmul.f32 1.0614054, %v7250_v25 }
 0x261   : > { %9634 = vst [vmem:[#allocation123_spill] sm:$0xff] %v7946_v52  ;;  %v2669_v42 = vmul.f32 1.0614054, %v7263_v54  ;;  %v2670_v49 = vmul.f32 1.0614054, %v7279_v31  ;;  %v2627_v34 = vsel %vm7925_vm6, %v7805_v3, %v2623_v11  ;;  %v2642_v32 = vsel %vm7936_vm3, %v7823_v46, %v2638_v40 }
 0x262   : > { %v2671_v2 = vmul.f32 1.0614054, %v7377_v35  ;;  %v2672_v62 = vmul.f32 1.0614054, %v7399_v63  ;;  %v2673_v9 = vmul.f32 1.0614054, %v7414_v18  ;;  %v2657_v3 = vsel %vm7950_vm10, %v7855_v12, %v2653_v13 }
 0x263   : > { %v2674_v14 = vmul.f32 1.0614054, %v7421_v0  ;;  %v2675_v57 = vmul.f32 1.0614054, %v7457_v10  ;;  %v2676_v4 = vmul.f32 1.0614054, %v7474_v37  ;;  %v7977_v24 = vsel %vm7884_vm14, %v2631_v28, %v2627_v34 }
 0x264   : > { %v2677_v23 = vmul.f32 1.0614054, %v7512_v47  ;;  %v2678_v22 = vmul.f32 1.0614054, %v7577_v60  ;;  %v2679_v30 = vmul.f32 1.0614054, %v7598_v45  ;;  %v7984_v33 = vsel %vm7908_vm1, %v2646_v61, %v2642_v32 }
 0x265   : > { %9637 = vst [vmem:[#allocation124_spill] sm:$0xff] %v7977_v24  ;;  %v2680_v46 = vmul.f32 1.0614054, %v7623_v26  ;;  %v2681_v20 = vmul.f32 1.0614054, %v7634_v27  ;;  %v7991_v50 = vsel %vm7930_vm2, %v2661_v19, %v2657_v3 }
 0x266   : > { %v2682_v11 = vmul.f32 1.0614054, %v7657_v58  ;;  %9638 = vst [vmem:[#allocation125_spill] sm:$0xff] %v7984_v33  ;;  %v2683_v12 = vmul.f32 1.0614054, %v7700_v51 }
 0x267   : > { %v2684_v40 = vmul.f32 1.0614054, %v7745_v41  ;;  %v2685_v59 = vmul.f32 1.0614054, %v7758_v56  ;;  %9639 = vst [vmem:[#allocation126_spill] sm:$0xff] %v7991_v50 }
 0x268   : > { %v2686_v28 = vmul.f32 1.0614054, %v7779_v36  ;;  %v2687_v13 = vmul.f32 1.0614054, %v7827_v29  ;;  %v2688_v48 = vmul.f32 1.0614054, %v7836_v6 }
 0x269   : > { %v2689_v55 = vmul.f32 1.0614054, %v7875_v1  ;;  %v2690_v61 = vmul.f32 1.0614054, %v7903_v43  ;;  %v2691_v34 = vmul.f32 1.0614054, %v7916_v7 }
 0x26a   : > { %v2692_v32 = vmul.f32 1.0614054, %v7946_v52  ;;  %v2693_v56 = vmul.f32 1.0614054, %v7977_v24  ;;  %v2696_v41 = vadd.f32 -1.4531521, %v2664_v17 }
 0x26b   : > { %v2694_v16 = vmul.f32 1.0614054, %v7984_v33  ;;  %v2695_v19 = vmul.f32 1.0614054, %v7991_v50  ;;  %v2697_v3 = vadd.f32 -1.4531521, %v2665_v21 }
 0x26c   : > { %v2698_v36 = vadd.f32 -1.4531521, %v2666_v39  ;;  %v2699_v29 = vadd.f32 -1.4531521, %v2667_v8  ;;  %v2700_v51 = vadd.f32 -1.4531521, %v2668_v5  ;;  %v2728_v7 = vmul.f32 %v2696_v41, %v7205_v44 }
 0x26d   : > { %v2701_v6 = vadd.f32 -1.4531521, %v2669_v42  ;;  %v2702_v58 = vadd.f32 -1.4531521, %v2670_v49  ;;  %v2703_v1 = vadd.f32 -1.4531521, %v2671_v2  ;;  %v2729_v17 = vmul.f32 %v2697_v3, %v7217_v38 }
 0x26e   : > { %v2704_v27 = vadd.f32 -1.4531521, %v2672_v62  ;;  %v2705_v43 = vadd.f32 -1.4531521, %v2673_v9  ;;  %v2706_v26 = vadd.f32 -1.4531521, %v2674_v14  ;;  %v2730_v21 = vmul.f32 %v2698_v36, %v7222_v15 }
 0x26f   : > { %v2707_v52 = vadd.f32 -1.4531521, %v2675_v57  ;;  %v2708_v45 = vadd.f32 -1.4531521, %v2676_v4  ;;  %v2709_v24 = vadd.f32 -1.4531521, %v2677_v23  ;;  %v2731_v42 = vmul.f32 %v2699_v29, %v7229_v53 }
 0x270   : > { %v2710_v33 = vadd.f32 -1.4531521, %v2678_v22  ;;  %v2711_v60 = vadd.f32 -1.4531521, %v2679_v30  ;;  %v2712_v50 = vadd.f32 -1.4531521, %v2680_v46  ;;  %v2732_v41 = vmul.f32 %v2700_v51, %v7250_v25 }
 0x271   : > { %v2713_v39 = vadd.f32 -1.4531521, %v2681_v20  ;;  %v2714_v8 = vadd.f32 -1.4531521, %v2682_v11  ;;  %v2715_v5 = vadd.f32 -1.4531521, %v2683_v12  ;;  %v2733_v4 = vmul.f32 %v2701_v6, %v7263_v54 }
 0x272   : > { %v2716_v49 = vadd.f32 -1.4531521, %v2684_v40  ;;  %v2717_v2 = vadd.f32 -1.4531521, %v2685_v59  ;;  %v2718_v62 = vadd.f32 -1.4531521, %v2686_v28  ;;  %v2734_v36 = vmul.f32 %v2702_v58, %v7279_v31 }
 0x273   : > { %v2719_v9 = vadd.f32 -1.4531521, %v2687_v13  ;;  %v2720_v14 = vadd.f32 -1.4531521, %v2688_v48  ;;  %v2721_v57 = vadd.f32 -1.4531521, %v2689_v55  ;;  %v2735_v29 = vmul.f32 %v2703_v1, %v7377_v35 }
 0x274   : > { %v2722_v23 = vadd.f32 -1.4531521, %v2690_v61  ;;  %v2723_v22 = vadd.f32 -1.4531521, %v2691_v34  ;;  %v2724_v30 = vadd.f32 -1.4531521, %v2692_v32  ;;  %v2736_v12 = vmul.f32 %v2704_v27, %v7399_v63 }
 0x275   : > { %v2725_v46 = vadd.f32 -1.4531521, %v2693_v56  ;;  %v2726_v20 = vadd.f32 -1.4531521, %v2694_v16  ;;  %v2727_v11 = vadd.f32 -1.4531521, %v2695_v19  ;;  %v2737_v40 = vmul.f32 %v2705_v43, %v7414_v18 }
 0x276   : > { %v2738_v51 = vmul.f32 %v2706_v26, %v7421_v0  ;;  %v2739_v59 = vmul.f32 %v2707_v52, %v7457_v10  ;;  %v2740_v6 = vmul.f32 %v2708_v45, %v7474_v37  ;;  %v2741_v28 = vmul.f32 %v2709_v24, %v7512_v47  ;;  %v9640_v13 = vld [vmem:[#allocation109_spill] sm:$0xff]  ;;  %v9641_v58 = vld [vmem:[#allocation110_spill] sm:$0xff]  ;;  %v9642_v55 = vld [vmem:[#allocation111_spill] sm:$0xff] }
 0x277   : > { %v2742_v48 = vmul.f32 %v2710_v33, %v9640_v13  ;;  %v2743_v56 = vmul.f32 %v2711_v60, %v9641_v58  ;;  %v2744_v61 = vmul.f32 %v2712_v50, %v9642_v55  ;;  %v9643_v34 = vld [vmem:[#allocation112_spill] sm:$0xff]  ;;  %v9644_v32 = vld [vmem:[#allocation113_spill] sm:$0xff]  ;;  %v9645_v16 = vld [vmem:[#allocation114_spill] sm:$0xff]  ;;  %v2760_v55 = vadd.f32 1.4214138, %v2728_v7 }
 0x278   : > { %v2745_v1 = vmul.f32 %v2713_v39, %v9643_v34  ;;  %v2746_v27 = vmul.f32 %v2714_v8, %v9644_v32  ;;  %v2747_v43 = vmul.f32 %v2715_v5, %v9645_v16  ;;  %v9646_v19 = vld [vmem:[#allocation115_spill] sm:$0xff]  ;;  %v9647_v3 = vld [vmem:[#allocation116_spill] sm:$0xff]  ;;  %v9648_v10 = vld [vmem:[#allocation117_spill] sm:$0xff]  ;;  %v2770_v7 = vadd.f32 1.4214138, %v2738_v51 }
 0x279   : > { %v2748_v26 = vmul.f32 %v2716_v49, %v9646_v19  ;;  %v2749_v52 = vmul.f32 %v2717_v2, %v9647_v3  ;;  %v2750_v45 = vmul.f32 %v2718_v62, %v9648_v10  ;;  %v9649_v37 = vld [vmem:[#allocation118_spill] sm:$0xff]  ;;  %v9650_v47 = vld [vmem:[#allocation119_spill] sm:$0xff]  ;;  %v9651_v13 = vld [vmem:[#allocation120_spill] sm:$0xff]  ;;  %v2761_v49 = vadd.f32 1.4214138, %v2729_v17 }
 0x27a   : > { %v2751_v24 = vmul.f32 %v2719_v9, %v9649_v37  ;;  %v2752_v33 = vmul.f32 %v2720_v14, %v9650_v47  ;;  %v2753_v60 = vmul.f32 %v2721_v57, %v9651_v13  ;;  %v9652_v58 = vld [vmem:[#allocation121_spill] sm:$0xff]  ;;  %v9653_v39 = vld [vmem:[#allocation122_spill] sm:$0xff]  ;;  %v9654_v8 = vld [vmem:[#allocation123_spill] sm:$0xff]  ;;  %v2762_v3 = vadd.f32 1.4214138, %v2730_v21 }
 0x27b   : > { %v2754_v50 = vmul.f32 %v2722_v23, %v9652_v58  ;;  %v2755_v34 = vmul.f32 %v2723_v22, %v9653_v39  ;;  %v2756_v32 = vmul.f32 %v2724_v30, %v9654_v8  ;;  %v9655_v5 = vld [vmem:[#allocation124_spill] sm:$0xff]  ;;  %v9656_v19 = vld [vmem:[#allocation125_spill] sm:$0xff]  ;;  %v2763_v62 = vadd.f32 1.4214138, %v2731_v42  ;;  %v9657_v9 = vld [vmem:[#allocation126_spill] sm:$0xff] }
 0x27c   : > { %v2757_v16 = vmul.f32 %v2725_v46, %v9655_v5  ;;  %v2758_v2 = vmul.f32 %v2726_v20, %v9656_v19  ;;  %v2764_v10 = vadd.f32 1.4214138, %v2732_v41  ;;  %v2759_v37 = vmul.f32 %v2727_v11, %v9657_v9 }
 0x27d   : > { %v2765_v14 = vadd.f32 1.4214138, %v2733_v4  ;;  %v2766_v47 = vadd.f32 1.4214138, %v2734_v36  ;;  %v2767_v57 = vadd.f32 1.4214138, %v2735_v29  ;;  %v2792_v22 = vmul.f32 %v2760_v55, %v7205_v44 }
 0x27e   : > { %v2768_v13 = vadd.f32 1.4214138, %v2736_v12  ;;  %v2769_v23 = vadd.f32 1.4214138, %v2737_v40  ;;  %v2771_v39 = vadd.f32 1.4214138, %v2739_v59  ;;  %v2793_v17 = vmul.f32 %v2761_v49, %v7217_v38 }
 0x27f   : > { %v2772_v30 = vadd.f32 1.4214138, %v2740_v6  ;;  %v2773_v8 = vadd.f32 1.4214138, %v2741_v28  ;;  %v2774_v46 = vadd.f32 1.4214138, %v2742_v48  ;;  %v2794_v42 = vmul.f32 %v2762_v3, %v7222_v15 }
 0x280   : > { %v2775_v20 = vadd.f32 1.4214138, %v2743_v56  ;;  %v2776_v21 = vadd.f32 1.4214138, %v2744_v61  ;;  %v2777_v41 = vadd.f32 1.4214138, %v2745_v1  ;;  %v2795_v36 = vmul.f32 %v2763_v62, %v7229_v53 }
 0x281   : > { %v2778_v11 = vadd.f32 1.4214138, %v2746_v27  ;;  %v2779_v4 = vadd.f32 1.4214138, %v2747_v43  ;;  %v2780_v29 = vadd.f32 1.4214138, %v2748_v26  ;;  %v2796_v51 = vmul.f32 %v2764_v10, %v7250_v25 }
 0x282   : > { %v2781_v12 = vadd.f32 1.4214138, %v2749_v52  ;;  %v2782_v40 = vadd.f32 1.4214138, %v2750_v45  ;;  %v2783_v59 = vadd.f32 1.4214138, %v2751_v24  ;;  %v2797_v55 = vmul.f32 %v2765_v14, %v7263_v54 }
 0x283   : > { %v2784_v6 = vadd.f32 1.4214138, %v2752_v33  ;;  %v2785_v28 = vadd.f32 1.4214138, %v2753_v60  ;;  %v2786_v48 = vadd.f32 1.4214138, %v2754_v50  ;;  %v2798_v3 = vmul.f32 %v2766_v47, %v7279_v31 }
 0x284   : > { %v2787_v56 = vadd.f32 1.4214138, %v2755_v34  ;;  %v2788_v61 = vadd.f32 1.4214138, %v2756_v32  ;;  %v2789_v1 = vadd.f32 1.4214138, %v2757_v16  ;;  %v2799_v49 = vmul.f32 %v2767_v57, %v7377_v35 }
 0x285   : > { %v2790_v27 = vadd.f32 1.4214138, %v2758_v2  ;;  %v2791_v43 = vadd.f32 1.4214138, %v2759_v37  ;;  %v2800_v26 = vmul.f32 %v2768_v13, %v7399_v63  ;;  %v2801_v52 = vmul.f32 %v2769_v23, %v7414_v18  ;;  %v9658_v45 = vld [vmem:[#allocation106_spill] sm:$0xff]  ;;  %v9659_v33 = vld [vmem:[#allocation107_spill] sm:$0xff] }
 0x286   : > { %v2802_v10 = vmul.f32 %v2770_v7, %v7421_v0  ;;  %v2803_v24 = vmul.f32 %v2771_v39, %v9658_v45  ;;  %v2804_v60 = vmul.f32 %v2772_v30, %v9659_v33  ;;  %v9660_v50 = vld [vmem:[#allocation108_spill] sm:$0xff]  ;;  %v9661_v32 = vld [vmem:[#allocation109_spill] sm:$0xff]  ;;  %v9662_v47 = vld [vmem:[#allocation110_spill] sm:$0xff]  ;;  %v2824_v33 = vadd.f32 -0.28449672, %v2792_v22 }
 0x287   : > { %v2805_v34 = vmul.f32 %v2773_v8, %v9660_v50  ;;  %v2806_v62 = vmul.f32 %v2774_v46, %v9661_v32  ;;  %v2807_v16 = vmul.f32 %v2775_v20, %v9662_v47  ;;  %v9663_v2 = vld [vmem:[#allocation111_spill] sm:$0xff]  ;;  %v9664_v14 = vld [vmem:[#allocation112_spill] sm:$0xff]  ;;  %v9665_v35 = vld [vmem:[#allocation113_spill] sm:$0xff]  ;;  %v2823_v22 = vmul.f32 %v2791_v43, %v9657_v9 }
 0x288   : > { %v2808_v37 = vmul.f32 %v2776_v21, %v9663_v2  ;;  %v2809_v57 = vmul.f32 %v2777_v41, %v9664_v14  ;;  %v2810_v13 = vmul.f32 %v2778_v11, %v9665_v35  ;;  %v9666_v63 = vld [vmem:[#allocation114_spill] sm:$0xff]  ;;  %v9667_v18 = vld [vmem:[#allocation115_spill] sm:$0xff]  ;;  %v9668_v0 = vld [vmem:[#allocation116_spill] sm:$0xff]  ;;  %v2825_v21 = vadd.f32 -0.28449672, %v2793_v17 }
 0x289   : > { %v2811_v23 = vmul.f32 %v2779_v4, %v9666_v63  ;;  %v2812_v7 = vmul.f32 %v2780_v29, %v9667_v18  ;;  %v2813_v39 = vmul.f32 %v2781_v12, %v9668_v0  ;;  %v9669_v45 = vld [vmem:[#allocation117_spill] sm:$0xff]  ;;  %v9670_v8 = vld [vmem:[#allocation118_spill] sm:$0xff]  ;;  %v9671_v46 = vld [vmem:[#allocation119_spill] sm:$0xff]  ;;  %v2818_v41 = vmul.f32 %v2786_v48, %v9652_v58 }
 0x28a   : > { %v2814_v30 = vmul.f32 %v2782_v40, %v9669_v45  ;;  %v2815_v50 = vmul.f32 %v2783_v59, %v9670_v8  ;;  %v2816_v32 = vmul.f32 %v2784_v6, %v9671_v46  ;;  %v9672_v20 = vld [vmem:[#allocation120_spill] sm:$0xff]  ;;  %v9673_v14 = vld [vmem:[#allocation122_spill] sm:$0xff]  ;;  %v9674_v35 = vld [vmem:[#allocation123_spill] sm:$0xff]  ;;  %v2826_v63 = vadd.f32 -0.28449672, %v2794_v42 }
 0x28b   : > { %v2817_v47 = vmul.f32 %v2785_v28, %v9672_v20  ;;  %v2819_v11 = vmul.f32 %v2787_v56, %v9673_v14  ;;  %v2820_v4 = vmul.f32 %v2788_v61, %v9674_v35  ;;  %v2821_v29 = vmul.f32 %v2789_v1, %v9655_v5 }
 0x28c   : > { %v2822_v12 = vmul.f32 %v2790_v27, %v9656_v19  ;;  %v2827_v40 = vadd.f32 -0.28449672, %v2795_v36  ;;  %v2828_v59 = vadd.f32 -0.28449672, %v2796_v51  ;;  %v2829_v8 = vadd.f32 -0.28449672, %v2797_v55 }
 0x28d   : > { %v2830_v6 = vadd.f32 -0.28449672, %v2798_v3  ;;  %v2856_v28 = vmul.f32 %v2824_v33, %v7205_v44  ;;  %v2831_v17 = vadd.f32 -0.28449672, %v2799_v49  ;;  %v2832_v20 = vadd.f32 -0.28449672, %v2800_v26 }
 0x28e   : > { %v2833_v48 = vadd.f32 -0.28449672, %v2801_v52  ;;  %v2857_v56 = vmul.f32 %v2825_v21, %v7217_v38  ;;  %v2834_v14 = vadd.f32 -0.28449672, %v2802_v10  ;;  %v2835_v61 = vadd.f32 -0.28449672, %v2803_v24 }
 0x28f   : > { %v2836_v42 = vadd.f32 -0.28449672, %v2804_v60  ;;  %v2858_v1 = vmul.f32 %v2826_v63, %v7222_v15  ;;  %v2837_v5 = vadd.f32 -0.28449672, %v2805_v34  ;;  %v2838_v27 = vadd.f32 -0.28449672, %v2806_v62 }
 0x290   : > { %v2839_v19 = vadd.f32 -0.28449672, %v2807_v16  ;;  %v2859_v36 = vmul.f32 %v2827_v40, %v7229_v53  ;;  %v2840_v51 = vadd.f32 -0.28449672, %v2808_v37  ;;  %v2841_v55 = vadd.f32 -0.28449672, %v2809_v57 }
 0x291   : > { %v2842_v3 = vadd.f32 -0.28449672, %v2810_v13  ;;  %v2860_v43 = vmul.f32 %v2828_v59, %v7250_v25  ;;  %v2843_v49 = vadd.f32 -0.28449672, %v2811_v23  ;;  %v2844_v26 = vadd.f32 -0.28449672, %v2812_v7 }
 0x292   : > { %v2845_v52 = vadd.f32 -0.28449672, %v2813_v39  ;;  %v2861_v33 = vmul.f32 %v2829_v8, %v7263_v54  ;;  %v2846_v10 = vadd.f32 -0.28449672, %v2814_v30  ;;  %v2847_v24 = vadd.f32 -0.28449672, %v2815_v50 }
 0x293   : > { %v2848_v60 = vadd.f32 -0.28449672, %v2816_v32  ;;  %v2862_v63 = vmul.f32 %v2830_v6, %v7279_v31  ;;  %v2849_v34 = vadd.f32 -0.28449672, %v2817_v47  ;;  %v2850_v62 = vadd.f32 -0.28449672, %v2818_v41 }
 0x294   : > { %v2851_v16 = vadd.f32 -0.28449672, %v2819_v11  ;;  %v9675_v21 = vld [vmem:[#allocation102_spill] sm:$0xff]  ;;  %v2852_v37 = vadd.f32 -0.28449672, %v2820_v4  ;;  %v9676_v53 = vld [vmem:[#allocation103_spill] sm:$0xff]  ;;  %v2872_v4 = vmul.f32 %v2840_v51, %v9663_v2 }
 0x295   : > { %v2863_v40 = vmul.f32 %v2831_v17, %v9675_v21  ;;  %v2853_v57 = vadd.f32 -0.28449672, %v2821_v29  ;;  %v2854_v13 = vadd.f32 -0.28449672, %v2822_v12  ;;  %v2864_v59 = vmul.f32 %v2832_v20, %v9676_v53  ;;  %v9677_v7 = vld [vmem:[#allocation104_spill] sm:$0xff]  ;;  %v9678_v25 = vld [vmem:[#allocation105_spill] sm:$0xff] }
 0x296   : > { %v2855_v23 = vadd.f32 -0.28449672, %v2823_v22  ;;  %v2865_v39 = vmul.f32 %v2833_v48, %v9677_v7  ;;  %v2866_v8 = vmul.f32 %v2834_v14, %v9678_v25  ;;  %v9679_v30 = vld [vmem:[#allocation106_spill] sm:$0xff]  ;;  %v9680_v32 = vld [vmem:[#allocation107_spill] sm:$0xff]  ;;  %v9681_v6 = vld [vmem:[#allocation108_spill] sm:$0xff]  ;;  %v2876_v14 = vmul.f32 %v2844_v26, %v9667_v18 }
 0x297   : > { %v2867_v50 = vmul.f32 %v2835_v61, %v9679_v30  ;;  %v2868_v54 = vmul.f32 %v2836_v42, %v9680_v32  ;;  %v2869_v47 = vmul.f32 %v2837_v5, %v9681_v6  ;;  %v9682_v41 = vld [vmem:[#allocation109_spill] sm:$0xff]  ;;  %v9683_v31 = vld [vmem:[#allocation110_spill] sm:$0xff]  ;;  %v9684_v29 = vld [vmem:[#allocation112_spill] sm:$0xff]  ;;  %v2877_v61 = vmul.f32 %v2845_v52, %v9668_v0 }
 0x298   : > { %v2870_v11 = vmul.f32 %v2838_v27, %v9682_v41  ;;  %v2871_v17 = vmul.f32 %v2839_v19, %v9683_v31  ;;  %v2873_v12 = vmul.f32 %v2841_v55, %v9684_v29  ;;  %v9685_v20 = vld [vmem:[#allocation113_spill] sm:$0xff]  ;;  %v9686_v53 = vld [vmem:[#allocation114_spill] sm:$0xff]  ;;  %v2878_v42 = vmul.f32 %v2846_v10, %v9669_v45  ;;  %v9688_v41 = vld [vmem:[#allocation120_spill] sm:$0xff] }
 0x299   : > { %v2874_v22 = vmul.f32 %v2842_v3, %v9685_v20  ;;  %v2875_v48 = vmul.f32 %v2843_v49, %v9686_v53  ;;  %v9687_v32 = vld [vmem:[#allocation118_spill] sm:$0xff]  ;;  %v2880_v27 = vmul.f32 %v2848_v60, %v9671_v46  ;;  %v2881_v19 = vmul.f32 %v2849_v34, %v9688_v41  ;;  %v9690_v49 = vld [vmem:[#allocation124_spill] sm:$0xff]  ;;  %v9691_v18 = vld [vmem:[#allocation125_spill] sm:$0xff] }
 0x29a   : > { %v2879_v5 = vmul.f32 %v2847_v24, %v9687_v32  ;;  %v2882_v51 = vmul.f32 %v2850_v62, %v9652_v58  ;;  %v2888_v2 = vadd.f32 0.2548296, %v2856_v28  ;;  %v9689_v55 = vld [vmem:[#allocation122_spill] sm:$0xff]  ;;  %v2884_v3 = vmul.f32 %v2852_v37, %v9674_v35 }
 0x29b   : > { %v2883_v29 = vmul.f32 %v2851_v16, %v9689_v55  ;;  %v2885_v53 = vmul.f32 %v2853_v57, %v9690_v49  ;;  %v2889_v26 = vadd.f32 0.2548296, %v2857_v56  ;;  %v2886_v52 = vmul.f32 %v2854_v13, %v9691_v18 }
 0x29c   : > { %v2890_v0 = vadd.f32 0.2548296, %v2858_v1  ;;  %v2891_v10 = vadd.f32 0.2548296, %v2859_v36  ;;  %v2892_v45 = vadd.f32 0.2548296, %v2860_v43  ;;  %v2887_v24 = vmul.f32 %v2855_v23, %v9657_v9 }
 0x29d   : > { %v2893_v60 = vadd.f32 0.2548296, %v2861_v33  ;;  %v2894_v46 = vadd.f32 0.2548296, %v2862_v63  ;;  %v2895_v34 = vadd.f32 0.2548296, %v2863_v40  ;;  %v8100_v16 = vmul.f32 %v2888_v2, %v7205_v44 }
 0x29e   : > { %v2896_v41 = vadd.f32 0.2548296, %v2864_v59  ;;  %v2897_v62 = vadd.f32 0.2548296, %v2865_v39  ;;  %v2898_v28 = vadd.f32 0.2548296, %v2866_v8  ;;  %v8103_v56 = vmul.f32 %v2889_v26, %v7217_v38 }
 0x29f   : > { %9692 = vst [vmem:[#allocation121_spill] sm:$0xff] %v8100_v16  ;;  %v2899_v37 = vadd.f32 0.2548296, %v2867_v50  ;;  %v2900_v35 = vadd.f32 0.2548296, %v2868_v54  ;;  %v8106_v13 = vmul.f32 %v2890_v0, %v7222_v15  ;;  %v9695_v59 = vld [vmem:[#allocation98_spill] sm:$0xff] }
 0x2a0   : > { %v2901_v57 = vadd.f32 0.2548296, %v2869_v47  ;;  %9693 = vst [vmem:[#allocation126_spill] sm:$0xff] %v8103_v56  ;;  %v2902_v1 = vadd.f32 0.2548296, %v2870_v11  ;;  %v8109_v23 = vmul.f32 %v2891_v10, %v9695_v59  ;;  %v9697_v54 = vld [vmem:[#allocation99_spill] sm:$0xff] }
 0x2a1   : > { %v2903_v36 = vadd.f32 0.2548296, %v2871_v17  ;;  %v2904_v43 = vadd.f32 0.2548296, %v2872_v4  ;;  %9694 = vst [vmem:[#allocation102_spill] sm:$0xff] %v8106_v13  ;;  %v8112_v8 = vmul.f32 %v2892_v45, %v9697_v54  ;;  %v9699_v11 = vld [vmem:[#allocation100_spill] sm:$0xff] }
 0x2a2   : > { %v2905_v33 = vadd.f32 0.2548296, %v2873_v12  ;;  %v2906_v63 = vadd.f32 0.2548296, %v2874_v22  ;;  %v2907_v40 = vadd.f32 0.2548296, %v2875_v48  ;;  %v8115_v17 = vmul.f32 %v2893_v60, %v9699_v11 }
 0x2a3   : > { %9696 = vst [vmem:[#allocation104_spill] sm:$0xff] %v8109_v23  ;;  %v2908_v44 = vadd.f32 0.2548296, %v2876_v14  ;;  %v2909_v2 = vadd.f32 0.2548296, %v2877_v61  ;;  %v9701_v12 = vld [vmem:[#allocation101_spill] sm:$0xff]  ;;  %v8121_v61 = vmul.f32 %v2895_v34, %v9675_v21 }
 0x2a4   : > { %v2910_v39 = vadd.f32 0.2548296, %v2878_v42  ;;  %9698 = vst [vmem:[#allocation105_spill] sm:$0xff] %v8112_v8  ;;  %v2911_v38 = vadd.f32 0.2548296, %v2879_v5  ;;  %v8118_v22 = vmul.f32 %v2894_v46, %v9701_v12  ;;  %v9704_v45 = vld [vmem:[#allocation103_spill] sm:$0xff]  ;;  %v8127_v5 = vmul.f32 %v2897_v62, %v9677_v7 }
 0x2a5   : > { %v2912_v50 = vadd.f32 0.2548296, %v2880_v27  ;;  %v2913_v47 = vadd.f32 0.2548296, %v2881_v19  ;;  %9700 = vst [vmem:[#allocation106_spill] sm:$0xff] %v8115_v17  ;;  %v8124_v42 = vmul.f32 %v2896_v41, %v9704_v45  ;;  %v8130_v27 = vmul.f32 %v2898_v28, %v9678_v25  ;;  %v9709_v46 = vld [vmem:[#allocation107_spill] sm:$0xff] }
 0x2a6   : > { %v2914_v15 = vadd.f32 0.2548296, %v2882_v51  ;;  %v2915_v0 = vadd.f32 0.2548296, %v2883_v29  ;;  %v2916_v4 = vadd.f32 0.2548296, %v2884_v3  ;;  %v8133_v29 = vmul.f32 %v2899_v37, %v9679_v30 }
 0x2a7   : > { %9702 = vst [vmem:[#allocation108_spill] sm:$0xff] %v8118_v22  ;;  %v2917_v48 = vadd.f32 0.2548296, %v2885_v53  ;;  %v2918_v26 = vadd.f32 0.2548296, %v2886_v52  ;;  %v8136_v19 = vmul.f32 %v2900_v35, %v9709_v46  ;;  %v8139_v53 = vmul.f32 %v2901_v57, %v9681_v6  ;;  %v9712_v21 = vld [vmem:[#allocation109_spill] sm:$0xff] }
 0x2a8   : > { %v2919_v14 = vadd.f32 0.2548296, %v2887_v24  ;;  %9703 = vst [vmem:[#allocation110_spill] sm:$0xff] %v8121_v61  ;;  %v8142_v51 = vmul.f32 %v2902_v1, %v9712_v21  ;;  %v8145_v41 = vmul.f32 %v2903_v36, %v9683_v31  ;;  %v9715_v7 = vld [vmem:[#allocation111_spill] sm:$0xff]  ;;  %v9717_v25 = vld [vmem:[#allocation112_spill] sm:$0xff]  ;;  %v8154_v30 = vmul.f32 %v2906_v63, %v9685_v20  ;;  %v9720_v35 = vld [vmem:[#allocation114_spill] sm:$0xff] }
 0x2a9   : > { %9705 = vst [vmem:[#allocation113_spill] sm:$0xff] %v8124_v42  ;;  %v8148_v3 = vmul.f32 %v2904_v43, %v9715_v7  ;;  %v8151_v52 = vmul.f32 %v2905_v33, %v9717_v25  ;;  %v8157_v10 = vmul.f32 %v2907_v40, %v9720_v35  ;;  %v9722_v6 = vld [vmem:[#allocation115_spill] sm:$0xff]  ;;  %v9724_v60 = vld [vmem:[#allocation116_spill] sm:$0xff]  ;;  %v9726_v31 = vld [vmem:[#allocation117_spill] sm:$0xff]  ;;  %v8169_v28 = vmul.f32 %v2911_v38, %v9687_v32 }
 0x2aa   : > { %9706 = vst [vmem:[#allocation118_spill] sm:$0xff] %v8127_v5  ;;  %v8160_v24 = vmul.f32 %v2908_v44, %v9722_v6  ;;  %v8163_v34 = vmul.f32 %v2909_v2, %v9724_v60  ;;  %v8166_v62 = vmul.f32 %v2910_v39, %v9726_v31  ;;  %v9729_v37 = vld [vmem:[#allocation119_spill] sm:$0xff]  ;;  %v9731_v20 = vld [vmem:[#allocation120_spill] sm:$0xff]  ;;  %v8178_v36 = vmul.f32 %v2914_v15, %v9652_v58  ;;  %v9741_v39 = vld [vmem:[#allocation61_spill] sm:$0xff] }
 0x2ab   : > { %9707 = vst [vmem:[#allocation122_spill] sm:$0xff] %v8130_v27  ;;  %v8172_v57 = vmul.f32 %v2912_v50, %v9729_v37  ;;  %v8175_v1 = vmul.f32 %v2913_v47, %v9731_v20  ;;  %v8181_v43 = vmul.f32 %v2915_v0, %v9689_v55  ;;  %v9735_v33 = vld [vmem:[#allocation123_spill] sm:$0xff]  ;;  %v8187_v40 = vmul.f32 %v2917_v48, %v9690_v49  ;;  %v9740_v44 = vld [vmem:[#allocation28_spill] sm:$0xff]  ;;  %v9742_v54 = vld [vmem:[#allocation62_spill] sm:$0xff] }
 0x2ac   : > { %9708 = vst [vmem:[#allocation124_spill] sm:$0xff] %v8133_v29  ;;  %v8184_v63 = vmul.f32 %v2916_v4, %v9735_v33  ;;  %v8190_v32 = vmul.f32 %v2918_v26, %v9691_v18  ;;  %v8193_v59 = vmul.f32 %v2919_v14, %v9657_v9  ;;  %v2952_v2 = vsub.f32 0.0, %v9740_v44  ;;  %v9743_v55 = vld [vmem:[#allocation55_spill] sm:$0xff]  ;;  %v9745_v15 = vld [vmem:[#allocation64_spill] sm:$0xff]  ;;  %v9748_v48 = vld [vmem:[#allocation29_spill] sm:$0xff] }
 0x2ad   : > { %9710 = vst [vmem:[#allocation125_spill] sm:$0xff] %v8136_v19  ;;  %v2953_v58 = vsub.f32 0.0, %v9741_v39  ;;  %v2954_v38 = vsub.f32 0.0, %v9742_v54  ;;  %v2955_v50 = vsub.f32 0.0, %v9743_v55  ;;  %v9744_v47 = vld [vmem:[#allocation63_spill] sm:$0xff]  ;;  %v2957_v0 = vsub.f32 0.0, %v9745_v15 }
 0x2ae   : > { %9711 = vst [vmem:[#allocation98_spill] sm:$0xff] %v8139_v53  ;;  %v2956_v11 = vsub.f32 0.0, %v9744_v47  ;;  %v9746_v49 = vld [vmem:[#allocation4_spill] sm:$0xff]  ;;  %v9747_v12 = vld [vmem:[#allocation3_spill] sm:$0xff]  ;;  %v2960_v26 = vsub.f32 0.0, %v9748_v48  ;;  %v9749_v9 = vld [vmem:[#allocation30_spill] sm:$0xff] }
 0x2af   : > { %9713 = vst [vmem:[#allocation99_spill] sm:$0xff] %v8142_v51  ;;  %v2958_v4 = vsub.f32 0.0, %v9746_v49  ;;  %v2959_v18 = vsub.f32 0.0, %v9747_v12  ;;  %v2961_v14 = vsub.f32 0.0, %v9749_v9  ;;  %v9750_v45 = vld [vmem:[#allocation37_spill] sm:$0xff]  ;;  %v9751_v21 = vld [vmem:[#allocation38_spill] sm:$0xff]  ;;  %v2986_v53 = vmul.f32 %v2954_v38, %v9742_v54 }
 0x2b0   : > { %9714 = vst [vmem:[#allocation100_spill] sm:$0xff] %v8145_v41  ;;  %v2962_v46 = vsub.f32 0.0, %v9750_v45  ;;  %v2963_v7 = vsub.f32 0.0, %v9751_v21  ;;  %v9752_v25 = vld [vmem:[#allocation43_spill] sm:$0xff]  ;;  %v9753_v6 = vld [vmem:[#allocation6_spill] sm:$0xff]  ;;  %v9763_v41 = vld [vmem:[#allocation85_spill] sm:$0xff]  ;;  %v2987_v19 = vmul.f32 %v2955_v50, %v9743_v55  ;;  %v2988_v17 = vmul.f32 %v2956_v11, %v9744_v47 }
 0x2b1   : > { %9716 = vst [vmem:[#allocation101_spill] sm:$0xff] %v8148_v3  ;;  %v2964_v35 = vsub.f32 0.0, %v9752_v25  ;;  %v2965_v60 = vsub.f32 0.0, %v9753_v6  ;;  %v9754_v31 = vld [vmem:[#allocation7_spill] sm:$0xff]  ;;  %v9755_v20 = vld [vmem:[#allocation10_spill] sm:$0xff]  ;;  %v2975_v51 = vsub.f32 0.0, %v9763_v41  ;;  %v2989_v13 = vmul.f32 %v2957_v0, %v9745_v15 }
 0x2b2   : > { %9718 = vst [vmem:[#allocation103_spill] sm:$0xff] %v8151_v52  ;;  %v2966_v37 = vsub.f32 0.0, %v9754_v31  ;;  %v2967_v33 = vsub.f32 0.0, %v9755_v20  ;;  %v9762_v52 = vld [vmem:[#allocation84_spill] sm:$0xff]  ;;  %v9764_v29 = vld [vmem:[#allocation86_spill] sm:$0xff]  ;;  %v9765_v5 = vld [vmem:[#allocation87_spill] sm:$0xff]  ;;  %v2990_v38 = vmul.f32 %v2958_v4, %v9746_v49  ;;  %v2992_v11 = vmul.f32 %v2960_v26, %v9748_v48 }
 0x2b3   : > { %9719 = vst [vmem:[#allocation107_spill] sm:$0xff] %v8154_v30  ;;  %v2985_v30 = vmul.f32 %v2953_v58, %v9741_v39  ;;  %v2974_v3 = vsub.f32 0.0, %v9762_v52  ;;  %v2976_v27 = vsub.f32 0.0, %v9764_v29  ;;  %v2977_v42 = vsub.f32 0.0, %v9765_v5  ;;  %v9766_v61 = vld [vmem:[#allocation88_spill] sm:$0xff]  ;;  %v9767_v8 = vld [vmem:[#allocation89_spill] sm:$0xff] }
 0x2b4   : > { %9721 = vst [vmem:[#allocation109_spill] sm:$0xff] %v8157_v10  ;;  %v2984_v10 = vmul.f32 %v2952_v2, %v9740_v44  ;;  %v2978_v22 = vsub.f32 0.0, %v9766_v61  ;;  %v2979_v44 = vsub.f32 0.0, %v9767_v8  ;;  %v9768_v2 = vld [vmem:[#allocation90_spill] sm:$0xff]  ;;  %v9769_v58 = vld [vmem:[#allocation91_spill] sm:$0xff]  ;;  %v9770_v56 = vld [vmem:[#allocation92_spill] sm:$0xff]  ;;  %v2991_v61 = vmul.f32 %v2959_v18, %v9747_v12 }
 0x2b5   : > { %9723 = vst [vmem:[#allocation111_spill] sm:$0xff] %v8160_v24  ;;  %v2980_v39 = vsub.f32 0.0, %v9768_v2  ;;  %v2981_v23 = vsub.f32 0.0, %v9769_v58  ;;  %v2982_v54 = vsub.f32 0.0, %v9770_v56  ;;  %v3018_v50 = vmul.f32 1.442695, %v2985_v30 }
 0x2b6   : > { %9725 = vst [vmem:[#allocation112_spill] sm:$0xff] %v8163_v34  ;;  %v9761_v34 = vld [vmem:[#allocation83_spill] sm:$0xff]  ;;  %v3016_v55 = vmul.f32 1.442695, %v2984_v10  ;;  %v9771_v16 = vld [vmem:[#allocation93_spill] sm:$0xff]  ;;  %v2993_v2 = vmul.f32 %v2961_v14, %v9749_v9  ;;  %v2994_v15 = vmul.f32 %v2962_v46, %v9750_v45  ;;  %v2995_v0 = vmul.f32 %v2963_v7, %v9751_v21 }
 0x2b7   : > { %9727 = vst [vmem:[#allocation114_spill] sm:$0xff] %v8166_v62  ;;  %v2973_v24 = vsub.f32 0.0, %v9761_v34  ;;  %v2983_v5 = vsub.f32 0.0, %v9771_v16  ;;  %v3020_v29 = vmul.f32 1.442695, %v2986_v53  ;;  %v2996_v30 = vmul.f32 %v2964_v35, %v9752_v25 }
 0x2b8   : > { %9728 = vst [vmem:[#allocation115_spill] sm:$0xff] %v8169_v28  ;;  %v9760_v28 = vld [vmem:[#allocation82_spill] sm:$0xff]  ;;  %v3022_v47 = vmul.f32 1.442695, %v2987_v19  ;;  %3585 = vpow2.f32 %v3016_v55  ;;  %v3024_v58 = vmul.f32 1.442695, %v2988_v17  ;;  %v2997_v10 = vmul.f32 %v2965_v60, %v9753_v6 }
 0x2b9   : > { %9730 = vst [vmem:[#allocation116_spill] sm:$0xff] %v8172_v57  ;;  %v2972_v62 = vsub.f32 0.0, %v9760_v28  ;;  %3587 = vpow2.f32 %v3018_v50  ;;  %v3026_v49 = vmul.f32 1.442695, %v2989_v13  ;;  %v3028_v4 = vmul.f32 1.442695, %v2990_v38 }
 0x2ba   : > { %9732 = vst [vmem:[#allocation117_spill] sm:$0xff] %v8175_v1  ;;  %v9759_v1 = vld [vmem:[#allocation81_spill] sm:$0xff]  ;;  %3589 = vpow2.f32 %v3020_v29  ;;  %v2998_v19 = vmul.f32 %v2966_v37, %v9754_v31  ;;  %v2999_v53 = vmul.f32 %v2967_v33, %v9755_v20  ;;  %v3030_v12 = vmul.f32 1.442695, %v2991_v61  ;;  %v9778_v55 = vld [vmem:[#allocation126_spill] sm:$0xff] }
 0x2bb   : > { %9733 = vst [vmem:[#allocation119_spill] sm:$0xff] %v8178_v36  ;;  %v2971_v57 = vsub.f32 0.0, %v9759_v1  ;;  %3591 = vpow2.f32 %v3022_v47  ;;  %v3032_v48 = vmul.f32 1.442695, %v2992_v11  ;;  %v3034_v9 = vmul.f32 1.442695, %v2993_v2 }
 0x2bc   : > { %9734 = vst [vmem:[#allocation120_spill] sm:$0xff] %v8181_v43  ;;  %v9758_v43 = vld [vmem:[#allocation80_spill] sm:$0xff]  ;;  %3593 = vpow2.f32 %v3024_v58  ;;  %v3004_v14 = vmul.f32 %v2972_v62, %v9760_v28  ;;  %v3005_v45 = vmul.f32 %v2973_v24, %v9761_v34  ;;  %v3036_v46 = vmul.f32 1.442695, %v2994_v15  ;;  %v9777_v38 = vld [vmem:[#allocation121_spill] sm:$0xff] }
 0x2bd   : > { %9736 = vst [vmem:[#allocation123_spill] sm:$0xff] %v8184_v63  ;;  %v2970_v36 = vsub.f32 0.0, %v9758_v43  ;;  %v3003_v26 = vmul.f32 %v2971_v57, %v9759_v1  ;;  %3595 = vpow2.f32 %v3026_v49  ;;  %v9773_v57 = vld [vmem:[#allocation87_spill] sm:$0xff]  ;;  %v3040_v21 = vmul.f32 1.442695, %v2996_v30  ;;  %v9774_v62 = vld [vmem:[#allocation88_spill] sm:$0xff] }
 0x2be   : > { %9737 = vst [vmem:[#allocation127_spill] sm:$0xff] %v8187_v40  ;;  %v9757_v40 = vld [vmem:[#allocation79_spill] sm:$0xff]  ;;  %v3586_v29 = vpop.eup %3585  ;;  %3597 = vpow2.f32 %v3028_v4  ;;  %v3009_v1 = vmul.f32 %v2977_v42, %v9773_v57  ;;  %v3010_v28 = vmul.f32 %v2978_v22, %v9774_v62  ;;  %v3011_v24 = vmul.f32 %v2979_v44, %v9767_v8  ;;  %v9780_v4 = vld [vmem:[#allocation104_spill] sm:$0xff]  ;;  %v9786_v62 = vld [vmem:[#allocation118_spill] sm:$0xff] }
 0x2bf   : > { %9738 = vst [vmem:[#allocation128_spill] sm:$0xff] %v8190_v32  ;;  %v2969_v63 = vsub.f32 0.0, %v9757_v40  ;;  %v3002_v13 = vmul.f32 %v2970_v36, %v9758_v43  ;;  %v3588_v61 = vpop.eup %3587  ;;  %3599 = vpow2.f32 %v3030_v12  ;;  %v9772_v36 = vld [vmem:[#allocation86_spill] sm:$0xff]  ;;  %v3042_v34 = vmul.f32 1.442695, %v2997_v10 }
 0x2c0   : > { %9739 = vst [vmem:[#allocation129_spill] sm:$0xff] %v8193_v59  ;;  %v9756_v59 = vld [vmem:[#allocation44_spill] sm:$0xff]  ;;  %v3008_v43 = vmul.f32 %v2976_v27, %v9772_v36  ;;  %3601 = vpow2.f32 %v3032_v48  ;;  %v3044_v35 = vmul.f32 1.442695, %v2998_v19  ;;  %v3014_v27 = vmul.f32 %v2982_v54, %v9770_v56  ;;  %v9782_v48 = vld [vmem:[#allocation106_spill] sm:$0xff] }
 0x2c1   : > { %v2968_v32 = vsub.f32 0.0, %v9756_v59  ;;  %v3001_v18 = vmul.f32 %v2969_v63, %v9757_v40  ;;  %v3007_v63 = vmul.f32 %v2975_v51, %v9763_v41  ;;  %v3038_v40 = vmul.f32 1.442695, %v2995_v0  ;;  %v9776_v51 = vld [vmem:[#allocation91_spill] sm:$0xff]  ;;  %v9779_v0 = vld [vmem:[#allocation102_spill] sm:$0xff] }
 0x2c2   : > { %3603 = vpow2.f32 %v3034_v9  ;;  %v3013_v41 = vmul.f32 %v2981_v23, %v9776_v51  ;;  %v3015_v42 = vmul.f32 %v2983_v5, %v9771_v16  ;;  %v3046_v60 = vmul.f32 1.442695, %v2999_v53  ;;  %v9781_v53 = vld [vmem:[#allocation105_spill] sm:$0xff] }
 0x2c3   : > { %v3000_v17 = vmul.f32 %v2968_v32, %v9756_v59  ;;  %v3006_v32 = vmul.f32 %v2974_v3, %v9762_v52  ;;  %v3590_v59 = vpop.eup %3589  ;;  %v9775_v3 = vld [vmem:[#allocation90_spill] sm:$0xff]  ;;  %3605 = vpow2.f32 %v3036_v46  ;;  %v3050_v8 = vmul.f32 1.442695, %v3001_v18 }
 0x2c4   : > { %v3592_v7 = vpop.eup %3591  ;;  %v3012_v52 = vmul.f32 %v2980_v39, %v9775_v3  ;;  %3607 = vpow2.f32 %v3038_v40  ;;  %v3052_v37 = vmul.f32 1.442695, %v3002_v13  ;;  %v3054_v33 = vmul.f32 1.442695, %v3003_v26 }
 0x2c5   : > { %v3594_v25 = vpop.eup %3593  ;;  %3609 = vpow2.f32 %v3040_v21  ;;  %v3048_v22 = vmul.f32 1.442695, %v3000_v17  ;;  %v3056_v44 = vmul.f32 1.442695, %v3004_v14  ;;  %v3058_v2 = vmul.f32 1.442695, %v3005_v45 }
 0x2c6   : > { %v3596_v6 = vpop.eup %3595  ;;  %3611 = vpow2.f32 %v3042_v34  ;;  %v3060_v39 = vmul.f32 1.442695, %v3006_v32  ;;  %v3062_v58 = vmul.f32 1.442695, %v3007_v63  ;;  %v3080_v56 = vmul.f32 %v3586_v29, %v9777_v38  ;;  %v9783_v14 = vld [vmem:[#allocation108_spill] sm:$0xff]  ;;  %v9784_v63 = vld [vmem:[#allocation110_spill] sm:$0xff] }
 0x2c7   : > { %v3598_v31 = vpop.eup %3597  ;;  %3613 = vpow2.f32 %v3044_v35  ;;  %v3064_v16 = vmul.f32 1.442695, %v3008_v43  ;;  %v3066_v5 = vmul.f32 1.442695, %v3009_v1  ;;  %v3081_v50 = vmul.f32 %v3588_v61, %v9778_v55  ;;  %v9785_v43 = vld [vmem:[#allocation113_spill] sm:$0xff]  ;;  %v9787_v34 = vld [vmem:[#allocation74_spill] sm:$0xff] }
 0x2c8   : > { %v3600_v20 = vpop.eup %3599  ;;  %3615 = vpow2.f32 %v3046_v60  ;;  %v3068_v11 = vmul.f32 1.442695, %v3010_v28  ;;  %v3070_v15 = vmul.f32 1.442695, %v3011_v24  ;;  %v3082_v49 = vmul.f32 %v3590_v59, %v9779_v0  ;;  %v9789_v35 = vld [vmem:[#allocation27_spill] sm:$0xff] }
 0x2c9   : > { %v3602_v23 = vpop.eup %3601  ;;  %3617 = vpow2.f32 %v3048_v22  ;;  %v3072_v10 = vmul.f32 1.442695, %v3012_v52  ;;  %v3083_v19 = vmul.f32 %v3592_v7, %v9780_v4  ;;  %v3084_v12 = vmul.f32 %v3594_v25, %v9781_v53  ;;  %v9788_v52 = vld [vmem:[#allocation122_spill] sm:$0xff]  ;;  %v9791_v22 = vld [vmem:[#allocation31_spill] sm:$0xff]  ;;  %v9798_v4 = vld [vmem:[#allocation100_spill] sm:$0xff] }
 0x2ca   : > { %v3604_v54 = vpop.eup %3603  ;;  %3619 = vpow2.f32 %v3050_v8  ;;  %v3074_v18 = vmul.f32 1.442695, %v3013_v41  ;;  %v3085_v13 = vmul.f32 %v3596_v6, %v9782_v48  ;;  %v3112_v26 = vsub.f32 1.0, %v3080_v56  ;;  %v9800_v48 = vld [vmem:[#allocation101_spill] sm:$0xff] }
 0x2cb   : > { %v3606_v47 = vpop.eup %3605  ;;  %3621 = vpow2.f32 %v3052_v37  ;;  %v3076_v29 = vmul.f32 1.442695, %v3014_v27  ;;  %v3086_v45 = vmul.f32 %v3598_v31, %v9783_v14  ;;  %v3113_v46 = vsub.f32 1.0, %v3081_v50  ;;  %v9796_v50 = vld [vmem:[#allocation99_spill] sm:$0xff] }
 0x2cc   : > { %v3608_v30 = vpop.eup %3607  ;;  %3623 = vpow2.f32 %v3054_v33  ;;  %v3078_v32 = vmul.f32 1.442695, %v3015_v42  ;;  %v3087_v40 = vmul.f32 %v3600_v20, %v9784_v63  ;;  %v3114_v59 = vsub.f32 1.0, %v3082_v49  ;;  %v9790_v42 = vld [vmem:[#allocation124_spill] sm:$0xff]  ;;  %v9792_v20 = vld [vmem:[#allocation125_spill] sm:$0xff] }
 0x2cd   : > { %v3610_v17 = vpop.eup %3609  ;;  %3625 = vpow2.f32 %v3056_v44  ;;  %v3088_v57 = vmul.f32 %v3602_v23, %v9785_v43  ;;  %v3115_v1 = vsub.f32 1.0, %v3083_v19  ;;  %v3116_v21 = vsub.f32 1.0, %v3084_v12 }
 0x2ce   : > { %v3612_v9 = vpop.eup %3611  ;;  %3627 = vpow2.f32 %v3058_v2  ;;  %v3089_v28 = vmul.f32 %v3604_v54, %v9786_v62  ;;  %v3117_v24 = vsub.f32 1.0, %v3085_v13  ;;  %v8270_v25 = vmul.f32 %v3112_v26, %v9787_v34  ;;  %v9793_v2 = vld [vmem:[#allocation75_spill] sm:$0xff]  ;;  %v9795_v54 = vld [vmem:[#allocation33_spill] sm:$0xff] }
 0x2cf   : > { %v3614_v61 = vpop.eup %3613  ;;  %3629 = vpow2.f32 %v3060_v39  ;;  %v3090_v51 = vmul.f32 %v3606_v47, %v9788_v52  ;;  %v3118_v41 = vsub.f32 1.0, %v3086_v45  ;;  %v8274_v6 = vmul.f32 %v3113_v46, %v9789_v35  ;;  %v9802_v45 = vld [vmem:[#allocation103_spill] sm:$0xff]  ;;  %v9811_v35 = vld [vmem:[#allocation114_spill] sm:$0xff] }
 0x2d0   : > { %v3616_v36 = vpop.eup %3615  ;;  %3631 = vpow2.f32 %v3062_v58  ;;  %v3091_v60 = vmul.f32 %v3608_v30, %v9790_v42  ;;  %v3119_v31 = vsub.f32 1.0, %v3087_v40  ;;  %v8278_v8 = vmul.f32 %v3114_v59, %v9791_v22  ;;  %v9794_v58 = vld [vmem:[#allocation98_spill] sm:$0xff]  ;;  %v9804_v59 = vld [vmem:[#allocation107_spill] sm:$0xff] }
 0x2d1   : > { %v3618_v7 = vpop.eup %3617  ;;  %3633 = vpow2.f32 %v3064_v16  ;;  %v3092_v33 = vmul.f32 %v3610_v17, %v9792_v20  ;;  %v3120_v44 = vsub.f32 1.0, %v3088_v57  ;;  %v8282_v23 = vmul.f32 %v3115_v1, %v9793_v2  ;;  %v9809_v52 = vld [vmem:[#allocation111_spill] sm:$0xff] }
 0x2d2   : > { %v3620_v3 = vpop.eup %3619  ;;  %3635 = vpow2.f32 %v3066_v5  ;;  %v3093_v38 = vmul.f32 %v3612_v9, %v9794_v58  ;;  %v3121_v56 = vsub.f32 1.0, %v3089_v28  ;;  %v8286_v16 = vmul.f32 %v3116_v21, %v9795_v54  ;;  %v9797_v5 = vld [vmem:[#allocation34_spill] sm:$0xff]  ;;  %v9806_v21 = vld [vmem:[#allocation109_spill] sm:$0xff]  ;;  %v9807_v28 = vld [vmem:[#allocation40_spill] sm:$0xff] }
 0x2d3   : > { %v3622_v27 = vpop.eup %3621  ;;  %3637 = vpow2.f32 %v3068_v11  ;;  %v3094_v47 = vmul.f32 %v3614_v61, %v9796_v50  ;;  %v3122_v0 = vsub.f32 1.0, %v3090_v51  ;;  %v8290_v49 = vmul.f32 %v3117_v24, %v9797_v5  ;;  %v9799_v11 = vld [vmem:[#allocation76_spill] sm:$0xff]  ;;  %v9808_v24 = vld [vmem:[#allocation41_spill] sm:$0xff]  ;;  %v9818_v5 = vld [vmem:[#allocation119_spill] sm:$0xff] }
 0x2d4   : > { %v3624_v37 = vpop.eup %3623  ;;  %3639 = vpow2.f32 %v3070_v15  ;;  %v3095_v19 = vmul.f32 %v3616_v36, %v9798_v4  ;;  %v3123_v53 = vsub.f32 1.0, %v3091_v60  ;;  %v8294_v12 = vmul.f32 %v3118_v41, %v9799_v11  ;;  %v9801_v15 = vld [vmem:[#allocation32_spill] sm:$0xff]  ;;  %v9816_v54 = vld [vmem:[#allocation117_spill] sm:$0xff]  ;;  %v9820_v11 = vld [vmem:[#allocation46_spill] sm:$0xff] }
 0x2d5   : > { %v3626_v39 = vpop.eup %3625  ;;  %3641 = vpow2.f32 %v3072_v10  ;;  %v3096_v13 = vmul.f32 %v3618_v7, %v9800_v48  ;;  %v3124_v26 = vsub.f32 1.0, %v3092_v33  ;;  %v8298_v9 = vmul.f32 %v3119_v31, %v9801_v15  ;;  %v9803_v10 = vld [vmem:[#allocation35_spill] sm:$0xff]  ;;  %v9819_v4 = vld [vmem:[#allocation120_spill] sm:$0xff] }
 0x2d6   : > { %v3628_v55 = vpop.eup %3627  ;;  %3643 = vpow2.f32 %v3074_v18  ;;  %v3097_v46 = vmul.f32 %v3620_v3, %v9802_v45  ;;  %v3125_v61 = vsub.f32 1.0, %v3093_v38  ;;  %v8302_v63 = vmul.f32 %v3120_v44, %v9803_v10  ;;  %v9805_v18 = vld [vmem:[#allocation77_spill] sm:$0xff]  ;;  %v9812_v31 = vld [vmem:[#allocation115_spill] sm:$0xff]  ;;  %v9814_v44 = vld [vmem:[#allocation36_spill] sm:$0xff] }
 0x2d7   : > { %v3630_v30 = vpop.eup %3629  ;;  %3645 = vpow2.f32 %v3076_v29  ;;  %v3098_v36 = vmul.f32 %v3622_v27, %v9804_v59  ;;  %v3126_v43 = vsub.f32 1.0, %v3094_v47  ;;  %v8306_v57 = vmul.f32 %v3121_v56, %v9805_v18  ;;  %v9815_v38 = vld [vmem:[#allocation116_spill] sm:$0xff]  ;;  %v9825_v18 = vld [vmem:[#allocation129_spill] sm:$0xff] }
 0x2d8   : > { %v3632_v17 = vpop.eup %3631  ;;  %3647 = vpow2.f32 %v3078_v32  ;;  %v3099_v7 = vmul.f32 %v3624_v37, %v9806_v21  ;;  %v3127_v62 = vsub.f32 1.0, %v3095_v19  ;;  %v8310_v29 = vmul.f32 %v3122_v0, %v9807_v28  ;;  %v9810_v32 = vld [vmem:[#allocation112_spill] sm:$0xff]  ;;  %v9813_v37 = vld [vmem:[#allocation78_spill] sm:$0xff] }
 0x2d9   : > { %v3634_v14 = vpop.eup %3633  ;;  %v8313_v34 = vmul.f32 %v3123_v53, %v9808_v24  ;;  %v3100_v51 = vmul.f32 %v3626_v39, %v9809_v52  ;;  %v3101_v41 = vmul.f32 %v3628_v55, %v9810_v32  ;;  %v3102_v27 = vmul.f32 %v3630_v30, %v9811_v35  ;;  %v9817_v39 = vld [vmem:[#allocation39_spill] sm:$0xff]  ;;  %v9823_v10 = vld [vmem:[#allocation128_spill] sm:$0xff]  ;;  %v9827_v52 = vld [vmem:[#allocation50_spill] sm:$0xff] }
 0x2da   : > { %v3636_v40 = vpop.eup %3635  ;;  %v3128_v42 = vsub.f32 1.0, %v3096_v13  ;;  %v3103_v22 = vmul.f32 %v3632_v17, %v9812_v31  ;;  %v3129_v20 = vsub.f32 1.0, %v3097_v46  ;;  %v3156_v33 = vmul.f32 %v3124_v26, %v9813_v37  ;;  %v9821_v13 = vld [vmem:[#allocation123_spill] sm:$0xff]  ;;  %v9830_v31 = vld [vmem:[#allocation42_spill] sm:$0xff] }
 0x2db   : > { %v3638_v1 = vpop.eup %3637  ;;  %v3157_v2 = vmul.f32 %v3125_v61, %v9814_v44  ;;  %v3104_v56 = vmul.f32 %v3634_v14, %v9815_v38  ;;  %v3105_v50 = vmul.f32 %v3636_v40, %v9816_v54  ;;  %v3130_v47 = vsub.f32 1.0, %v3098_v36  ;;  %v9822_v14 = vld [vmem:[#allocation127_spill] sm:$0xff]  ;;  %v9824_v36 = vld [vmem:[#allocation2_spill] sm:$0xff]  ;;  %v9832_v38 = vld [vmem:[#allocation56_spill] sm:$0xff] }
 0x2dc   : > { %v3640_v3 = vpop.eup %3639  ;;  %v3158_v0 = vmul.f32 %v3126_v43, %v9817_v39  ;;  %v3106_v30 = vmul.f32 %v3638_v1, %v9818_v5  ;;  %v3131_v53 = vsub.f32 1.0, %v3099_v7  ;;  %v3159_v17 = vmul.f32 %v3127_v62, %v9820_v11  ;;  %v9826_v7 = vld [vmem:[#allocation52_spill] sm:$0xff] }
 0x2dd   : > { %v3642_v60 = vpop.eup %3641  ;;  %v3107_v19 = vmul.f32 %v3640_v3, %v9819_v4  ;;  %v3132_v15 = vsub.f32 1.0, %v3100_v51  ;;  %v3133_v45 = vsub.f32 1.0, %v3101_v41  ;;  %v3134_v46 = vsub.f32 1.0, %v3102_v27  ;;  %v9828_v51 = vld [vmem:[#allocation51_spill] sm:$0xff]  ;;  %v9829_v27 = vld [vmem:[#allocation53_spill] sm:$0xff] }
 0x2de   : > { %v3644_v58 = vpop.eup %3643  ;;  %v3108_v26 = vmul.f32 %v3642_v60, %v9821_v13  ;;  %v3135_v59 = vsub.f32 1.0, %v3103_v22  ;;  %v3160_v43 = vmul.f32 %v3128_v42, %v9824_v36  ;;  %v3136_v21 = vsub.f32 1.0, %v3104_v56  ;;  %v9831_v22 = vld [vmem:[#allocation54_spill] sm:$0xff] }
 0x2df   : > { %v3646_v55 = vpop.eup %3645  ;;  %v3109_v61 = vmul.f32 %v3644_v58, %v9822_v14  ;;  %v3137_v28 = vsub.f32 1.0, %v3105_v50  ;;  %v3161_v24 = vmul.f32 %v3129_v20, %v9826_v7  ;;  %v3138_v62 = vsub.f32 1.0, %v3106_v30  ;;  %v9833_v50 = vld [vmem:[#allocation57_spill] sm:$0xff]  ;;  %v9835_v30 = vld [vmem:[#allocation59_spill] sm:$0xff]  ;;  %v9837_v13 = vld [vmem:[#allocation94_spill] sm:$0xff] }
 0x2e0   : > { %v3648_v48 = vpop.eup %3647  ;;  %v3110_v40 = vmul.f32 %v3646_v55, %v9823_v10  ;;  %v3139_v3 = vsub.f32 1.0, %v3107_v19  ;;  %v3162_v32 = vmul.f32 %v3130_v47, %v9827_v52  ;;  %v3163_v41 = vmul.f32 %v3131_v53, %v9828_v51  ;;  %v9834_v55 = vld [vmem:[#allocation58_spill] sm:$0xff]  ;;  %v9836_v19 = vld [vmem:[#allocation60_spill] sm:$0xff]  ;;  %v9842_v51 = vld [vmem:[#allocation47_spill] sm:$0xff] }
 0x2e1   : > { %v3111_v1 = vmul.f32 %v3648_v48, %v9825_v18  ;;  %v3140_v35 = vsub.f32 1.0, %v3108_v26  ;;  %v3164_v60 = vmul.f32 %v3132_v15, %v9829_v27  ;;  %v3165_v37 = vmul.f32 %v3133_v45, %v9830_v31 }
 0x2e2   : > { %v3166_v44 = vmul.f32 %v3134_v46, %v9831_v22  ;;  %v3141_v42 = vsub.f32 1.0, %v3109_v61  ;;  %v3142_v58 = vsub.f32 1.0, %v3110_v40  ;;  %v3167_v56 = vmul.f32 %v3135_v59, %v9832_v38  ;;  %v9838_v46 = vld [vmem:[#allocation95_spill] sm:$0xff]  ;;  %v9839_v61 = vld [vmem:[#allocation96_spill] sm:$0xff]  ;;  %v9840_v59 = vld [vmem:[#allocation97_spill] sm:$0xff] }
 0x2e3   : > { %v3176_v54 = vadd.f32 1.0, %v8270_v25  ;;  %v3143_v20 = vsub.f32 1.0, %v3111_v1  ;;  %v3168_v39 = vmul.f32 %v3136_v21, %v9833_v50  ;;  %v3169_v47 = vmul.f32 %v3137_v28, %v9834_v55  ;;  %v9850_v38 = vld [vmem:[#allocation66_spill] sm:$0xff]  ;;  %v9851_v50 = vld [vmem:[#allocation9_spill] sm:$0xff] }
 0x2e4   : > { %v3177_v5 = vadd.f32 1.0, %v8274_v6  ;;  %v3170_v4 = vmul.f32 %v3138_v62, %v9835_v30  ;;  %v3171_v53 = vmul.f32 %v3139_v3, %v9836_v19  ;;  %v3178_v11 = vadd.f32 1.0, %v8278_v8  ;;  %v9854_v19 = vld [vmem:[#allocation14_spill] sm:$0xff] }
 0x2e5   : > { %v3179_v48 = vadd.f32 1.0, %v8282_v23  ;;  %v3172_v26 = vmul.f32 %v3140_v35, %v9837_v13  ;;  %v3180_v15 = vadd.f32 1.0, %v8286_v16  ;;  %v3181_v25 = vadd.f32 1.0, %v8290_v49 }
 0x2e6   : > { %v3182_v45 = vadd.f32 1.0, %v8294_v12  ;;  %v3173_v14 = vmul.f32 %v3141_v42, %v9838_v46  ;;  %v3174_v6 = vmul.f32 %v3142_v58, %v9839_v61  ;;  %v3183_v10 = vadd.f32 1.0, %v8298_v9  ;;  %v9849_v42 = vld [vmem:[#allocation13_spill] sm:$0xff] }
 0x2e7   : > { %v3184_v40 = vadd.f32 1.0, %v8302_v63  ;;  %v3175_v8 = vmul.f32 %v3143_v20, %v9840_v59  ;;  %v3185_v23 = vadd.f32 1.0, %v8306_v57  ;;  %v3186_v36 = vadd.f32 1.0, %v8310_v29  ;;  %v9841_v63 = vld [vmem:[#allocation45_spill] sm:$0xff]  ;;  %v9843_v57 = vld [vmem:[#allocation48_spill] sm:$0xff] }
 0x2e8   : > { %v3187_v16 = vadd.f32 1.0, %v8313_v34  ;;  %v3188_v49 = vadd.f32 1.0, %v3156_v33  ;;  %v3189_v18 = vadd.f32 1.0, %v3157_v2  ;;  %v3190_v12 = vadd.f32 1.0, %v3158_v0  ;;  %v9844_v29 = vld [vmem:[#allocation49_spill] sm:$0xff]  ;;  %v9846_v2 = vld [vmem:[#allocation8_spill] sm:$0xff] }
 0x2e9   : > { %v3191_v1 = vadd.f32 1.0, %v3159_v17  ;;  %v3192_v21 = vadd.f32 1.0, %v3160_v43  ;;  %v3193_v28 = vadd.f32 1.0, %v3161_v24  ;;  %v3194_v7 = vadd.f32 1.0, %v3162_v32  ;;  %v9845_v34 = vld [vmem:[#allocation5_spill] sm:$0xff] }
 0x2ea   : > { %v3195_v62 = vadd.f32 1.0, %v3163_v41  ;;  %v3196_v9 = vadd.f32 1.0, %v3164_v60  ;;  %v3197_v3 = vadd.f32 1.0, %v3165_v37  ;;  %v3208_v52 = vmul.f32 %v3176_v54, %v9841_v63  ;;  %v9847_v24 = vld [vmem:[#allocation65_spill] sm:$0xff]  ;;  %v9848_v41 = vld [vmem:[#allocation12_spill] sm:$0xff]  ;;  %v9860_v63 = vld [vmem:[#allocation19_spill] sm:$0xff] }
 0x2eb   : > { %v3209_v35 = vmul.f32 %v3177_v5, %v9842_v51  ;;  %v3210_v27 = vmul.f32 %v3178_v11, %v9843_v57  ;;  %v3211_v31 = vmul.f32 %v3179_v48, %v9844_v29  ;;  %v3212_v33 = vmul.f32 %v3180_v15, %v9845_v34  ;;  %v9853_v5 = vld [vmem:[#allocation67_spill] sm:$0xff]  ;;  %v9855_v15 = vld [vmem:[#allocation16_spill] sm:$0xff]  ;;  %v9858_v59 = vld [vmem:[#allocation17_spill] sm:$0xff] }
 0x2ec   : > { %v3213_v0 = vmul.f32 %v3181_v25, %v9846_v2  ;;  %v3198_v17 = vadd.f32 1.0, %v3166_v44  ;;  %v3199_v43 = vadd.f32 1.0, %v3167_v56  ;;  %v3214_v32 = vmul.f32 %v3182_v45, %v9847_v24  ;;  %v9852_v56 = vld [vmem:[#allocation11_spill] sm:$0xff]  ;;  %v9856_v45 = vld [vmem:[#allocation68_spill] sm:$0xff]  ;;  %v9863_v57 = vld [vmem:[#allocation18_spill] sm:$0xff] }
 0x2ed   : > { %v3215_v60 = vmul.f32 %v3183_v10, %v9848_v41  ;;  %v3200_v37 = vadd.f32 1.0, %v3168_v39  ;;  %v3201_v22 = vadd.f32 1.0, %v3169_v47  ;;  %v3216_v58 = vmul.f32 %v3184_v40, %v9849_v42  ;;  %v9857_v10 = vld [vmem:[#allocation15_spill] sm:$0xff]  ;;  %v9861_v51 = vld [vmem:[#allocation20_spill] sm:$0xff] }
 0x2ee   : > { %v3217_v54 = vmul.f32 %v3185_v23, %v9850_v38  ;;  %v3202_v20 = vadd.f32 1.0, %v3170_v4  ;;  %v3218_v44 = vmul.f32 %v3186_v36, %v9851_v50  ;;  %v3219_v55 = vmul.f32 %v3187_v16, %v9852_v56  ;;  %v9866_v34 = vld [vmem:[#allocation24_spill] sm:$0xff]  ;;  %v9870_v24 = vld [vmem:[#allocation23_spill] sm:$0xff] }
 0x2ef   : > { %v3220_v30 = vmul.f32 %v3188_v49, %v9853_v5  ;;  %v3221_v39 = vmul.f32 %v3189_v18, %v9854_v19  ;;  %v3409_v47 = vpack.c.bf16 %v3209_v35, %v3208_v52  ;;  %v3414_v11 = vpack.c.bf16 %v3211_v31, %v3210_v27  ;;  %v9859_v49 = vld [vmem:[#allocation69_spill] sm:$0xff]  ;;  %v9868_v2 = vld [vmem:[#allocation72_spill] sm:$0xff] }
 0x2f0   : > { %v3419_v48 = vpack.c.bf16 %v3213_v0, %v3212_v33  ;;  %v3203_v13 = vadd.f32 1.0, %v3171_v53  ;;  %v3222_v25 = vmul.f32 %v3190_v12, %v9855_v15  ;;  %v3223_v46 = vmul.f32 %v3191_v1, %v9856_v45 }
 0x2f1   : > { %v3424_v61 = vpack.c.bf16 %v3215_v60, %v3214_v32  ;;  %v3204_v4 = vadd.f32 1.0, %v3172_v26  ;;  %v3224_v40 = vmul.f32 %v3192_v21, %v9857_v10  ;;  %v3225_v23 = vmul.f32 %v3193_v28, %v9858_v59  ;;  %3410 = vst [vmem:[%s8373_s29] sm:$0xff] %v3409_v47   ;;  %v9862_v26 = vld [vmem:[#allocation70_spill] sm:$0xff]  ;;  %v9871_v60 = vld [vmem:[#allocation73_spill] sm:$0xff] }
 0x2f2   : > { %v3429_v36 = vpack.c.bf16 %v3217_v54, %v3216_v58  ;;  %v3205_v16 = vadd.f32 1.0, %v3173_v14  ;;  %v3226_v18 = vmul.f32 %v3194_v7, %v9859_v49  ;;  %v3227_v53 = vmul.f32 %v3195_v62, %v9860_v63  ;;  %3494 = vst [vmem:[%s8373_s29 + $0x8] sm:$0xff] %v3414_v11   ;;  %v9864_v14 = vld [vmem:[#allocation21_spill] sm:$0xff]  ;;  %v9865_v62 = vld [vmem:[#allocation71_spill] sm:$0xff] }
 0x2f3   : > { %v3434_v12 = vpack.c.bf16 %v3219_v55, %v3218_v44  ;;  %v3206_v52 = vadd.f32 1.0, %v3174_v6  ;;  %v3228_v1 = vmul.f32 %v3196_v9, %v9861_v51  ;;  %v3229_v35 = vmul.f32 %v3197_v3, %v9862_v26  ;;  %3495 = vst [vmem:[%s8373_s29 + $0x10] sm:$0xff] %v3419_v48   ;;  %v9867_v3 = vld [vmem:[#allocation25_spill] sm:$0xff] }
 0x2f4   : > { %v3439_v21 = vpack.c.bf16 %v3221_v39, %v3220_v30  ;;  %v3207_v28 = vadd.f32 1.0, %v3175_v8  ;;  %v3230_v27 = vmul.f32 %v3198_v17, %v9863_v57  ;;  %v3231_v29 = vmul.f32 %v3199_v43, %v9864_v14  ;;  %3496 = vst [vmem:[%s8373_s29 + $0x18] sm:$0xff] %v3424_v61   ;;  %v9869_v17 = vld [vmem:[#allocation22_spill] sm:$0xff] }
 0x2f5   : > { %v3444_v7 = vpack.c.bf16 %v3223_v46, %v3222_v25  ;;  %v3232_v31 = vmul.f32 %v3200_v37, %v9865_v62  ;;  %v3233_v6 = vmul.f32 %v3201_v22, %v9866_v34  ;;  %3497 = vst [vmem:[%s8373_s29 + $0x20] sm:$0xff] %v3429_v36   ;;  %v3449_v9 = vpack.c.bf16 %v3225_v23, %v3224_v40  ;;  %v9872_v22 = vld [vmem:[#allocation26_spill] sm:$0xff] }
 0x2f6   : > { %v3234_v33 = vmul.f32 %v3202_v20, %v9867_v3  ;;  %v3235_v8 = vmul.f32 %v3203_v13, %v9868_v2  ;;  %3498 = vst [vmem:[%s8373_s29 + $0x28] sm:$0xff] %v3434_v12   ;;  %v3454_v0 = vpack.c.bf16 %v3227_v53, %v3226_v18  ;;  %v3236_v43 = vmul.f32 %v3204_v4, %v9869_v17 }
 0x2f7   : > { %v3237_v32 = vmul.f32 %v3205_v16, %v9870_v24  ;;  %3499 = vst [vmem:[%s8373_s29 + $0x30] sm:$0xff] %v3439_v21   ;;  %v3459_v41 = vpack.c.bf16 %v3229_v35, %v3228_v1  ;;  %v3238_v37 = vmul.f32 %v3206_v52, %v9871_v60  ;;  %v3239_v42 = vmul.f32 %v3207_v28, %v9872_v22 }
 0x2f8   : > { %3500 = vst [vmem:[%s8373_s29 + $0x38] sm:$0xff] %v3444_v7   ;;  %v3464_v58 = vpack.c.bf16 %v3231_v29, %v3230_v27  ;;  %v3469_v38 = vpack.c.bf16 %v3233_v6, %v3232_v31  ;;  %v3474_v54 = vpack.c.bf16 %v3235_v8, %v3234_v33 }
 0x2f9   : > { %3501 = vst [vmem:[%s8373_s29 + $0x40] sm:$0xff] %v3449_v9   ;;  %v3479_v20 = vpack.c.bf16 %v3237_v32, %v3236_v43  ;;  %v3484_v50 = vpack.c.bf16 %v3239_v42, %v3238_v37 }
 0x2fa   : > { %3502 = vst [vmem:[%s8373_s29 + $0x48] sm:$0xff] %v3454_v0  }
 0x2fb   : > { %3503 = vst [vmem:[%s8373_s29 + $0x50] sm:$0xff] %v3459_v41  }
 0x2fc   : > { %3504 = vst [vmem:[%s8373_s29 + $0x58] sm:$0xff] %v3464_v58  }
 0x2fd   : > { %3505 = vst [vmem:[%s8373_s29 + $0x60] sm:$0xff] %v3469_v38  }
 0x2fe   : > { %3506 = vst [vmem:[%s8373_s29 + $0x68] sm:$0xff] %v3474_v54  }
 0x2ff   : > { %3507 = vst [vmem:[%s8373_s29 + $0x70] sm:$0xff] %v3479_v20  }
 0x300   : > { %3508 = vst [vmem:[%s8373_s29 + $0x78] sm:$0xff] %v3484_v50  }
 0x301 PF: > { %s13_s12 = sadd.s32 1, %s3656_s12  }
 0x302   : > { %p10_p4 = scmp.ge.s32.totalorder %s13_s12, 4  }
 0x304   :  { %12 = sbr.rel (!%p10_p4) target bundleno = 1 (0x1), region = 62 }

// kernel: shiftmlp_forward.5
= control target key start
LH: loop header
LB: loop body
LE: loop exit
PB: predicated region body
PF: predicated region fallthrough
CT: control target
= control target key end

     0   :  { %8 = vsyncpa [#allocation3], 0  ;;  %s998_s0 = inlined_call_operand.vmem [shape: bf16[512,128], index: 0, kind: input, shape index: {}]   ;;  %s999_s1 = inlined_call_operand.vmem [shape: f32[128,128], index: 1, kind: input, shape index: {}]   ;;  %s1000_s2 = inlined_call_operand.vmem [shape: f32[1,128], index: 2, kind: input, shape index: {}]   ;;  %s1001_s3 = inlined_call_operand.hbm [shape: f32[512,128], index: 3, kind: output, shape index: {}]  }
   0x1   :  { %10 = vsyncpa [#allocation3 + $0x1], 0  ;;  %s772_s12 = smov 0   ;;  %s774_s13 = smov 0  }
   0x2   :  { %s776_s14 = smov 0   ;;  %s778_s15 = smov 0  }
   0x3 LB: > { %s793_s16 = sadd.s32 4294967295, %s748_s15   ;;  %s527_s17 = sadd.s32 4294967294, %s748_s15   ;;  %s748_s15 = sphi %s778_s15, %s1007_s15   ;;  %s744_s14 = sphi %s776_s14, %s1006_s14   ;;  %s740_s13 = sphi %s774_s13, %s1005_s13   ;;  %s736_s12 = sphi %s772_s12, %s1004_s12  }
   0x4   : > { %s797_s18 = sadd.s32 1, %s748_s15   ;;  %s91_s19 = sadd.s32 1, %s744_s14 }
   0x5   : > { %s88_s20 = ssub.s32 %s748_s15, %s797_s18  ;;  %p101_p0 = scmp.ne.s32.totalorder %s744_s14, %s740_s13 }
   0x6   : > { %p89_p1 = scmp.eq.s32.totalorder %s88_s20, 0  ;;  %p102_p2 = scmp.eq.s32.totalorder %s793_s16, 1 }
   0x7   : > { %p107_p3 = scmp.ne.s32.totalorder %s740_s13, %s736_s12  ;;  %p108_p4 = scmp.eq.s32.totalorder %s527_s17, 1 }
   0x8   : > { %s808_s21 = scalar_select %p89_p1, %s744_s14, %s91_s19  }
   0x9   : > { %p810_p5 = por %p102_p2, %p101_p0  ;;  %p814_p6 = por %p108_p4, %p107_p3 }
   0xa   : > { %p530_p7 = scmp.ge.s32.totalorder %s748_s15, 1  ;;  %p141_p8 = scmp.lt.s32.totalorder %s748_s15, 3 }
   0xc   : > { %p142_p9 = pnand %p530_p7, %p141_p8 }
   0xd   : > { %s532_s26 = sshll.u32 (!%p142_p9), %s793_s16, 5  ;;  %s162_s25 = sand.u32 (!%p142_p9), 1, %s740_s13  }
   0xe   : > { %145 = sbr.rel (%p142_p9) target bundleno = 249 (0xf9), region = 32  ;;  %p166_p10 = scmp.lt.s32.totalorder (!%p142_p9), %s532_s26, 63 }
   0xf   : > { %s619_s30 = sshll.u32 (!%p142_p9), %s793_s16, 8  ;;  %s450_s8 = scalar_lea.sflag (!%p142_p9), [#allocation3], %s162_s25 }
  0x10   : > { %s461_s6 = scalar_lea.hbm (!%p142_p9), %s1001_s3, %s619_s30  ;;  %s706_s19 = scalar_lea.hbm (!%p142_p9), %s1001_s3, 512 }
  0x11   : > { %s464_s7 = sshll.u32 (!%p142_p9), %s461_s6, 4  ;;  %s465_s7 = int_to_ptr.hbm [resolvable:$true] %s464_s7 }
  0x12   : > { %s700_s9 = sshra.s32 (!%p142_p9), %s465_s7, 4  ;;  %s701_s9 = int_to_ptr.hbm [resolvable:$true] %s700_s9 }
  0x13   : > { %v218_v0 = vld [vmem:[%s999_s1 + $0x70] sm:$0xff]  ;;  %v219_v1 = vld [vmem:[%s999_s1 + $0x78] sm:$0xff]  ;;  %v216_v2 = vld [vmem:[%s999_s1 + $0x60] sm:$0xff]  ;;  %s1009_s26 = smov (!%p166_p10, %s532_s26), 63  ;;  %s702_s10 = scalar_lea.hbm %s701_s9, 256 }
  0x14   : > { %v227_v3 = vpack.c.bf16 %v219_v1, %v218_v0  ;;  %v217_v4 = vld [vmem:[%s999_s1 + $0x68] sm:$0xff]  ;;  %v214_v6 = vld [vmem:[%s999_s1 + $0x50] sm:$0xff]  ;;  %v215_v7 = vld [vmem:[%s999_s1 + $0x58] sm:$0xff]  ;;  %s533_s17 = sshll.u32 %s1009_s26, 2  ;;  %s531_s26 = sshll.u32 %s162_s25, 8 }
  0x15   : > { %v226_v5 = vpack.c.bf16 %v217_v4, %v216_v2  ;;  %v225_v8 = vpack.c.bf16 %v215_v7, %v214_v6  ;;  %v212_v9 = vld [vmem:[%s999_s1 + $0x40] sm:$0xff]  ;;  %v213_v10 = vld [vmem:[%s999_s1 + $0x48] sm:$0xff]  ;;  %v210_v12 = vld [vmem:[%s999_s1 + $0x30] sm:$0xff]  ;;  %s872_s24 = scalar_lea.vmem %s998_s0, %s533_s17  ;;  %s900_s29 = scalar_lea.vmem [#allocation2], %s531_s26 }
  0x16   : > { %328 = vmatpush.bf16.msra.mxu0 %v227_v3  ;;  %620 = vmatpush.bf16.msra.mxu1 %v227_v3  ;;  %v224_v11 = vpack.c.bf16 %v213_v10, %v212_v9  ;;  %v211_v13 = vld [vmem:[%s999_s1 + $0x38] sm:$0xff]  ;;  %v208_v15 = vld [vmem:[%s999_s1 + $0x20] sm:$0xff]  ;;  %v209_v16 = vld [vmem:[%s999_s1 + $0x28] sm:$0xff]  ;;  %s462_s16 = sshll.u32 %s900_s29, 4  ;;  %p703_p11 = scmp.ne.s32.totalorder %s701_s9, %s702_s10  ;;  %s463_s16 = int_to_ptr.vmem [resolvable:$true] %s462_s16 }
  0x17   : > { %621 = vmatpush.bf16.msra.mxu2 %v227_v3  ;;  %622 = vmatpush.bf16.msra.mxu3 %v227_v3  ;;  %v223_v14 = vpack.c.bf16 %v211_v13, %v210_v12  ;;  %v222_v17 = vpack.c.bf16 %v209_v16, %v208_v15  ;;  %v206_v18 = vld [vmem:[%s999_s1 + $0x10] sm:$0xff]  ;;  %v207_v19 = vld [vmem:[%s999_s1 + $0x18] sm:$0xff]  ;;  %v204_v21 = vld [vmem:[%s999_s1] sm:$0xff]  ;;  %p707_p0 = scmp.lt.s32.totalorder %s701_s9, %s1001_s3  ;;  %p708_p1 = scmp.lt.s32.totalorder %s706_s19, %s702_s10 }
  0x18   : > { %v221_v20 = vpack.c.bf16 %v207_v19, %v206_v18  ;;  %v205_v22 = vld [vmem:[%s999_s1 + $0x8] sm:$0xff]  ;;  %v603_v24 = vld [vmem:[%s872_s24] sm:$0xff]  ;;  %v605_v32 = vld [vmem:[%s872_s24 + $0x10] sm:$0xff]  ;;  %p704_p12 = pnand %p703_p11, %p810_p5 }
  0x19   : > { %v220_v23 = vpack.c.bf16 %v205_v22, %v204_v21  ;;  %v607_v25 = vld [vmem:[%s872_s24 + $0x20] sm:$0xff]  ;;  %v604_v28 = vld [vmem:[%s872_s24 + $0x8] sm:$0xff]  ;;  %v609_v33 = vld [vmem:[%s872_s24 + $0x30] sm:$0xff]  ;;  %p709_p2 = por %p708_p1, %p707_p0 }
  0x1a   : > { %329 = vmatpush.bf16.msra.mxu0 %v226_v5  ;;  %623 = vmatpush.bf16.msra.mxu1 %v226_v5  ;;  %v611_v26 = vld [vmem:[%s872_s24 + $0x40] sm:$0xff]  ;;  %v608_v29 = vld [vmem:[%s872_s24 + $0x28] sm:$0xff]  ;;  %v613_v34 = vld [vmem:[%s872_s24 + $0x50] sm:$0xff]  ;;  %p705_p13 = pneg %p704_p12 }
  0x1b   : > { %624 = vmatpush.bf16.msra.mxu2 %v226_v5  ;;  %625 = vmatpush.bf16.msra.mxu3 %v226_v5  ;;  %v615_v27 = vld [vmem:[%s872_s24 + $0x60] sm:$0xff]  ;;  %v612_v30 = vld [vmem:[%s872_s24 + $0x48] sm:$0xff]  ;;  %v617_v35 = vld [vmem:[%s872_s24 + $0x70] sm:$0xff] }
  0x1c   : > { %v616_v31 = vld [vmem:[%s872_s24 + $0x68] sm:$0xff]  ;;  %v606_v36 = vld [vmem:[%s872_s24 + $0x18] sm:$0xff]  ;;  %v896_v40 = vld [vmem:[%s1000_s2] ss:$0 sm:$0xff]  ;;  %p710_p3 = pnand %p709_p2, %p705_p13 }
  0x1d   : > { %v610_v37 = vld [vmem:[%s872_s24 + $0x38] sm:$0xff] }
  0x1e   : > { %330 = vmatpush.bf16.msra.mxu0 %v225_v8  ;;  %626 = vmatpush.bf16.msra.mxu1 %v225_v8  ;;  %v614_v38 = vld [vmem:[%s872_s24 + $0x58] sm:$0xff] }
  0x1f   : > { %627 = vmatpush.bf16.msra.mxu2 %v225_v8  ;;  %628 = vmatpush.bf16.msra.mxu3 %v225_v8  ;;  %v618_v39 = vld [vmem:[%s872_s24 + $0x78] sm:$0xff] }
  0x22   : > { %331 = vmatpush.bf16.msra.mxu0 %v224_v11  ;;  %629 = vmatpush.bf16.msra.mxu1 %v224_v11 }
  0x23   : > { %630 = vmatpush.bf16.msra.mxu2 %v224_v11  ;;  %631 = vmatpush.bf16.msra.mxu3 %v224_v11 }
  0x26   : > { %332 = vmatpush.bf16.msra.mxu0 %v223_v14  ;;  %632 = vmatpush.bf16.msra.mxu1 %v223_v14 }
  0x27   : > { %633 = vmatpush.bf16.msra.mxu2 %v223_v14  ;;  %634 = vmatpush.bf16.msra.mxu3 %v223_v14 }
  0x2a   : > { %333 = vmatpush.bf16.msra.mxu0 %v222_v17  ;;  %635 = vmatpush.bf16.msra.mxu1 %v222_v17 }
  0x2b   : > { %636 = vmatpush.bf16.msra.mxu2 %v222_v17  ;;  %637 = vmatpush.bf16.msra.mxu3 %v222_v17 }
  0x2e   : > { %334 = vmatpush.bf16.msra.mxu0 %v221_v20  ;;  %638 = vmatpush.bf16.msra.mxu1 %v221_v20 }
  0x2f   : > { %639 = vmatpush.bf16.msra.mxu2 %v221_v20  ;;  %640 = vmatpush.bf16.msra.mxu3 %v221_v20 }
  0x32   : > { %335 = vmatpush.bf16.msra.mxu0 %v220_v23  ;;  %641 = vmatpush.bf16.msra.mxu1 %v220_v23 }
  0x33   : > { %642 = vmatpush.bf16.msra.mxu2 %v220_v23  ;;  %643 = vmatpush.bf16.msra.mxu3 %v220_v23 }
  0x35   : > { %336 = vmatmul.bf16.vlgmr.msra.gmra.mxu0 %v603_v24  ;;  %356 = vmatmul.bf16.vlgmr.msra.gmra.mxu1 %v607_v25 }
  0x36   : > { %376 = vmatmul.bf16.vlgmr.msra.gmra.mxu2 %v611_v26  ;;  %396 = vmatmul.bf16.vlgmr.msra.gmra.mxu3 %v615_v27 }
  0x45   : > { %341 = vmatmul.bf16.gmra.mxu0 %v604_v28  ;;  %361 = vmatmul.bf16.gmra.mxu1 %v608_v29 }
  0x46   : > { %381 = vmatmul.bf16.gmra.mxu2 %v612_v30  ;;  %401 = vmatmul.bf16.gmra.mxu3 %v616_v31 }
  0x55   : > { %346 = vmatmul.bf16.gmra.mxu0 %v605_v32  ;;  %366 = vmatmul.bf16.gmra.mxu1 %v609_v33 }
  0x56   : > { %386 = vmatmul.bf16.gmra.mxu2 %v613_v34  ;;  %406 = vmatmul.bf16.gmra.mxu3 %v617_v35 }
  0x65   : > { %351 = vmatmul.bf16.gmra.mxu0 %v606_v36  ;;  %371 = vmatmul.bf16.gmra.mxu1 %v610_v37 }
  0x66   : > { %391 = vmatmul.bf16.gmra.mxu2 %v614_v38  ;;  %411 = vmatmul.bf16.gmra.mxu3 %v618_v39 }
  0xb2   : > { %v337_v41 = vpop.f32.mrf.mxu0  ;;  %v357_v42 = vpop.f32.mrf.mxu1 }
  0xb3   : > { %v338_v43 = vadd.f32 %v896_v40, %v337_v41  ;;  %v358_v44 = vadd.f32 %v896_v40, %v357_v42 }
  0xb5   : > { %417 = vst [vmem:[%s900_s29] sm:$0xff] %v338_v43 }
  0xb6   : > { %425 = vst [vmem:[%s900_s29 + $0x40] sm:$0xff] %v358_v44 }
  0xb9   : > { %v377_v45 = vpop.f32.mrf.mxu2  ;;  %v397_v46 = vpop.f32.mrf.mxu3 }
  0xba   : > { %v378_v47 = vadd.f32 %v896_v40, %v377_v45  ;;  %v398_v48 = vadd.f32 %v896_v40, %v397_v46  ;;  %v339_v49 = vpop.f32.mrf.mxu0  ;;  %v359_v50 = vpop.f32.mrf.mxu1 }
  0xbb   : > { %v340_v51 = vadd.f32 %v896_v40, %v339_v49  ;;  %v360_v52 = vadd.f32 %v896_v40, %v359_v50 }
  0xbc   : > { %433 = vst [vmem:[%s900_s29 + $0x80] sm:$0xff] %v378_v47 }
  0xbd   : > { %441 = vst [vmem:[%s900_s29 + $0xc0] sm:$0xff] %v398_v48 }
  0xbe   : > { %418 = vst [vmem:[%s900_s29 + $0x8] sm:$0xff] %v340_v51 }
  0xbf   : > { %426 = vst [vmem:[%s900_s29 + $0x48] sm:$0xff] %v360_v52 }
  0xc1   : > { %v379_v53 = vpop.f32.mrf.mxu2  ;;  %v399_v54 = vpop.f32.mrf.mxu3 }
  0xc2   : > { %v380_v55 = vadd.f32 %v896_v40, %v379_v53  ;;  %v400_v56 = vadd.f32 %v896_v40, %v399_v54  ;;  %v342_v57 = vpop.f32.mrf.mxu0  ;;  %v362_v58 = vpop.f32.mrf.mxu1 }
  0xc3   : > { %v343_v59 = vadd.f32 %v896_v40, %v342_v57  ;;  %v363_v60 = vadd.f32 %v896_v40, %v362_v58 }
  0xc4   : > { %434 = vst [vmem:[%s900_s29 + $0x88] sm:$0xff] %v380_v55 }
  0xc5   : > { %442 = vst [vmem:[%s900_s29 + $0xc8] sm:$0xff] %v400_v56 }
  0xc6   : > { %419 = vst [vmem:[%s900_s29 + $0x10] sm:$0xff] %v343_v59 }
  0xc7   : > { %427 = vst [vmem:[%s900_s29 + $0x50] sm:$0xff] %v363_v60 }
  0xc9   : > { %v382_v61 = vpop.f32.mrf.mxu2  ;;  %v402_v62 = vpop.f32.mrf.mxu3 }
  0xca   : > { %v383_v63 = vadd.f32 %v896_v40, %v382_v61  ;;  %v403_v0 = vadd.f32 %v896_v40, %v402_v62  ;;  %v344_v1 = vpop.f32.mrf.mxu0  ;;  %v364_v2 = vpop.f32.mrf.mxu1 }
  0xcb   : > { %v345_v3 = vadd.f32 %v896_v40, %v344_v1  ;;  %v365_v4 = vadd.f32 %v896_v40, %v364_v2 }
  0xcc   : > { %435 = vst [vmem:[%s900_s29 + $0x90] sm:$0xff] %v383_v63 }
  0xcd   : > { %443 = vst [vmem:[%s900_s29 + $0xd0] sm:$0xff] %v403_v0 }
  0xce   : > { %420 = vst [vmem:[%s900_s29 + $0x18] sm:$0xff] %v345_v3 }
  0xcf   : > { %428 = vst [vmem:[%s900_s29 + $0x58] sm:$0xff] %v365_v4 }
  0xd1   : > { %v384_v5 = vpop.f32.mrf.mxu2  ;;  %v404_v6 = vpop.f32.mrf.mxu3 }
  0xd2   : > { %v385_v7 = vadd.f32 %v896_v40, %v384_v5  ;;  %v405_v8 = vadd.f32 %v896_v40, %v404_v6  ;;  %v347_v9 = vpop.f32.mrf.mxu0  ;;  %v367_v10 = vpop.f32.mrf.mxu1 }
  0xd3   : > { %v348_v11 = vadd.f32 %v896_v40, %v347_v9  ;;  %v368_v12 = vadd.f32 %v896_v40, %v367_v10 }
  0xd4   : > { %436 = vst [vmem:[%s900_s29 + $0x98] sm:$0xff] %v385_v7 }
  0xd5   : > { %444 = vst [vmem:[%s900_s29 + $0xd8] sm:$0xff] %v405_v8 }
  0xd6   : > { %421 = vst [vmem:[%s900_s29 + $0x20] sm:$0xff] %v348_v11 }
  0xd7   : > { %429 = vst [vmem:[%s900_s29 + $0x60] sm:$0xff] %v368_v12 }
  0xd9   : > { %v387_v13 = vpop.f32.mrf.mxu2  ;;  %v407_v14 = vpop.f32.mrf.mxu3 }
  0xda   : > { %v388_v15 = vadd.f32 %v896_v40, %v387_v13  ;;  %v408_v16 = vadd.f32 %v896_v40, %v407_v14  ;;  %v349_v17 = vpop.f32.mrf.mxu0  ;;  %v369_v18 = vpop.f32.mrf.mxu1 }
  0xdb   : > { %v350_v19 = vadd.f32 %v896_v40, %v349_v17  ;;  %v370_v20 = vadd.f32 %v896_v40, %v369_v18 }
  0xdc   : > { %437 = vst [vmem:[%s900_s29 + $0xa0] sm:$0xff] %v388_v15 }
  0xdd   : > { %445 = vst [vmem:[%s900_s29 + $0xe0] sm:$0xff] %v408_v16 }
  0xde   : > { %422 = vst [vmem:[%s900_s29 + $0x28] sm:$0xff] %v350_v19 }
  0xdf   : > { %430 = vst [vmem:[%s900_s29 + $0x68] sm:$0xff] %v370_v20 }
  0xe1   : > { %v389_v21 = vpop.f32.mrf.mxu2  ;;  %v409_v22 = vpop.f32.mrf.mxu3 }
  0xe2   : > { %v390_v23 = vadd.f32 %v896_v40, %v389_v21  ;;  %v410_v24 = vadd.f32 %v896_v40, %v409_v22  ;;  %v352_v25 = vpop.f32.mrf.mxu0  ;;  %v372_v26 = vpop.f32.mrf.mxu1 }
  0xe3   : > { %v353_v27 = vadd.f32 %v896_v40, %v352_v25  ;;  %v373_v28 = vadd.f32 %v896_v40, %v372_v26 }
  0xe4   : > { %438 = vst [vmem:[%s900_s29 + $0xa8] sm:$0xff] %v390_v23 }
  0xe5   : > { %446 = vst [vmem:[%s900_s29 + $0xe8] sm:$0xff] %v410_v24 }
  0xe6   : > { %423 = vst [vmem:[%s900_s29 + $0x30] sm:$0xff] %v353_v27 }
  0xe7   : > { %431 = vst [vmem:[%s900_s29 + $0x70] sm:$0xff] %v373_v28 }
  0xe9   : > { %v392_v29 = vpop.f32.mrf.mxu2  ;;  %v412_v30 = vpop.f32.mrf.mxu3 }
  0xea   : > { %v393_v31 = vadd.f32 %v896_v40, %v392_v29  ;;  %v413_v32 = vadd.f32 %v896_v40, %v412_v30  ;;  %v354_v33 = vpop.f32.mrf.mxu0  ;;  %v374_v34 = vpop.f32.mrf.mxu1 }
  0xeb   : > { %v355_v35 = vadd.f32 %v896_v40, %v354_v33  ;;  %v375_v36 = vadd.f32 %v896_v40, %v374_v34 }
  0xec   : > { %439 = vst [vmem:[%s900_s29 + $0xb0] sm:$0xff] %v393_v31 }
  0xed   : > { %447 = vst [vmem:[%s900_s29 + $0xf0] sm:$0xff] %v413_v32 }
  0xee   : > { %424 = vst [vmem:[%s900_s29 + $0x38] sm:$0xff] %v355_v35 }
  0xef   : > { %432 = vst [vmem:[%s900_s29 + $0x78] sm:$0xff] %v375_v36 }
  0xf1   : > { %v394_v37 = vpop.f32.mrf.mxu2  ;;  %v414_v38 = vpop.f32.mrf.mxu3 }
  0xf2   : > { %v395_v39 = vadd.f32 %v896_v40, %v394_v37  ;;  %v415_v41 = vadd.f32 %v896_v40, %v414_v38 }
  0xf4   : > { %440 = vst [vmem:[%s900_s29 + $0xb8] sm:$0xff] %v395_v39 }
  0xf5   : > { %448 = vst [vmem:[%s900_s29 + $0xf8] sm:$0xff] %v415_v41 }
  0xf6   : > { %713 = shalt.err (!%p710_p3)
}
  0xf7   : > { %s750_s25 = smov 128   ;;  %s751_s26 = smov 8  }
  0xf8   : > { %644 = dma.vmem_to_hbm [thread:$0]  (%p810_p5), %s463_s16, 4096, %s465_s7, %s450_s8, %s750_s25, %s750_s25, %s751_s26  }
  0xf9 PF: > { %p650_p4 = scmp.ge.s32.totalorder %s748_s15, 2  ;;  %s479_s27 = sand.u32 1, %s736_s12  }
  0xfa   : > { %s480_s28 = scalar_lea.sflag [#allocation3], %s479_s27 }
  0xfb   : > { %p647_p7 = pnand %p650_p4, %p814_p6 }
  0xfd   : > { %p648_p8 = pneg %p647_p7 }
  0xff   : > { %731 = dma.done.wait (%p648_p8), %s480_s28, 4096  }
 0x100   : > { %733 = vsyncadd (%p648_p8), %s480_s28, 4294963200  ;;  %p13_p9 = scmp.ge.s32.totalorder %s797_s18, 4   ;;  %s1004_s12 = smov %s740_s13 }
 0x101   : > { %s1005_s13 = smov %s744_s14  ;;  %s1006_s14 = smov %s808_s21 }
 0x102   : > { %s1007_s15 = smov %s797_s18  ;;  %15 = sbr.rel (!%p13_p9) target bundleno = 3 (0x3), region = 67 }
 0x107   :  { %486 = vsyncpa [#allocation3], 1 }
 0x108   :  { %488 = vsyncpa [#allocation3 + $0x1], 1 }

</bundles_post_ra>
